<compile_context>
chip_gen: v7x
topology: tpu7x:2x2x1
jax: 0.10.0
libtpu: 0.0.40
codegen_flags: <defaults>
</compile_context>

<pallas_src>
import math

import numpy as np

import jax
import jax.numpy as jnp
from jax.experimental import pallas as pl
from jax.experimental.pallas import tpu as pltpu

# ----- small but structurally faithful hyper-parameters -----
B = 4                                  # batch
N_SEGMENTS = 3
CONFIG_PER_SEGMENT = 2
N_HEADS = N_SEGMENTS * CONFIG_PER_SEGMENT        # 6 projection layers / primary nets
N_GMM = 8                              # GMM components (module default 50)
HYPER_H = 128                          # hypernetwork nodes_per_layer (default 1024)
PRIM_P = 32                            # primary_network nodes_per_layer (default 256)
N_IN_PAD = 8                           # per-row input block width (config prefix + aux)
BN_EPS = 1e-5
VAR_EPS = 1e-12                        # guards the reference's own 1/var, log(var)

P, G = PRIM_P, N_GMM
NR = N_HEADS * B                       # stacked (head, batch) rows = 24

# aux lanes inside the [NR, N_IN_PAD] per-row input block
LANE_ACT_RANGE = 6                     # actuator range of this head
LANE_SAMPLE = 7                        # training sample (config[:, i]) of this head

# per-head kernel column layout (uniform across heads, lane-aligned slots)
OFF_W1 = 0                             # [in(8), out(32)] transposed weights1
OFF_B = OFF_W1 + N_IN_PAD * P          # 256 ; b1@[0:32] b2@[32:64] b3@[64:96] in one slot
OFF_W2 = OFF_B + 128                   # 384
OFF_W3 = OFF_W2 + P * P                # 1408
OFF_W4 = OFF_W3 + P * P                # 2432 ; [mu cols | var cols]  (pi dropped)
W_PAD = OFF_W4 + P * 2 * G             # 2944 = 23 * 128
assert W_PAD % 128 == 0


def head_weight_size(i: int) -> int:
    # size of the reference (PyTorch) projection-layer output for head i
    n_in = max(1, i)
    return (P * n_in + P + P * P + P + P * P + P + P * (3 * G))


# ---------------------------------------------------------------------------
# static layout helpers (init-time only, numpy)
# ---------------------------------------------------------------------------
def _head_repack(i):
    """PyTorch flat weight_array index -> kernel column.  pi columns are dropped."""
    n_in = max(1, i)
    src, dst = [], []
    spot = 0
    for p_ in range(P):                          # weights1 [P, n_in] row-major
        for j in range(n_in):
            src.append(spot + p_ * n_in + j)
            dst.append(OFF_W1 + j * P + p_)
    spot += P * n_in
    for p_ in range(P):                          # bias1 -> lanes 0:32 of the bias slot
        src.append(spot + p_); dst.append(OFF_B + p_)
    spot += P
    for q in range(P):                           # weights2 [out, in] row-major
        for p_ in range(P):
            src.append(spot + q * P + p_)
            dst.append(OFF_W2 + p_ * P + q)
    spot += P * P
    for p_ in range(P):                          # bias2 -> lanes 32:64
        src.append(spot + p_); dst.append(OFF_B + P + p_)
    spot += P
    for q in range(P):                           # weights3
        for p_ in range(P):
            src.append(spot + q * P + p_)
            dst.append(OFF_W3 + p_ * P + q)
    spot += P * P
    for p_ in range(P):                          # bias3 -> lanes 64:96
        src.append(spot + p_); dst.append(OFF_B + 2 * P + p_)
    spot += P
    for k in range(3 * G):                       # weights4 [3G, P]; k = 3g + c
        g_, c_ = k // 3, k % 3
        if c_ == 2:
            continue                             # pi / sparsemax columns: unused on LL path
        for p_ in range(P):
            src.append(spot + k * P + p_)
            dst.append(OFF_W4 + p_ * 2 * G + c_ * G + g_)
    spot += P * 3 * G
    assert spot == head_weight_size(i)
    return np.asarray(src, np.int64), np.asarray(dst, np.int64)


def _expand(n_rows, n_groups, group):
    e = np.zeros((n_rows, n_groups * group), np.float32)
    for j in range(n_groups):
        e[j, j * group:(j + 1) * group] = 1.0
    return e


def _select(n_groups, group, out_width):
    s = np.zeros((n_groups * group, out_width), np.float32)
    for c in range(n_groups * group):
        s[c, c % group] = 1.0
    return s


U_MASK = np.zeros((N_HEADS, N_IN_PAD), np.float32)      # head i consumes config[:, :i]
for _i in range(N_HEADS):
    U_MASK[_i, :_i] = 1.0

ACT_RANGE = np.asarray(
    [2.0 * math.pi if i % 2 == 0 else math.pi for i in range(N_HEADS)], np.float32)


# ---------------------------------------------------------------------------
# The single fused kernel: trunk + 6 projections + 6 primary nets + GMM LL
# ---------------------------------------------------------------------------
def _nik_kernel(x_ref, tw1_ref, twr_ref, tb_ref, tg_ref, tbe_ref,
                pw_ref, pb_ref, u_ref, hsel_ref, rsel_ref, rselt_ref,
                e1_ref, s1_ref, e2_ref, s2_ref, e4_ref, s4_ref,
                out_ref):
    f32 = jnp.float32
    bf16 = jnp.bfloat16

    # ---- hypernetwork trunk: (Linear -> ReLU -> BatchNorm1d[train stats]) x 4 ----
    h = x_ref[...]                                              # [B, 8] f32
    for l in range(4):
        w = tw1_ref[...] if l == 0 else twr_ref[l - 1]
        h = jnp.dot(h, w, preferred_element_type=f32) + tb_ref[l]
        h = jnp.maximum(h, 0.0)
        mu = jnp.mean(h, axis=0, keepdims=True)
        var = jnp.mean((h - mu) ** 2, axis=0, keepdims=True)    # biased batch stats
        h = (h - mu) * jax.lax.rsqrt(var + BN_EPS) * tg_ref[l] + tbe_ref[l]
    pre = h                                                     # [B, 128] f32

    # ---- all 6 projection layers as ONE block-diagonal matmul; output rows are the
    #      (head, batch) pairs stacked along sublanes: flat[h*B+b, :] = head-h weights
    hsel = hsel_ref[...]                                        # [NR, 8] one-hot head
    rsel = rsel_ref[...]                                        # [NR, B] one-hot batch
    pre_rep = jnp.dot(rsel, pre, preferred_element_type=f32)    # [NR, 128] exact replicate
    pre_stack = jnp.concatenate(
        [pre_rep * hsel[:, i:i + 1] for i in range(N_HEADS)], axis=1
    ).astype(bf16)                                              # [NR, 6*128] block-diag LHS
    flat = jnp.dot(pre_stack, pw_ref[...], preferred_element_type=f32)      # [NR, W_PAD]
    flat = flat + jnp.dot(hsel, pb_ref[...], preferred_element_type=f32)    # + proj bias

    # ---- per-sample primary networks, batch-and-head vectorized (M = NR rows) ----
    # per-sample weights live on the lane axis:  h_out = relu((w_flat * (h_in @ E)) @ S + b)
    u = u_ref[...]                                              # [NR, 8] f32
    s = u[:, LANE_SAMPLE:LANE_SAMPLE + 1]                       # training sample
    act_range = u[:, LANE_ACT_RANGE:LANE_ACT_RANGE + 1]         # 2*pi / pi per head

    w1s = flat[:, OFF_W1:OFF_W1 + N_IN_PAD * P]
    b1 = flat[:, OFF_B:OFF_B + P]
    b2 = flat[:, OFF_B + P:OFF_B + 2 * P]
    b3 = flat[:, OFF_B + 2 * P:OFF_B + 3 * P]
    w2s = flat[:, OFF_W2:OFF_W2 + P * P]
    w3s = flat[:, OFF_W3:OFF_W3 + P * P]
    w4s = flat[:, OFF_W4:OFF_W4 + P * 2 * G]

    ue = jnp.dot(u.astype(bf16), e1_ref[...], preferred_element_type=f32)   # [NR, 256]
    h = jnp.maximum(
        jnp.dot((w1s * ue).astype(bf16), s1_ref[...], preferred_element_type=f32) + b1,
        0.0)                                                                # [NR, 32]

    he = jnp.dot(h.astype(bf16), e2_ref[...], preferred_element_type=f32)   # [NR, 1024]
    h = jnp.maximum(
        jnp.dot((w2s * he).astype(bf16), s2_ref[...], preferred_element_type=f32) + b2,
        0.0)

    he = jnp.dot(h.astype(bf16), e2_ref[...], preferred_element_type=f32)
    h = jnp.maximum(
        jnp.dot((w3s * he).astype(bf16), s2_ref[...], preferred_element_type=f32) + b3,
        0.0)

    he = jnp.dot(h.astype(bf16), e4_ref[...], preferred_element_type=f32)   # [NR, 512]
    gmm = jnp.dot((w4s * he).astype(bf16), s4_ref[...],
                  preferred_element_type=f32)                               # [NR, 2G]

    # GMM activations + per-component Gaussian log-likelihood (matches the reference:
    # sum of log N(s; mu_g, var_g) over all components, no pi weighting / logsumexp).
    mu_g = (jnp.tanh(gmm[:, 0:G]) + 1.0) * 0.5 * act_range
    var_g = jnp.abs(gmm[:, G:2 * G]) + VAR_EPS
    ll = -0.5 * (jnp.log(2.0 * math.pi * var_g) + (s - mu_g) ** 2 / var_g)  # [NR, G]
    ll_row = jnp.sum(ll, axis=1, keepdims=True)                             # [NR, 1]
    # TODO(synk): sparsemax mixture weights are computed by the reference but unused
    # on the LL path; their projection columns were dropped from the layout.

    # reduce over heads -> one lane-dense [B, 128] output block
    ll_b = jnp.broadcast_to(ll_row, (NR, 128))
    out_ref[...] = jnp.dot(rselt_ref[...], ll_b, preferred_element_type=f32)


def _nik_pallas(params, x_pad, u_stack):
    batch = x_pad.shape[0]
    return pl.pallas_call(
        _nik_kernel,
        out_shape=jax.ShapeDtypeStruct((batch, 128), jnp.float32),
        compiler_params=pltpu.CompilerParams(vmem_limit_bytes=32 * 1024 * 1024),
    )(x_pad, params["tw1"], params["twr"], params["tb"], params["tg"], params["tbe"],
      params["proj_w"], params["proj_b"], u_stack,
      params["hsel"], params["rsel"], params["rsel_t"],
      params["e1"], params["s1"], params["e2"], params["s2"],
      params["e4"], params["s4"])


# ---------------------------------------------------------------------------
# Full forward (config given -> log-likelihood per batch element)
# ---------------------------------------------------------------------------
@jax.jit
def probabalistic_nik_forward(params, x, config):
    batch = x.shape[0]                          # must equal B (selector constants)
    x_pad = jnp.zeros((batch, N_IN_PAD), jnp.float32).at[:, :x.shape[1]].set(x)

    cfg_pad = jnp.zeros((batch, N_IN_PAD), jnp.float32).at[:, :N_HEADS].set(config)
    u = jnp.asarray(U_MASK)[:, None, :] * cfg_pad[None, :, :]            # config prefixes
    u = u.at[:, :, LANE_ACT_RANGE].set(
        jnp.broadcast_to(jnp.asarray(ACT_RANGE)[:, None], (N_HEADS, batch)))
    u = u.at[:, :, LANE_SAMPLE].set(config.T)                            # per-head sample
    u_stack = u.reshape(N_HEADS * batch, N_IN_PAD)                       # [NR, 8]

    out = _nik_pallas(params, x_pad, u_stack)                            # [B, 128]
    # TODO(synk): config=None sampling branch not implemented (see header).
    return out[:, 0]                                                     # [B]


# ---------------------------------------------------------------------------
# deterministic synthetic parameters (built directly in the kernel layout)
# ---------------------------------------------------------------------------
def init_params(key):
    k_main, k_proj = jax.random.split(key)

    # hypernetwork trunk
    fan_ins = [3, HYPER_H, HYPER_H, HYPER_H]
    mkeys = jax.random.split(k_main, 4 * len(fan_ins))
    tw1 = None
    twr, tb, tg, tbe = [], [], [], []
    ki = 0
    for li, fan_in in enumerate(fan_ins):
        w = jax.random.normal(mkeys[ki], (fan_in, HYPER_H), jnp.float32) / jnp.sqrt(float(fan_in))
        ki += 1
        if li == 0:
            tw1 = jnp.zeros((N_IN_PAD, HYPER_H), jnp.float32).at[:fan_in, :].set(w)
        else:
            twr.append(w)
        tb.append(0.1 * jax.random.normal(mkeys[ki], (1, HYPER_H), jnp.float32)); ki += 1
        tg.append(1.0 + 0.1 * jax.random.normal(mkeys[ki], (1, HYPER_H), jnp.float32)); ki += 1
        tbe.append(0.1 * jax.random.normal(mkeys[ki], (1, HYPER_H), jnp.float32)); ki += 1

    # projection layers: generated in PyTorch flat order, permuted ONCE into the
    # aligned, transposed, pi-dropped, bias-packed kernel layout (zero runtime glue).
    proj_w = np.zeros((N_HEADS * HYPER_H, W_PAD), np.float32)   # block-diag RHS, stacked rows
    proj_b = np.zeros((8, W_PAD), np.float32)                   # rows 6,7 zero padding
    pkeys = jax.random.split(k_proj, 2 * N_HEADS)
    for i in range(N_HEADS):
        ws = head_weight_size(i)
        w_pt = 0.05 * jax.random.normal(pkeys[2 * i], (HYPER_H, ws), jnp.float32)
        b_pt = 0.10 * jax.random.normal(pkeys[2 * i + 1], (ws,), jnp.float32)
        src, dst = _head_repack(i)
        proj_w[i * HYPER_H:(i + 1) * HYPER_H, dst] = np.asarray(w_pt)[:, src]
        proj_b[i, dst] = np.asarray(b_pt)[src]

    # static expand / select matrices (exact 0/1 -> bf16 is exact)
    e1 = _expand(N_IN_PAD, N_IN_PAD, P)
    e1[LANE_ACT_RANGE:, :] = 0.0            # aux lanes (act_range/sample) never feed the net

    # tiny one-hot selectors for (head, batch) sublane stacking / reduction
    hsel = np.zeros((NR, 8), np.float32)
    rsel = np.zeros((NR, B), np.float32)
    for i in range(N_HEADS):
        for b_ in range(B):
            hsel[i * B + b_, i] = 1.0
            rsel[i * B + b_, b_] = 1.0

    return dict(
        tw1=tw1,
        twr=jnp.stack(twr),                                # [3, 128, 128]
        tb=jnp.stack(tb), tg=jnp.stack(tg), tbe=jnp.stack(tbe),   # each [4, 1, 128]
        proj_w=jnp.asarray(proj_w, jnp.bfloat16),          # [768, 2944]  (~4.3 MB)
        proj_b=jnp.asarray(proj_b, jnp.float32),           # [8, 2944]
        hsel=jnp.asarray(hsel),
        rsel=jnp.asarray(rsel),
        rsel_t=jnp.asarray(np.ascontiguousarray(rsel.T)),
        e1=jnp.asarray(e1, jnp.bfloat16),                  # [8, 256]
        s1=jnp.asarray(_select(N_IN_PAD, P, P), jnp.bfloat16),      # [256, 32]
        e2=jnp.asarray(_expand(P, P, P), jnp.bfloat16),             # [32, 1024]
        s2=jnp.asarray(_select(P, P, P), jnp.bfloat16),             # [1024, 32]
        e4=jnp.asarray(_expand(P, P, 2 * G), jnp.bfloat16),         # [32, 512]
        s4=jnp.asarray(_select(P, 2 * G, 2 * G), jnp.bfloat16),     # [512, 16]
    )


if __name__ == "__main__":
    key = jax.random.PRNGKey(0)
    kp, kx, kc = jax.random.split(key, 3)
    params = init_params(kp)
    x = jax.random.normal(kx, (B, 3), jnp.float32)                        # tip positions
    config = jax.random.uniform(kc, (B, N_HEADS), jnp.float32,
                                minval=0.0, maxval=math.pi)               # training configs
    ll = probabalistic_nik_forward(params, x, config)
    jax.block_until_ready(ll)
    assert ll.shape == (B,)
    assert bool(jnp.all(jnp.isfinite(ll)))
    print("KERNEL_OK")
</pallas_src>

<mosaic_0001>
module attributes {stable_mosaic.version = 11 : i64} {
  func.func @_nik_kernel(%arg0: memref<4x8xf32, #tpu.memory_space<vmem>>, %arg1: memref<8x128xf32, #tpu.memory_space<vmem>>, %arg2: memref<3x128x128xf32, #tpu.memory_space<vmem>>, %arg3: memref<4x1x128xf32, #tpu.memory_space<vmem>>, %arg4: memref<4x1x128xf32, #tpu.memory_space<vmem>>, %arg5: memref<4x1x128xf32, #tpu.memory_space<vmem>>, %arg6: memref<768x2944xbf16, #tpu.memory_space<vmem>>, %arg7: memref<8x2944xf32, #tpu.memory_space<vmem>>, %arg8: memref<24x8xf32, #tpu.memory_space<vmem>>, %arg9: memref<24x8xf32, #tpu.memory_space<vmem>>, %arg10: memref<24x4xf32, #tpu.memory_space<vmem>>, %arg11: memref<4x24xf32, #tpu.memory_space<vmem>>, %arg12: memref<8x256xbf16, #tpu.memory_space<vmem>>, %arg13: memref<256x32xbf16, #tpu.memory_space<vmem>>, %arg14: memref<32x1024xbf16, #tpu.memory_space<vmem>>, %arg15: memref<1024x32xbf16, #tpu.memory_space<vmem>>, %arg16: memref<32x512xbf16, #tpu.memory_space<vmem>>, %arg17: memref<512x16xbf16, #tpu.memory_space<vmem>>, %arg18: memref<4x128xf32, #tpu.memory_space<vmem>>) attributes {dimension_semantics = [], scalar_prefetch = 0 : i64, scratch_operands = 0 : i64, tpu.core_type = #tpu.core_type<tc>} {
    %c0 = arith.constant 0 : index
    %c0_0 = arith.constant 0 : index
    %0 = vector.load %arg0[%c0, %c0_0] : memref<4x8xf32, #tpu.memory_space<vmem>>, vector<4x8xf32>
    %c0_1 = arith.constant 0 : index
    %c0_2 = arith.constant 0 : index
    %1 = vector.load %arg1[%c0_1, %c0_2] : memref<8x128xf32, #tpu.memory_space<vmem>>, vector<8x128xf32>
    %cst = arith.constant dense<0.000000e+00> : vector<4x128xf32>
    %2 = tpu.matmul %0, %1, %cst {dimension_numbers = #tpu.dot_dimension_numbers<[1], [0], [0], [1], [0, 0, 1, 1], [], []>} : vector<4x8xf32>, vector<8x128xf32>, vector<4x128xf32> -> vector<4x128xf32>
    %c0_3 = arith.constant 0 : index
    %c0_4 = arith.constant 0 : index
    %c0_5 = arith.constant 0 : index
    %3 = vector.load %arg3[%c0_3, %c0_4, %c0_5] : memref<4x1x128xf32, #tpu.memory_space<vmem>>, vector<1x1x128xf32>
    %4 = vector.shape_cast %3 : vector<1x1x128xf32> to vector<1x128xf32>
    %5 = vector.broadcast %4 : vector<1x128xf32> to vector<4x128xf32>
    %6 = arith.addf %2, %5 : vector<4x128xf32>
    %cst_6 = arith.constant 0.000000e+00 : f32
    %7 = vector.broadcast %cst_6 : f32 to vector<4x128xf32>
    %8 = arith.maximumf %6, %7 : vector<4x128xf32>
    %cst_7 = arith.constant dense<0.000000e+00> : vector<128xf32>
    %9 = vector.multi_reduction <add>, %8, %cst_7 [0] : vector<4x128xf32> to vector<128xf32>
    %10 = vector.shape_cast %9 : vector<128xf32> to vector<1x128xf32>
    %cst_8 = arith.constant 4.000000e+00 : f32
    %11 = vector.broadcast %cst_8 : f32 to vector<1x128xf32>
    %12 = arith.divf %10, %11 : vector<1x128xf32>
    %13 = vector.broadcast %12 : vector<1x128xf32> to vector<4x128xf32>
    %14 = arith.subf %8, %13 : vector<4x128xf32>
    %15 = arith.mulf %14, %14 : vector<4x128xf32>
    %cst_9 = arith.constant dense<0.000000e+00> : vector<128xf32>
    %16 = vector.multi_reduction <add>, %15, %cst_9 [0] : vector<4x128xf32> to vector<128xf32>
    %17 = vector.shape_cast %16 : vector<128xf32> to vector<1x128xf32>
    %cst_10 = arith.constant 4.000000e+00 : f32
    %18 = vector.broadcast %cst_10 : f32 to vector<1x128xf32>
    %19 = arith.divf %17, %18 : vector<1x128xf32>
    %20 = vector.broadcast %12 : vector<1x128xf32> to vector<4x128xf32>
    %21 = arith.subf %8, %20 : vector<4x128xf32>
    %cst_11 = arith.constant 9.99999974E-6 : f32
    %22 = vector.broadcast %cst_11 : f32 to vector<1x128xf32>
    %23 = arith.addf %19, %22 : vector<1x128xf32>
    %24 = math.rsqrt %23 : vector<1x128xf32>
    %25 = vector.broadcast %24 : vector<1x128xf32> to vector<4x128xf32>
    %26 = arith.mulf %21, %25 : vector<4x128xf32>
    %c0_12 = arith.constant 0 : index
    %c0_13 = arith.constant 0 : index
    %c0_14 = arith.constant 0 : index
    %27 = vector.load %arg4[%c0_12, %c0_13, %c0_14] : memref<4x1x128xf32, #tpu.memory_space<vmem>>, vector<1x1x128xf32>
    %28 = vector.shape_cast %27 : vector<1x1x128xf32> to vector<1x128xf32>
    %29 = vector.broadcast %28 : vector<1x128xf32> to vector<4x128xf32>
    %30 = arith.mulf %26, %29 : vector<4x128xf32>
    %c0_15 = arith.constant 0 : index
    %c0_16 = arith.constant 0 : index
    %c0_17 = arith.constant 0 : index
    %31 = vector.load %arg5[%c0_15, %c0_16, %c0_17] : memref<4x1x128xf32, #tpu.memory_space<vmem>>, vector<1x1x128xf32>
    %32 = vector.shape_cast %31 : vector<1x1x128xf32> to vector<1x128xf32>
    %33 = vector.broadcast %32 : vector<1x128xf32> to vector<4x128xf32>
    %34 = arith.addf %30, %33 : vector<4x128xf32>
    %c0_18 = arith.constant 0 : index
    %c0_19 = arith.constant 0 : index
    %c0_20 = arith.constant 0 : index
    %35 = vector.load %arg2[%c0_18, %c0_19, %c0_20] : memref<3x128x128xf32, #tpu.memory_space<vmem>>, vector<1x128x128xf32>
    %36 = vector.shape_cast %35 : vector<1x128x128xf32> to vector<128x128xf32>
    %cst_21 = arith.constant dense<0.000000e+00> : vector<4x128xf32>
    %37 = tpu.matmul %34, %36, %cst_21 {dimension_numbers = #tpu.dot_dimension_numbers<[1], [0], [0], [1], [0, 0, 1, 1], [], []>} : vector<4x128xf32>, vector<128x128xf32>, vector<4x128xf32> -> vector<4x128xf32>
    %c1 = arith.constant 1 : index
    %c0_22 = arith.constant 0 : index
    %c0_23 = arith.constant 0 : index
    %38 = vector.load %arg3[%c1, %c0_22, %c0_23] : memref<4x1x128xf32, #tpu.memory_space<vmem>>, vector<1x1x128xf32>
    %39 = vector.shape_cast %38 : vector<1x1x128xf32> to vector<1x128xf32>
    %40 = vector.broadcast %39 : vector<1x128xf32> to vector<4x128xf32>
    %41 = arith.addf %37, %40 : vector<4x128xf32>
    %cst_24 = arith.constant 0.000000e+00 : f32
    %42 = vector.broadcast %cst_24 : f32 to vector<4x128xf32>
    %43 = arith.maximumf %41, %42 : vector<4x128xf32>
    %cst_25 = arith.constant dense<0.000000e+00> : vector<128xf32>
    %44 = vector.multi_reduction <add>, %43, %cst_25 [0] : vector<4x128xf32> to vector<128xf32>
    %45 = vector.shape_cast %44 : vector<128xf32> to vector<1x128xf32>
    %cst_26 = arith.constant 4.000000e+00 : f32
    %46 = vector.broadcast %cst_26 : f32 to vector<1x128xf32>
    %47 = arith.divf %45, %46 : vector<1x128xf32>
    %48 = vector.broadcast %47 : vector<1x128xf32> to vector<4x128xf32>
    %49 = arith.subf %43, %48 : vector<4x128xf32>
    %50 = arith.mulf %49, %49 : vector<4x128xf32>
    %cst_27 = arith.constant dense<0.000000e+00> : vector<128xf32>
    %51 = vector.multi_reduction <add>, %50, %cst_27 [0] : vector<4x128xf32> to vector<128xf32>
    %52 = vector.shape_cast %51 : vector<128xf32> to vector<1x128xf32>
    %cst_28 = arith.constant 4.000000e+00 : f32
    %53 = vector.broadcast %cst_28 : f32 to vector<1x128xf32>
    %54 = arith.divf %52, %53 : vector<1x128xf32>
    %55 = vector.broadcast %47 : vector<1x128xf32> to vector<4x128xf32>
    %56 = arith.subf %43, %55 : vector<4x128xf32>
    %cst_29 = arith.constant 9.99999974E-6 : f32
    %57 = vector.broadcast %cst_29 : f32 to vector<1x128xf32>
    %58 = arith.addf %54, %57 : vector<1x128xf32>
    %59 = math.rsqrt %58 : vector<1x128xf32>
    %60 = vector.broadcast %59 : vector<1x128xf32> to vector<4x128xf32>
    %61 = arith.mulf %56, %60 : vector<4x128xf32>
    %c1_30 = arith.constant 1 : index
    %c0_31 = arith.constant 0 : index
    %c0_32 = arith.constant 0 : index
    %62 = vector.load %arg4[%c1_30, %c0_31, %c0_32] : memref<4x1x128xf32, #tpu.memory_space<vmem>>, vector<1x1x128xf32>
    %63 = vector.shape_cast %62 : vector<1x1x128xf32> to vector<1x128xf32>
    %64 = vector.broadcast %63 : vector<1x128xf32> to vector<4x128xf32>
    %65 = arith.mulf %61, %64 : vector<4x128xf32>
    %c1_33 = arith.constant 1 : index
    %c0_34 = arith.constant 0 : index
    %c0_35 = arith.constant 0 : index
    %66 = vector.load %arg5[%c1_33, %c0_34, %c0_35] : memref<4x1x128xf32, #tpu.memory_space<vmem>>, vector<1x1x128xf32>
    %67 = vector.shape_cast %66 : vector<1x1x128xf32> to vector<1x128xf32>
    %68 = vector.broadcast %67 : vector<1x128xf32> to vector<4x128xf32>
    %69 = arith.addf %65, %68 : vector<4x128xf32>
    %c1_36 = arith.constant 1 : index
    %c0_37 = arith.constant 0 : index
    %c0_38 = arith.constant 0 : index
    %70 = vector.load %arg2[%c1_36, %c0_37, %c0_38] : memref<3x128x128xf32, #tpu.memory_space<vmem>>, vector<1x128x128xf32>
    %71 = vector.shape_cast %70 : vector<1x128x128xf32> to vector<128x128xf32>
    %cst_39 = arith.constant dense<0.000000e+00> : vector<4x128xf32>
    %72 = tpu.matmul %69, %71, %cst_39 {dimension_numbers = #tpu.dot_dimension_numbers<[1], [0], [0], [1], [0, 0, 1, 1], [], []>} : vector<4x128xf32>, vector<128x128xf32>, vector<4x128xf32> -> vector<4x128xf32>
    %c2 = arith.constant 2 : index
    %c0_40 = arith.constant 0 : index
    %c0_41 = arith.constant 0 : index
    %73 = vector.load %arg3[%c2, %c0_40, %c0_41] : memref<4x1x128xf32, #tpu.memory_space<vmem>>, vector<1x1x128xf32>
    %74 = vector.shape_cast %73 : vector<1x1x128xf32> to vector<1x128xf32>
    %75 = vector.broadcast %74 : vector<1x128xf32> to vector<4x128xf32>
    %76 = arith.addf %72, %75 : vector<4x128xf32>
    %cst_42 = arith.constant 0.000000e+00 : f32
    %77 = vector.broadcast %cst_42 : f32 to vector<4x128xf32>
    %78 = arith.maximumf %76, %77 : vector<4x128xf32>
    %cst_43 = arith.constant dense<0.000000e+00> : vector<128xf32>
    %79 = vector.multi_reduction <add>, %78, %cst_43 [0] : vector<4x128xf32> to vector<128xf32>
    %80 = vector.shape_cast %79 : vector<128xf32> to vector<1x128xf32>
    %cst_44 = arith.constant 4.000000e+00 : f32
    %81 = vector.broadcast %cst_44 : f32 to vector<1x128xf32>
    %82 = arith.divf %80, %81 : vector<1x128xf32>
    %83 = vector.broadcast %82 : vector<1x128xf32> to vector<4x128xf32>
    %84 = arith.subf %78, %83 : vector<4x128xf32>
    %85 = arith.mulf %84, %84 : vector<4x128xf32>
    %cst_45 = arith.constant dense<0.000000e+00> : vector<128xf32>
    %86 = vector.multi_reduction <add>, %85, %cst_45 [0] : vector<4x128xf32> to vector<128xf32>
    %87 = vector.shape_cast %86 : vector<128xf32> to vector<1x128xf32>
    %cst_46 = arith.constant 4.000000e+00 : f32
    %88 = vector.broadcast %cst_46 : f32 to vector<1x128xf32>
    %89 = arith.divf %87, %88 : vector<1x128xf32>
    %90 = vector.broadcast %82 : vector<1x128xf32> to vector<4x128xf32>
    %91 = arith.subf %78, %90 : vector<4x128xf32>
    %cst_47 = arith.constant 9.99999974E-6 : f32
    %92 = vector.broadcast %cst_47 : f32 to vector<1x128xf32>
    %93 = arith.addf %89, %92 : vector<1x128xf32>
    %94 = math.rsqrt %93 : vector<1x128xf32>
    %95 = vector.broadcast %94 : vector<1x128xf32> to vector<4x128xf32>
    %96 = arith.mulf %91, %95 : vector<4x128xf32>
    %c2_48 = arith.constant 2 : index
    %c0_49 = arith.constant 0 : index
    %c0_50 = arith.constant 0 : index
    %97 = vector.load %arg4[%c2_48, %c0_49, %c0_50] : memref<4x1x128xf32, #tpu.memory_space<vmem>>, vector<1x1x128xf32>
    %98 = vector.shape_cast %97 : vector<1x1x128xf32> to vector<1x128xf32>
    %99 = vector.broadcast %98 : vector<1x128xf32> to vector<4x128xf32>
    %100 = arith.mulf %96, %99 : vector<4x128xf32>
    %c2_51 = arith.constant 2 : index
    %c0_52 = arith.constant 0 : index
    %c0_53 = arith.constant 0 : index
    %101 = vector.load %arg5[%c2_51, %c0_52, %c0_53] : memref<4x1x128xf32, #tpu.memory_space<vmem>>, vector<1x1x128xf32>
    %102 = vector.shape_cast %101 : vector<1x1x128xf32> to vector<1x128xf32>
    %103 = vector.broadcast %102 : vector<1x128xf32> to vector<4x128xf32>
    %104 = arith.addf %100, %103 : vector<4x128xf32>
    %c2_54 = arith.constant 2 : index
    %c0_55 = arith.constant 0 : index
    %c0_56 = arith.constant 0 : index
    %105 = vector.load %arg2[%c2_54, %c0_55, %c0_56] : memref<3x128x128xf32, #tpu.memory_space<vmem>>, vector<1x128x128xf32>
    %106 = vector.shape_cast %105 : vector<1x128x128xf32> to vector<128x128xf32>
    %cst_57 = arith.constant dense<0.000000e+00> : vector<4x128xf32>
    %107 = tpu.matmul %104, %106, %cst_57 {dimension_numbers = #tpu.dot_dimension_numbers<[1], [0], [0], [1], [0, 0, 1, 1], [], []>} : vector<4x128xf32>, vector<128x128xf32>, vector<4x128xf32> -> vector<4x128xf32>
    %c3 = arith.constant 3 : index
    %c0_58 = arith.constant 0 : index
    %c0_59 = arith.constant 0 : index
    %108 = vector.load %arg3[%c3, %c0_58, %c0_59] : memref<4x1x128xf32, #tpu.memory_space<vmem>>, vector<1x1x128xf32>
    %109 = vector.shape_cast %108 : vector<1x1x128xf32> to vector<1x128xf32>
    %110 = vector.broadcast %109 : vector<1x128xf32> to vector<4x128xf32>
    %111 = arith.addf %107, %110 : vector<4x128xf32>
    %cst_60 = arith.constant 0.000000e+00 : f32
    %112 = vector.broadcast %cst_60 : f32 to vector<4x128xf32>
    %113 = arith.maximumf %111, %112 : vector<4x128xf32>
    %cst_61 = arith.constant dense<0.000000e+00> : vector<128xf32>
    %114 = vector.multi_reduction <add>, %113, %cst_61 [0] : vector<4x128xf32> to vector<128xf32>
    %115 = vector.shape_cast %114 : vector<128xf32> to vector<1x128xf32>
    %cst_62 = arith.constant 4.000000e+00 : f32
    %116 = vector.broadcast %cst_62 : f32 to vector<1x128xf32>
    %117 = arith.divf %115, %116 : vector<1x128xf32>
    %118 = vector.broadcast %117 : vector<1x128xf32> to vector<4x128xf32>
    %119 = arith.subf %113, %118 : vector<4x128xf32>
    %120 = arith.mulf %119, %119 : vector<4x128xf32>
    %cst_63 = arith.constant dense<0.000000e+00> : vector<128xf32>
    %121 = vector.multi_reduction <add>, %120, %cst_63 [0] : vector<4x128xf32> to vector<128xf32>
    %122 = vector.shape_cast %121 : vector<128xf32> to vector<1x128xf32>
    %cst_64 = arith.constant 4.000000e+00 : f32
    %123 = vector.broadcast %cst_64 : f32 to vector<1x128xf32>
    %124 = arith.divf %122, %123 : vector<1x128xf32>
    %125 = vector.broadcast %117 : vector<1x128xf32> to vector<4x128xf32>
    %126 = arith.subf %113, %125 : vector<4x128xf32>
    %cst_65 = arith.constant 9.99999974E-6 : f32
    %127 = vector.broadcast %cst_65 : f32 to vector<1x128xf32>
    %128 = arith.addf %124, %127 : vector<1x128xf32>
    %129 = math.rsqrt %128 : vector<1x128xf32>
    %130 = vector.broadcast %129 : vector<1x128xf32> to vector<4x128xf32>
    %131 = arith.mulf %126, %130 : vector<4x128xf32>
    %c3_66 = arith.constant 3 : index
    %c0_67 = arith.constant 0 : index
    %c0_68 = arith.constant 0 : index
    %132 = vector.load %arg4[%c3_66, %c0_67, %c0_68] : memref<4x1x128xf32, #tpu.memory_space<vmem>>, vector<1x1x128xf32>
    %133 = vector.shape_cast %132 : vector<1x1x128xf32> to vector<1x128xf32>
    %134 = vector.broadcast %133 : vector<1x128xf32> to vector<4x128xf32>
    %135 = arith.mulf %131, %134 : vector<4x128xf32>
    %c3_69 = arith.constant 3 : index
    %c0_70 = arith.constant 0 : index
    %c0_71 = arith.constant 0 : index
    %136 = vector.load %arg5[%c3_69, %c0_70, %c0_71] : memref<4x1x128xf32, #tpu.memory_space<vmem>>, vector<1x1x128xf32>
    %137 = vector.shape_cast %136 : vector<1x1x128xf32> to vector<1x128xf32>
    %138 = vector.broadcast %137 : vector<1x128xf32> to vector<4x128xf32>
    %139 = arith.addf %135, %138 : vector<4x128xf32>
    %c0_72 = arith.constant 0 : index
    %c0_73 = arith.constant 0 : index
    %140 = vector.load %arg9[%c0_72, %c0_73] : memref<24x8xf32, #tpu.memory_space<vmem>>, vector<24x8xf32>
    %c0_74 = arith.constant 0 : index
    %c0_75 = arith.constant 0 : index
    %141 = vector.load %arg10[%c0_74, %c0_75] : memref<24x4xf32, #tpu.memory_space<vmem>>, vector<24x4xf32>
    %cst_76 = arith.constant dense<0.000000e+00> : vector<24x128xf32>
    %142 = tpu.matmul %141, %139, %cst_76 {dimension_numbers = #tpu.dot_dimension_numbers<[1], [0], [0], [1], [0, 0, 1, 1], [], []>} : vector<24x4xf32>, vector<4x128xf32>, vector<24x128xf32> -> vector<24x128xf32>
    %143 = vector.extract_strided_slice %140 {offsets = [0, 0], sizes = [24, 1], strides = [1, 1]} : vector<24x8xf32> to vector<24x1xf32>
    %144 = vector.broadcast %143 : vector<24x1xf32> to vector<24x128xf32>
    %145 = arith.mulf %142, %144 : vector<24x128xf32>
    %146 = vector.extract_strided_slice %140 {offsets = [0, 1], sizes = [24, 1], strides = [1, 1]} : vector<24x8xf32> to vector<24x1xf32>
    %147 = vector.broadcast %146 : vector<24x1xf32> to vector<24x128xf32>
    %148 = arith.mulf %142, %147 : vector<24x128xf32>
    %149 = vector.extract_strided_slice %140 {offsets = [0, 2], sizes = [24, 1], strides = [1, 1]} : vector<24x8xf32> to vector<24x1xf32>
    %150 = vector.broadcast %149 : vector<24x1xf32> to vector<24x128xf32>
    %151 = arith.mulf %142, %150 : vector<24x128xf32>
    %152 = vector.extract_strided_slice %140 {offsets = [0, 3], sizes = [24, 1], strides = [1, 1]} : vector<24x8xf32> to vector<24x1xf32>
    %153 = vector.broadcast %152 : vector<24x1xf32> to vector<24x128xf32>
    %154 = arith.mulf %142, %153 : vector<24x128xf32>
    %155 = vector.extract_strided_slice %140 {offsets = [0, 4], sizes = [24, 1], strides = [1, 1]} : vector<24x8xf32> to vector<24x1xf32>
    %156 = vector.broadcast %155 : vector<24x1xf32> to vector<24x128xf32>
    %157 = arith.mulf %142, %156 : vector<24x128xf32>
    %158 = vector.extract_strided_slice %140 {offsets = [0, 5], sizes = [24, 1], strides = [1, 1]} : vector<24x8xf32> to vector<24x1xf32>
    %159 = vector.broadcast %158 : vector<24x1xf32> to vector<24x128xf32>
    %160 = arith.mulf %142, %159 : vector<24x128xf32>
    %161 = tpu.concatenate %145, %148, %151, %154, %157, %160 in 1 : vector<24x128xf32>, vector<24x128xf32>, vector<24x128xf32>, vector<24x128xf32>, vector<24x128xf32>, vector<24x128xf32> -> vector<24x768xf32>
    %162 = arith.truncf %161 : vector<24x768xf32> to vector<24x768xbf16>
    %c0_77 = arith.constant 0 : index
    %c0_78 = arith.constant 0 : index
    %163 = vector.load %arg6[%c0_77, %c0_78] : memref<768x2944xbf16, #tpu.memory_space<vmem>>, vector<768x2944xbf16>
    %cst_79 = arith.constant dense<0.000000e+00> : vector<24x2944xf32>
    %164 = tpu.matmul %162, %163, %cst_79 {dimension_numbers = #tpu.dot_dimension_numbers<[1], [0], [0], [1], [0, 0, 1, 1], [], []>} : vector<24x768xbf16>, vector<768x2944xbf16>, vector<24x2944xf32> -> vector<24x2944xf32>
    %c0_80 = arith.constant 0 : index
    %c0_81 = arith.constant 0 : index
    %165 = vector.load %arg7[%c0_80, %c0_81] : memref<8x2944xf32, #tpu.memory_space<vmem>>, vector<8x2944xf32>
    %cst_82 = arith.constant dense<0.000000e+00> : vector<24x2944xf32>
    %166 = tpu.matmul %140, %165, %cst_82 {dimension_numbers = #tpu.dot_dimension_numbers<[1], [0], [0], [1], [0, 0, 1, 1], [], []>} : vector<24x8xf32>, vector<8x2944xf32>, vector<24x2944xf32> -> vector<24x2944xf32>
    %167 = arith.addf %164, %166 : vector<24x2944xf32>
    %c0_83 = arith.constant 0 : index
    %c0_84 = arith.constant 0 : index
    %168 = vector.load %arg8[%c0_83, %c0_84] : memref<24x8xf32, #tpu.memory_space<vmem>>, vector<24x8xf32>
    %169 = vector.extract_strided_slice %168 {offsets = [0, 7], sizes = [24, 1], strides = [1, 1]} : vector<24x8xf32> to vector<24x1xf32>
    %170 = vector.extract_strided_slice %168 {offsets = [0, 6], sizes = [24, 1], strides = [1, 1]} : vector<24x8xf32> to vector<24x1xf32>
    %171 = vector.extract_strided_slice %167 {offsets = [0, 0], sizes = [24, 256], strides = [1, 1]} : vector<24x2944xf32> to vector<24x256xf32>
    %172 = vector.extract_strided_slice %167 {offsets = [0, 256], sizes = [24, 32], strides = [1, 1]} : vector<24x2944xf32> to vector<24x32xf32>
    %173 = vector.extract_strided_slice %167 {offsets = [0, 288], sizes = [24, 32], strides = [1, 1]} : vector<24x2944xf32> to vector<24x32xf32>
    %174 = vector.extract_strided_slice %167 {offsets = [0, 320], sizes = [24, 32], strides = [1, 1]} : vector<24x2944xf32> to vector<24x32xf32>
    %175 = vector.extract_strided_slice %167 {offsets = [0, 384], sizes = [24, 1024], strides = [1, 1]} : vector<24x2944xf32> to vector<24x1024xf32>
    %176 = vector.extract_strided_slice %167 {offsets = [0, 1408], sizes = [24, 1024], strides = [1, 1]} : vector<24x2944xf32> to vector<24x1024xf32>
    %177 = vector.extract_strided_slice %167 {offsets = [0, 2432], sizes = [24, 512], strides = [1, 1]} : vector<24x2944xf32> to vector<24x512xf32>
    %178 = arith.truncf %168 : vector<24x8xf32> to vector<24x8xbf16>
    %c0_85 = arith.constant 0 : index
    %c0_86 = arith.constant 0 : index
    %179 = vector.load %arg12[%c0_85, %c0_86] : memref<8x256xbf16, #tpu.memory_space<vmem>>, vector<8x256xbf16>
    %cst_87 = arith.constant dense<0.000000e+00> : vector<24x256xf32>
    %180 = tpu.matmul %178, %179, %cst_87 {dimension_numbers = #tpu.dot_dimension_numbers<[1], [0], [0], [1], [0, 0, 1, 1], [], []>} : vector<24x8xbf16>, vector<8x256xbf16>, vector<24x256xf32> -> vector<24x256xf32>
    %181 = arith.mulf %171, %180 : vector<24x256xf32>
    %182 = arith.truncf %181 : vector<24x256xf32> to vector<24x256xbf16>
    %c0_88 = arith.constant 0 : index
    %c0_89 = arith.constant 0 : index
    %183 = vector.load %arg13[%c0_88, %c0_89] : memref<256x32xbf16, #tpu.memory_space<vmem>>, vector<256x32xbf16>
    %cst_90 = arith.constant dense<0.000000e+00> : vector<24x32xf32>
    %184 = tpu.matmul %182, %183, %cst_90 {dimension_numbers = #tpu.dot_dimension_numbers<[1], [0], [0], [1], [0, 0, 1, 1], [], []>} : vector<24x256xbf16>, vector<256x32xbf16>, vector<24x32xf32> -> vector<24x32xf32>
    %185 = arith.addf %184, %172 : vector<24x32xf32>
    %cst_91 = arith.constant 0.000000e+00 : f32
    %186 = vector.broadcast %cst_91 : f32 to vector<24x32xf32>
    %187 = arith.maximumf %185, %186 : vector<24x32xf32>
    %188 = arith.truncf %187 : vector<24x32xf32> to vector<24x32xbf16>
    %c0_92 = arith.constant 0 : index
    %c0_93 = arith.constant 0 : index
    %189 = vector.load %arg14[%c0_92, %c0_93] : memref<32x1024xbf16, #tpu.memory_space<vmem>>, vector<32x1024xbf16>
    %cst_94 = arith.constant dense<0.000000e+00> : vector<24x1024xf32>
    %190 = tpu.matmul %188, %189, %cst_94 {dimension_numbers = #tpu.dot_dimension_numbers<[1], [0], [0], [1], [0, 0, 1, 1], [], []>} : vector<24x32xbf16>, vector<32x1024xbf16>, vector<24x1024xf32> -> vector<24x1024xf32>
    %191 = arith.mulf %175, %190 : vector<24x1024xf32>
    %192 = arith.truncf %191 : vector<24x1024xf32> to vector<24x1024xbf16>
    %c0_95 = arith.constant 0 : index
    %c0_96 = arith.constant 0 : index
    %193 = vector.load %arg15[%c0_95, %c0_96] : memref<1024x32xbf16, #tpu.memory_space<vmem>>, vector<1024x32xbf16>
    %cst_97 = arith.constant dense<0.000000e+00> : vector<24x32xf32>
    %194 = tpu.matmul %192, %193, %cst_97 {dimension_numbers = #tpu.dot_dimension_numbers<[1], [0], [0], [1], [0, 0, 1, 1], [], []>} : vector<24x1024xbf16>, vector<1024x32xbf16>, vector<24x32xf32> -> vector<24x32xf32>
    %195 = arith.addf %194, %173 : vector<24x32xf32>
    %cst_98 = arith.constant 0.000000e+00 : f32
    %196 = vector.broadcast %cst_98 : f32 to vector<24x32xf32>
    %197 = arith.maximumf %195, %196 : vector<24x32xf32>
    %198 = arith.truncf %197 : vector<24x32xf32> to vector<24x32xbf16>
    %c0_99 = arith.constant 0 : index
    %c0_100 = arith.constant 0 : index
    %199 = vector.load %arg14[%c0_99, %c0_100] : memref<32x1024xbf16, #tpu.memory_space<vmem>>, vector<32x1024xbf16>
    %cst_101 = arith.constant dense<0.000000e+00> : vector<24x1024xf32>
    %200 = tpu.matmul %198, %199, %cst_101 {dimension_numbers = #tpu.dot_dimension_numbers<[1], [0], [0], [1], [0, 0, 1, 1], [], []>} : vector<24x32xbf16>, vector<32x1024xbf16>, vector<24x1024xf32> -> vector<24x1024xf32>
    %201 = arith.mulf %176, %200 : vector<24x1024xf32>
    %202 = arith.truncf %201 : vector<24x1024xf32> to vector<24x1024xbf16>
    %c0_102 = arith.constant 0 : index
    %c0_103 = arith.constant 0 : index
    %203 = vector.load %arg15[%c0_102, %c0_103] : memref<1024x32xbf16, #tpu.memory_space<vmem>>, vector<1024x32xbf16>
    %cst_104 = arith.constant dense<0.000000e+00> : vector<24x32xf32>
    %204 = tpu.matmul %202, %203, %cst_104 {dimension_numbers = #tpu.dot_dimension_numbers<[1], [0], [0], [1], [0, 0, 1, 1], [], []>} : vector<24x1024xbf16>, vector<1024x32xbf16>, vector<24x32xf32> -> vector<24x32xf32>
    %205 = arith.addf %204, %174 : vector<24x32xf32>
    %cst_105 = arith.constant 0.000000e+00 : f32
    %206 = vector.broadcast %cst_105 : f32 to vector<24x32xf32>
    %207 = arith.maximumf %205, %206 : vector<24x32xf32>
    %208 = arith.truncf %207 : vector<24x32xf32> to vector<24x32xbf16>
    %c0_106 = arith.constant 0 : index
    %c0_107 = arith.constant 0 : index
    %209 = vector.load %arg16[%c0_106, %c0_107] : memref<32x512xbf16, #tpu.memory_space<vmem>>, vector<32x512xbf16>
    %cst_108 = arith.constant dense<0.000000e+00> : vector<24x512xf32>
    %210 = tpu.matmul %208, %209, %cst_108 {dimension_numbers = #tpu.dot_dimension_numbers<[1], [0], [0], [1], [0, 0, 1, 1], [], []>} : vector<24x32xbf16>, vector<32x512xbf16>, vector<24x512xf32> -> vector<24x512xf32>
    %211 = arith.mulf %177, %210 : vector<24x512xf32>
    %212 = arith.truncf %211 : vector<24x512xf32> to vector<24x512xbf16>
    %c0_109 = arith.constant 0 : index
    %c0_110 = arith.constant 0 : index
    %213 = vector.load %arg17[%c0_109, %c0_110] : memref<512x16xbf16, #tpu.memory_space<vmem>>, vector<512x16xbf16>
    %cst_111 = arith.constant dense<0.000000e+00> : vector<24x16xf32>
    %214 = tpu.matmul %212, %213, %cst_111 {dimension_numbers = #tpu.dot_dimension_numbers<[1], [0], [0], [1], [0, 0, 1, 1], [], []>} : vector<24x512xbf16>, vector<512x16xbf16>, vector<24x16xf32> -> vector<24x16xf32>
    %215 = vector.extract_strided_slice %214 {offsets = [0, 0], sizes = [24, 8], strides = [1, 1]} : vector<24x16xf32> to vector<24x8xf32>
    %216 = math.tanh %215 : vector<24x8xf32>
    %cst_112 = arith.constant 1.000000e+00 : f32
    %217 = vector.broadcast %cst_112 : f32 to vector<24x8xf32>
    %218 = arith.addf %216, %217 : vector<24x8xf32>
    %cst_113 = arith.constant 5.000000e-01 : f32
    %219 = vector.broadcast %cst_113 : f32 to vector<24x8xf32>
    %220 = arith.mulf %218, %219 : vector<24x8xf32>
    %221 = vector.broadcast %170 : vector<24x1xf32> to vector<24x8xf32>
    %222 = arith.mulf %220, %221 : vector<24x8xf32>
    %223 = vector.extract_strided_slice %214 {offsets = [0, 8], sizes = [24, 8], strides = [1, 1]} : vector<24x16xf32> to vector<24x8xf32>
    %224 = math.absf %223 : vector<24x8xf32>
    %cst_114 = arith.constant 9.99999996E-13 : f32
    %225 = vector.broadcast %cst_114 : f32 to vector<24x8xf32>
    %226 = arith.addf %224, %225 : vector<24x8xf32>
    %cst_115 = arith.constant 6.28318548 : f32
    %227 = vector.broadcast %cst_115 : f32 to vector<24x8xf32>
    %228 = arith.mulf %227, %226 : vector<24x8xf32>
    %229 = math.log %228 : vector<24x8xf32>
    %230 = vector.broadcast %169 : vector<24x1xf32> to vector<24x8xf32>
    %231 = arith.subf %230, %222 : vector<24x8xf32>
    %232 = arith.mulf %231, %231 : vector<24x8xf32>
    %233 = arith.divf %232, %226 : vector<24x8xf32>
    %234 = arith.addf %229, %233 : vector<24x8xf32>
    %cst_116 = arith.constant -5.000000e-01 : f32
    %235 = vector.broadcast %cst_116 : f32 to vector<24x8xf32>
    %236 = arith.mulf %235, %234 : vector<24x8xf32>
    %cst_117 = arith.constant dense<0.000000e+00> : vector<24xf32>
    %237 = vector.multi_reduction <add>, %236, %cst_117 [1] : vector<24x8xf32> to vector<24xf32>
    %238 = vector.shape_cast %237 : vector<24xf32> to vector<24x1xf32>
    %239 = vector.shape_cast %238 : vector<24x1xf32> to vector<24x1xf32>
    %240 = vector.broadcast %239 : vector<24x1xf32> to vector<24x128xf32>
    %c0_118 = arith.constant 0 : index
    %c0_119 = arith.constant 0 : index
    %241 = vector.load %arg11[%c0_118, %c0_119] : memref<4x24xf32, #tpu.memory_space<vmem>>, vector<4x24xf32>
    %cst_120 = arith.constant dense<0.000000e+00> : vector<4x128xf32>
    %242 = tpu.matmul %241, %240, %cst_120 {dimension_numbers = #tpu.dot_dimension_numbers<[1], [0], [0], [1], [0, 0, 1, 1], [], []>} : vector<4x24xf32>, vector<24x128xf32>, vector<4x128xf32> -> vector<4x128xf32>
    %c0_121 = arith.constant 0 : index
    %c0_122 = arith.constant 0 : index
    %243 = vector.load %arg18[%c0_121, %c0_122] : memref<4x128xf32, #tpu.memory_space<vmem>>, vector<4x128xf32>
    tpu.vector_store %arg18[%c0_121, %c0_122], %242 {strides = array<i32>} : memref<4x128xf32, #tpu.memory_space<vmem>>, vector<4x128xf32>,
    return
  }
}

</mosaic_0001>

<bundles_post_ra>
// kernel: probabalistic_nik_forward.1
= control target key start
LH: loop header
LB: loop body
LE: loop exit
PB: predicated region body
PF: predicated region fallthrough
CT: control target
= control target key end

     0   :  { %s19307_s0 = inlined_call_operand.vmem [shape: f32[4,8], index: 0, kind: input, shape index: {}]   ;;  %s19308_s1 = inlined_call_operand.hbm [shape: f32[8,128], index: 1, kind: input, shape index: {}]   ;;  %s19309_s2 = inlined_call_operand.hbm [shape: f32[3,128,128], index: 2, kind: input, shape index: {}]   ;;  %s19310_s3 = inlined_call_operand.hbm [shape: f32[4,1,128], index: 3, kind: input, shape index: {}]   ;;  %s19311_s4 = inlined_call_operand.hbm [shape: f32[4,1,128], index: 4, kind: input, shape index: {}]   ;;  %s19312_s5 = inlined_call_operand.hbm [shape: f32[4,1,128], index: 5, kind: input, shape index: {}]   ;;  %s19313_s6 = inlined_call_operand.hbm [shape: bf16[768,2944], index: 6, kind: input, shape index: {}]   ;;  %s19314_s7 = inlined_call_operand.hbm [shape: f32[8,2944], index: 7, kind: input, shape index: {}]   ;;  %s19315_s8 = inlined_call_operand.vmem [shape: f32[24,8], index: 8, kind: input, shape index: {}]   ;;  %s19316_s9 = inlined_call_operand.vmem [shape: f32[24,8], index: 9, kind: input, shape index: {}]   ;;  %s19317_s10 = inlined_call_operand.vmem [shape: f32[24,4], index: 10, kind: input, shape index: {}]   ;;  %s19318_s11 = inlined_call_operand.hbm [shape: f32[4,24], index: 11, kind: input, shape index: {}]   ;;  %s19319_s12 = inlined_call_operand.hbm [shape: bf16[8,256], index: 12, kind: input, shape index: {}]   ;;  %s19320_s13 = inlined_call_operand.vmem [shape: bf16[256,32], index: 13, kind: input, shape index: {}]   ;;  %s19321_s14 = inlined_call_operand.hbm [shape: bf16[32,1024], index: 14, kind: input, shape index: {}]   ;;  %s19322_s15 = inlined_call_operand.vmem [shape: bf16[1024,32], index: 15, kind: input, shape index: {}]   ;;  %s19323_s16 = inlined_call_operand.hbm [shape: bf16[32,512], index: 16, kind: input, shape index: {}]   ;;  %s19324_s17 = inlined_call_operand.vmem [shape: bf16[512,16], index: 17, kind: input, shape index: {}]   ;;  %s19325_s18 = inlined_call_operand.vmem [shape: f32[4,128], index: 18, kind: output, shape index: {}]  }
   0x1   :  { %19370 = sst [smem:[#allocation95_spill]] %s19307_s0 }
   0x2   :  { %19371 = sst [smem:[#allocation96_spill]] %s19308_s1 }
   0x3   :  { %19372 = sst [smem:[#allocation97_spill]] %s19309_s2 }
   0x4   :  { %19373 = sst [smem:[#allocation98_spill]] %s19324_s17 }
   0x5   :  { %19374 = sst [smem:[#allocation99_spill]] %s19325_s18 }
   0x6   :  { %23 = vsyncpa [#allocation3], 0 }
   0x7   :  { %24 = vsyncpa [#allocation5], 0 }
   0x8   :  { %25 = vsyncpa [#allocation8], 0 }
   0x9   :  { %26 = vsyncpa [#allocation11], 0 }
   0xa   :  { %27 = vsyncpa [#allocation14], 0 }
   0xb   :  { %28 = vsyncpa [#allocation17], 0  ;;  %s17262_s27 = smov [#allocation4]   ;;  %s19375_s0 = sld [smem:[#allocation97_spill]] }
   0xc   :  { %s46_s28 = sshll.u32 %s17262_s27, 4  ;;  %s47_s28 = int_to_ptr.vmem [resolvable:$true] %s46_s28 }
  0x11   :  { %s17008_s19 = scalar_lea.hbm %s19375_s0, 6144 }
  0x12   :  { %p17009_p0 = scmp.ne.s32.totalorder %s19375_s0, %s17008_s19  ;;  %p17012_p1 = scmp.lt.u32.totalorder %s17008_s19, %s19375_s0 }
  0x14   :  { %p17014_p2 = pnand %p17012_p1, %p17009_p0 }
  0x16   :  { %17017 = shalt.err (!%p17014_p2)
}
  0x17   :  { %s17018_s2 = scalar_lea.vmem %s47_s28, 6144  ;;  %p17023_p4 = scmp.lt.s32.totalorder %s47_s28, %s47_s28 }
  0x18   :  { %p17019_p3 = scmp.ne.s32.totalorder %s47_s28, %s17018_s2  ;;  %p17024_p5 = scmp.lt.s32.totalorder %s17018_s2, %s17018_s2 }
  0x1a   :  { %p17025_p6 = por %p17024_p5, %p17023_p4 }
  0x1c   :  { %p17026_p7 = pnand %p17025_p6, %p17019_p3 }
  0x1e   :  { %17029 = shalt.err (!%p17026_p7)
}
  0x1f   :  { %s17263_s23 = smov 128   ;;  %s19329_s24 = smov 8  }
  0x20   :  { %52 = dma.hbm_to_vmem [thread:$0]  %s19375_s0, 6144, %s47_s28, [#allocation5], %s17263_s23, %s17263_s23, %s19329_s24  }
  0x21   :  { %s17265_s27 = smov [#allocation7]   ;;  %s17266_s30 = smov [#allocation10]  }
  0x22   :  { %s70_s29 = sshll.u32 %s17265_s27, 4  ;;  %s94_s19 = sshll.u32 %s17266_s30, 4  ;;  %s71_s29 = int_to_ptr.vmem [resolvable:$true] %s70_s29  ;;  %s95_s19 = int_to_ptr.vmem [resolvable:$true] %s94_s19 }
  0x23   :  { %s17030_s21 = scalar_lea.hbm %s19311_s4, 64 }
  0x24   :  { %p17031_p8 = scmp.ne.s32.totalorder %s19311_s4, %s17030_s21  ;;  %p17034_p9 = scmp.lt.u32.totalorder %s17030_s21, %s19311_s4 }
  0x26   :  { %p17036_p10 = pnand %p17034_p9, %p17031_p8 }
  0x28   :  { %17039 = shalt.err (!%p17036_p10)
}
  0x29   :  { %s17040_s28 = scalar_lea.vmem %s71_s29, 64  ;;  %p17045_p12 = scmp.lt.s32.totalorder %s71_s29, %s71_s29 }
  0x2a   :  { %p17041_p11 = scmp.ne.s32.totalorder %s71_s29, %s17040_s28  ;;  %p17046_p13 = scmp.lt.s32.totalorder %s17040_s28, %s17040_s28 }
  0x2c   :  { %p17047_p0 = por %p17046_p13, %p17045_p12 }
  0x2e   :  { %p17048_p1 = pnand %p17047_p0, %p17041_p11 }
  0x30   :  { %17051 = shalt.err (!%p17048_p1)
}
  0x31   :  { %s17267_s0 = smov 16   ;;  %s17268_s23 = smov 1  }
  0x32   :  { %76 = dma.hbm_to_vmem [thread:$0]  %s19311_s4, 64, %s71_s29, [#allocation8], %s17267_s0, %s17267_s0, %s17268_s23  }
  0x33   :  { %s17052_s27 = scalar_lea.hbm %s19313_s6, 141312 }
  0x34   :  { %p17053_p2 = scmp.ne.s32.totalorder %s19313_s6, %s17052_s27  ;;  %p17056_p3 = scmp.lt.u32.totalorder %s17052_s27, %s19313_s6 }
  0x36   :  { %p17058_p4 = pnand %p17056_p3, %p17053_p2 }
  0x38   :  { %17061 = shalt.err (!%p17058_p4)
}
  0x39   :  { %s17062_s22 = scalar_lea.vmem %s95_s19, 141312  ;;  %p17067_p6 = scmp.lt.s32.totalorder %s95_s19, %s95_s19 }
  0x3a   :  { %p17063_p5 = scmp.ne.s32.totalorder %s95_s19, %s17062_s22  ;;  %p17068_p7 = scmp.lt.s32.totalorder %s17062_s22, %s17062_s22 }
  0x3c   :  { %p17069_p8 = por %p17068_p7, %p17067_p6 }
  0x3e   :  { %p17070_p9 = pnand %p17069_p8, %p17063_p5 }
  0x40   :  { %17073 = shalt.err (!%p17070_p9)
}
  0x41   :  { %s17269_s4 = smov 1472   ;;  %s17270_s29 = smov 92  }
  0x42   :  { %100 = dma.hbm_to_vmem [thread:$0]  %s19313_s6, 141312, %s95_s19, [#allocation11], %s17269_s4, %s17269_s4, %s17270_s29  }
  0x43   :  { %s17271_s25 = smov [#allocation13]   ;;  %s17272_s17 = smov [#allocation16]  }
  0x44   :  { %s123_s26 = sshll.u32 %s17271_s25, 4  ;;  %s144_s18 = sshll.u32 %s17272_s17, 4  ;;  %s124_s26 = int_to_ptr.vmem [resolvable:$true] %s123_s26  ;;  %s145_s18 = int_to_ptr.vmem [resolvable:$true] %s144_s18 }
  0x45   :  { %s17074_s1 = scalar_lea.hbm %s19318_s11, 64 }
  0x46   :  { %p17075_p10 = scmp.ne.s32.totalorder %s19318_s11, %s17074_s1  ;;  %p17078_p11 = scmp.lt.u32.totalorder %s17074_s1, %s19318_s11 }
  0x48   :  { %p17080_p12 = pnand %p17078_p11, %p17075_p10 }
  0x4a   :  { %17083 = shalt.err (!%p17080_p12)
}
  0x4b   :  { %s17084_s6 = scalar_lea.vmem %s124_s26, 64  ;;  %p17089_p0 = scmp.lt.s32.totalorder %s124_s26, %s124_s26 }
  0x4c   :  { %p17085_p13 = scmp.ne.s32.totalorder %s124_s26, %s17084_s6  ;;  %p17090_p1 = scmp.lt.s32.totalorder %s17084_s6, %s17084_s6 }
  0x4e   :  { %p17091_p2 = por %p17090_p1, %p17089_p0 }
  0x50   :  { %p17092_p3 = pnand %p17091_p2, %p17085_p13 }
  0x52   :  { %17095 = shalt.err (!%p17092_p3)
}
  0x53   :  { %126 = dma.hbm_to_vmem [thread:$0]  %s19318_s11, 64, %s124_s26, [#allocation14]  }
  0x54   :  { %s17096_s28 = scalar_lea.hbm %s19321_s14, 2048 }
  0x55   :  { %p17097_p4 = scmp.ne.s32.totalorder %s19321_s14, %s17096_s28  ;;  %p17100_p5 = scmp.lt.u32.totalorder %s17096_s28, %s19321_s14 }
  0x57   :  { %p17102_p6 = pnand %p17100_p5, %p17097_p4 }
  0x59   :  { %17105 = shalt.err (!%p17102_p6)
}
  0x5a   :  { %s17106_s30 = scalar_lea.vmem %s145_s18, 2048  ;;  %p17111_p8 = scmp.lt.s32.totalorder %s145_s18, %s145_s18 }
  0x5b   :  { %p17107_p7 = scmp.ne.s32.totalorder %s145_s18, %s17106_s30  ;;  %p17112_p9 = scmp.lt.s32.totalorder %s17106_s30, %s17106_s30 }
  0x5d   :  { %p17113_p10 = por %p17112_p9, %p17111_p8 }
  0x5f   :  { %p17114_p11 = pnand %p17113_p10, %p17107_p7 }
  0x61   :  { %17117 = shalt.err (!%p17114_p11)
}
  0x62   :  { %s17273_s11 = smov 512   ;;  %s17274_s26 = smov 32  }
  0x63   :  { %150 = dma.hbm_to_vmem [thread:$0]  %s19321_s14, 2048, %s145_s18, [#allocation17], %s17273_s11, %s17273_s11, %s17274_s26  }
  0x64   :  { %s17275_s21 = smov [#allocation2]   ;;  %s17276_s6 = smov [#allocation6]  }
  0x65   :  { %s37_s22 = sshll.u32 %s17275_s21, 4  ;;  %s58_s19 = sshll.u32 %s17276_s6, 4  ;;  %s38_s22 = int_to_ptr.vmem [resolvable:$true] %s37_s22  ;;  %s59_s19 = int_to_ptr.vmem [resolvable:$true] %s58_s19 }
  0x66   :  { %s19376_s2 = sld [smem:[#allocation96_spill]] }
  0x6c   :  { %s17118_s28 = scalar_lea.hbm %s19376_s2, 128 }
  0x6d   :  { %p17119_p12 = scmp.ne.s32.totalorder %s19376_s2, %s17118_s28  ;;  %p17122_p13 = scmp.lt.u32.totalorder %s17118_s28, %s19376_s2 }
  0x6f   :  { %p17124_p0 = pnand %p17122_p13, %p17119_p12 }
  0x71   :  { %17127 = shalt.err (!%p17124_p0)
}
  0x72   :  { %s17128_s14 = scalar_lea.vmem %s38_s22, 128  ;;  %p17133_p2 = scmp.lt.s32.totalorder %s38_s22, %s38_s22 }
  0x73   :  { %p17129_p1 = scmp.ne.s32.totalorder %s38_s22, %s17128_s14  ;;  %p17134_p3 = scmp.lt.s32.totalorder %s17128_s14, %s17128_s14 }
  0x75   :  { %p17135_p4 = por %p17134_p3, %p17133_p2 }
  0x77   :  { %p17136_p5 = pnand %p17135_p4, %p17129_p1 }
  0x79   :  { %17139 = shalt.err (!%p17136_p5)
}
  0x7a   :  { %40 = dma.hbm_to_vmem [thread:$0]  %s19376_s2, 128, %s38_s22, [#allocation3]  }
  0x7b   :  { %s17140_s1 = scalar_lea.hbm %s19310_s3, 64 }
  0x7c   :  { %p17141_p6 = scmp.ne.s32.totalorder %s19310_s3, %s17140_s1  ;;  %p17144_p7 = scmp.lt.u32.totalorder %s17140_s1, %s19310_s3 }
  0x7e   :  { %p17146_p8 = pnand %p17144_p7, %p17141_p6 }
  0x80   :  { %17149 = shalt.err (!%p17146_p8)
}
  0x81   :  { %s17150_s29 = scalar_lea.vmem %s59_s19, 64  ;;  %p17155_p10 = scmp.lt.s32.totalorder %s59_s19, %s59_s19 }
  0x82   :  { %p17151_p9 = scmp.ne.s32.totalorder %s59_s19, %s17150_s29  ;;  %p17156_p11 = scmp.lt.s32.totalorder %s17150_s29, %s17150_s29 }
  0x84   :  { %p17157_p12 = por %p17156_p11, %p17155_p10 }
  0x86   :  { %p17158_p13 = pnand %p17157_p12, %p17151_p9 }
  0x88   :  { %17161 = shalt.err (!%p17158_p13)
}
  0x89   :  { %64 = dma.hbm_to_vmem [thread:$0]  %s19310_s3, 64, %s59_s19, [#allocation5], %s17267_s0, %s17267_s0, %s17268_s23  }
  0x8a   :  { %s17277_s28 = smov [#allocation9]   ;;  %s17278_s25 = smov [#allocation12]  }
  0x8b   :  { %s82_s24 = sshll.u32 %s17277_s28, 4  ;;  %s107_s17 = sshll.u32 %s17278_s25, 4  ;;  %s83_s24 = int_to_ptr.vmem [resolvable:$true] %s82_s24  ;;  %s108_s17 = int_to_ptr.vmem [resolvable:$true] %s107_s17 }
  0x8c   :  { %s17162_s18 = scalar_lea.hbm %s19312_s5, 64 }
  0x8d   :  { %p17163_p0 = scmp.ne.s32.totalorder %s19312_s5, %s17162_s18  ;;  %p17166_p1 = scmp.lt.u32.totalorder %s17162_s18, %s19312_s5 }
  0x8f   :  { %p17168_p2 = pnand %p17166_p1, %p17163_p0 }
  0x91   :  { %17171 = shalt.err (!%p17168_p2)
}
  0x92   :  { %s17172_s3 = scalar_lea.vmem %s83_s24, 64  ;;  %p17177_p4 = scmp.lt.s32.totalorder %s83_s24, %s83_s24 }
  0x93   :  { %p17173_p3 = scmp.ne.s32.totalorder %s83_s24, %s17172_s3  ;;  %p17178_p5 = scmp.lt.s32.totalorder %s17172_s3, %s17172_s3 }
  0x95   :  { %p17179_p6 = por %p17178_p5, %p17177_p4 }
  0x97   :  { %p17180_p7 = pnand %p17179_p6, %p17173_p3 }
  0x99   :  { %17183 = shalt.err (!%p17180_p7)
}
  0x9a   :  { %88 = dma.hbm_to_vmem [thread:$0]  %s19312_s5, 64, %s83_s24, [#allocation8], %s17267_s0, %s17267_s0, %s17268_s23  }
  0x9b   :  { %s17184_s4 = scalar_lea.hbm %s19314_s7, 2944 }
  0x9c   :  { %p17185_p8 = scmp.ne.s32.totalorder %s19314_s7, %s17184_s4  ;;  %p17188_p9 = scmp.lt.u32.totalorder %s17184_s4, %s19314_s7 }
  0x9e   :  { %p17190_p10 = pnand %p17188_p9, %p17185_p8 }
  0xa0   :  { %17193 = shalt.err (!%p17190_p10)
}
  0xa1   :  { %s17194_s25 = scalar_lea.vmem %s108_s17, 2944  ;;  %p17199_p12 = scmp.lt.s32.totalorder %s108_s17, %s108_s17 }
  0xa2   :  { %p17195_p11 = scmp.ne.s32.totalorder %s108_s17, %s17194_s25  ;;  %p17200_p13 = scmp.lt.s32.totalorder %s17194_s25, %s17194_s25 }
  0xa4   :  { %p17201_p0 = por %p17200_p13, %p17199_p12 }
  0xa6   :  { %p17202_p1 = pnand %p17201_p0, %p17195_p11 }
  0xa8   :  { %17205 = shalt.err (!%p17202_p1)
}
  0xa9   :  { %110 = dma.hbm_to_vmem [thread:$0]  %s19314_s7, 2944, %s108_s17, [#allocation11]  }
  0xaa   :  { %s17279_s24 = smov [#allocation15]   ;;  %s17280_s14 = smov [#allocation18]  }
  0xab   :  { %s133_s27 = sshll.u32 %s17279_s24, 4  ;;  %s158_s18 = sshll.u32 %s17280_s14, 4  ;;  %s134_s27 = int_to_ptr.vmem [resolvable:$true] %s133_s27  ;;  %s159_s18 = int_to_ptr.vmem [resolvable:$true] %s158_s18 }
  0xac   :  { %s17206_s26 = scalar_lea.hbm %s19319_s12, 128 }
  0xad   :  { %p17207_p2 = scmp.ne.s32.totalorder %s19319_s12, %s17206_s26  ;;  %p17210_p3 = scmp.lt.u32.totalorder %s17206_s26, %s19319_s12 }
  0xaf   :  { %p17212_p4 = pnand %p17210_p3, %p17207_p2 }
  0xb1   :  { %17215 = shalt.err (!%p17212_p4)
}
  0xb2   :  { %s17216_s7 = scalar_lea.vmem %s134_s27, 128  ;;  %p17221_p6 = scmp.lt.s32.totalorder %s134_s27, %s134_s27 }
  0xb3   :  { %p17217_p5 = scmp.ne.s32.totalorder %s134_s27, %s17216_s7  ;;  %p17222_p7 = scmp.lt.s32.totalorder %s17216_s7, %s17216_s7 }
  0xb5   :  { %p17223_p8 = por %p17222_p7, %p17221_p6 }
  0xb7   :  { %p17224_p9 = pnand %p17223_p8, %p17217_p5 }
  0xb9   :  { %17227 = shalt.err (!%p17224_p9)
}
  0xba   :  { %136 = dma.hbm_to_vmem [thread:$0]  %s19319_s12, 128, %s134_s27, [#allocation14]  }
  0xbb   :  { %s17228_s29 = scalar_lea.hbm %s19323_s16, 1024 }
  0xbc   :  { %p17229_p10 = scmp.ne.s32.totalorder %s19323_s16, %s17228_s29  ;;  %p17232_p11 = scmp.lt.u32.totalorder %s17228_s29, %s19323_s16 }
  0xbe   :  { %p17234_p12 = pnand %p17232_p11, %p17229_p10 }
  0xc0   :  { %17237 = shalt.err (!%p17234_p12)
}
  0xc1   :  { %s17238_s5 = scalar_lea.vmem %s159_s18, 1024  ;;  %p17243_p0 = scmp.lt.s32.totalorder %s159_s18, %s159_s18 }
  0xc2   :  { %p17239_p13 = scmp.ne.s32.totalorder %s159_s18, %s17238_s5  ;;  %p17244_p1 = scmp.lt.s32.totalorder %s17238_s5, %s17238_s5 }
  0xc4   :  { %p17245_p2 = por %p17244_p1, %p17243_p0 }
  0xc6   :  { %p17246_p3 = pnand %p17245_p2, %p17239_p13 }
  0xc8   :  { %17249 = shalt.err (!%p17246_p3)
}
  0xc9   :  { %s17281_s12 = smov 256  }
  0xca   :  { %164 = dma.hbm_to_vmem [thread:$0]  %s19323_s16, 1024, %s159_s18, [#allocation17], %s17281_s12, %s17281_s12, %s17267_s0  }
  0xcb   :  { %17250 = dma.done.wait [#allocation3], 128  }
  0xcc   :  { %17251 = vsyncadd [#allocation3], 4294967168 }
  0xcd   :  { %17252 = dma.done.wait [#allocation5], 6208  }
  0xce   :  { %17253 = vsyncadd [#allocation5], 4294961088 }
  0xcf   :  { %17254 = dma.done.wait [#allocation8], 128  }
  0xd0   :  { %17255 = vsyncadd [#allocation8], 4294967168 }
  0xd1   :  { %17256 = dma.done.wait [#allocation11], 144256  }
  0xd2   :  { %17257 = vsyncadd [#allocation11], 4294823040 }
  0xd3   :  { %17258 = dma.done.wait [#allocation14], 192  }
  0xd4   :  { %17259 = vsyncadd [#allocation14], 4294967104 }
  0xd5   :  { %17260 = dma.done.wait [#allocation17], 3072  }
  0xd6   :  { %17261 = vsyncadd [#allocation17], 4294964224  ;;  %v19331_v0 = vmov 0.0   ;;  %vm17283_vm0 = vmmov 0   ;;  %vm210_vm1 = vcmask 64512   ;;  %v202_v1 = vld [vmem:[#allocation2] sm:$0xff] }
  0xd7   :  { %14797 = vmatprep.subr.mxu0 %v19331_v0  ;;  %14799 = vmatprep.mubr.msk.f32.mxu0 %vm17283_vm0, %v19331_v0  ;;  %s19377_s27 = sld [smem:[#allocation95_spill]]  ;;  %v324_v3 = vld [vmem:[#allocation4] sm:$0xff]  ;;  %v325_v4 = vld [vmem:[#allocation4 + $0x8] sm:$0xff]  ;;  %v19333_v6 = vmov 0.0|0.0   ;;  %v326_v7 = vld [vmem:[#allocation4 + $0x10] sm:$0xff]  ;;  %vm285_vm2 = vcmask 1043456  }
  0xd8   :  { %14834 = vmatprep.mubr.msk.f32.mxu1 %vm17283_vm0, %v19331_v0  ;;  %14798 = vmatpush3.msra.mxu0 %v202_v1  ;;  %v14939_v5 = vpack.c.bf16 %v325_v4, %v324_v3  ;;  %v327_v8 = vld [vmem:[#allocation4 + $0x18] sm:$0xff]  ;;  %v328_v10 = vld [vmem:[#allocation4 + $0x20] sm:$0xff]  ;;  %v329_v11 = vld [vmem:[#allocation4 + $0x28] sm:$0xff]  ;;  %vm734_vm3 = vcmask 31744   ;;  %s17292_s21 = smov 64   ;;  %vm10862_vm4 = vcmask 261120  }
  0xd9   :  { %14938 = vmatprep.subr.bf16.mxu1 %v19333_v6  ;;  %14962 = vmatprep.subr.bf16.mxu0 %v19333_v6  ;;  %v14942_v9 = vpack.c.bf16 %v327_v8, %v326_v7  ;;  %v14945_v12 = vpack.c.bf16 %v329_v11, %v328_v10  ;;  %v330_v13 = vld [vmem:[#allocation4 + $0x30] sm:$0xff]  ;;  %v331_v14 = vld [vmem:[#allocation4 + $0x38] sm:$0xff]  ;;  %v332_v16 = vld [vmem:[#allocation4 + $0x40] sm:$0xff]  ;;  %s19590_s19 = sld [smem:[#allocation98_spill]]  ;;  %s19605_s2 = smov 8   ;;  %vm12936_vm5 = vcmask 195584  }
  0xda   :  { %14940 = vmatpush3.bf16.msra.mxu1 %v14939_v5  ;;  %v14948_v15 = vpack.c.bf16 %v331_v14, %v330_v13  ;;  %v333_v17 = vld [vmem:[#allocation4 + $0x48] sm:$0xff]  ;;  %v334_v19 = vld [vmem:[#allocation4 + $0x50] sm:$0xff]  ;;  %v335_v20 = vld [vmem:[#allocation4 + $0x58] sm:$0xff]  ;;  %s19606_s5 = sld [smem:[#allocation99_spill]] }
  0xdb   :  { %14941 = vmatprep.subr.bf16.mxu1 %v19333_v6  ;;  %v14951_v18 = vpack.c.bf16 %v333_v17, %v332_v16  ;;  %v14954_v21 = vpack.c.bf16 %v335_v20, %v334_v19  ;;  %v336_v22 = vld [vmem:[#allocation4 + $0x60] sm:$0xff]  ;;  %v337_v23 = vld [vmem:[#allocation4 + $0x68] sm:$0xff]  ;;  %v338_v25 = vld [vmem:[#allocation4 + $0x70] sm:$0xff] }
  0xdc   :  { %v14957_v24 = vpack.c.bf16 %v337_v23, %v336_v22  ;;  %v339_v26 = vld [vmem:[#allocation4 + $0x78] sm:$0xff]  ;;  %v13021_v28 = vld [vmem:[#allocation6] ss:$0 sm:$0xff]  ;;  %v13023_v52 = vld [vmem:[#allocation7] ss:$0 sm:$0xff] }
  0xdd   :  { %v201_v2 = vld [vmem:[%s19377_s27] sm:$0xf]  ;;  %v14960_v27 = vpack.c.bf16 %v339_v26, %v338_v25  ;;  %v13024_v54 = vld [vmem:[#allocation9] ss:$0 sm:$0xff]  ;;  %v459_v58 = vld [vmem:[#allocation4 + $0x80] sm:$0xff] }
  0xde   :  { %14800 = vmatmul.mubr.msk.f32.vlgmr.msra.gmra.mrb[0].mxu0 %vm210_vm1, %v201_v2  ;;  %14943 = vmatpush3.bf16.msra.mxu1 %v14942_v9  ;;  %v460_v59 = vld [vmem:[#allocation4 + $0x88] sm:$0xff]  ;;  %v461_v61 = vld [vmem:[#allocation4 + $0x90] sm:$0xff]  ;;  %v462_v62 = vld [vmem:[#allocation4 + $0x98] sm:$0xff] }
  0xdf   :  { %14869 = vmatprep.mubr.msk.f32.mxu0 %vm17283_vm0, %v19331_v0  ;;  %14944 = vmatprep.subr.bf16.mxu1 %v19333_v6  ;;  %v14963_v60 = vpack.c.bf16 %v460_v59, %v459_v58  ;;  %v14966_v63 = vpack.c.bf16 %v462_v62, %v461_v61  ;;  %v463_v1 = vld [vmem:[#allocation4 + $0xa0] sm:$0xff]  ;;  %v464_v2 = vld [vmem:[#allocation4 + $0xa8] sm:$0xff]  ;;  %v465_v4 = vld [vmem:[#allocation4 + $0xb0] sm:$0xff] }
  0xe0   :  { %v14969_v3 = vpack.c.bf16 %v464_v2, %v463_v1  ;;  %v466_v5 = vld [vmem:[#allocation4 + $0xb8] sm:$0xff]  ;;  %v467_v8 = vld [vmem:[#allocation4 + $0xc0] sm:$0xff]  ;;  %v468_v9 = vld [vmem:[#allocation4 + $0xc8] sm:$0xff] }
  0xe1   :  { %14964 = vmatpush3.bf16.msra.mxu0 %v14963_v60  ;;  %v14972_v7 = vpack.c.bf16 %v466_v5, %v465_v4  ;;  %v14975_v10 = vpack.c.bf16 %v468_v9, %v467_v8  ;;  %v469_v11 = vld [vmem:[#allocation4 + $0xd0] sm:$0xff]  ;;  %v471_v14 = vld [vmem:[#allocation4 + $0xe0] sm:$0xff]  ;;  %v601_v60 = vld [vmem:[#allocation4 + $0x138] sm:$0xff] }
  0xe2   :  { %14946 = vmatpush3.bf16.msra.mxu1 %v14945_v12  ;;  %14965 = vmatprep.subr.bf16.mxu0 %v19333_v6  ;;  %v470_v12 = vld [vmem:[#allocation4 + $0xd8] sm:$0xff]  ;;  %v473_v17 = vld [vmem:[#allocation4 + $0xf0] sm:$0xff]  ;;  %v13025_v20 = vld [vmem:[#allocation6 + $0x1] ss:$0 sm:$0xff] }
  0xe3   :  { %14947 = vmatprep.subr.bf16.mxu1 %v19333_v6  ;;  %v14978_v13 = vpack.c.bf16 %v470_v12, %v469_v11  ;;  %v600_v59 = vld [vmem:[#allocation4 + $0x130] sm:$0xff]  ;;  %v602_v62 = vld [vmem:[#allocation4 + $0x140] sm:$0xff] }
  0xe4   :  { %v14996_v61 = vpack.c.bf16 %v601_v60, %v600_v59  ;;  %v604_v2 = vld [vmem:[#allocation4 + $0x150] sm:$0xff]  ;;  %v606_v5 = vld [vmem:[#allocation4 + $0x160] sm:$0xff] }
  0xe5   :  { %14967 = vmatpush3.bf16.msra.mxu0 %v14966_v63  ;;  %v603_v63 = vld [vmem:[#allocation4 + $0x148] sm:$0xff]  ;;  %v608_v9 = vld [vmem:[#allocation4 + $0x170] sm:$0xff]  ;;  %v13028_v12 = vld [vmem:[#allocation6 + $0x2] ss:$0 sm:$0xff] }
  0xe6   :  { %14949 = vmatpush3.bf16.msra.mxu1 %v14948_v15  ;;  %14968 = vmatprep.subr.bf16.mxu0 %v19333_v6  ;;  %v472_v15 = vld [vmem:[#allocation4 + $0xe8] sm:$0xff]  ;;  %v14999_v1 = vpack.c.bf16 %v603_v63, %v602_v62 }
  0xe7   :  { %14950 = vmatprep.subr.bf16.mxu1 %v19333_v6  ;;  %v14981_v16 = vpack.c.bf16 %v472_v15, %v471_v14  ;;  %v2100_v60 = vld [vmem:[#allocation12 + $0x80] sm:$0xff] }
  0xe9   :  { %14970 = vmatpush3.bf16.msra.mxu0 %v14969_v3  ;;  %v605_v3 = vld [vmem:[#allocation4 + $0x158] sm:$0xff] }
  0xea   :  { %14952 = vmatpush3.bf16.msra.mxu1 %v14951_v18  ;;  %14971 = vmatprep.subr.bf16.mxu0 %v19333_v6  ;;  %v474_v18 = vld [vmem:[#allocation4 + $0xf8] sm:$0xff]  ;;  %v15002_v4 = vpack.c.bf16 %v605_v3, %v604_v2 }
  0xeb   :  { %14953 = vmatprep.subr.bf16.mxu1 %v19333_v6  ;;  %v14984_v19 = vpack.c.bf16 %v474_v18, %v473_v17 }
  0xed   :  { %14973 = vmatpush3.bf16.msra.mxu0 %v14972_v7  ;;  %v607_v7 = vld [vmem:[#allocation4 + $0x168] sm:$0xff] }
  0xee   :  { %14955 = vmatpush3.bf16.msra.mxu1 %v14954_v21  ;;  %14974 = vmatprep.subr.bf16.mxu0 %v19333_v6  ;;  %v15005_v8 = vpack.c.bf16 %v607_v7, %v606_v5  ;;  %v2105_v5 = vld [vmem:[#allocation12 + $0xa8] sm:$0xff]  ;;  %v2104_v7 = vld [vmem:[#allocation12 + $0xa0] sm:$0xff] }
  0xef   :  { %14956 = vmatprep.subr.bf16.mxu1 %v19333_v6 }
  0xf1   :  { %14976 = vmatpush3.bf16.msra.mxu0 %v14975_v10  ;;  %v609_v10 = vld [vmem:[#allocation4 + $0x178] sm:$0xff] }
  0xf2   :  { %14958 = vmatpush3.bf16.msra.mxu1 %v14957_v24  ;;  %14977 = vmatprep.subr.bf16.mxu0 %v19333_v6  ;;  %v15008_v11 = vpack.c.bf16 %v609_v10, %v608_v9  ;;  %v15221_v10 = vld [vmem:[#allocation10] ss:$92 sps:$4 sm:$0xff]  }
  0xf3   :  { %14959 = vmatprep.subr.bf16.mxu1 %v19333_v6 }
  0xf5   :  { %14979 = vmatpush3.bf16.msra.mxu0 %v14978_v13 }
  0xf6   :  { %14961 = vmatpush3.bf16.msra.mxu1 %v14960_v27  ;;  %14980 = vmatprep.subr.bf16.mxu0 %v19333_v6 }
  0xf7   :  { %14986 = vmatprep.subr.bf16.mxu1 %v19333_v6 }
  0xf9   :  { %14982 = vmatpush3.bf16.msra.mxu0 %v14981_v16 }
  0xfa   :  { %14983 = vmatprep.subr.bf16.mxu0 %v19333_v6 }
  0xfd   :  { %14985 = vmatpush3.bf16.msra.mxu0 %v14984_v19 }
  0xfe   :  { %14907 = vmatprep.subr.mxu0 %v19331_v0 }
 0x1b1   :  { %v280_v29 = vpop.f32.mrb[0].mxu0 }
 0x1b2   :  { %v281_v30 = vadd.f32 %v13021_v28, %v280_v29  ;;  %v14801_v31 = vpop.f32.mrb[1].mxu0 }
 0x1b4   :  { %v284_v32 = vmax.f32 %v281_v30, 0.0 }
 0x1b6   :  { %v286_v33 = vsel %vm285_vm2, %v284_v32, 0.0 }
 0x1b7   :  { %v287_v34 = vrot.slane %v286_v33, 4 }
 0x1b9   :  { %v288_v35 = vadd.f32 %v287_v34, %v286_v33 }
 0x1bb   :  { %v289_v36 = vrot.slane %v288_v35, 2 }
 0x1bd   :  { %v290_v37 = vadd.f32 %v289_v36, %v288_v35 }
 0x1bf   :  { %v291_v38 = vrot.slane %v290_v37, 1 }
 0x1c1   :  { %v292_v39 = vadd.f32 %v291_v38, %v290_v37 }
 0x1c3   :  { %v294_v40 = vmul.f32 0.25, %v292_v39 }
 0x1c5   :  { %v295_v41 = vsub.f32 %v284_v32, %v294_v40 }
 0x1c7   :  { %v296_v42 = vmul.f32 %v295_v41, %v295_v41 }
 0x1c9   :  { %v297_v43 = vsel %vm285_vm2, %v296_v42, 0.0 }
 0x1ca   :  { %v298_v44 = vrot.slane %v297_v43, 4 }
 0x1cc   :  { %v299_v45 = vadd.f32 %v298_v44, %v297_v43 }
 0x1ce   :  { %v300_v46 = vrot.slane %v299_v45, 2 }
 0x1d0   :  { %v301_v47 = vadd.f32 %v300_v46, %v299_v45  ;;  %v13026_v45 = vld [vmem:[#allocation7 + $0x1] ss:$0 sm:$0xff] }
 0x1d2   :  { %v302_v48 = vrot.slane %v301_v47, 1 }
 0x1d4   :  { %v303_v49 = vadd.f32 %v302_v48, %v301_v47  ;;  %v13027_v47 = vld [vmem:[#allocation9 + $0x1] ss:$0 sm:$0xff] }
 0x1d6   :  { %v304_v50 = vmul.f32 0.25, %v303_v49 }
 0x1d8   :  { %v305_v51 = vadd.f32 1e-05, %v304_v50  ;;  %v594_v50 = vld [vmem:[#allocation4 + $0x100] sm:$0xff] }
 0x1da   :  { %16979 = vrsqrt.f32 %v305_v51  ;;  %v595_v51 = vld [vmem:[#allocation4 + $0x108] sm:$0xff] }
 0x1e4   :  { %v16980_v53 = vpop.eup %16979 }
 0x1e5   :  { %v307_v55 = vmul.f32 %v16980_v53, %v295_v41  ;;  %v596_v53 = vld [vmem:[#allocation4 + $0x110] sm:$0xff] }
 0x1e7   :  { %v315_v56 = vmul.f32 %v13023_v52, %v307_v55  ;;  %v14987_v52 = vpack.c.bf16 %v595_v51, %v594_v50  ;;  %v2089_v50 = vld [vmem:[#allocation12 + $0x28] sm:$0xff]  ;;  %v2088_v51 = vld [vmem:[#allocation12 + $0x20] sm:$0xff] }
 0x1e9   :  { %v323_v57 = vadd.f32 %v13024_v54, %v315_v56  ;;  %v597_v54 = vld [vmem:[#allocation4 + $0x118] sm:$0xff]  ;;  %v598_v56 = vld [vmem:[#allocation4 + $0x120] sm:$0xff] }
 0x1ea   :  { %v14990_v55 = vpack.c.bf16 %v597_v54, %v596_v53  ;;  %v2093_v53 = vld [vmem:[#allocation12 + $0x48] sm:$0xff]  ;;  %v2092_v54 = vld [vmem:[#allocation12 + $0x40] sm:$0xff] }
 0x1eb   :  { %14835 = vmatmul.mubr.f32.vlgmr.msra.gmra.mrb[0].mxu1 %v323_v57  ;;  %v599_v57 = vld [vmem:[#allocation4 + $0x128] sm:$0xff] }
 0x1ec   :  { %14904 = vmatprep.mubr.msk.f32.mxu1 %vm17283_vm0, %v19331_v0  ;;  %14988 = vmatpush3.bf16.msra.mxu1 %v14987_v52  ;;  %v14993_v58 = vpack.c.bf16 %v599_v57, %v598_v56  ;;  %v19334_v52 = vmov 0   ;;  %v2096_v56 = vld [vmem:[#allocation12 + $0x60] sm:$0xff]  ;;  %v13031_v57 = vld [vmem:[#allocation6 + $0x3] ss:$0 sm:$0xff] }
 0x1ed   :  { %14989 = vmatprep.subr.bf16.mxu1 %v19333_v6 }
 0x1f0   :  { %14991 = vmatpush3.bf16.msra.mxu1 %v14990_v55  ;;  %v2097_v55 = vld [vmem:[#allocation12 + $0x68] sm:$0xff] }
 0x1f1   :  { %14992 = vmatprep.subr.bf16.mxu1 %v19333_v6 }
 0x1f4   :  { %14994 = vmatpush3.bf16.msra.mxu1 %v14993_v58  ;;  %v2101_v58 = vld [vmem:[#allocation12 + $0x88] sm:$0xff] }
 0x1f5   :  { %14995 = vmatprep.subr.bf16.mxu1 %v19333_v6 }
 0x1f8   :  { %14997 = vmatpush3.bf16.msra.mxu1 %v14996_v61 }
 0x1f9   :  { %14998 = vmatprep.subr.bf16.mxu1 %v19333_v6 }
 0x1fc   :  { %15000 = vmatpush3.bf16.msra.mxu1 %v14999_v1 }
 0x1fd   :  { %15001 = vmatprep.subr.bf16.mxu1 %v19333_v6 }
 0x200   :  { %15003 = vmatpush3.bf16.msra.mxu1 %v15002_v4 }
 0x201   :  { %15004 = vmatprep.subr.bf16.mxu1 %v19333_v6 }
 0x204   :  { %15006 = vmatpush3.bf16.msra.mxu1 %v15005_v8 }
 0x205   :  { %15007 = vmatprep.subr.bf16.mxu1 %v19333_v6 }
 0x208   :  { %15009 = vmatpush3.bf16.msra.mxu1 %v15008_v11  ;;  %v15223_v11 = vld [vmem:[#allocation10 + $0x4] ss:$92 sps:$4 sm:$0xff]  }
 0x209   :  { %2279 = vmatprep.subr.mxu1 %v2089_v50  ;;  %v13033_v50 = vld [vmem:[#allocation9 + $0x3] ss:$0 sm:$0xff] }
 0x2be   :  { %v414_v21 = vpop.f32.mrb[0].mxu1 }
 0x2bf   :  { %v415_v22 = vadd.f32 %v13025_v20, %v414_v21  ;;  %v14836_v23 = vpop.f32.mrb[1].mxu1 }
 0x2c1   :  { %v418_v24 = vmax.f32 %v415_v22, 0.0 }
 0x2c3   :  { %v419_v25 = vsel %vm285_vm2, %v418_v24, 0.0 }
 0x2c4   :  { %v420_v26 = vrot.slane %v419_v25, 4 }
 0x2c6   :  { %v421_v27 = vadd.f32 %v420_v26, %v419_v25 }
 0x2c8   :  { %v422_v28 = vrot.slane %v421_v27, 2 }
 0x2ca   :  { %v423_v29 = vadd.f32 %v422_v28, %v421_v27 }
 0x2cc   :  { %v424_v30 = vrot.slane %v423_v29, 1 }
 0x2ce   :  { %v425_v31 = vadd.f32 %v424_v30, %v423_v29 }
 0x2d0   :  { %v426_v32 = vmul.f32 0.25, %v425_v31 }
 0x2d2   :  { %v427_v33 = vsub.f32 %v418_v24, %v426_v32 }
 0x2d4   :  { %v428_v34 = vmul.f32 %v427_v33, %v427_v33 }
 0x2d6   :  { %v429_v35 = vsel %vm285_vm2, %v428_v34, 0.0 }
 0x2d7   :  { %v430_v36 = vrot.slane %v429_v35, 4 }
 0x2d9   :  { %v431_v37 = vadd.f32 %v430_v36, %v429_v35 }
 0x2db   :  { %v432_v38 = vrot.slane %v431_v37, 2 }
 0x2dd   :  { %v433_v39 = vadd.f32 %v432_v38, %v431_v37  ;;  %v13029_v37 = vld [vmem:[#allocation7 + $0x2] ss:$0 sm:$0xff] }
 0x2df   :  { %v434_v40 = vrot.slane %v433_v39, 1 }
 0x2e1   :  { %v435_v41 = vadd.f32 %v434_v40, %v433_v39  ;;  %v13030_v39 = vld [vmem:[#allocation9 + $0x2] ss:$0 sm:$0xff] }
 0x2e3   :  { %v436_v42 = vmul.f32 0.25, %v435_v41 }
 0x2e5   :  { %v437_v43 = vadd.f32 1e-05, %v436_v42  ;;  %v17584_v42 = vld [vmem:[%s19316_s9] sm:$0xff] }
 0x2e7   :  { %16981 = vrsqrt.f32 %v437_v43  ;;  %v17285_v43 = vmov 2  }
 0x2e8   :  { %15202 = vset.pattern.permute.xlu1 %v17285_v43  ;;  %v15275_v43 = vld [vmem:[#allocation10 + $0x678] ss:$92 sps:$4 sm:$0xff]  }
 0x2e9   :  { %861 = vperm.xlu1 %15202, %v17584_v42  }
 0x2f1   :  { %v16982_v44 = vpop.eup %16981 }
 0x2f2   :  { %v439_v46 = vmul.f32 %v16982_v44, %v427_v33  ;;  %v17286_v44 = vmov 3  }
 0x2f3   :  { %15201 = vset.pattern.permute.xlu0 %v17286_v44 }
 0x2f4   :  { %v448_v48 = vmul.f32 %v13026_v45, %v439_v46  ;;  %876 = vperm.xlu0 %15201, %v17584_v42   ;;  %v17591_v45 = vld [vmem:[%s19316_s9 + $0x8] sm:$0xff]  ;;  %v17598_v46 = vld [vmem:[%s19316_s9 + $0x10] sm:$0xff] }
 0x2f5   :  { %865 = vperm.xlu1 %15202, %v17591_v45  }
 0x2f6   :  { %v457_v49 = vadd.f32 %v13027_v47, %v448_v48  ;;  %v17287_v47 = vmov 5   ;;  %v17288_v48 = vmov 4  }
 0x2f8   :  { %14870 = vmatmul.mubr.f32.vlgmr.msra.gmra.mrb[2].mxu0 %v457_v49  ;;  %880 = vperm.xlu0 %15201, %v17591_v45   ;;  %v17289_v49 = vmov 1  }
 0x2f9   :  { %14909 = vmatprep.mubr.msk.f32.mxu0 %vm17283_vm0, %v19331_v0  ;;  %869 = vperm.xlu1 %15202, %v17598_v46  }
 0x2fc   :  { %884 = vperm.xlu0 %15201, %v17598_v46  }
 0x2fd   :  { %15204 = vset.pattern.permute.xlu1 %v17287_v47 }
 0x2fe   :  { %910 = vperm.xlu1 %15204, %v17591_v45  }
 0x300   :  { %15203 = vset.pattern.permute.xlu0 %v17287_v47 }
 0x301   :  { %906 = vperm.xlu0 %15203, %v17584_v42  }
 0x302   :  { %15205 = vset.pattern.permute.xlu1 %v17288_v48 }
 0x303   :  { %891 = vperm.xlu1 %15205, %v17584_v42  }
 0x305   :  { %15206 = vset.pattern.permute.xlu0 %v17288_v48 }
 0x306   :  { %895 = vperm.xlu0 %15206, %v17591_v45  }
 0x307   :  { %15207 = vset.pattern.permute.xlu1 %v17287_v47  ;;  %v13032_v47 = vld [vmem:[#allocation7 + $0x3] ss:$0 sm:$0xff] }
 0x308   :  { %914 = vperm.xlu1 %15207, %v17598_v46  }
 0x30a   :  { %15209 = vset.pattern.permute.xlu0 %v17289_v49 }
 0x30b   :  { %846 = vperm.xlu0 %15209, %v17584_v42  }
 0x30c   :  { %15208 = vset.pattern.permute.xlu1 %v17288_v48 }
 0x30d   :  { %899 = vperm.xlu1 %15208, %v17598_v46  }
 0x30f   :  { %15212 = vset.pattern.permute.xlu0 %v19334_v52 }
 0x310   :  { %834 = vperm.xlu0 %15212, %v17591_v45  }
 0x311   :  { %15210 = vset.pattern.permute.xlu1 %v17289_v49 }
 0x312   :  { %850 = vperm.xlu1 %15210, %v17591_v45  }
 0x316   :  { %15211 = vset.pattern.permute.xlu1 %v19334_v52 }
 0x317   :  { %829 = vperm.xlu1 %15211, %v17584_v42  }
 0x31b   :  { %15213 = vset.pattern.permute.xlu1 %v17289_v49  ;;  %v15283_v49 = vld [vmem:[#allocation10 + $0x734] ss:$92 sps:$4 sm:$0xff]  }
 0x31c   :  { %854 = vperm.xlu1 %15213, %v17598_v46  }
 0x320   :  { %15214 = vset.pattern.permute.xlu1 %v19334_v52  ;;  %v15422_v52 = vld [vmem:[#allocation10 + $0xc8] ss:$92 sps:$4 sm:$0xff]  }
 0x321   :  { %839 = vperm.xlu1 %15214, %v17598_v46  }
 0x3cb   :  { %v549_v13 = vpop.f32.mrb[2].mxu0 }
 0x3cc   :  { %v550_v14 = vadd.f32 %v13028_v12, %v549_v13  ;;  %v14871_v15 = vpop.f32.mrb[3].mxu0  ;;  %v15229_v13 = vld [vmem:[#allocation10 + $0xbc] ss:$92 sps:$4 sm:$0xff]  }
 0x3cd   :  { %v15227_v15 = vld [vmem:[#allocation10 + $0xb8] ss:$92 sps:$4 sm:$0xff]  }
 0x3ce   :  { %v553_v16 = vmax.f32 %v550_v14, 0.0 }
 0x3d0   :  { %v554_v17 = vsel %vm285_vm2, %v553_v16, 0.0 }
 0x3d1   :  { %v555_v18 = vrot.slane %v554_v17, 4 }
 0x3d3   :  { %v556_v19 = vadd.f32 %v555_v18, %v554_v17  ;;  %v15235_v17 = vld [vmem:[#allocation10 + $0x174] ss:$92 sps:$4 sm:$0xff]  }
 0x3d5   :  { %v557_v20 = vrot.slane %v556_v19, 2 }
 0x3d7   :  { %v558_v21 = vadd.f32 %v557_v20, %v556_v19  ;;  %v15233_v19 = vld [vmem:[#allocation10 + $0x170] ss:$92 sps:$4 sm:$0xff]  }
 0x3d9   :  { %v559_v22 = vrot.slane %v558_v21, 1 }
 0x3db   :  { %v560_v23 = vadd.f32 %v559_v22, %v558_v21  ;;  %v15241_v21 = vld [vmem:[#allocation10 + $0x22c] ss:$92 sps:$4 sm:$0xff]  }
 0x3dd   :  { %v561_v24 = vmul.f32 0.25, %v560_v23  ;;  %v15239_v23 = vld [vmem:[#allocation10 + $0x228] ss:$92 sps:$4 sm:$0xff]  }
 0x3df   :  { %v562_v25 = vsub.f32 %v553_v16, %v561_v24 }
 0x3e1   :  { %v563_v26 = vmul.f32 %v562_v25, %v562_v25 }
 0x3e3   :  { %v564_v27 = vsel %vm285_vm2, %v563_v26, 0.0 }
 0x3e4   :  { %v565_v28 = vrot.slane %v564_v27, 4 }
 0x3e6   :  { %v566_v29 = vadd.f32 %v565_v28, %v564_v27  ;;  %v15245_v27 = vld [vmem:[#allocation10 + $0x2e0] ss:$92 sps:$4 sm:$0xff]  }
 0x3e8   :  { %v567_v30 = vrot.slane %v566_v29, 2 }
 0x3ea   :  { %v568_v31 = vadd.f32 %v567_v30, %v566_v29  ;;  %v15253_v29 = vld [vmem:[#allocation10 + $0x39c] ss:$92 sps:$4 sm:$0xff]  }
 0x3ec   :  { %v569_v32 = vrot.slane %v568_v31, 1 }
 0x3ee   :  { %v570_v33 = vadd.f32 %v569_v32, %v568_v31  ;;  %v15251_v31 = vld [vmem:[#allocation10 + $0x398] ss:$92 sps:$4 sm:$0xff]  }
 0x3f0   :  { %v571_v34 = vmul.f32 0.25, %v570_v33  ;;  %v15259_v33 = vld [vmem:[#allocation10 + $0x454] ss:$92 sps:$4 sm:$0xff]  }
 0x3f2   :  { %v572_v35 = vadd.f32 1e-05, %v571_v34 }
 0x3f4   :  { %16983 = vrsqrt.f32 %v572_v35  ;;  %v15257_v35 = vld [vmem:[#allocation10 + $0x450] ss:$92 sps:$4 sm:$0xff]  }
 0x3fe   :  { %v16984_v36 = vpop.eup %16983 }
 0x3ff   :  { %v574_v38 = vmul.f32 %v16984_v36, %v562_v25  ;;  %v15247_v25 = vld [vmem:[#allocation10 + $0x2e4] ss:$92 sps:$4 sm:$0xff]  }
 0x401   :  { %v583_v40 = vmul.f32 %v13029_v37, %v574_v38  ;;  %v15265_v37 = vld [vmem:[#allocation10 + $0x50c] ss:$92 sps:$4 sm:$0xff]  }
 0x402   :  { %v15263_v38 = vld [vmem:[#allocation10 + $0x508] ss:$92 sps:$4 sm:$0xff]  }
 0x403   :  { %v592_v41 = vadd.f32 %v13030_v39, %v583_v40  ;;  %v15271_v39 = vld [vmem:[#allocation10 + $0x5c4] ss:$92 sps:$4 sm:$0xff]  }
 0x404   :  { %v15269_v40 = vld [vmem:[#allocation10 + $0x5c0] ss:$92 sps:$4 sm:$0xff]  }
 0x405   :  { %14905 = vmatmul.mubr.f32.vlgmr.msra.gmra.mrb[2].mxu1 %v592_v41  ;;  %v15277_v41 = vld [vmem:[#allocation10 + $0x67c] ss:$92 sps:$4 sm:$0xff]  }
 0x406   :  { %2343 = vmatprep.mubr.f32.mxu1 %v19331_v0  ;;  %2280 = vmatpush1.msra.mxu1 %v2088_v51 }
 0x407   :  { %2445 = vmatprep.subr.mxu1 %v2093_v53  ;;  %v15281_v53 = vld [vmem:[#allocation10 + $0x730] ss:$92 sps:$4 sm:$0xff]  }
 0x409   :  { %13044 = vmatmul.mubr.msk.f32.vlgmr.msra.gmra.mrb[4].mxu1 %vm210_vm1, %v17584_v42 }
 0x40a   :  { %2349 = vmatprep.mubr.f32.mxu1 %v19331_v0  ;;  %2446 = vmatpush1.msra.mxu1 %v2092_v54 }
 0x40b   :  { %2611 = vmatprep.subr.mxu1 %v2097_v55  ;;  %v731_v55 = vld [vmem:[%s19317_s10] sm:$0xff] }
 0x40d   :  { %13045 = vmatmul.mubr.msk.f32.gmra.mrb[6].mxu1 %vm210_vm1, %v17591_v45 }
 0x40e   :  { %2355 = vmatprep.mubr.f32.mxu1 %v19331_v0 }
 0x411   :  { %13046 = vmatmul.mubr.msk.f32.gmra.mrb[8].mxu1 %vm210_vm1, %v17598_v46 }
 0x412   :  { %2509 = vmatprep.mubr.f32.mxu1 %v19331_v0 }
 0x415   :  { %13050 = vmatmul.mubr.msk.f32.vlgmr.msra.gmra.mrb[10].mxu1 %vm210_vm1, %v17584_v42 }
 0x416   :  { %2515 = vmatprep.mubr.f32.mxu1 %v19331_v0  ;;  %2612 = vmatpush1.msra.mxu1 %v2096_v56  ;;  %v2085_v56 = vld [vmem:[#allocation12 + $0x8] sm:$0xff] }
 0x417   :  { %2777 = vmatprep.subr.mxu1 %v2101_v58  ;;  %v15289_v58 = vld [vmem:[#allocation10 + $0x7ec] ss:$92 sps:$4 sm:$0xff]  }
 0x419   :  { %13051 = vmatmul.mubr.msk.f32.gmra.mrb[12].mxu1 %vm210_vm1, %v17591_v45 }
 0x41a   :  { %2521 = vmatprep.mubr.f32.mxu1 %v19331_v0 }
 0x41d   :  { %13052 = vmatmul.mubr.msk.f32.gmra.mrb[14].mxu1 %vm210_vm1, %v17598_v46 }
 0x41e   :  { %2675 = vmatprep.mubr.f32.mxu1 %v19331_v0 }
 0x421   :  { %13056 = vmatmul.mubr.msk.f32.vlgmr.msra.gmra.mrb[16].mxu1 %vm210_vm1, %v17584_v42 }
 0x422   :  { %2681 = vmatprep.mubr.f32.mxu1 %v19331_v0  ;;  %2778 = vmatpush1.msra.mxu1 %v2100_v60  ;;  %v15287_v60 = vld [vmem:[#allocation10 + $0x7e8] ss:$92 sps:$4 sm:$0xff]  }
 0x423   :  { %2943 = vmatprep.subr.mxu1 %v2105_v5  ;;  %v2091_v5 = vld [vmem:[#allocation12 + $0x38] sm:$0xff] }
 0x425   :  { %13057 = vmatmul.mubr.msk.f32.gmra.mrb[18].mxu1 %vm210_vm1, %v17591_v45 }
 0x426   :  { %2687 = vmatprep.mubr.f32.mxu1 %v19331_v0 }
 0x429   :  { %13058 = vmatmul.mubr.msk.f32.gmra.mrb[20].mxu1 %vm210_vm1, %v17598_v46 }
 0x42a   :  { %2841 = vmatprep.mubr.f32.mxu1 %v19331_v0 }
 0x42d   :  { %13062 = vmatmul.mubr.msk.f32.vlgmr.msra.gmra.mrb[22].mxu1 %vm210_vm1, %v17584_v42 }
 0x42e   :  { %2847 = vmatprep.mubr.f32.mxu1 %v19331_v0  ;;  %2944 = vmatpush1.msra.mxu1 %v2104_v7  ;;  %v2090_v7 = vld [vmem:[#allocation12 + $0x30] sm:$0xff] }
 0x42f   :  { %8674 = vmatprep.subr.bf16.mxu1 %v15223_v11  ;;  %v2098_v11 = vld [vmem:[#allocation12 + $0x70] sm:$0xff] }
 0x431   :  { %13063 = vmatmul.mubr.msk.f32.gmra.mrb[24].mxu1 %vm210_vm1, %v17591_v45 }
 0x432   :  { %2853 = vmatprep.mubr.f32.mxu1 %v19331_v0 }
 0x435   :  { %13064 = vmatmul.mubr.msk.f32.gmra.mrb[26].mxu1 %vm210_vm1, %v17598_v46 }
 0x436   :  { %3007 = vmatprep.mubr.f32.mxu1 %v19331_v0 }
 0x439   :  { %13068 = vmatmul.mubr.msk.f32.vlgmr.msra.gmra.mrb[28].mxu1 %vm210_vm1, %v17584_v42 }
 0x43a   :  { %3013 = vmatprep.mubr.f32.mxu1 %v19331_v0  ;;  %8675 = vmatpush1.bf16.msra.mxu1 %v15221_v10  ;;  %v2099_v10 = vld [vmem:[#allocation12 + $0x78] sm:$0xff] }
 0x43b   :  { %8676 = vmatprep.subr.bf16.mxu1 %v15229_v13  ;;  %v2102_v13 = vld [vmem:[#allocation12 + $0x90] sm:$0xff] }
 0x43d   :  { %13069 = vmatmul.mubr.msk.f32.gmra.mrb[30].mxu1 %vm210_vm1, %v17591_v45 }
 0x43e   :  { %3019 = vmatprep.mubr.f32.mxu1 %v19331_v0  ;;  %8677 = vmatpush1.bf16.msra.mxu1 %v15227_v15  ;;  %v15226_v15 = vld [vmem:[#allocation10 + $0xb84] ss:$92 sps:$4 sm:$0xff]  }
 0x43f   :  { %8678 = vmatprep.subr.bf16.mxu1 %v15235_v17  ;;  %v15232_v17 = vld [vmem:[#allocation10 + $0xc3c] ss:$92 sps:$4 sm:$0xff]  }
 0x441   :  { %13070 = vmatmul.mubr.msk.f32.gmra.mrb[32].mxu1 %vm210_vm1, %v17598_v46 }
 0x442   :  { %8679 = vmatpush1.bf16.msra.mxu1 %v15233_v19  ;;  %v15305_v19 = vld [vmem:[#allocation10 + $0xa10] ss:$92 sps:$4 sm:$0xff]  }
 0x443   :  { %8680 = vmatprep.subr.bf16.mxu1 %v15241_v21  ;;  %v15238_v21 = vld [vmem:[#allocation10 + $0xcf4] ss:$92 sps:$4 sm:$0xff]  }
 0x446   :  { %8681 = vmatpush1.bf16.msra.mxu1 %v15239_v23  ;;  %v15311_v23 = vld [vmem:[#allocation10 + $0xac8] ss:$92 sps:$4 sm:$0xff]  }
 0x447   :  { %8682 = vmatprep.subr.bf16.mxu1 %v15247_v25  ;;  %v15322_v25 = vld [vmem:[#allocation10 + $0xc] ss:$92 sps:$4 sm:$0xff]  }
 0x44a   :  { %8683 = vmatpush1.bf16.msra.mxu1 %v15245_v27  ;;  %v15250_v27 = vld [vmem:[#allocation10 + $0xe64] ss:$92 sps:$4 sm:$0xff]  }
 0x44b   :  { %8684 = vmatprep.subr.bf16.mxu1 %v15253_v29  ;;  %v15254_v29 = vld [vmem:[#allocation10 + $0xf18] ss:$92 sps:$4 sm:$0xff]  }
 0x44e   :  { %8685 = vmatpush1.bf16.msra.mxu1 %v15251_v31  ;;  %v15260_v31 = vld [vmem:[#allocation10 + $0xfd0] ss:$92 sps:$4 sm:$0xff]  }
 0x44f   :  { %8686 = vmatprep.subr.bf16.mxu1 %v15259_v33  ;;  %v15266_v33 = vld [vmem:[#allocation10 + $0x1088] ss:$92 sps:$4 sm:$0xff]  }
 0x452   :  { %8687 = vmatpush1.bf16.msra.mxu1 %v15257_v35  ;;  %v15280_v35 = vld [vmem:[#allocation10 + $0x11fc] ss:$92 sps:$4 sm:$0xff]  }
 0x453   :  { %8688 = vmatprep.subr.bf16.mxu1 %v15265_v37  ;;  %v15286_v37 = vld [vmem:[#allocation10 + $0x12b4] ss:$92 sps:$4 sm:$0xff]  }
 0x456   :  { %8689 = vmatpush1.bf16.msra.mxu1 %v15263_v38  ;;  %v15284_v38 = vld [vmem:[#allocation10 + $0x12b0] ss:$92 sps:$4 sm:$0xff]  }
 0x457   :  { %8690 = vmatprep.subr.bf16.mxu1 %v15271_v39  ;;  %v15292_v39 = vld [vmem:[#allocation10 + $0x136c] ss:$92 sps:$4 sm:$0xff]  }
 0x45a   :  { %8691 = vmatpush1.bf16.msra.mxu1 %v15269_v40  ;;  %v15290_v40 = vld [vmem:[#allocation10 + $0x1368] ss:$92 sps:$4 sm:$0xff]  }
 0x45b   :  { %8692 = vmatprep.subr.bf16.mxu1 %v15277_v41  ;;  %v15298_v41 = vld [vmem:[#allocation10 + $0x1424] ss:$92 sps:$4 sm:$0xff]  }
 0x45e   :  { %8693 = vmatpush1.bf16.msra.mxu1 %v15275_v43  ;;  %v15296_v43 = vld [vmem:[#allocation10 + $0x1420] ss:$92 sps:$4 sm:$0xff]  }
 0x45f   :  { %8694 = vmatprep.subr.bf16.mxu1 %v15283_v49  ;;  %v15308_v49 = vld [vmem:[#allocation10 + $0x1590] ss:$92 sps:$4 sm:$0xff]  }
 0x462   :  { %8695 = vmatpush1.bf16.msra.mxu1 %v15281_v53  ;;  %v15319_v53 = vld [vmem:[#allocation10 + $0x1704] ss:$92 sps:$4 sm:$0xff]  }
 0x463   :  { %8696 = vmatprep.subr.bf16.mxu1 %v15289_v58 }
 0x466   :  { %8697 = vmatpush1.bf16.msra.mxu1 %v15287_v60 }
 0x4d8   :  { %v684_v59 = vpop.f32.mrb[2].mxu1 }
 0x4d9   :  { %v685_v61 = vadd.f32 %v13031_v57, %v684_v59  ;;  %v14906_v62 = vpop.f32.mrb[3].mxu1  ;;  %v2084_v57 = vld [vmem:[#allocation12] sm:$0xff]  ;;  %v2087_v59 = vld [vmem:[#allocation12 + $0x18] sm:$0xff] }
 0x4da   :  { %v15295_v62 = vld [vmem:[#allocation10 + $0x8a4] ss:$92 sps:$4 sm:$0xff]  }
 0x4db   :  { %v688_v63 = vmax.f32 %v685_v61, 0.0  ;;  %v732_v61 = vld [vmem:[%s19317_s10 + $0x8] sm:$0xff]  ;;  %8698 = vmatprep.subr.bf16.mxu1 %v15295_v62 }
 0x4dd   :  { %v689_v1 = vsel %vm285_vm2, %v688_v63, 0.0 }
 0x4de   :  { %v690_v2 = vrot.slane %v689_v1, 4 }
 0x4e0   :  { %v691_v3 = vadd.f32 %v690_v2, %v689_v1  ;;  %v733_v1 = vld [vmem:[%s19317_s10 + $0x10] sm:$0xff]  ;;  %s17291_s10 = smov 96  }
 0x4e1   :  { %v15301_v2 = vld [vmem:[#allocation10 + $0x95c] ss:$92 sps:$4 sm:$0xff]  }
 0x4e2   :  { %v692_v4 = vrot.slane %v691_v3, 2 }
 0x4e4   :  { %v693_v8 = vadd.f32 %v692_v4, %v691_v3  ;;  %v15299_v3 = vld [vmem:[#allocation10 + $0x958] ss:$92 sps:$4 sm:$0xff]  }
 0x4e5   :  { %v2086_v4 = vld [vmem:[#allocation12 + $0x10] sm:$0xff] }
 0x4e6   :  { %v694_v9 = vrot.slane %v693_v8, 1 }
 0x4e8   :  { %v695_v12 = vadd.f32 %v694_v9, %v693_v8  ;;  %v2095_v8 = vld [vmem:[#allocation12 + $0x58] sm:$0xff]  ;;  %v2094_v9 = vld [vmem:[#allocation12 + $0x50] sm:$0xff] }
 0x4ea   :  { %v696_v14 = vmul.f32 0.25, %v695_v12  ;;  %v2103_v12 = vld [vmem:[#allocation12 + $0x98] sm:$0xff] }
 0x4ec   :  { %v697_v16 = vsub.f32 %v688_v63, %v696_v14  ;;  %v15293_v63 = vld [vmem:[#allocation10 + $0x8a0] ss:$92 sps:$4 sm:$0xff]   ;;  %v2106_v14 = vld [vmem:[#allocation12 + $0xb0] sm:$0xff] }
 0x4ed   :  { %8699 = vmatpush1.bf16.msra.mxu1 %v15293_v63 }
 0x4ee   :  { %v698_v18 = vmul.f32 %v697_v16, %v697_v16  ;;  %8700 = vmatprep.subr.bf16.mxu1 %v15301_v2 }
 0x4f0   :  { %v699_v20 = vsel %vm285_vm2, %v698_v18, 0.0  ;;  %v15307_v18 = vld [vmem:[#allocation10 + $0xa14] ss:$92 sps:$4 sm:$0xff]  }
 0x4f1   :  { %v700_v22 = vrot.slane %v699_v20, 4  ;;  %8701 = vmatpush1.bf16.msra.mxu1 %v15299_v3 }
 0x4f2   :  { %8702 = vmatprep.subr.bf16.mxu1 %v15307_v18 }
 0x4f3   :  { %v701_v24 = vadd.f32 %v700_v22, %v699_v20  ;;  %v15230_v20 = vld [vmem:[#allocation10 + $0xc38] ss:$92 sps:$4 sm:$0xff]   ;;  %v15313_v22 = vld [vmem:[#allocation10 + $0xacc] ss:$92 sps:$4 sm:$0xff]  }
 0x4f5   :  { %v702_v26 = vrot.slane %v701_v24, 2  ;;  %8703 = vmatpush1.bf16.msra.mxu1 %v15305_v19 }
 0x4f6   :  { %8704 = vmatprep.subr.bf16.mxu1 %v15313_v22 }
 0x4f7   :  { %v703_v28 = vadd.f32 %v702_v26, %v701_v24  ;;  %v15236_v24 = vld [vmem:[#allocation10 + $0xcf0] ss:$92 sps:$4 sm:$0xff]   ;;  %v15242_v26 = vld [vmem:[#allocation10 + $0xda8] ss:$92 sps:$4 sm:$0xff]  }
 0x4f9   :  { %v704_v30 = vrot.slane %v703_v28, 1  ;;  %8705 = vmatpush1.bf16.msra.mxu1 %v15311_v23 }
 0x4fa   :  { %8827 = vmatprep.subr.bf16.mxu1 %v15322_v25 }
 0x4fb   :  { %v705_v32 = vadd.f32 %v704_v30, %v703_v28  ;;  %v15256_v28 = vld [vmem:[#allocation10 + $0xf1c] ss:$92 sps:$4 sm:$0xff]   ;;  %v15262_v30 = vld [vmem:[#allocation10 + $0xfd4] ss:$92 sps:$4 sm:$0xff]  }
 0x4fd   :  { %v706_v34 = vmul.f32 0.25, %v705_v32  ;;  %v15268_v32 = vld [vmem:[#allocation10 + $0x108c] ss:$92 sps:$4 sm:$0xff]  }
 0x4ff   :  { %v707_v36 = vadd.f32 1e-05, %v706_v34  ;;  %v15272_v34 = vld [vmem:[#allocation10 + $0x1140] ss:$92 sps:$4 sm:$0xff]  }
 0x501   :  { %16985 = vrsqrt.f32 %v707_v36  ;;  %v15278_v36 = vld [vmem:[#allocation10 + $0x11f8] ss:$92 sps:$4 sm:$0xff]  }
 0x50b   :  { %v16986_v44 = vpop.eup %16985 }
 0x50c   :  { %v709_v48 = vmul.f32 %v16986_v44, %v697_v16  ;;  %v15224_v16 = vld [vmem:[#allocation10 + $0xb80] ss:$92 sps:$4 sm:$0xff]  }
 0x50d   :  { %v15304_v44 = vld [vmem:[#allocation10 + $0x14dc] ss:$92 sps:$4 sm:$0xff]  }
 0x50e   :  { %v718_v51 = vmul.f32 %v13032_v47, %v709_v48  ;;  %v15302_v47 = vld [vmem:[#allocation10 + $0x14d8] ss:$92 sps:$4 sm:$0xff]  }
 0x50f   :  { %v15310_v48 = vld [vmem:[#allocation10 + $0x1594] ss:$92 sps:$4 sm:$0xff]  }
 0x510   :  { %v727_v54 = vadd.f32 %v13033_v50, %v718_v51  ;;  %v15316_v50 = vld [vmem:[#allocation10 + $0x164c] ss:$92 sps:$4 sm:$0xff]  }
 0x511   :  { %v15314_v51 = vld [vmem:[#allocation10 + $0x1648] ss:$92 sps:$4 sm:$0xff]  }
 0x512   :  { %14908 = vmatpush3.msk.msra.mxu0 %vm285_vm2, %v727_v54  ;;  %v862_v54 = vpop.permute.xlu1 %861 }
 0x513   :  { %14910 = vmatmul.mubr.msk.f32.vlgmr.msra.gmra.mrb[4].mxu0 %vm734_vm3, %v731_v55  ;;  %2113 = vmatprep.subr.mxu0 %v2085_v56 }
 0x514   :  { %14912 = vmatprep.mubr.msk.f32.mxu0 %vm17283_vm0, %v19331_v0  ;;  %2114 = vmatpush1.msra.mxu0 %v2084_v57  ;;  %v877_v57 = vpop.permute.xlu0 %876 }
 0x515   :  { %2196 = vmatprep.subr.mxu0 %v2087_v59 }
 0x516   :  { %v866_v55 = vpop.permute.xlu1 %865 }
 0x517   :  { %14913 = vmatmul.mubr.msk.f32.gmra.mrb[6].mxu0 %vm734_vm3, %v732_v61 }
 0x518   :  { %14915 = vmatprep.mubr.msk.f32.mxu0 %vm17283_vm0, %v19331_v0  ;;  %v881_v59 = vpop.permute.xlu0 %880 }
 0x51a   :  { %v870_v56 = vpop.permute.xlu1 %869 }
 0x51b   :  { %14916 = vmatmul.mubr.msk.f32.gmra.mrb[8].mxu0 %vm734_vm3, %v733_v1 }
 0x51c   :  { %2177 = vmatprep.mubr.f32.mxu0 %v19331_v0  ;;  %v885_v61 = vpop.permute.xlu0 %884 }
 0x51e   :  { %v911_v58 = vpop.permute.xlu1 %910 }
 0x51f   :  { %13038 = vmatmul.mubr.msk.f32.vlgmr.msra.gmra.mrb[10].mxu0 %vm210_vm1, %v17584_v42 }
 0x520   :  { %2183 = vmatprep.mubr.f32.mxu0 %v19331_v0  ;;  %2197 = vmatpush1.msra.mxu0 %v2086_v4  ;;  %v907_v63 = vpop.permute.xlu0 %906 }
 0x521   :  { %2362 = vmatprep.subr.mxu0 %v2091_v5 }
 0x522   :  { %v892_v60 = vpop.permute.xlu1 %891 }
 0x523   :  { %13039 = vmatmul.mubr.msk.f32.gmra.mrb[12].mxu0 %vm210_vm1, %v17591_v45 }
 0x524   :  { %2189 = vmatprep.mubr.f32.mxu0 %v19331_v0  ;;  %v896_v2 = vpop.permute.xlu0 %895 }
 0x526   :  { %v17747_v62 = vpop.permute.xlu1 %914 }
 0x527   :  { %13040 = vmatmul.mubr.msk.f32.gmra.mrb[14].mxu0 %vm210_vm1, %v17598_v46 }
 0x528   :  { %2260 = vmatprep.mubr.f32.mxu0 %v19331_v0  ;;  %v847_v4 = vpop.permute.xlu0 %846 }
 0x52a   :  { %v17749_v1 = vpop.permute.xlu1 %899 }
 0x52b   :  { %13041 = vmatmul.mubr.msk.f32.vlgmr.msra.gmra.mrb[16].mxu0 %vm210_vm1, %v17584_v42 }
 0x52c   :  { %2266 = vmatprep.mubr.f32.mxu0 %v19331_v0  ;;  %2363 = vmatpush1.msra.mxu0 %v2090_v7 }
 0x52d   :  { %2528 = vmatprep.subr.mxu0 %v2095_v8 }
 0x52e   :  { %v851_v3 = vpop.permute.xlu1 %850 }
 0x52f   :  { %13042 = vmatmul.mubr.msk.f32.gmra.mrb[18].mxu0 %vm210_vm1, %v17591_v45 }
 0x530   :  { %2272 = vmatprep.mubr.f32.mxu0 %v19331_v0 }
 0x532   :  { %v830_v5 = vpop.permute.xlu1 %829 }
 0x533   :  { %13043 = vmatmul.mubr.msk.f32.gmra.mrb[20].mxu0 %vm210_vm1, %v17598_v46 }
 0x534   :  { %2426 = vmatprep.mubr.f32.mxu0 %v19331_v0 }
 0x537   :  { %13047 = vmatmul.mubr.msk.f32.vlgmr.msra.gmra.mrb[22].mxu0 %vm210_vm1, %v17584_v42 }
 0x538   :  { %2432 = vmatprep.mubr.f32.mxu0 %v19331_v0  ;;  %2529 = vmatpush1.msra.mxu0 %v2094_v9  ;;  %v855_v9 = vpop.permute.xlu1 %854 }
 0x539   :  { %2694 = vmatprep.subr.mxu0 %v2099_v10  ;;  %v835_v10 = vpop.permute.xlu0 %834 }
 0x53b   :  { %13048 = vmatmul.mubr.msk.f32.gmra.mrb[24].mxu0 %vm210_vm1, %v17591_v45 }
 0x53c   :  { %2438 = vmatprep.mubr.f32.mxu0 %v19331_v0 }
 0x53f   :  { %13049 = vmatmul.mubr.msk.f32.gmra.mrb[26].mxu0 %vm210_vm1, %v17598_v46 }
 0x540   :  { %2592 = vmatprep.mubr.f32.mxu0 %v19331_v0 }
 0x543   :  { %13053 = vmatmul.mubr.msk.f32.vlgmr.msra.gmra.mrb[28].mxu0 %vm210_vm1, %v17584_v42 }
 0x544   :  { %2598 = vmatprep.mubr.f32.mxu0 %v19331_v0  ;;  %2695 = vmatpush1.msra.mxu0 %v2098_v11 }
 0x545   :  { %2860 = vmatprep.subr.mxu0 %v2103_v12 }
 0x547   :  { %13054 = vmatmul.mubr.msk.f32.gmra.mrb[30].mxu0 %vm210_vm1, %v17591_v45 }
 0x548   :  { %2604 = vmatprep.mubr.f32.mxu0 %v19331_v0 }
 0x54b   :  { %13055 = vmatmul.mubr.msk.f32.gmra.mrb[32].mxu0 %vm210_vm1, %v17598_v46 }
 0x54c   :  { %2758 = vmatprep.mubr.f32.mxu0 %v19331_v0 }
 0x54f   :  { %13059 = vmatmul.mubr.msk.f32.vlgmr.msra.gmra.mrb[34].mxu0 %vm210_vm1, %v17584_v42 }
 0x550   :  { %2764 = vmatprep.mubr.f32.mxu0 %v19331_v0  ;;  %2861 = vmatpush1.msra.mxu0 %v2102_v13 }
 0x551   :  { %14918 = vmatprep.subr.mxu0 %v19331_v0 }
 0x553   :  { %13060 = vmatmul.mubr.msk.f32.gmra.mrb[36].mxu0 %vm210_vm1, %v17591_v45 }
 0x554   :  { %2770 = vmatprep.mubr.f32.mxu0 %v19331_v0 }
 0x557   :  { %13061 = vmatmul.mubr.msk.f32.gmra.mrb[38].mxu0 %vm210_vm1, %v17598_v46 }
 0x558   :  { %2924 = vmatprep.mubr.f32.mxu0 %v19331_v0 }
 0x55b   :  { %13065 = vmatmul.mubr.msk.f32.vlgmr.msra.gmra.mrb[40].mxu0 %vm210_vm1, %v17584_v42 }
 0x55c   :  { %2930 = vmatprep.mubr.f32.mxu0 %v19331_v0  ;;  %14919 = vmatpush3.msra.mxu0 %v2106_v14 }
 0x55d   :  { %8725 = vmatprep.subr.bf16.mxu0 %v15226_v15 }
 0x55f   :  { %13066 = vmatmul.mubr.msk.f32.gmra.mrb[42].mxu0 %vm210_vm1, %v17591_v45 }
 0x560   :  { %2936 = vmatprep.mubr.f32.mxu0 %v19331_v0 }
 0x563   :  { %13067 = vmatmul.mubr.msk.f32.gmra.mrb[44].mxu0 %vm210_vm1, %v17598_v46 }
 0x564   :  { %14920 = vmatprep.mubr.msk.f32.mxu0 %vm17283_vm0, %v19331_v0 }
 0x567   :  { %14921 = vmatmul.mubr.msk.f32.vlgmr.msra.gmra.mrb[46].mxu0 %vm210_vm1, %v17584_v42  ;;  %v15244_v42 = vld [vmem:[#allocation10 + $0xdac] ss:$92 sps:$4 sm:$0xff]  }
 0x568   :  { %8726 = vmatpush1.bf16.msra.mxu0 %v15224_v16  ;;  %14923 = vmatprep.mubr.msk.f32.mxu0 %vm17283_vm0, %v19331_v0 }
 0x569   :  { %8727 = vmatprep.subr.bf16.mxu0 %v15232_v17 }
 0x56b   :  { %14924 = vmatmul.mubr.msk.f32.gmra.mrb[48].mxu0 %vm210_vm1, %v17591_v45  ;;  %v15248_v45 = vld [vmem:[#allocation10 + $0xe60] ss:$92 sps:$4 sm:$0xff]  }
 0x56c   :  { %8728 = vmatpush1.bf16.msra.mxu0 %v15230_v20  ;;  %14926 = vmatprep.mubr.msk.f32.mxu0 %vm17283_vm0, %v19331_v0  ;;  %v15424_v0 = vld [vmem:[#allocation10 + $0xcc] ss:$92 sps:$4 sm:$0xff]  }
 0x56d   :  { %8729 = vmatprep.subr.bf16.mxu0 %v15238_v21 }
 0x56f   :  { %14927 = vmatmul.mubr.msk.f32.gmra.mrb[50].mxu0 %vm210_vm1, %v17598_v46  ;;  %v15274_v46 = vld [vmem:[#allocation10 + $0x1144] ss:$92 sps:$4 sm:$0xff]  }
 0x570   :  { %8730 = vmatpush1.bf16.msra.mxu0 %v15236_v24 }
 0x571   :  { %8731 = vmatprep.subr.bf16.mxu0 %v15244_v42 }
 0x574   :  { %8732 = vmatpush1.bf16.msra.mxu0 %v15242_v26 }
 0x575   :  { %8733 = vmatprep.subr.bf16.mxu0 %v15250_v27 }
 0x578   :  { %8734 = vmatpush1.bf16.msra.mxu0 %v15248_v45  ;;  %v840_v45 = vpop.permute.xlu1 %839 }
 0x579   :  { %8735 = vmatprep.subr.bf16.mxu0 %v15256_v28 }
 0x57c   :  { %8736 = vmatpush1.bf16.msra.mxu0 %v15254_v29 }
 0x57d   :  { %8737 = vmatprep.subr.bf16.mxu0 %v15262_v30 }
 0x580   :  { %8738 = vmatpush1.bf16.msra.mxu0 %v15260_v31  ;;  %v15317_v31 = vld [vmem:[#allocation10 + $0x1700] ss:$92 sps:$4 sm:$0xff]  }
 0x581   :  { %8739 = vmatprep.subr.bf16.mxu0 %v15268_v32  ;;  %v15320_v32 = vld [vmem:[#allocation10 + $0x8] ss:$92 sps:$4 sm:$0xff]  }
 0x584   :  { %8740 = vmatpush1.bf16.msra.mxu0 %v15266_v33 }
 0x585   :  { %8741 = vmatprep.subr.bf16.mxu0 %v15274_v46  ;;  %v15325_v46 = vld [vmem:[#allocation10 + $0x17bc] ss:$92 sps:$4 sm:$0xff]  }
 0x588   :  { %8742 = vmatpush1.bf16.msra.mxu0 %v15272_v34 }
 0x589   :  { %8743 = vmatprep.subr.bf16.mxu0 %v15280_v35 }
 0x58c   :  { %8744 = vmatpush1.bf16.msra.mxu0 %v15278_v36 }
 0x58d   :  { %8745 = vmatprep.subr.bf16.mxu0 %v15286_v37  ;;  %v15328_v37 = vld [vmem:[#allocation10 + $0xc4] ss:$92 sps:$4 sm:$0xff]  }
 0x590   :  { %8746 = vmatpush1.bf16.msra.mxu0 %v15284_v38 }
 0x591   :  { %8747 = vmatprep.subr.bf16.mxu0 %v15292_v39 }
 0x594   :  { %8748 = vmatpush1.bf16.msra.mxu0 %v15290_v40  ;;  %v15323_v40 = vld [vmem:[#allocation10 + $0x17b8] ss:$92 sps:$4 sm:$0xff]  }
 0x595   :  { %8749 = vmatprep.subr.bf16.mxu0 %v15298_v41  ;;  %v15326_v41 = vld [vmem:[#allocation10 + $0xc0] ss:$92 sps:$4 sm:$0xff]  }
 0x598   :  { %8750 = vmatpush1.bf16.msra.mxu0 %v15296_v43 }
 0x599   :  { %8751 = vmatprep.subr.bf16.mxu0 %v15304_v44 }
 0x59c   :  { %8752 = vmatpush1.bf16.msra.mxu0 %v15302_v47  ;;  %v15331_v47 = vld [vmem:[#allocation10 + $0x1874] ss:$92 sps:$4 sm:$0xff]  }
 0x59d   :  { %8753 = vmatprep.subr.bf16.mxu0 %v15310_v48  ;;  %v15334_v48 = vld [vmem:[#allocation10 + $0x17c] ss:$92 sps:$4 sm:$0xff]  }
 0x5a0   :  { %8754 = vmatpush1.bf16.msra.mxu0 %v15308_v49 }
 0x5a1   :  { %8755 = vmatprep.subr.bf16.mxu0 %v15316_v50 }
 0x5a4   :  { %8756 = vmatpush1.bf16.msra.mxu0 %v15314_v51  ;;  %v15329_v51 = vld [vmem:[#allocation10 + $0x1870] ss:$92 sps:$4 sm:$0xff]  }
 0x5a5   :  { %8776 = vmatprep.subr.bf16.mxu0 %v15319_v53  ;;  %v15332_v53 = vld [vmem:[#allocation10 + $0x178] ss:$92 sps:$4 sm:$0xff]  }
 0x5e6   :  { %v813_v7 = vpop.f32.mrb[4].mxu0 }
 0x5e7   :  { %v14911_v8 = vpop.f32.mrb[5].mxu0  ;;  %v842_v11 = vmul.f32 %v830_v5, %v813_v7  ;;  %v857_v12 = vmul.f32 %v847_v4, %v813_v7  ;;  %v872_v13 = vmul.f32 %v862_v54, %v813_v7  ;;  %v887_v14 = vmul.f32 %v877_v57, %v813_v7  ;;  %v15341_v4 = vld [vmem:[#allocation10 + $0x19e0] ss:$92 sps:$4 sm:$0xff]   ;;  %v15344_v5 = vld [vmem:[#allocation10 + $0x2e8] ss:$92 sps:$4 sm:$0xff]  }
 0x5e8   :  { %v902_v21 = vmul.f32 %v892_v60, %v813_v7  ;;  %v917_v22 = vmul.f32 %v907_v63, %v813_v7  ;;  %v15338_v60 = vld [vmem:[#allocation10 + $0x230] ss:$92 sps:$4 sm:$0xff]   ;;  %v15343_v63 = vld [vmem:[#allocation10 + $0x19e4] ss:$92 sps:$4 sm:$0xff]   ;;  %v15349_v8 = vld [vmem:[#allocation10 + $0x1a9c] ss:$92 sps:$4 sm:$0xff]  }
 0x5ea   :  { %v818_v15 = vpop.f32.mrb[6].mxu0 }
 0x5eb   :  { %v843_v16 = vmul.f32 %v835_v10, %v818_v15  ;;  %v858_v17 = vmul.f32 %v851_v3, %v818_v15  ;;  %v873_v18 = vmul.f32 %v866_v55, %v818_v15  ;;  %v888_v19 = vmul.f32 %v881_v59, %v818_v15  ;;  %v14914_v20 = vpop.f32.mrb[7].mxu0  ;;  %v15335_v59 = vld [vmem:[#allocation10 + $0x1928] ss:$92 sps:$4 sm:$0xff]  }
 0x5ec   :  { %v903_v23 = vmul.f32 %v896_v2, %v818_v15  ;;  %v918_v24 = vmul.f32 %v911_v58, %v818_v15  ;;  %v15340_v58 = vld [vmem:[#allocation10 + $0x234] ss:$92 sps:$4 sm:$0xff]   ;;  %v15346_v2 = vld [vmem:[#allocation10 + $0x2ec] ss:$92 sps:$4 sm:$0xff]   ;;  %v15358_v15 = vld [vmem:[#allocation10 + $0x45c] ss:$92 sps:$4 sm:$0xff]  }
 0x5ed   :  { %v17751_v42 = vpack.c.bf16 %v843_v16, %v842_v11  ;;  %v17753_v25 = vpack.c.bf16 %v858_v17, %v857_v12  ;;  %v17755_v26 = vpack.c.bf16 %v873_v18, %v872_v13  ;;  %v17757_v27 = vpack.c.bf16 %v888_v19, %v887_v14  ;;  %v15347_v11 = vld [vmem:[#allocation10 + $0x1a98] ss:$92 sps:$4 sm:$0xff]   ;;  %v15350_v12 = vld [vmem:[#allocation10 + $0x3a0] ss:$92 sps:$4 sm:$0xff]   ;;  %v15353_v17 = vld [vmem:[#allocation10 + $0x1b50] ss:$92 sps:$4 sm:$0xff]  }
 0x5ee   :  { %v17759_v28 = vpack.c.bf16 %v903_v23, %v902_v21  ;;  %v17761_v29 = vpack.c.bf16 %v918_v24, %v917_v22  ;;  %v17763_v30 = vpop.f32.mrb[8].mxu0  ;;  %v15355_v14 = vld [vmem:[#allocation10 + $0x1b54] ss:$92 sps:$4 sm:$0xff]   ;;  %v15361_v20 = vld [vmem:[#allocation10 + $0x1c0c] ss:$92 sps:$4 sm:$0xff]  }
 0x5ef   :  { %v889_v33 = vmul.f32 %v885_v61, %v17763_v30  ;;  %8706 = vmatprep.mubr.bf16.mxu1 %v17753_v25  ;;  %v14917_v34 = vpop.f32.mrb[9].mxu0  ;;  %v859_v35 = vmul.f32 %v855_v9, %v17763_v30  ;;  %8757 = vmatprep.mubr.bf16.mxu0 %v17757_v27  ;;  %v844_v36 = vmul.f32 %v840_v45, %v17763_v30  ;;  %v15352_v9 = vld [vmem:[#allocation10 + $0x3a4] ss:$92 sps:$4 sm:$0xff]   ;;  %v15356_v18 = vld [vmem:[#allocation10 + $0x458] ss:$92 sps:$4 sm:$0xff]  }
 0x5f0   :  { %8707 = vmatmul.mubr.bf16.vlgmr.msra.gmra.mrb[36].mxu1 %v17751_v42  ;;  %8758 = vmatmul.mubr.bf16.vlgmr.msra.gmra.mrb[52].mxu0 %v17755_v26  ;;  %v874_v44 = vmul.f32 %v870_v56, %v17763_v30  ;;  %v15337_v56 = vld [vmem:[#allocation10 + $0x192c] ss:$92 sps:$4 sm:$0xff]   ;;  %v15364_v21 = vld [vmem:[#allocation10 + $0x514] ss:$92 sps:$4 sm:$0xff]  }
 0x5f1   :  { %v17771_v38 = vpack.c.bf16 %v889_v33, %v889_v33  ;;  %v17774_v39 = vpack.c.bf16 %v859_v35, %v859_v35  ;;  %8777 = vmatpush1.bf16.msra.mxu0 %v15317_v31  ;;  %8828 = vmatpush1.bf16.msra.mxu1 %v15320_v32  ;;  %v17782_v50 = vpack.c.bf16 %v844_v36, %v844_v36  ;;  %v15359_v23 = vld [vmem:[#allocation10 + $0x1c08] ss:$92 sps:$4 sm:$0xff]   ;;  %v15362_v24 = vld [vmem:[#allocation10 + $0x510] ss:$92 sps:$4 sm:$0xff]   ;;  %v15373_v36 = vld [vmem:[#allocation10 + $0x1d7c] ss:$92 sps:$4 sm:$0xff]  }
 0x5f2   :  { %v17776_v43 = vpop.f32.mrb[10].mxu0  ;;  %8778 = vmatprep.subr.bf16.mxu0 %v15325_v46  ;;  %8829 = vmatprep.subr.bf16.mxu1 %v15328_v37  ;;  %v17787_v55 = vpack.c.bf16 %v874_v44, %v874_v44  ;;  %v15367_v31 = vld [vmem:[#allocation10 + $0x1cc4] ss:$92 sps:$4 sm:$0xff]   ;;  %v15370_v32 = vld [vmem:[#allocation10 + $0x5cc] ss:$92 sps:$4 sm:$0xff]  }
 0x5f3   :  { %8767 = vmatprep.mubr.bf16.mxu0 %v17771_v38  ;;  %v17780_v49 = vpop.f32.mrb[11].mxu0  ;;  %8716 = vmatprep.mubr.bf16.mxu1 %v17774_v39  ;;  %v15365_v46 = vld [vmem:[#allocation10 + $0x1cc0] ss:$92 sps:$4 sm:$0xff]   ;;  %v15368_v34 = vld [vmem:[#allocation10 + $0x5c8] ss:$92 sps:$4 sm:$0xff]  }
 0x5f4   :  { %v15376_v37 = vld [vmem:[#allocation10 + $0x684] ss:$92 sps:$4 sm:$0xff]  }
 0x5f5   :  { %8779 = vmatpush1.bf16.msra.mxu0 %v15323_v40  ;;  %8830 = vmatpush1.bf16.msra.mxu1 %v15326_v41  ;;  %v15371_v41 = vld [vmem:[#allocation10 + $0x1d78] ss:$92 sps:$4 sm:$0xff]   ;;  %v15374_v44 = vld [vmem:[#allocation10 + $0x680] ss:$92 sps:$4 sm:$0xff]  }
 0x5f6   :  { %v17785_v54 = vpop.f32.mrb[12].mxu0  ;;  %8780 = vmatprep.subr.bf16.mxu0 %v15331_v47  ;;  %8831 = vmatprep.subr.bf16.mxu1 %v15334_v48  ;;  %v15379_v48 = vld [vmem:[#allocation10 + $0x1e34] ss:$92 sps:$4 sm:$0xff]  }
 0x5f7   :  { %v17789_v57 = vpop.f32.mrb[13].mxu0 }
 0x5f8   :  { %8717 = vmatmul.mubr.bf16.gmra.mrb[40].mxu1 %v17782_v50  ;;  %8768 = vmatmul.mubr.bf16.gmra.mrb[56].mxu0 %v17787_v55 }
 0x5f9   :  { %8859 = vmatprep.mubr.bf16.mxu1 %v17753_v25  ;;  %8781 = vmatpush1.bf16.msra.mxu0 %v15329_v51  ;;  %v15382_v51 = vld [vmem:[#allocation10 + $0x73c] ss:$92 sps:$4 sm:$0xff]  }
 0x5fa   :  { %8832 = vmatpush1.bf16.msra.mxu1 %v15332_v53  ;;  %v17794_v61 = vpop.f32.mrb[14].mxu0  ;;  %8808 = vmatprep.mubr.bf16.mxu0 %v17761_v29 }
 0x5fb   :  { %8782 = vmatprep.subr.bf16.mxu0 %v15337_v56  ;;  %v17797_v3 = vpop.f32.mrb[15].mxu0  ;;  %8833 = vmatprep.subr.bf16.mxu1 %v15340_v58  ;;  %v15377_v56 = vld [vmem:[#allocation10 + $0x1e30] ss:$92 sps:$4 sm:$0xff]   ;;  %v15380_v58 = vld [vmem:[#allocation10 + $0x738] ss:$92 sps:$4 sm:$0xff]  }
 0x5fd   :  { %8783 = vmatpush1.bf16.msra.mxu0 %v15335_v59 }
 0x5fe   :  { %8834 = vmatpush1.bf16.msra.mxu1 %v15338_v60  ;;  %v17799_v7 = vpop.f32.mrb[16].mxu0  ;;  %8784 = vmatprep.subr.bf16.mxu0 %v15343_v63  ;;  %v15385_v60 = vld [vmem:[#allocation10 + $0x1eec] ss:$92 sps:$4 sm:$0xff]   ;;  %v15388_v63 = vld [vmem:[#allocation10 + $0x7f4] ss:$92 sps:$4 sm:$0xff]  }
 0x5ff   :  { %8835 = vmatprep.subr.bf16.mxu1 %v15346_v2  ;;  %v17801_v10 = vpop.f32.mrb[17].mxu0 }
 0x601   :  { %8785 = vmatpush1.bf16.msra.mxu0 %v15341_v4  ;;  %v15383_v4 = vld [vmem:[#allocation10 + $0x1ee8] ss:$92 sps:$4 sm:$0xff]  }
 0x602   :  { %8836 = vmatpush1.bf16.msra.mxu1 %v15344_v5  ;;  %v17803_v13 = vpop.f32.mrb[18].mxu0  ;;  %8786 = vmatprep.subr.bf16.mxu0 %v15349_v8  ;;  %v15386_v5 = vld [vmem:[#allocation10 + $0x7f0] ss:$92 sps:$4 sm:$0xff]  }
 0x603   :  { %8837 = vmatprep.subr.bf16.mxu1 %v15352_v9  ;;  %v17805_v16 = vpop.f32.mrb[19].mxu0  ;;  %v15391_v9 = vld [vmem:[#allocation10 + $0x1fa4] ss:$92 sps:$4 sm:$0xff]  }
 0x605   :  { %8787 = vmatpush1.bf16.msra.mxu0 %v15347_v11  ;;  %v15394_v11 = vld [vmem:[#allocation10 + $0x8ac] ss:$92 sps:$4 sm:$0xff]  }
 0x606   :  { %8838 = vmatpush1.bf16.msra.mxu1 %v15350_v12  ;;  %v17807_v19 = vpop.f32.mrb[20].mxu0  ;;  %8788 = vmatprep.subr.bf16.mxu0 %v15355_v14  ;;  %v15389_v14 = vld [vmem:[#allocation10 + $0x1fa0] ss:$92 sps:$4 sm:$0xff]  }
 0x607   :  { %8839 = vmatprep.subr.bf16.mxu1 %v15358_v15  ;;  %v17809_v22 = vpop.f32.mrb[21].mxu0  ;;  %v15392_v15 = vld [vmem:[#allocation10 + $0x8a8] ss:$92 sps:$4 sm:$0xff]  }
 0x609   :  { %8789 = vmatpush1.bf16.msra.mxu0 %v15353_v17 }
 0x60a   :  { %8840 = vmatpush1.bf16.msra.mxu1 %v15356_v18  ;;  %v17811_v45 = vpop.f32.mrb[22].mxu0  ;;  %8790 = vmatprep.subr.bf16.mxu0 %v15361_v20  ;;  %v15397_v18 = vld [vmem:[#allocation10 + $0x205c] ss:$92 sps:$4 sm:$0xff]   ;;  %v15400_v20 = vld [vmem:[#allocation10 + $0x964] ss:$92 sps:$4 sm:$0xff]  }
 0x60b   :  { %8841 = vmatprep.subr.bf16.mxu1 %v15364_v21  ;;  %v17813_v33 = vpop.f32.mrb[23].mxu0 }
 0x60d   :  { %8791 = vmatpush1.bf16.msra.mxu0 %v15359_v23  ;;  %v15395_v23 = vld [vmem:[#allocation10 + $0x2058] ss:$92 sps:$4 sm:$0xff]  }
 0x60e   :  { %8842 = vmatpush1.bf16.msra.mxu1 %v15362_v24  ;;  %v17815_v35 = vpop.f32.mrb[24].mxu0  ;;  %8792 = vmatprep.subr.bf16.mxu0 %v15367_v31  ;;  %v15398_v24 = vld [vmem:[#allocation10 + $0x960] ss:$92 sps:$4 sm:$0xff]  }
 0x60f   :  { %8843 = vmatprep.subr.bf16.mxu1 %v15370_v32  ;;  %v17817_v40 = vpop.f32.mrb[25].mxu0  ;;  %v15403_v32 = vld [vmem:[#allocation10 + $0x2114] ss:$92 sps:$4 sm:$0xff]  }
 0x611   :  { %8793 = vmatpush1.bf16.msra.mxu0 %v15365_v46  ;;  %v15406_v46 = vld [vmem:[#allocation10 + $0xa1c] ss:$92 sps:$4 sm:$0xff]  }
 0x612   :  { %8844 = vmatpush1.bf16.msra.mxu1 %v15368_v34  ;;  %v17819_v47 = vpop.f32.mrb[26].mxu0  ;;  %8794 = vmatprep.subr.bf16.mxu0 %v15373_v36  ;;  %v15401_v36 = vld [vmem:[#allocation10 + $0x2110] ss:$92 sps:$4 sm:$0xff]  }
 0x613   :  { %8845 = vmatprep.subr.bf16.mxu1 %v15376_v37  ;;  %v17821_v53 = vpop.f32.mrb[27].mxu0  ;;  %v15404_v37 = vld [vmem:[#allocation10 + $0xa18] ss:$92 sps:$4 sm:$0xff]  }
 0x615   :  { %8795 = vmatpush1.bf16.msra.mxu0 %v15371_v41 }
 0x616   :  { %8846 = vmatpush1.bf16.msra.mxu1 %v15374_v44  ;;  %v17823_v59 = vpop.f32.mrb[28].mxu0  ;;  %8796 = vmatprep.subr.bf16.mxu0 %v15379_v48  ;;  %v15409_v44 = vld [vmem:[#allocation10 + $0x21cc] ss:$92 sps:$4 sm:$0xff]   ;;  %v15412_v48 = vld [vmem:[#allocation10 + $0xad4] ss:$92 sps:$4 sm:$0xff]  }
 0x617   :  { %8847 = vmatprep.subr.bf16.mxu1 %v15382_v51  ;;  %v17825_v2 = vpop.f32.mrb[29].mxu0 }
 0x619   :  { %8797 = vmatpush1.bf16.msra.mxu0 %v15377_v56  ;;  %v17843_v56 = vpop.f32.mrb[4].mxu1 }
 0x61a   :  { %8848 = vmatpush1.bf16.msra.mxu1 %v15380_v58  ;;  %v17827_v8 = vpop.f32.mrb[30].mxu0  ;;  %8798 = vmatprep.subr.bf16.mxu0 %v15385_v60  ;;  %v17845_v58 = vpop.f32.mrb[5].mxu1  ;;  %v15407_v60 = vld [vmem:[#allocation10 + $0x21c8] ss:$92 sps:$4 sm:$0xff]  }
 0x61b   :  { %8849 = vmatprep.subr.bf16.mxu1 %v15388_v63  ;;  %v17829_v12 = vpop.f32.mrb[31].mxu0  ;;  %v15410_v63 = vld [vmem:[#allocation10 + $0xad0] ss:$92 sps:$4 sm:$0xff]  }
 0x61d   :  { %8799 = vmatpush1.bf16.msra.mxu0 %v15383_v4 }
 0x61e   :  { %8850 = vmatpush1.bf16.msra.mxu1 %v15386_v5  ;;  %v17831_v17 = vpop.f32.mrb[32].mxu0  ;;  %8800 = vmatprep.subr.bf16.mxu0 %v15391_v9  ;;  %v17849_v5 = vpop.f32.mrb[6].mxu1  ;;  %v15415_v9 = vld [vmem:[#allocation10 + $0xb8c] ss:$92 sps:$4 sm:$0xff]  }
 0x61f   :  { %8851 = vmatprep.subr.bf16.mxu1 %v15394_v11  ;;  %v17833_v21 = vpop.f32.mrb[33].mxu0  ;;  %v15418_v11 = vld [vmem:[#allocation10 + $0x14] ss:$92 sps:$4 sm:$0xff]  }
 0x621   :  { %8801 = vmatpush1.bf16.msra.mxu0 %v15389_v14 }
 0x622   :  { %8852 = vmatpush1.bf16.msra.mxu1 %v15392_v15  ;;  %v17835_v31 = vpop.f32.mrb[34].mxu0  ;;  %8802 = vmatprep.subr.bf16.mxu0 %v15397_v18  ;;  %v17853_v15 = vpop.f32.mrb[7].mxu1  ;;  %v919_v18 = vmul.f32 %v17747_v62, %v17763_v30  ;;  %v15421_v62 = vld [vmem:[#allocation10 + $0xc44] ss:$92 sps:$4 sm:$0xff]  }
 0x623   :  { %19378 = vst [vmem:[#allocation25_spill] sm:$0xff] %v17835_v31  ;;  %8853 = vmatprep.subr.bf16.mxu1 %v15400_v20  ;;  %v17837_v34 = vpop.f32.mrb[35].mxu0  ;;  %v17857_v20 = vpop.f32.mrb[8].mxu1  ;;  %v15439_v31 = vld [vmem:[#allocation10 + $0xe6c] ss:$92 sps:$4 sm:$0xff]  }
 0x624   :  { %19379 = vst [vmem:[#allocation26_spill] sm:$0xff] %v17837_v34 }
 0x625   :  { %8803 = vmatpush1.bf16.msra.mxu0 %v15395_v23  ;;  %v17859_v23 = vpop.f32.mrb[9].mxu1 }
 0x626   :  { %8854 = vmatpush1.bf16.msra.mxu1 %v15398_v24  ;;  %v17839_v41 = vpop.f32.mrb[36].mxu0  ;;  %8804 = vmatprep.subr.bf16.mxu0 %v15403_v32  ;;  %v17863_v32 = vpop.f32.mrb[10].mxu1 }
 0x627   :  { %19380 = vst [vmem:[#allocation27_spill] sm:$0xff] %v17839_v41  ;;  %8855 = vmatprep.subr.bf16.mxu1 %v15406_v46  ;;  %v17841_v51 = vpop.f32.mrb[37].mxu0  ;;  %v15413_v46 = vld [vmem:[#allocation10 + $0xb88] ss:$92 sps:$4 sm:$0xff]  }
 0x628   :  { %19381 = vst [vmem:[#allocation28_spill] sm:$0xff] %v17841_v51 }
 0x629   :  { %8805 = vmatpush1.bf16.msra.mxu0 %v15401_v36  ;;  %v15416_v36 = vld [vmem:[#allocation10 + $0x10] ss:$92 sps:$4 sm:$0xff]  }
 0x62a   :  { %8856 = vmatpush1.bf16.msra.mxu1 %v15404_v37  ;;  %v17847_v4 = vpop.f32.mrb[38].mxu0  ;;  %8806 = vmatprep.subr.bf16.mxu0 %v15409_v44  ;;  %v17867_v44 = vpop.f32.mrb[11].mxu1 }
 0x62b   :  { %19382 = vst [vmem:[#allocation29_spill] sm:$0xff] %v17847_v4  ;;  %8857 = vmatprep.subr.bf16.mxu1 %v15412_v48  ;;  %v17851_v14 = vpop.f32.mrb[39].mxu0  ;;  %v17869_v48 = vpack.c.bf16 %v919_v18, %v919_v18  ;;  %v17871_v6 = vpop.f32.mrb[12].mxu1  ;;  %v15419_v18 = vld [vmem:[#allocation10 + $0xc40] ss:$92 sps:$4 sm:$0xff]  }
 0x62c   :  { %19383 = vst [vmem:[#allocation30_spill] sm:$0xff] %v17851_v14  ;;  %v15427_v14 = vld [vmem:[#allocation10 + $0xcfc] ss:$92 sps:$4 sm:$0xff]   ;;  %v15430_v4 = vld [vmem:[#allocation10 + $0x184] ss:$92 sps:$4 sm:$0xff]  }
 0x62d   :  { %8807 = vmatpush1.bf16.msra.mxu0 %v15407_v60  ;;  %v17875_v60 = vpop.f32.mrb[13].mxu1 }
 0x62e   :  { %8858 = vmatpush1.bf16.msra.mxu1 %v15410_v63  ;;  %v17861_v24 = vpop.f32.mrb[40].mxu0  ;;  %8980 = vmatprep.subr.bf16.mxu0 %v15418_v11  ;;  %v904_v11 = vmul.f32 %v17749_v1, %v17763_v30  ;;  %v15425_v1 = vld [vmem:[#allocation10 + $0xcf8] ss:$92 sps:$4 sm:$0xff]   ;;  %v15428_v30 = vld [vmem:[#allocation10 + $0x180] ss:$92 sps:$4 sm:$0xff]  }
 0x62f   :  { %19384 = vst [vmem:[#allocation31_spill] sm:$0xff] %v17861_v24  ;;  %8878 = vmatprep.subr.bf16.mxu1 %v15415_v9  ;;  %v17865_v37 = vpop.f32.mrb[41].mxu0  ;;  %v17881_v9 = vpop.f32.mrb[14].mxu1 }
 0x630   :  { %19385 = vst [vmem:[#allocation32_spill] sm:$0xff] %v17865_v37  ;;  %8809 = vmatmul.mubr.bf16.vlgmr.msra.gmra.mrb[52].mxu0 %v17759_v28  ;;  %v17887_v24 = vpop.f32.mrb[15].mxu1  ;;  %v17895_v34 = vpack.c.bf16 %v904_v11, %v904_v11 }
 0x631   :  { %8860 = vmatmul.mubr.bf16.vlgmr.msra.gmra.mrb[44].mxu1 %v17751_v42  ;;  %8818 = vmatprep.mubr.bf16.mxu0 %v17869_v48  ;;  %v17889_v51 = vpop.f32.mrb[16].mxu1 }
 0x632   :  { %8869 = vmatprep.mubr.bf16.mxu1 %v17774_v39  ;;  %v17879_v63 = vpop.f32.mrb[42].mxu0  ;;  %8879 = vmatpush1.bf16.msra.mxu1 %v15413_v46  ;;  %19388 = vst [vmem:[#allocation35_spill] sm:$0xff] %v17889_v51  ;;  %v17893_v41 = vpop.f32.mrb[17].mxu1  ;;  %v15739_v51 = vld [vmem:[#allocation10 + $0xfec] ss:$92 sps:$4 sm:$0xff]  }
 0x633   :  { %19386 = vst [vmem:[#allocation33_spill] sm:$0xff] %v17879_v63  ;;  %8981 = vmatpush1.bf16.msra.mxu0 %v15416_v36  ;;  %v17885_v37 = vpop.f32.mrb[43].mxu0  ;;  %8880 = vmatprep.subr.bf16.mxu1 %v15421_v62  ;;  %19390 = vst [vmem:[#allocation37_spill] sm:$0xff] %v17893_v41  ;;  %v17899_v36 = vpop.f32.mrb[18].mxu1  ;;  %v15436_v62 = vld [vmem:[#allocation10 + $0x23c] ss:$92 sps:$4 sm:$0xff]  }
 0x634   :  { %19387 = vst [vmem:[#allocation34_spill] sm:$0xff] %v17885_v37  ;;  %8982 = vmatprep.subr.bf16.mxu0 %v15424_v0  ;;  %19392 = vst [vmem:[#allocation39_spill] sm:$0xff] %v17899_v36  ;;  %v15433_v0 = vld [vmem:[#allocation10 + $0xdb4] ss:$92 sps:$4 sm:$0xff]   ;;  %v17901_v37 = vpop.f32.mrb[19].mxu1 }
 0x635   :  { %19393 = vst [vmem:[#allocation40_spill] sm:$0xff] %v17901_v37  ;;  %v17905_v11 = vpop.f32.mrb[20].mxu1  ;;  %v15442_v37 = vld [vmem:[#allocation10 + $0x2f4] ss:$92 sps:$4 sm:$0xff]  }
 0x636   :  { %v17891_v63 = vpop.f32.mrb[44].mxu0  ;;  %8881 = vmatpush1.bf16.msra.mxu1 %v15419_v18  ;;  %19394 = vst [vmem:[#allocation41_spill] sm:$0xff] %v17905_v11  ;;  %v17911_v18 = vpop.f32.mrb[21].mxu1 }
 0x637   :  { %19389 = vst [vmem:[#allocation36_spill] sm:$0xff] %v17891_v63  ;;  %8983 = vmatpush1.bf16.msra.mxu0 %v15422_v52  ;;  %v17897_v46 = vpop.f32.mrb[45].mxu0  ;;  %8882 = vmatprep.subr.bf16.mxu1 %v15427_v14  ;;  %19396 = vst [vmem:[#allocation43_spill] sm:$0xff] %v17911_v18  ;;  %v15434_v14 = vld [vmem:[#allocation10 + $0x238] ss:$92 sps:$4 sm:$0xff]   ;;  %v17913_v63 = vpop.f32.mrb[22].mxu1 }
 0x638   :  { %19391 = vst [vmem:[#allocation38_spill] sm:$0xff] %v17897_v46  ;;  %8984 = vmatprep.subr.bf16.mxu0 %v15430_v4  ;;  %8819 = vmatmul.mubr.bf16.gmra.mrb[56].mxu0 %v17895_v34  ;;  %v15431_v4 = vld [vmem:[#allocation10 + $0xdb0] ss:$92 sps:$4 sm:$0xff]   ;;  %19397 = vst [vmem:[#allocation44_spill] sm:$0xff] %v17913_v63  ;;  %v17915_v11 = vpop.f32.mrb[23].mxu1 }
 0x639   :  { %8870 = vmatmul.mubr.bf16.gmra.mrb[48].mxu1 %v17782_v50  ;;  %9012 = vmatprep.mubr.bf16.mxu0 %v17753_v25  ;;  %19398 = vst [vmem:[#allocation45_spill] sm:$0xff] %v17915_v11  ;;  %v17917_v36 = vpop.f32.mrb[24].mxu1 }
 0x63a   :  { %8910 = vmatprep.mubr.bf16.mxu1 %v17757_v27  ;;  %v17909_v52 = vpop.f32.mrb[46].mxu0  ;;  %8883 = vmatpush1.bf16.msra.mxu1 %v15425_v1  ;;  %19399 = vst [vmem:[#allocation46_spill] sm:$0xff] %v17917_v36  ;;  %v17919_v41 = vpop.f32.mrb[25].mxu1  ;;  %v15437_v1 = vld [vmem:[#allocation10 + $0xe68] ss:$92 sps:$4 sm:$0xff]  }
 0x63b   :  { %19395 = vst [vmem:[#allocation42_spill] sm:$0xff] %v17909_v52  ;;  %8985 = vmatpush1.bf16.msra.mxu0 %v15428_v30  ;;  %v14922_v46 = vpop.f32.mrb[47].mxu0  ;;  %8884 = vmatprep.subr.bf16.mxu1 %v15433_v0  ;;  %19400 = vst [vmem:[#allocation47_spill] sm:$0xff] %v17919_v41  ;;  %v15440_v30 = vld [vmem:[#allocation10 + $0x2f0] ss:$92 sps:$4 sm:$0xff]   ;;  %v17923_v18 = vpop.f32.mrb[26].mxu1 }
 0x63c   :  { %8986 = vmatprep.subr.bf16.mxu0 %v15436_v62  ;;  %19402 = vst [vmem:[#allocation49_spill] sm:$0xff] %v17923_v18  ;;  %v15445_v0 = vld [vmem:[#allocation10 + $0xf24] ss:$92 sps:$4 sm:$0xff]   ;;  %v15448_v62 = vld [vmem:[#allocation10 + $0x3ac] ss:$92 sps:$4 sm:$0xff]   ;;  %v17925_v63 = vpop.f32.mrb[27].mxu1 }
 0x63d   :  { %19403 = vst [vmem:[#allocation50_spill] sm:$0xff] %v17925_v63  ;;  %v17927_v11 = vpop.f32.mrb[28].mxu1 }
 0x63e   :  { %v17921_v52 = vpop.f32.mrb[48].mxu0  ;;  %8885 = vmatpush1.bf16.msra.mxu1 %v15431_v4  ;;  %19404 = vst [vmem:[#allocation51_spill] sm:$0xff] %v17927_v11  ;;  %v17929_v36 = vpop.f32.mrb[29].mxu1  ;;  %v15443_v4 = vld [vmem:[#allocation10 + $0xf20] ss:$92 sps:$4 sm:$0xff]  }
 0x63f   :  { %19401 = vst [vmem:[#allocation48_spill] sm:$0xff] %v17921_v52  ;;  %8987 = vmatpush1.bf16.msra.mxu0 %v15434_v14  ;;  %v14925_v46 = vpop.f32.mrb[49].mxu0  ;;  %8886 = vmatprep.subr.bf16.mxu1 %v15439_v31  ;;  %19405 = vst [vmem:[#allocation52_spill] sm:$0xff] %v17929_v36  ;;  %v15446_v14 = vld [vmem:[#allocation10 + $0x3a8] ss:$92 sps:$4 sm:$0xff]   ;;  %v17933_v52 = vpop.f32.mrb[30].mxu1 }
 0x640   :  { %8988 = vmatprep.subr.bf16.mxu0 %v15442_v37  ;;  %19407 = vst [vmem:[#allocation54_spill] sm:$0xff] %v17933_v52  ;;  %v15451_v31 = vld [vmem:[#allocation10 + $0xfdc] ss:$92 sps:$4 sm:$0xff]   ;;  %v15454_v37 = vld [vmem:[#allocation10 + $0x464] ss:$92 sps:$4 sm:$0xff]   ;;  %v17935_v46 = vpop.f32.mrb[31].mxu1 }
 0x641   :  { %19408 = vst [vmem:[#allocation55_spill] sm:$0xff] %v17935_v46  ;;  %v17937_v63 = vpop.f32.mrb[32].mxu1  ;;  %v15460_v36 = vld [vmem:[#allocation10 + $0x51c] ss:$92 sps:$4 sm:$0xff]   ;;  %v15466_v46 = vld [vmem:[#allocation10 + $0x5d4] ss:$92 sps:$4 sm:$0xff]  }
 0x642   :  { %v17931_v41 = vpop.f32.mrb[50].mxu0  ;;  %8887 = vmatpush1.bf16.msra.mxu1 %v15437_v1  ;;  %19409 = vst [vmem:[#allocation56_spill] sm:$0xff] %v17937_v63  ;;  %v17939_v11 = vpop.f32.mrb[33].mxu1  ;;  %v15452_v1 = vld [vmem:[#allocation10 + $0x460] ss:$92 sps:$4 sm:$0xff]  }
 0x643   :  { %19406 = vst [vmem:[#allocation53_spill] sm:$0xff] %v17931_v41  ;;  %8989 = vmatpush1.bf16.msra.mxu0 %v15440_v30  ;;  %v14928_v18 = vpop.f32.mrb[51].mxu0  ;;  %8888 = vmatprep.subr.bf16.mxu1 %v15445_v0  ;;  %19410 = vst [vmem:[#allocation57_spill] sm:$0xff] %v17939_v11  ;;  %v15449_v41 = vld [vmem:[#allocation10 + $0xfd8] ss:$92 sps:$4 sm:$0xff]  }
 0x644   :  { %8990 = vmatprep.subr.bf16.mxu0 %v15448_v62  ;;  %v15457_v30 = vld [vmem:[#allocation10 + $0x1094] ss:$92 sps:$4 sm:$0xff]   ;;  %v15463_v62 = vld [vmem:[#allocation10 + $0x114c] ss:$92 sps:$4 sm:$0xff]  }
 0x645   :  { %v15455_v18 = vld [vmem:[#allocation10 + $0x1090] ss:$92 sps:$4 sm:$0xff]   ;;  %v15458_v0 = vld [vmem:[#allocation10 + $0x518] ss:$92 sps:$4 sm:$0xff]   ;;  %v15461_v63 = vld [vmem:[#allocation10 + $0x1148] ss:$92 sps:$4 sm:$0xff]  }
 0x646   :  { %8889 = vmatpush1.bf16.msra.mxu1 %v15443_v4  ;;  %v15464_v11 = vld [vmem:[#allocation10 + $0x5d0] ss:$92 sps:$4 sm:$0xff]   ;;  %v15469_v4 = vld [vmem:[#allocation10 + $0x1204] ss:$92 sps:$4 sm:$0xff]  }
 0x647   :  { %8991 = vmatpush1.bf16.msra.mxu0 %v15446_v14  ;;  %8890 = vmatprep.subr.bf16.mxu1 %v15451_v31  ;;  %v15472_v14 = vld [vmem:[#allocation10 + $0x68c] ss:$92 sps:$4 sm:$0xff]   ;;  %v15467_v31 = vld [vmem:[#allocation10 + $0x1200] ss:$92 sps:$4 sm:$0xff]  }
 0x648   :  { %8992 = vmatprep.subr.bf16.mxu0 %v15454_v37  ;;  %v15470_v37 = vld [vmem:[#allocation10 + $0x688] ss:$92 sps:$4 sm:$0xff]  }
 0x649   :  { %v15646_v52 = vld [vmem:[#allocation10 + $0x46c] ss:$92 sps:$4 sm:$0xff]  }
 0x64a   :  { %8891 = vmatpush1.bf16.msra.mxu1 %v15449_v41  ;;  %v15475_v41 = vld [vmem:[#allocation10 + $0x12bc] ss:$92 sps:$4 sm:$0xff]  }
 0x64b   :  { %8993 = vmatpush1.bf16.msra.mxu0 %v15452_v1  ;;  %8892 = vmatprep.subr.bf16.mxu1 %v15457_v30  ;;  %v15478_v1 = vld [vmem:[#allocation10 + $0x744] ss:$92 sps:$4 sm:$0xff]  }
 0x64c   :  { %8994 = vmatprep.subr.bf16.mxu0 %v15460_v36  ;;  %v15473_v36 = vld [vmem:[#allocation10 + $0x12b8] ss:$92 sps:$4 sm:$0xff]   ;;  %v15476_v30 = vld [vmem:[#allocation10 + $0x740] ss:$92 sps:$4 sm:$0xff]  }
 0x64e   :  { %8893 = vmatpush1.bf16.msra.mxu1 %v15455_v18  ;;  %v15481_v18 = vld [vmem:[#allocation10 + $0x1374] ss:$92 sps:$4 sm:$0xff]  }
 0x64f   :  { %8995 = vmatpush1.bf16.msra.mxu0 %v15458_v0  ;;  %8894 = vmatprep.subr.bf16.mxu1 %v15463_v62  ;;  %v15484_v0 = vld [vmem:[#allocation10 + $0x7fc] ss:$92 sps:$4 sm:$0xff]  }
 0x650   :  { %8996 = vmatprep.subr.bf16.mxu0 %v15466_v46  ;;  %v15479_v46 = vld [vmem:[#allocation10 + $0x1370] ss:$92 sps:$4 sm:$0xff]   ;;  %v15482_v62 = vld [vmem:[#allocation10 + $0x7f8] ss:$92 sps:$4 sm:$0xff]  }
 0x652   :  { %8895 = vmatpush1.bf16.msra.mxu1 %v15461_v63  ;;  %v15487_v63 = vld [vmem:[#allocation10 + $0x142c] ss:$92 sps:$4 sm:$0xff]  }
 0x653   :  { %8997 = vmatpush1.bf16.msra.mxu0 %v15464_v11  ;;  %8896 = vmatprep.subr.bf16.mxu1 %v15469_v4  ;;  %v15490_v11 = vld [vmem:[#allocation10 + $0x8b4] ss:$92 sps:$4 sm:$0xff]   ;;  %v15485_v4 = vld [vmem:[#allocation10 + $0x1428] ss:$92 sps:$4 sm:$0xff]  }
 0x654   :  { %8998 = vmatprep.subr.bf16.mxu0 %v15472_v14  ;;  %v15488_v14 = vld [vmem:[#allocation10 + $0x8b0] ss:$92 sps:$4 sm:$0xff]  }
 0x656   :  { %8897 = vmatpush1.bf16.msra.mxu1 %v15467_v31  ;;  %v15493_v31 = vld [vmem:[#allocation10 + $0x14e4] ss:$92 sps:$4 sm:$0xff]  }
 0x657   :  { %8999 = vmatpush1.bf16.msra.mxu0 %v15470_v37  ;;  %8898 = vmatprep.subr.bf16.mxu1 %v15475_v41  ;;  %v15496_v37 = vld [vmem:[#allocation10 + $0x96c] ss:$92 sps:$4 sm:$0xff]   ;;  %v15491_v41 = vld [vmem:[#allocation10 + $0x14e0] ss:$92 sps:$4 sm:$0xff]  }
 0x658   :  { %9000 = vmatprep.subr.bf16.mxu0 %v15478_v1  ;;  %v15494_v1 = vld [vmem:[#allocation10 + $0x968] ss:$92 sps:$4 sm:$0xff]  }
 0x65a   :  { %8899 = vmatpush1.bf16.msra.mxu1 %v15473_v36  ;;  %v15499_v36 = vld [vmem:[#allocation10 + $0x159c] ss:$92 sps:$4 sm:$0xff]  }
 0x65b   :  { %9001 = vmatpush1.bf16.msra.mxu0 %v15476_v30  ;;  %8900 = vmatprep.subr.bf16.mxu1 %v15481_v18  ;;  %v15502_v30 = vld [vmem:[#allocation10 + $0xa24] ss:$92 sps:$4 sm:$0xff]   ;;  %v15497_v18 = vld [vmem:[#allocation10 + $0x1598] ss:$92 sps:$4 sm:$0xff]  }
 0x65c   :  { %9002 = vmatprep.subr.bf16.mxu0 %v15484_v0  ;;  %v15500_v0 = vld [vmem:[#allocation10 + $0xa20] ss:$92 sps:$4 sm:$0xff]  }
 0x65e   :  { %8901 = vmatpush1.bf16.msra.mxu1 %v15479_v46  ;;  %v15505_v46 = vld [vmem:[#allocation10 + $0x1654] ss:$92 sps:$4 sm:$0xff]  }
 0x65f   :  { %9003 = vmatpush1.bf16.msra.mxu0 %v15482_v62  ;;  %8902 = vmatprep.subr.bf16.mxu1 %v15487_v63  ;;  %v15508_v62 = vld [vmem:[#allocation10 + $0xadc] ss:$92 sps:$4 sm:$0xff]   ;;  %v15503_v63 = vld [vmem:[#allocation10 + $0x1650] ss:$92 sps:$4 sm:$0xff]  }
 0x660   :  { %9004 = vmatprep.subr.bf16.mxu0 %v15490_v11  ;;  %v15506_v11 = vld [vmem:[#allocation10 + $0xad8] ss:$92 sps:$4 sm:$0xff]  }
 0x662   :  { %8903 = vmatpush1.bf16.msra.mxu1 %v15485_v4  ;;  %v15511_v4 = vld [vmem:[#allocation10 + $0x170c] ss:$92 sps:$4 sm:$0xff]  }
 0x663   :  { %9005 = vmatpush1.bf16.msra.mxu0 %v15488_v14  ;;  %8904 = vmatprep.subr.bf16.mxu1 %v15493_v31  ;;  %v15514_v14 = vld [vmem:[#allocation10 + $0xb94] ss:$92 sps:$4 sm:$0xff]   ;;  %v15509_v31 = vld [vmem:[#allocation10 + $0x1708] ss:$92 sps:$4 sm:$0xff]  }
 0x664   :  { %9006 = vmatprep.subr.bf16.mxu0 %v15496_v37  ;;  %v15512_v37 = vld [vmem:[#allocation10 + $0xb90] ss:$92 sps:$4 sm:$0xff]  }
 0x666   :  { %8905 = vmatpush1.bf16.msra.mxu1 %v15491_v41  ;;  %v15517_v41 = vld [vmem:[#allocation10 + $0x17c4] ss:$92 sps:$4 sm:$0xff]  }
 0x667   :  { %9007 = vmatpush1.bf16.msra.mxu0 %v15494_v1  ;;  %8906 = vmatprep.subr.bf16.mxu1 %v15499_v36  ;;  %v15520_v1 = vld [vmem:[#allocation10 + $0xc4c] ss:$92 sps:$4 sm:$0xff]   ;;  %v15515_v36 = vld [vmem:[#allocation10 + $0x17c0] ss:$92 sps:$4 sm:$0xff]  }
 0x668   :  { %9008 = vmatprep.subr.bf16.mxu0 %v15502_v30  ;;  %v15518_v30 = vld [vmem:[#allocation10 + $0xc48] ss:$92 sps:$4 sm:$0xff]  }
 0x66a   :  { %8907 = vmatpush1.bf16.msra.mxu1 %v15497_v18  ;;  %v15523_v18 = vld [vmem:[#allocation10 + $0x187c] ss:$92 sps:$4 sm:$0xff]  }
 0x66b   :  { %9009 = vmatpush1.bf16.msra.mxu0 %v15500_v0  ;;  %8908 = vmatprep.subr.bf16.mxu1 %v15505_v46  ;;  %v15526_v0 = vld [vmem:[#allocation10 + $0xd04] ss:$92 sps:$4 sm:$0xff]   ;;  %v15521_v46 = vld [vmem:[#allocation10 + $0x1878] ss:$92 sps:$4 sm:$0xff]  }
 0x66c   :  { %9010 = vmatprep.subr.bf16.mxu0 %v15508_v62  ;;  %v15524_v62 = vld [vmem:[#allocation10 + $0xd00] ss:$92 sps:$4 sm:$0xff]  }
 0x66e   :  { %8909 = vmatpush1.bf16.msra.mxu1 %v15503_v63  ;;  %v15529_v63 = vld [vmem:[#allocation10 + $0x1934] ss:$92 sps:$4 sm:$0xff]  }
 0x66f   :  { %9011 = vmatpush1.bf16.msra.mxu0 %v15506_v11  ;;  %8929 = vmatprep.subr.bf16.mxu1 %v15511_v4  ;;  %v15532_v11 = vld [vmem:[#allocation10 + $0xdbc] ss:$92 sps:$4 sm:$0xff]   ;;  %v15527_v4 = vld [vmem:[#allocation10 + $0x1930] ss:$92 sps:$4 sm:$0xff]  }
 0x670   :  { %9031 = vmatprep.subr.bf16.mxu0 %v15514_v14  ;;  %v15530_v14 = vld [vmem:[#allocation10 + $0xdb8] ss:$92 sps:$4 sm:$0xff]  }
 0x671   :  { %8911 = vmatmul.mubr.bf16.vlgmr.msra.gmra.mrb[52].mxu1 %v17755_v26 }
 0x672   :  { %9013 = vmatmul.mubr.bf16.vlgmr.msra.gmra.mrb[60].mxu0 %v17751_v42  ;;  %8920 = vmatprep.mubr.bf16.mxu1 %v17771_v38 }
 0x673   :  { %8930 = vmatpush1.bf16.msra.mxu1 %v15509_v31  ;;  %9022 = vmatprep.mubr.bf16.mxu0 %v17774_v39  ;;  %v15535_v31 = vld [vmem:[#allocation10 + $0x19ec] ss:$92 sps:$4 sm:$0xff]  }
 0x674   :  { %9032 = vmatpush1.bf16.msra.mxu0 %v15512_v37  ;;  %8931 = vmatprep.subr.bf16.mxu1 %v15517_v41  ;;  %v15538_v37 = vld [vmem:[#allocation10 + $0xe74] ss:$92 sps:$4 sm:$0xff]   ;;  %v15533_v41 = vld [vmem:[#allocation10 + $0x19e8] ss:$92 sps:$4 sm:$0xff]  }
 0x675   :  { %9033 = vmatprep.subr.bf16.mxu0 %v15520_v1  ;;  %v15536_v1 = vld [vmem:[#allocation10 + $0xe70] ss:$92 sps:$4 sm:$0xff]  }
 0x677   :  { %8932 = vmatpush1.bf16.msra.mxu1 %v15515_v36  ;;  %v15541_v36 = vld [vmem:[#allocation10 + $0x1aa4] ss:$92 sps:$4 sm:$0xff]  }
 0x678   :  { %9034 = vmatpush1.bf16.msra.mxu0 %v15518_v30  ;;  %8933 = vmatprep.subr.bf16.mxu1 %v15523_v18  ;;  %v15544_v30 = vld [vmem:[#allocation10 + $0xf2c] ss:$92 sps:$4 sm:$0xff]   ;;  %v15539_v18 = vld [vmem:[#allocation10 + $0x1aa0] ss:$92 sps:$4 sm:$0xff]  }
 0x679   :  { %9035 = vmatprep.subr.bf16.mxu0 %v15526_v0  ;;  %8921 = vmatmul.mubr.bf16.gmra.mrb[56].mxu1 %v17787_v55  ;;  %v15542_v0 = vld [vmem:[#allocation10 + $0xf28] ss:$92 sps:$4 sm:$0xff]  }
 0x67a   :  { %9023 = vmatmul.mubr.bf16.gmra.mrb[64].mxu0 %v17782_v50  ;;  %8961 = vmatprep.mubr.bf16.mxu1 %v17761_v29 }
 0x67b   :  { %8934 = vmatpush1.bf16.msra.mxu1 %v15521_v46  ;;  %9063 = vmatprep.mubr.bf16.mxu0 %v17757_v27  ;;  %v15547_v46 = vld [vmem:[#allocation10 + $0x1b5c] ss:$92 sps:$4 sm:$0xff]  }
 0x67c   :  { %9036 = vmatpush1.bf16.msra.mxu0 %v15524_v62  ;;  %8935 = vmatprep.subr.bf16.mxu1 %v15529_v63  ;;  %v15550_v62 = vld [vmem:[#allocation10 + $0xfe4] ss:$92 sps:$4 sm:$0xff]   ;;  %v15545_v63 = vld [vmem:[#allocation10 + $0x1b58] ss:$92 sps:$4 sm:$0xff]  }
 0x67d   :  { %9037 = vmatprep.subr.bf16.mxu0 %v15532_v11  ;;  %v15548_v11 = vld [vmem:[#allocation10 + $0xfe0] ss:$92 sps:$4 sm:$0xff]  }
 0x67f   :  { %8936 = vmatpush1.bf16.msra.mxu1 %v15527_v4  ;;  %v15553_v4 = vld [vmem:[#allocation10 + $0x1c14] ss:$92 sps:$4 sm:$0xff]  }
 0x680   :  { %9038 = vmatpush1.bf16.msra.mxu0 %v15530_v14  ;;  %8937 = vmatprep.subr.bf16.mxu1 %v15535_v31  ;;  %v15556_v14 = vld [vmem:[#allocation10 + $0x109c] ss:$92 sps:$4 sm:$0xff]   ;;  %v15551_v31 = vld [vmem:[#allocation10 + $0x1c10] ss:$92 sps:$4 sm:$0xff]  }
 0x681   :  { %9039 = vmatprep.subr.bf16.mxu0 %v15538_v37  ;;  %v15554_v37 = vld [vmem:[#allocation10 + $0x1098] ss:$92 sps:$4 sm:$0xff]  }
 0x683   :  { %8938 = vmatpush1.bf16.msra.mxu1 %v15533_v41  ;;  %v15559_v41 = vld [vmem:[#allocation10 + $0x1ccc] ss:$92 sps:$4 sm:$0xff]  }
 0x684   :  { %9040 = vmatpush1.bf16.msra.mxu0 %v15536_v1  ;;  %8939 = vmatprep.subr.bf16.mxu1 %v15541_v36  ;;  %v15562_v1 = vld [vmem:[#allocation10 + $0x1154] ss:$92 sps:$4 sm:$0xff]   ;;  %v15557_v36 = vld [vmem:[#allocation10 + $0x1cc8] ss:$92 sps:$4 sm:$0xff]  }
 0x685   :  { %9041 = vmatprep.subr.bf16.mxu0 %v15544_v30  ;;  %v15560_v30 = vld [vmem:[#allocation10 + $0x1150] ss:$92 sps:$4 sm:$0xff]  }
 0x687   :  { %8940 = vmatpush1.bf16.msra.mxu1 %v15539_v18  ;;  %v15565_v18 = vld [vmem:[#allocation10 + $0x1d84] ss:$92 sps:$4 sm:$0xff]  }
 0x688   :  { %9042 = vmatpush1.bf16.msra.mxu0 %v15542_v0  ;;  %8941 = vmatprep.subr.bf16.mxu1 %v15547_v46  ;;  %v15568_v0 = vld [vmem:[#allocation10 + $0x120c] ss:$92 sps:$4 sm:$0xff]   ;;  %v15563_v46 = vld [vmem:[#allocation10 + $0x1d80] ss:$92 sps:$4 sm:$0xff]  }
 0x689   :  { %9043 = vmatprep.subr.bf16.mxu0 %v15550_v62  ;;  %v15566_v62 = vld [vmem:[#allocation10 + $0x1208] ss:$92 sps:$4 sm:$0xff]  }
 0x68b   :  { %8942 = vmatpush1.bf16.msra.mxu1 %v15545_v63  ;;  %v15571_v63 = vld [vmem:[#allocation10 + $0x1e3c] ss:$92 sps:$4 sm:$0xff]  }
 0x68c   :  { %9044 = vmatpush1.bf16.msra.mxu0 %v15548_v11  ;;  %8943 = vmatprep.subr.bf16.mxu1 %v15553_v4  ;;  %v15574_v11 = vld [vmem:[#allocation10 + $0x12c4] ss:$92 sps:$4 sm:$0xff]   ;;  %v15569_v4 = vld [vmem:[#allocation10 + $0x1e38] ss:$92 sps:$4 sm:$0xff]  }
 0x68d   :  { %9045 = vmatprep.subr.bf16.mxu0 %v15556_v14  ;;  %v15572_v14 = vld [vmem:[#allocation10 + $0x12c0] ss:$92 sps:$4 sm:$0xff]  }
 0x68f   :  { %8944 = vmatpush1.bf16.msra.mxu1 %v15551_v31  ;;  %v15577_v31 = vld [vmem:[#allocation10 + $0x1ef4] ss:$92 sps:$4 sm:$0xff]  }
 0x690   :  { %9046 = vmatpush1.bf16.msra.mxu0 %v15554_v37  ;;  %8945 = vmatprep.subr.bf16.mxu1 %v15559_v41  ;;  %v15580_v37 = vld [vmem:[#allocation10 + $0x137c] ss:$92 sps:$4 sm:$0xff]   ;;  %v15575_v41 = vld [vmem:[#allocation10 + $0x1ef0] ss:$92 sps:$4 sm:$0xff]  }
 0x691   :  { %9047 = vmatprep.subr.bf16.mxu0 %v15562_v1  ;;  %v15578_v1 = vld [vmem:[#allocation10 + $0x1378] ss:$92 sps:$4 sm:$0xff]  }
 0x693   :  { %8946 = vmatpush1.bf16.msra.mxu1 %v15557_v36  ;;  %v15583_v36 = vld [vmem:[#allocation10 + $0x1fac] ss:$92 sps:$4 sm:$0xff]  }
 0x694   :  { %9048 = vmatpush1.bf16.msra.mxu0 %v15560_v30  ;;  %8947 = vmatprep.subr.bf16.mxu1 %v15565_v18  ;;  %v15586_v30 = vld [vmem:[#allocation10 + $0x1434] ss:$92 sps:$4 sm:$0xff]   ;;  %v15581_v18 = vld [vmem:[#allocation10 + $0x1fa8] ss:$92 sps:$4 sm:$0xff]  }
 0x695   :  { %9049 = vmatprep.subr.bf16.mxu0 %v15568_v0  ;;  %v15584_v0 = vld [vmem:[#allocation10 + $0x1430] ss:$92 sps:$4 sm:$0xff]  }
 0x697   :  { %8948 = vmatpush1.bf16.msra.mxu1 %v15563_v46  ;;  %v15589_v46 = vld [vmem:[#allocation10 + $0x2064] ss:$92 sps:$4 sm:$0xff]  }
 0x698   :  { %9050 = vmatpush1.bf16.msra.mxu0 %v15566_v62  ;;  %8949 = vmatprep.subr.bf16.mxu1 %v15571_v63  ;;  %v15592_v62 = vld [vmem:[#allocation10 + $0x14ec] ss:$92 sps:$4 sm:$0xff]   ;;  %v15587_v63 = vld [vmem:[#allocation10 + $0x2060] ss:$92 sps:$4 sm:$0xff]  }
 0x699   :  { %9051 = vmatprep.subr.bf16.mxu0 %v15574_v11  ;;  %v15590_v11 = vld [vmem:[#allocation10 + $0x14e8] ss:$92 sps:$4 sm:$0xff]  }
 0x69b   :  { %8950 = vmatpush1.bf16.msra.mxu1 %v15569_v4  ;;  %v15595_v4 = vld [vmem:[#allocation10 + $0x211c] ss:$92 sps:$4 sm:$0xff]  }
 0x69c   :  { %9052 = vmatpush1.bf16.msra.mxu0 %v15572_v14  ;;  %8951 = vmatprep.subr.bf16.mxu1 %v15577_v31  ;;  %v15598_v14 = vld [vmem:[#allocation10 + $0x15a4] ss:$92 sps:$4 sm:$0xff]   ;;  %v15593_v31 = vld [vmem:[#allocation10 + $0x2118] ss:$92 sps:$4 sm:$0xff]  }
 0x69d   :  { %9053 = vmatprep.subr.bf16.mxu0 %v15580_v37  ;;  %v15596_v37 = vld [vmem:[#allocation10 + $0x15a0] ss:$92 sps:$4 sm:$0xff]  }
 0x69f   :  { %8952 = vmatpush1.bf16.msra.mxu1 %v15575_v41  ;;  %v15601_v41 = vld [vmem:[#allocation10 + $0x21d4] ss:$92 sps:$4 sm:$0xff]  }
 0x6a0   :  { %9054 = vmatpush1.bf16.msra.mxu0 %v15578_v1  ;;  %8953 = vmatprep.subr.bf16.mxu1 %v15583_v36  ;;  %v15604_v1 = vld [vmem:[#allocation10 + $0x165c] ss:$92 sps:$4 sm:$0xff]   ;;  %v15599_v36 = vld [vmem:[#allocation10 + $0x21d0] ss:$92 sps:$4 sm:$0xff]  }
 0x6a1   :  { %9055 = vmatprep.subr.bf16.mxu0 %v15586_v30  ;;  %v15602_v30 = vld [vmem:[#allocation10 + $0x1658] ss:$92 sps:$4 sm:$0xff]  }
 0x6a3   :  { %8954 = vmatpush1.bf16.msra.mxu1 %v15581_v18  ;;  %v15610_v18 = vld [vmem:[#allocation10 + $0x1c] ss:$92 sps:$4 sm:$0xff]  }
 0x6a4   :  { %9056 = vmatpush1.bf16.msra.mxu0 %v15584_v0  ;;  %8955 = vmatprep.subr.bf16.mxu1 %v15589_v46  ;;  %v15607_v0 = vld [vmem:[#allocation10 + $0x1714] ss:$92 sps:$4 sm:$0xff]  }
 0x6a5   :  { %9057 = vmatprep.subr.bf16.mxu0 %v15592_v62  ;;  %v15605_v46 = vld [vmem:[#allocation10 + $0x1710] ss:$92 sps:$4 sm:$0xff]   ;;  %v15608_v62 = vld [vmem:[#allocation10 + $0x18] ss:$92 sps:$4 sm:$0xff]  }
 0x6a7   :  { %8956 = vmatpush1.bf16.msra.mxu1 %v15587_v63  ;;  %v15613_v63 = vld [vmem:[#allocation10 + $0x17cc] ss:$92 sps:$4 sm:$0xff]  }
 0x6a8   :  { %9058 = vmatpush1.bf16.msra.mxu0 %v15590_v11  ;;  %8957 = vmatprep.subr.bf16.mxu1 %v15595_v4  ;;  %v15616_v11 = vld [vmem:[#allocation10 + $0xd4] ss:$92 sps:$4 sm:$0xff]   ;;  %v15611_v4 = vld [vmem:[#allocation10 + $0x17c8] ss:$92 sps:$4 sm:$0xff]  }
 0x6a9   :  { %9059 = vmatprep.subr.bf16.mxu0 %v15598_v14  ;;  %v15614_v14 = vld [vmem:[#allocation10 + $0xd0] ss:$92 sps:$4 sm:$0xff]  }
 0x6ab   :  { %8958 = vmatpush1.bf16.msra.mxu1 %v15593_v31  ;;  %v15619_v31 = vld [vmem:[#allocation10 + $0x1884] ss:$92 sps:$4 sm:$0xff]  }
 0x6ac   :  { %9060 = vmatpush1.bf16.msra.mxu0 %v15596_v37  ;;  %8959 = vmatprep.subr.bf16.mxu1 %v15601_v41  ;;  %v15622_v37 = vld [vmem:[#allocation10 + $0x18c] ss:$92 sps:$4 sm:$0xff]   ;;  %v15617_v41 = vld [vmem:[#allocation10 + $0x1880] ss:$92 sps:$4 sm:$0xff]  }
 0x6ad   :  { %9061 = vmatprep.subr.bf16.mxu0 %v15604_v1  ;;  %v15620_v1 = vld [vmem:[#allocation10 + $0x188] ss:$92 sps:$4 sm:$0xff]  }
 0x6af   :  { %8960 = vmatpush1.bf16.msra.mxu1 %v15599_v36  ;;  %v15625_v36 = vld [vmem:[#allocation10 + $0x193c] ss:$92 sps:$4 sm:$0xff]  }
 0x6b0   :  { %9062 = vmatpush1.bf16.msra.mxu0 %v15602_v30  ;;  %9133 = vmatprep.subr.bf16.mxu1 %v15610_v18  ;;  %v15628_v30 = vld [vmem:[#allocation10 + $0x244] ss:$92 sps:$4 sm:$0xff]   ;;  %v15623_v18 = vld [vmem:[#allocation10 + $0x1938] ss:$92 sps:$4 sm:$0xff]  }
 0x6b1   :  { %9082 = vmatprep.subr.bf16.mxu0 %v15607_v0  ;;  %v15626_v0 = vld [vmem:[#allocation10 + $0x240] ss:$92 sps:$4 sm:$0xff]  }
 0x6b2   :  { %8962 = vmatmul.mubr.bf16.vlgmr.msra.gmra.mrb[52].mxu1 %v17759_v28 }
 0x6b3   :  { %9064 = vmatmul.mubr.bf16.vlgmr.msra.gmra.mrb[68].mxu0 %v17755_v26  ;;  %8971 = vmatprep.mubr.bf16.mxu1 %v17869_v48 }
 0x6b4   :  { %9073 = vmatprep.mubr.bf16.mxu0 %v17771_v38  ;;  %9083 = vmatpush1.bf16.msra.mxu0 %v15605_v46  ;;  %v15631_v46 = vld [vmem:[#allocation10 + $0x19f4] ss:$92 sps:$4 sm:$0xff]  }
 0x6b5   :  { %9134 = vmatpush1.bf16.msra.mxu1 %v15608_v62  ;;  %9084 = vmatprep.subr.bf16.mxu0 %v15613_v63  ;;  %v15634_v62 = vld [vmem:[#allocation10 + $0x2fc] ss:$92 sps:$4 sm:$0xff]   ;;  %v15629_v63 = vld [vmem:[#allocation10 + $0x19f0] ss:$92 sps:$4 sm:$0xff]  }
 0x6b6   :  { %9135 = vmatprep.subr.bf16.mxu1 %v15616_v11  ;;  %v15632_v11 = vld [vmem:[#allocation10 + $0x2f8] ss:$92 sps:$4 sm:$0xff]  }
 0x6b8   :  { %9085 = vmatpush1.bf16.msra.mxu0 %v15611_v4  ;;  %v15637_v4 = vld [vmem:[#allocation10 + $0x1aac] ss:$92 sps:$4 sm:$0xff]  }
 0x6b9   :  { %9136 = vmatpush1.bf16.msra.mxu1 %v15614_v14  ;;  %9086 = vmatprep.subr.bf16.mxu0 %v15619_v31  ;;  %v15640_v14 = vld [vmem:[#allocation10 + $0x3b4] ss:$92 sps:$4 sm:$0xff]  }
 0x6ba   :  { %8972 = vmatmul.mubr.bf16.gmra.mrb[56].mxu1 %v17895_v34  ;;  %9137 = vmatprep.subr.bf16.mxu1 %v15622_v37 }
 0x6bb   :  { %9074 = vmatmul.mubr.bf16.gmra.mrb[72].mxu0 %v17787_v55  ;;  %9165 = vmatprep.mubr.bf16.mxu1 %v17753_v25 }
 0x6bc   :  { %9087 = vmatpush1.bf16.msra.mxu0 %v15617_v41  ;;  %9114 = vmatprep.mubr.bf16.mxu0 %v17761_v29  ;;  %v15635_v41 = vld [vmem:[#allocation10 + $0x1aa8] ss:$92 sps:$4 sm:$0xff]  }
 0x6bd   :  { %9138 = vmatpush1.bf16.msra.mxu1 %v15620_v1  ;;  %9088 = vmatprep.subr.bf16.mxu0 %v15625_v36  ;;  %v15638_v36 = vld [vmem:[#allocation10 + $0x3b0] ss:$92 sps:$4 sm:$0xff]  }
 0x6be   :  { %9139 = vmatprep.subr.bf16.mxu1 %v15628_v30 }
 0x6c0   :  { %9089 = vmatpush1.bf16.msra.mxu0 %v15623_v18 }
 0x6c1   :  { %9140 = vmatpush1.bf16.msra.mxu1 %v15626_v0  ;;  %9090 = vmatprep.subr.bf16.mxu0 %v15631_v46  ;;  %v15643_v0 = vld [vmem:[#allocation10 + $0x1b64] ss:$92 sps:$4 sm:$0xff]  }
 0x6c2   :  { %9141 = vmatprep.subr.bf16.mxu1 %v15634_v62 }
 0x6c3   :  { %v8708_v31 = vpop.f32.mrb[36].mxu1 }
 0x6c4   :  { %9091 = vmatpush1.bf16.msra.mxu0 %v15629_v63  ;;  %v17958_v37 = vadd.f32 %v8708_v31, %v17776_v43  ;;  %v8710_v1 = vpop.f32.mrb[37].mxu1  ;;  %v15641_v43 = vld [vmem:[#allocation10 + $0x1b60] ss:$92 sps:$4 sm:$0xff]  }
 0x6c5   :  { %9142 = vmatpush1.bf16.msra.mxu1 %v15632_v11  ;;  %9092 = vmatprep.subr.bf16.mxu0 %v15637_v4  ;;  %v17961_v30 = vadd.f32 %v8710_v1, %v17780_v49  ;;  %v8712_v18 = vpop.f32.mrb[38].mxu1  ;;  %v15644_v11 = vld [vmem:[#allocation10 + $0x468] ss:$92 sps:$4 sm:$0xff]   ;;  %v15649_v4 = vld [vmem:[#allocation10 + $0x1c1c] ss:$92 sps:$4 sm:$0xff]  }
 0x6c6   :  { %9143 = vmatprep.subr.bf16.mxu1 %v15640_v14  ;;  %v17964_v46 = vadd.f32 %v8712_v18, %v17785_v54  ;;  %v8714_v62 = vpop.f32.mrb[39].mxu1  ;;  %v15652_v49 = vld [vmem:[#allocation10 + $0x524] ss:$92 sps:$4 sm:$0xff]   ;;  %v15647_v54 = vld [vmem:[#allocation10 + $0x1c18] ss:$92 sps:$4 sm:$0xff]  }
 0x6c7   :  { %v17967_v63 = vadd.f32 %v8714_v62, %v17789_v57  ;;  %v15650_v18 = vld [vmem:[#allocation10 + $0x520] ss:$92 sps:$4 sm:$0xff]  }
 0x6c8   :  { %9093 = vmatpush1.bf16.msra.mxu0 %v15635_v41  ;;  %v15655_v41 = vld [vmem:[#allocation10 + $0x1cd4] ss:$92 sps:$4 sm:$0xff]  }
 0x6c9   :  { %9144 = vmatpush1.bf16.msra.mxu1 %v15638_v36  ;;  %9094 = vmatprep.subr.bf16.mxu0 %v15643_v0  ;;  %v15658_v0 = vld [vmem:[#allocation10 + $0x5dc] ss:$92 sps:$4 sm:$0xff]  }
 0x6ca   :  { %9145 = vmatprep.subr.bf16.mxu1 %v15646_v52  ;;  %v15653_v52 = vld [vmem:[#allocation10 + $0x1cd0] ss:$92 sps:$4 sm:$0xff]  }
 0x6cb   :  { %v8718_v31 = vpop.f32.mrb[40].mxu1 }
 0x6cc   :  { %9095 = vmatpush1.bf16.msra.mxu0 %v15641_v43  ;;  %v17970_v14 = vadd.f32 %v8718_v31, %v17794_v61  ;;  %v8720_v1 = vpop.f32.mrb[41].mxu1  ;;  %v15656_v43 = vld [vmem:[#allocation10 + $0x5d8] ss:$92 sps:$4 sm:$0xff]   ;;  %v15661_v61 = vld [vmem:[#allocation10 + $0x1d8c] ss:$92 sps:$4 sm:$0xff]  }
 0x6cd   :  { %9146 = vmatpush1.bf16.msra.mxu1 %v15644_v11  ;;  %9096 = vmatprep.subr.bf16.mxu0 %v15649_v4  ;;  %v17973_v57 = vadd.f32 %v8720_v1, %v17797_v3  ;;  %v8722_v36 = vpop.f32.mrb[42].mxu1  ;;  %v15664_v31 = vld [vmem:[#allocation10 + $0x694] ss:$92 sps:$4 sm:$0xff]   ;;  %v15659_v11 = vld [vmem:[#allocation10 + $0x1d88] ss:$92 sps:$4 sm:$0xff]  }
 0x6ce   :  { %9147 = vmatprep.subr.bf16.mxu1 %v15652_v49  ;;  %v8723_v62 = vpop.f32.mrb[43].mxu1  ;;  %v15662_v4 = vld [vmem:[#allocation10 + $0x690] ss:$92 sps:$4 sm:$0xff]   ;;  %v15667_v3 = vld [vmem:[#allocation10 + $0x1e44] ss:$92 sps:$4 sm:$0xff]  }
 0x6cf   :  { %v15670_v1 = vld [vmem:[#allocation10 + $0x74c] ss:$92 sps:$4 sm:$0xff]   ;;  %v15665_v49 = vld [vmem:[#allocation10 + $0x1e40] ss:$92 sps:$4 sm:$0xff]   ;;  %v15679_v62 = vld [vmem:[#allocation10 + $0x1fb4] ss:$92 sps:$4 sm:$0xff]  }
 0x6d0   :  { %9097 = vmatpush1.bf16.msra.mxu0 %v15647_v54  ;;  %v15668_v54 = vld [vmem:[#allocation10 + $0x748] ss:$92 sps:$4 sm:$0xff]   ;;  %v15673_v36 = vld [vmem:[#allocation10 + $0x1efc] ss:$92 sps:$4 sm:$0xff]  }
 0x6d1   :  { %9148 = vmatpush1.bf16.msra.mxu1 %v15650_v18  ;;  %9098 = vmatprep.subr.bf16.mxu0 %v15655_v41  ;;  %v15676_v18 = vld [vmem:[#allocation10 + $0x804] ss:$92 sps:$4 sm:$0xff]   ;;  %v15671_v41 = vld [vmem:[#allocation10 + $0x1ef8] ss:$92 sps:$4 sm:$0xff]  }
 0x6d2   :  { %9149 = vmatprep.subr.bf16.mxu1 %v15658_v0  ;;  %v15674_v0 = vld [vmem:[#allocation10 + $0x800] ss:$92 sps:$4 sm:$0xff]  }
 0x6d4   :  { %9099 = vmatpush1.bf16.msra.mxu0 %v15653_v52  ;;  %v15682_v52 = vld [vmem:[#allocation10 + $0x8bc] ss:$92 sps:$4 sm:$0xff]  }
 0x6d5   :  { %9150 = vmatpush1.bf16.msra.mxu1 %v15656_v43  ;;  %9100 = vmatprep.subr.bf16.mxu0 %v15661_v61  ;;  %v15677_v43 = vld [vmem:[#allocation10 + $0x1fb0] ss:$92 sps:$4 sm:$0xff]   ;;  %v15680_v61 = vld [vmem:[#allocation10 + $0x8b8] ss:$92 sps:$4 sm:$0xff]  }
 0x6d6   :  { %9151 = vmatprep.subr.bf16.mxu1 %v15664_v31  ;;  %v15685_v31 = vld [vmem:[#allocation10 + $0x206c] ss:$92 sps:$4 sm:$0xff]  }
 0x6d8   :  { %9101 = vmatpush1.bf16.msra.mxu0 %v15659_v11  ;;  %v15688_v11 = vld [vmem:[#allocation10 + $0x974] ss:$92 sps:$4 sm:$0xff]  }
 0x6d9   :  { %9152 = vmatpush1.bf16.msra.mxu1 %v15662_v4  ;;  %9102 = vmatprep.subr.bf16.mxu0 %v15667_v3  ;;  %v15683_v4 = vld [vmem:[#allocation10 + $0x2068] ss:$92 sps:$4 sm:$0xff]   ;;  %v15686_v3 = vld [vmem:[#allocation10 + $0x970] ss:$92 sps:$4 sm:$0xff]  }
 0x6da   :  { %9153 = vmatprep.subr.bf16.mxu1 %v15670_v1  ;;  %v15691_v1 = vld [vmem:[#allocation10 + $0x2124] ss:$92 sps:$4 sm:$0xff]  }
 0x6dc   :  { %9103 = vmatpush1.bf16.msra.mxu0 %v15665_v49  ;;  %v15694_v49 = vld [vmem:[#allocation10 + $0xa2c] ss:$92 sps:$4 sm:$0xff]  }
 0x6dd   :  { %9154 = vmatpush1.bf16.msra.mxu1 %v15668_v54  ;;  %9104 = vmatprep.subr.bf16.mxu0 %v15673_v36  ;;  %v15689_v54 = vld [vmem:[#allocation10 + $0x2120] ss:$92 sps:$4 sm:$0xff]   ;;  %v15692_v36 = vld [vmem:[#allocation10 + $0xa28] ss:$92 sps:$4 sm:$0xff]  }
 0x6de   :  { %9155 = vmatprep.subr.bf16.mxu1 %v15676_v18  ;;  %v15697_v18 = vld [vmem:[#allocation10 + $0x21dc] ss:$92 sps:$4 sm:$0xff]  }
 0x6e0   :  { %9105 = vmatpush1.bf16.msra.mxu0 %v15671_v41  ;;  %v15700_v41 = vld [vmem:[#allocation10 + $0xae4] ss:$92 sps:$4 sm:$0xff]  }
 0x6e1   :  { %9156 = vmatpush1.bf16.msra.mxu1 %v15674_v0  ;;  %9106 = vmatprep.subr.bf16.mxu0 %v15679_v62  ;;  %v15695_v0 = vld [vmem:[#allocation10 + $0x21d8] ss:$92 sps:$4 sm:$0xff]   ;;  %v15698_v62 = vld [vmem:[#allocation10 + $0xae0] ss:$92 sps:$4 sm:$0xff]  }
 0x6e2   :  { %9157 = vmatprep.subr.bf16.mxu1 %v15682_v52  ;;  %v15706_v52 = vld [vmem:[#allocation10 + $0x24] ss:$92 sps:$4 sm:$0xff]  }
 0x6e4   :  { %9107 = vmatpush1.bf16.msra.mxu0 %v15677_v43  ;;  %v15703_v43 = vld [vmem:[#allocation10 + $0xb9c] ss:$92 sps:$4 sm:$0xff]  }
 0x6e5   :  { %9158 = vmatpush1.bf16.msra.mxu1 %v15680_v61  ;;  %9108 = vmatprep.subr.bf16.mxu0 %v15685_v31  ;;  %v15701_v61 = vld [vmem:[#allocation10 + $0xb98] ss:$92 sps:$4 sm:$0xff]   ;;  %v15704_v31 = vld [vmem:[#allocation10 + $0x20] ss:$92 sps:$4 sm:$0xff]  }
 0x6e6   :  { %9159 = vmatprep.subr.bf16.mxu1 %v15688_v11  ;;  %v15709_v11 = vld [vmem:[#allocation10 + $0xc54] ss:$92 sps:$4 sm:$0xff]  }
 0x6e8   :  { %9109 = vmatpush1.bf16.msra.mxu0 %v15683_v4  ;;  %v15712_v4 = vld [vmem:[#allocation10 + $0xdc] ss:$92 sps:$4 sm:$0xff]  }
 0x6e9   :  { %9160 = vmatpush1.bf16.msra.mxu1 %v15686_v3  ;;  %9110 = vmatprep.subr.bf16.mxu0 %v15691_v1  ;;  %v15707_v3 = vld [vmem:[#allocation10 + $0xc50] ss:$92 sps:$4 sm:$0xff]   ;;  %v15710_v1 = vld [vmem:[#allocation10 + $0xd8] ss:$92 sps:$4 sm:$0xff]  }
 0x6ea   :  { %9161 = vmatprep.subr.bf16.mxu1 %v15694_v49  ;;  %v15715_v49 = vld [vmem:[#allocation10 + $0xd0c] ss:$92 sps:$4 sm:$0xff]  }
 0x6ec   :  { %9111 = vmatpush1.bf16.msra.mxu0 %v15689_v54  ;;  %v15718_v54 = vld [vmem:[#allocation10 + $0x194] ss:$92 sps:$4 sm:$0xff]  }
 0x6ed   :  { %9162 = vmatpush1.bf16.msra.mxu1 %v15692_v36  ;;  %9112 = vmatprep.subr.bf16.mxu0 %v15697_v18  ;;  %v15713_v36 = vld [vmem:[#allocation10 + $0xd08] ss:$92 sps:$4 sm:$0xff]   ;;  %v15716_v18 = vld [vmem:[#allocation10 + $0x190] ss:$92 sps:$4 sm:$0xff]  }
 0x6ee   :  { %9163 = vmatprep.subr.bf16.mxu1 %v15700_v41  ;;  %v15721_v41 = vld [vmem:[#allocation10 + $0xdc4] ss:$92 sps:$4 sm:$0xff]  }
 0x6f0   :  { %9113 = vmatpush1.bf16.msra.mxu0 %v15695_v0  ;;  %v15724_v0 = vld [vmem:[#allocation10 + $0x24c] ss:$92 sps:$4 sm:$0xff]  }
 0x6f1   :  { %9164 = vmatpush1.bf16.msra.mxu1 %v15698_v62  ;;  %9286 = vmatprep.subr.bf16.mxu0 %v15706_v52  ;;  %v15719_v62 = vld [vmem:[#allocation10 + $0xdc0] ss:$92 sps:$4 sm:$0xff]   ;;  %v15722_v52 = vld [vmem:[#allocation10 + $0x248] ss:$92 sps:$4 sm:$0xff]  }
 0x6f2   :  { %9184 = vmatprep.subr.bf16.mxu1 %v15703_v43  ;;  %v15727_v43 = vld [vmem:[#allocation10 + $0xe7c] ss:$92 sps:$4 sm:$0xff]  }
 0x6f3   :  { %9115 = vmatmul.mubr.bf16.vlgmr.msra.gmra.mrb[68].mxu0 %v17759_v28 }
 0x6f4   :  { %9166 = vmatmul.mubr.bf16.vlgmr.msra.gmra.mrb[60].mxu1 %v17751_v42  ;;  %9124 = vmatprep.mubr.bf16.mxu0 %v17869_v48 }
 0x6f5   :  { %9175 = vmatprep.mubr.bf16.mxu1 %v17774_v39  ;;  %9185 = vmatpush1.bf16.msra.mxu1 %v15701_v61  ;;  %v15730_v61 = vld [vmem:[#allocation10 + $0x304] ss:$92 sps:$4 sm:$0xff]  }
 0x6f6   :  { %9287 = vmatpush1.bf16.msra.mxu0 %v15704_v31  ;;  %9186 = vmatprep.subr.bf16.mxu1 %v15709_v11  ;;  %v15725_v31 = vld [vmem:[#allocation10 + $0xe78] ss:$92 sps:$4 sm:$0xff]   ;;  %v15728_v11 = vld [vmem:[#allocation10 + $0x300] ss:$92 sps:$4 sm:$0xff]  }
 0x6f7   :  { %9288 = vmatprep.subr.bf16.mxu0 %v15712_v4  ;;  %v15733_v4 = vld [vmem:[#allocation10 + $0xf34] ss:$92 sps:$4 sm:$0xff]  }
 0x6f9   :  { %9187 = vmatpush1.bf16.msra.mxu1 %v15707_v3  ;;  %v15736_v3 = vld [vmem:[#allocation10 + $0x3bc] ss:$92 sps:$4 sm:$0xff]  }
 0x6fa   :  { %9289 = vmatpush1.bf16.msra.mxu0 %v15710_v1  ;;  %9188 = vmatprep.subr.bf16.mxu1 %v15715_v49 }
 0x6fb   :  { %9125 = vmatmul.mubr.bf16.gmra.mrb[72].mxu0 %v17895_v34  ;;  %9290 = vmatprep.subr.bf16.mxu0 %v15718_v54 }
 0x6fc   :  { %9176 = vmatmul.mubr.bf16.gmra.mrb[64].mxu1 %v17782_v50  ;;  %9318 = vmatprep.mubr.bf16.mxu0 %v17753_v25 }
 0x6fd   :  { %9189 = vmatpush1.bf16.msra.mxu1 %v15713_v36  ;;  %9216 = vmatprep.mubr.bf16.mxu1 %v17757_v27 }
 0x6fe   :  { %9291 = vmatpush1.bf16.msra.mxu0 %v15716_v18  ;;  %9190 = vmatprep.subr.bf16.mxu1 %v15721_v41 }
 0x6ff   :  { %9292 = vmatprep.subr.bf16.mxu0 %v15724_v0  ;;  %v15731_v0 = vld [vmem:[#allocation10 + $0xf30] ss:$92 sps:$4 sm:$0xff]  }
 0x701   :  { %9191 = vmatpush1.bf16.msra.mxu1 %v15719_v62 }
 0x702   :  { %9293 = vmatpush1.bf16.msra.mxu0 %v15722_v52  ;;  %9192 = vmatprep.subr.bf16.mxu1 %v15727_v43  ;;  %v15734_v43 = vld [vmem:[#allocation10 + $0x3b8] ss:$92 sps:$4 sm:$0xff]  }
 0x703   :  { %9294 = vmatprep.subr.bf16.mxu0 %v15730_v61  ;;  %v8810_v1 = vpop.f32.mrb[52].mxu0 }
 0x704   :  { %v8861_v49 = vpop.f32.mrb[44].mxu1  ;;  %v17984_v54 = vadd.f32 %v8810_v1, %v17958_v37  ;;  %v8812_v18 = vpop.f32.mrb[53].mxu0 }
 0x705   :  { %9193 = vmatpush1.bf16.msra.mxu1 %v15725_v31  ;;  %v17987_v36 = vadd.f32 %v8861_v49, %v17799_v7  ;;  %v8863_v41 = vpop.f32.mrb[45].mxu1  ;;  %v17990_v62 = vadd.f32 %v8812_v18, %v17961_v30  ;;  %v8814_v61 = vpop.f32.mrb[54].mxu0  ;;  %v15742_v49 = vld [vmem:[#allocation10 + $0x474] ss:$92 sps:$4 sm:$0xff]   ;;  %v15745_v18 = vld [vmem:[#allocation10 + $0x10a4] ss:$92 sps:$4 sm:$0xff]  }
 0x706   :  { %9295 = vmatpush1.bf16.msra.mxu0 %v15728_v11  ;;  %v17993_v52 = vadd.f32 %v8863_v41, %v17801_v10  ;;  %9194 = vmatprep.subr.bf16.mxu1 %v15733_v4  ;;  %v8865_v31 = vpop.f32.mrb[46].mxu1  ;;  %v17996_v37 = vadd.f32 %v8814_v61, %v17964_v46  ;;  %v8816_v1 = vpop.f32.mrb[55].mxu0  ;;  %v15737_v4 = vld [vmem:[#allocation10 + $0xfe8] ss:$92 sps:$4 sm:$0xff]  }
 0x707   :  { %9296 = vmatprep.subr.bf16.mxu0 %v15736_v3  ;;  %v17999_v7 = vadd.f32 %v8865_v31, %v17803_v13  ;;  %v8867_v11 = vpop.f32.mrb[47].mxu1  ;;  %v18002_v30 = vadd.f32 %v8816_v1, %v17967_v63  ;;  %v15740_v3 = vld [vmem:[#allocation10 + $0x470] ss:$92 sps:$4 sm:$0xff]   ;;  %v15743_v1 = vld [vmem:[#allocation10 + $0x10a0] ss:$92 sps:$4 sm:$0xff]  }
 0x708   :  { %v18005_v10 = vadd.f32 %v8867_v11, %v17805_v16  ;;  %v15748_v46 = vld [vmem:[#allocation10 + $0x52c] ss:$92 sps:$4 sm:$0xff]  }
 0x709   :  { %9195 = vmatpush1.bf16.msra.mxu1 %v15731_v0 }
 0x70a   :  { %9297 = vmatpush1.bf16.msra.mxu0 %v15734_v43  ;;  %9196 = vmatprep.subr.bf16.mxu1 %v15739_v51  ;;  %v15746_v43 = vld [vmem:[#allocation10 + $0x528] ss:$92 sps:$4 sm:$0xff]  }
 0x70b   :  { %9298 = vmatprep.subr.bf16.mxu0 %v15742_v49  ;;  %v8820_v41 = vpop.f32.mrb[56].mxu0 }
 0x70c   :  { %v8871_v13 = vpop.f32.mrb[48].mxu1  ;;  %v18008_v61 = vadd.f32 %v8820_v41, %v17970_v14  ;;  %v8822_v31 = vpop.f32.mrb[57].mxu0 }
 0x70d   :  { %9197 = vmatpush1.bf16.msra.mxu1 %v15737_v4  ;;  %v18011_v63 = vadd.f32 %v8871_v13, %v17807_v19  ;;  %v8873_v16 = vpop.f32.mrb[49].mxu1  ;;  %v18014_v0 = vadd.f32 %v8822_v31, %v17973_v57  ;;  %v8824_v11 = vpop.f32.mrb[58].mxu0  ;;  %v15751_v4 = vld [vmem:[#allocation10 + $0x115c] ss:$92 sps:$4 sm:$0xff]   ;;  %v15754_v19 = vld [vmem:[#allocation10 + $0x5e4] ss:$92 sps:$4 sm:$0xff]  }
 0x70e   :  { %19411 = vst [vmem:[#allocation58_spill] sm:$0xff] %v18008_v61  ;;  %9299 = vmatpush1.bf16.msra.mxu0 %v15740_v3  ;;  %v18017_v51 = vadd.f32 %v8873_v16, %v17809_v22  ;;  %9198 = vmatprep.subr.bf16.mxu1 %v15745_v18  ;;  %v8875_v49 = vpop.f32.mrb[50].mxu1  ;;  %v8825_v14 = vpop.f32.mrb[59].mxu0  ;;  %v15749_v13 = vld [vmem:[#allocation10 + $0x1158] ss:$92 sps:$4 sm:$0xff]  }
 0x70f   :  { %9300 = vmatprep.subr.bf16.mxu0 %v15748_v46  ;;  %v8876_v41 = vpop.f32.mrb[51].mxu1  ;;  %v15752_v3 = vld [vmem:[#allocation10 + $0x5e0] ss:$92 sps:$4 sm:$0xff]   ;;  %v15757_v61 = vld [vmem:[#allocation10 + $0x1214] ss:$92 sps:$4 sm:$0xff]  }
 0x710   :  { %v15760_v57 = vld [vmem:[#allocation10 + $0x69c] ss:$92 sps:$4 sm:$0xff]   ;;  %v15755_v22 = vld [vmem:[#allocation10 + $0x1210] ss:$92 sps:$4 sm:$0xff]   ;;  %v15761_v46 = vld [vmem:[#allocation10 + $0x12c8] ss:$92 sps:$4 sm:$0xff]  }
 0x711   :  { %9199 = vmatpush1.bf16.msra.mxu1 %v15743_v1  ;;  %v15758_v18 = vld [vmem:[#allocation10 + $0x698] ss:$92 sps:$4 sm:$0xff]   ;;  %v15763_v31 = vld [vmem:[#allocation10 + $0x12cc] ss:$92 sps:$4 sm:$0xff]   ;;  %v15769_v11 = vld [vmem:[#allocation10 + $0x1384] ss:$92 sps:$4 sm:$0xff]  }
 0x712   :  { %9301 = vmatpush1.bf16.msra.mxu0 %v15746_v43  ;;  %9200 = vmatprep.subr.bf16.mxu1 %v15751_v4  ;;  %v15766_v16 = vld [vmem:[#allocation10 + $0x754] ss:$92 sps:$4 sm:$0xff]   ;;  %v15772_v43 = vld [vmem:[#allocation10 + $0x80c] ss:$92 sps:$4 sm:$0xff]   ;;  %v15767_v49 = vld [vmem:[#allocation10 + $0x1380] ss:$92 sps:$4 sm:$0xff]  }
 0x713   :  { %9302 = vmatprep.subr.bf16.mxu0 %v15754_v19  ;;  %v15764_v1 = vld [vmem:[#allocation10 + $0x750] ss:$92 sps:$4 sm:$0xff]   ;;  %v15770_v4 = vld [vmem:[#allocation10 + $0x808] ss:$92 sps:$4 sm:$0xff]   ;;  %v15775_v14 = vld [vmem:[#allocation10 + $0x143c] ss:$92 sps:$4 sm:$0xff]  }
 0x714   :  { %v15773_v41 = vld [vmem:[#allocation10 + $0x1438] ss:$92 sps:$4 sm:$0xff]   ;;  %v15776_v19 = vld [vmem:[#allocation10 + $0x8c0] ss:$92 sps:$4 sm:$0xff]  }
 0x715   :  { %9201 = vmatpush1.bf16.msra.mxu1 %v15749_v13  ;;  %v15781_v13 = vld [vmem:[#allocation10 + $0x14f4] ss:$92 sps:$4 sm:$0xff]  }
 0x716   :  { %9303 = vmatpush1.bf16.msra.mxu0 %v15752_v3  ;;  %9202 = vmatprep.subr.bf16.mxu1 %v15757_v61  ;;  %v15778_v61 = vld [vmem:[#allocation10 + $0x8c4] ss:$92 sps:$4 sm:$0xff]   ;;  %v15784_v3 = vld [vmem:[#allocation10 + $0x97c] ss:$92 sps:$4 sm:$0xff]  }
 0x717   :  { %9304 = vmatprep.subr.bf16.mxu0 %v15760_v57  ;;  %v15779_v57 = vld [vmem:[#allocation10 + $0x14f0] ss:$92 sps:$4 sm:$0xff]  }
 0x719   :  { %9203 = vmatpush1.bf16.msra.mxu1 %v15755_v22  ;;  %v15782_v22 = vld [vmem:[#allocation10 + $0x978] ss:$92 sps:$4 sm:$0xff]  }
 0x71a   :  { %9305 = vmatpush1.bf16.msra.mxu0 %v15758_v18  ;;  %9204 = vmatprep.subr.bf16.mxu1 %v15763_v31  ;;  %v15787_v18 = vld [vmem:[#allocation10 + $0x15ac] ss:$92 sps:$4 sm:$0xff]   ;;  %v15790_v31 = vld [vmem:[#allocation10 + $0xa34] ss:$92 sps:$4 sm:$0xff]  }
 0x71b   :  { %9306 = vmatprep.subr.bf16.mxu0 %v15766_v16  ;;  %v15785_v16 = vld [vmem:[#allocation10 + $0x15a8] ss:$92 sps:$4 sm:$0xff]  }
 0x71d   :  { %9205 = vmatpush1.bf16.msra.mxu1 %v15761_v46  ;;  %v15788_v46 = vld [vmem:[#allocation10 + $0xa30] ss:$92 sps:$4 sm:$0xff]  }
 0x71e   :  { %9307 = vmatpush1.bf16.msra.mxu0 %v15764_v1  ;;  %9206 = vmatprep.subr.bf16.mxu1 %v15769_v11  ;;  %v15793_v1 = vld [vmem:[#allocation10 + $0x1664] ss:$92 sps:$4 sm:$0xff]   ;;  %v15796_v11 = vld [vmem:[#allocation10 + $0xaec] ss:$92 sps:$4 sm:$0xff]  }
 0x71f   :  { %9308 = vmatprep.subr.bf16.mxu0 %v15772_v43  ;;  %v15791_v43 = vld [vmem:[#allocation10 + $0x1660] ss:$92 sps:$4 sm:$0xff]  }
 0x721   :  { %9207 = vmatpush1.bf16.msra.mxu1 %v15767_v49  ;;  %v15794_v49 = vld [vmem:[#allocation10 + $0xae8] ss:$92 sps:$4 sm:$0xff]  }
 0x722   :  { %9309 = vmatpush1.bf16.msra.mxu0 %v15770_v4  ;;  %9208 = vmatprep.subr.bf16.mxu1 %v15775_v14  ;;  %v15799_v4 = vld [vmem:[#allocation10 + $0x171c] ss:$92 sps:$4 sm:$0xff]   ;;  %v15802_v14 = vld [vmem:[#allocation10 + $0xba4] ss:$92 sps:$4 sm:$0xff]  }
 0x723   :  { %9310 = vmatprep.subr.bf16.mxu0 %v15778_v61  ;;  %v15797_v61 = vld [vmem:[#allocation10 + $0x1718] ss:$92 sps:$4 sm:$0xff]  }
 0x725   :  { %9209 = vmatpush1.bf16.msra.mxu1 %v15773_v41  ;;  %v15800_v41 = vld [vmem:[#allocation10 + $0xba0] ss:$92 sps:$4 sm:$0xff]  }
 0x726   :  { %9311 = vmatpush1.bf16.msra.mxu0 %v15776_v19  ;;  %9210 = vmatprep.subr.bf16.mxu1 %v15781_v13  ;;  %v15805_v19 = vld [vmem:[#allocation10 + $0x17d4] ss:$92 sps:$4 sm:$0xff]   ;;  %v15808_v13 = vld [vmem:[#allocation10 + $0xc5c] ss:$92 sps:$4 sm:$0xff]  }
 0x727   :  { %9312 = vmatprep.subr.bf16.mxu0 %v15784_v3  ;;  %v15803_v3 = vld [vmem:[#allocation10 + $0x17d0] ss:$92 sps:$4 sm:$0xff]  }
 0x729   :  { %9211 = vmatpush1.bf16.msra.mxu1 %v15779_v57  ;;  %v15806_v57 = vld [vmem:[#allocation10 + $0xc58] ss:$92 sps:$4 sm:$0xff]  }
 0x72a   :  { %9313 = vmatpush1.bf16.msra.mxu0 %v15782_v22  ;;  %9212 = vmatprep.subr.bf16.mxu1 %v15787_v18  ;;  %v15811_v22 = vld [vmem:[#allocation10 + $0x188c] ss:$92 sps:$4 sm:$0xff]   ;;  %v15814_v18 = vld [vmem:[#allocation10 + $0xd14] ss:$92 sps:$4 sm:$0xff]  }
 0x72b   :  { %9314 = vmatprep.subr.bf16.mxu0 %v15790_v31  ;;  %v15809_v31 = vld [vmem:[#allocation10 + $0x1888] ss:$92 sps:$4 sm:$0xff]  }
 0x72d   :  { %9213 = vmatpush1.bf16.msra.mxu1 %v15785_v16  ;;  %v15812_v16 = vld [vmem:[#allocation10 + $0xd10] ss:$92 sps:$4 sm:$0xff]  }
 0x72e   :  { %9315 = vmatpush1.bf16.msra.mxu0 %v15788_v46  ;;  %9214 = vmatprep.subr.bf16.mxu1 %v15793_v1  ;;  %v15817_v46 = vld [vmem:[#allocation10 + $0x1944] ss:$92 sps:$4 sm:$0xff]   ;;  %v15820_v1 = vld [vmem:[#allocation10 + $0xdcc] ss:$92 sps:$4 sm:$0xff]  }
 0x72f   :  { %9316 = vmatprep.subr.bf16.mxu0 %v15796_v11  ;;  %v15815_v11 = vld [vmem:[#allocation10 + $0x1940] ss:$92 sps:$4 sm:$0xff]  }
 0x731   :  { %9215 = vmatpush1.bf16.msra.mxu1 %v15791_v43  ;;  %v15818_v43 = vld [vmem:[#allocation10 + $0xdc8] ss:$92 sps:$4 sm:$0xff]  }
 0x732   :  { %9317 = vmatpush1.bf16.msra.mxu0 %v15794_v49  ;;  %9235 = vmatprep.subr.bf16.mxu1 %v15799_v4  ;;  %v15823_v49 = vld [vmem:[#allocation10 + $0x19fc] ss:$92 sps:$4 sm:$0xff]   ;;  %v15826_v4 = vld [vmem:[#allocation10 + $0xe84] ss:$92 sps:$4 sm:$0xff]  }
 0x733   :  { %9337 = vmatprep.subr.bf16.mxu0 %v15802_v14  ;;  %v15821_v14 = vld [vmem:[#allocation10 + $0x19f8] ss:$92 sps:$4 sm:$0xff]  }
 0x734   :  { %9217 = vmatmul.mubr.bf16.vlgmr.msra.gmra.mrb[68].mxu1 %v17755_v26 }
 0x735   :  { %9319 = vmatmul.mubr.bf16.vlgmr.msra.gmra.mrb[76].mxu0 %v17751_v42  ;;  %9226 = vmatprep.mubr.bf16.mxu1 %v17771_v38 }
 0x736   :  { %9236 = vmatpush1.bf16.msra.mxu1 %v15797_v61  ;;  %9328 = vmatprep.mubr.bf16.mxu0 %v17774_v39  ;;  %v15824_v61 = vld [vmem:[#allocation10 + $0xe80] ss:$92 sps:$4 sm:$0xff]  }
 0x737   :  { %9338 = vmatpush1.bf16.msra.mxu0 %v15800_v41  ;;  %9237 = vmatprep.subr.bf16.mxu1 %v15805_v19  ;;  %v15829_v41 = vld [vmem:[#allocation10 + $0x1ab4] ss:$92 sps:$4 sm:$0xff]   ;;  %v15832_v19 = vld [vmem:[#allocation10 + $0xf3c] ss:$92 sps:$4 sm:$0xff]  }
 0x738   :  { %9339 = vmatprep.subr.bf16.mxu0 %v15808_v13 }
 0x73a   :  { %9238 = vmatpush1.bf16.msra.mxu1 %v15803_v3 }
 0x73b   :  { %9340 = vmatpush1.bf16.msra.mxu0 %v15806_v57  ;;  %9239 = vmatprep.subr.bf16.mxu1 %v15811_v22  ;;  %v15827_v22 = vld [vmem:[#allocation10 + $0x1ab0] ss:$92 sps:$4 sm:$0xff]  }
 0x73c   :  { %9227 = vmatmul.mubr.bf16.gmra.mrb[72].mxu1 %v17787_v55  ;;  %9341 = vmatprep.subr.bf16.mxu0 %v15814_v18 }
 0x73d   :  { %9329 = vmatmul.mubr.bf16.gmra.mrb[80].mxu0 %v17782_v50  ;;  %9267 = vmatprep.mubr.bf16.mxu1 %v17761_v29 }
 0x73e   :  { %9240 = vmatpush1.bf16.msra.mxu1 %v15809_v31  ;;  %9369 = vmatprep.mubr.bf16.mxu0 %v17757_v27  ;;  %v15830_v31 = vld [vmem:[#allocation10 + $0xf38] ss:$92 sps:$4 sm:$0xff]  }
 0x73f   :  { %9342 = vmatpush1.bf16.msra.mxu0 %v15812_v16  ;;  %9241 = vmatprep.subr.bf16.mxu1 %v15817_v46  ;;  %v15835_v46 = vld [vmem:[#allocation10 + $0x1b6c] ss:$92 sps:$4 sm:$0xff]  }
 0x740   :  { %9343 = vmatprep.subr.bf16.mxu0 %v15820_v1 }
 0x742   :  { %9242 = vmatpush1.bf16.msra.mxu1 %v15815_v11 }
 0x743   :  { %9344 = vmatpush1.bf16.msra.mxu0 %v15818_v43  ;;  %9243 = vmatprep.subr.bf16.mxu1 %v15823_v49  ;;  %v15838_v43 = vld [vmem:[#allocation10 + $0xff4] ss:$92 sps:$4 sm:$0xff]  }
 0x744   :  { %9345 = vmatprep.subr.bf16.mxu0 %v15826_v4  ;;  %v15836_v4 = vld [vmem:[#allocation10 + $0xff0] ss:$92 sps:$4 sm:$0xff]  }
 0x745   :  { %v9014_v13 = vpop.f32.mrb[60].mxu0 }
 0x746   :  { %9244 = vmatpush1.bf16.msra.mxu1 %v15821_v14  ;;  %v18028_v3 = vadd.f32 %v9014_v13, %v17843_v56  ;;  %v9016_v57 = vpop.f32.mrb[61].mxu0  ;;  %v15833_v56 = vld [vmem:[#allocation10 + $0x1b68] ss:$92 sps:$4 sm:$0xff]  }
 0x747   :  { %9346 = vmatpush1.bf16.msra.mxu0 %v15824_v61  ;;  %v18031_v18 = vadd.f32 %v9016_v57, %v17845_v58  ;;  %9245 = vmatprep.subr.bf16.mxu1 %v15829_v41  ;;  %v9018_v16 = vpop.f32.mrb[62].mxu0  ;;  %v15841_v58 = vld [vmem:[#allocation10 + $0x1c24] ss:$92 sps:$4 sm:$0xff]   ;;  %v15844_v14 = vld [vmem:[#allocation10 + $0x10ac] ss:$92 sps:$4 sm:$0xff]  }
 0x748   :  { %9347 = vmatprep.subr.bf16.mxu0 %v15832_v19  ;;  %v18034_v1 = vadd.f32 %v9018_v16, %v17849_v5  ;;  %v9020_v11 = vpop.f32.mrb[63].mxu0  ;;  %v15839_v19 = vld [vmem:[#allocation10 + $0x1c20] ss:$92 sps:$4 sm:$0xff]  }
 0x749   :  { %v18037_v49 = vadd.f32 %v9020_v11, %v17853_v15  ;;  %v15842_v15 = vld [vmem:[#allocation10 + $0x10a8] ss:$92 sps:$4 sm:$0xff]   ;;  %v15848_v11 = vld [vmem:[#allocation10 + $0x1160] ss:$92 sps:$4 sm:$0xff]  }
 0x74a   :  { %9246 = vmatpush1.bf16.msra.mxu1 %v15827_v22  ;;  %v15847_v22 = vld [vmem:[#allocation10 + $0x1cdc] ss:$92 sps:$4 sm:$0xff]   ;;  %v15850_v16 = vld [vmem:[#allocation10 + $0x1164] ss:$92 sps:$4 sm:$0xff]  }
 0x74b   :  { %9348 = vmatpush1.bf16.msra.mxu0 %v15830_v31  ;;  %9247 = vmatprep.subr.bf16.mxu1 %v15835_v46  ;;  %v15845_v46 = vld [vmem:[#allocation10 + $0x1cd8] ss:$92 sps:$4 sm:$0xff]  }
 0x74c   :  { %9349 = vmatprep.subr.bf16.mxu0 %v15838_v43  ;;  %v15856_v43 = vld [vmem:[#allocation10 + $0x121c] ss:$92 sps:$4 sm:$0xff]  }
 0x74d   :  { %v9024_v61 = vpop.f32.mrb[64].mxu0 }
 0x74e   :  { %9248 = vmatpush1.bf16.msra.mxu1 %v15833_v56  ;;  %v18040_v41 = vadd.f32 %v9024_v61, %v17857_v20  ;;  %v9026_v5 = vpop.f32.mrb[65].mxu0  ;;  %v15853_v20 = vld [vmem:[#allocation10 + $0x1d94] ss:$92 sps:$4 sm:$0xff]  }
 0x74f   :  { %9350 = vmatpush1.bf16.msra.mxu0 %v15836_v4  ;;  %v18043_v13 = vadd.f32 %v9026_v5, %v17859_v23  ;;  %9249 = vmatprep.subr.bf16.mxu1 %v15841_v58  ;;  %v9028_v57 = vpop.f32.mrb[66].mxu0  ;;  %v15851_v56 = vld [vmem:[#allocation10 + $0x1d90] ss:$92 sps:$4 sm:$0xff]   ;;  %v15854_v23 = vld [vmem:[#allocation10 + $0x1218] ss:$92 sps:$4 sm:$0xff]  }
 0x750   :  { %9351 = vmatprep.subr.bf16.mxu0 %v15844_v14  ;;  %v9029_v31 = vpop.f32.mrb[67].mxu0  ;;  %v15859_v4 = vld [vmem:[#allocation10 + $0x1e4c] ss:$92 sps:$4 sm:$0xff]   ;;  %v15862_v58 = vld [vmem:[#allocation10 + $0x12d4] ss:$92 sps:$4 sm:$0xff]  }
 0x751   :  { %v15857_v14 = vld [vmem:[#allocation10 + $0x1e48] ss:$92 sps:$4 sm:$0xff]   ;;  %v15860_v61 = vld [vmem:[#allocation10 + $0x12d0] ss:$92 sps:$4 sm:$0xff]  }
 0x752   :  { %9250 = vmatpush1.bf16.msra.mxu1 %v15839_v19  ;;  %v15865_v5 = vld [vmem:[#allocation10 + $0x1f04] ss:$92 sps:$4 sm:$0xff]   ;;  %v15868_v19 = vld [vmem:[#allocation10 + $0x138c] ss:$92 sps:$4 sm:$0xff]  }
 0x753   :  { %9352 = vmatpush1.bf16.msra.mxu0 %v15842_v15  ;;  %9251 = vmatprep.subr.bf16.mxu1 %v15847_v22  ;;  %v15863_v15 = vld [vmem:[#allocation10 + $0x1f00] ss:$92 sps:$4 sm:$0xff]   ;;  %v15866_v57 = vld [vmem:[#allocation10 + $0x1388] ss:$92 sps:$4 sm:$0xff]  }
 0x754   :  { %9353 = vmatprep.subr.bf16.mxu0 %v15850_v16  ;;  %v15871_v22 = vld [vmem:[#allocation10 + $0x1fbc] ss:$92 sps:$4 sm:$0xff]   ;;  %v15874_v31 = vld [vmem:[#allocation10 + $0x1444] ss:$92 sps:$4 sm:$0xff]  }
 0x755   :  { %v15869_v16 = vld [vmem:[#allocation10 + $0x1fb8] ss:$92 sps:$4 sm:$0xff]  }
 0x756   :  { %9252 = vmatpush1.bf16.msra.mxu1 %v15845_v46  ;;  %v15872_v46 = vld [vmem:[#allocation10 + $0x1440] ss:$92 sps:$4 sm:$0xff]  }
 0x757   :  { %9354 = vmatpush1.bf16.msra.mxu0 %v15848_v11  ;;  %9253 = vmatprep.subr.bf16.mxu1 %v15853_v20  ;;  %v15877_v11 = vld [vmem:[#allocation10 + $0x2074] ss:$92 sps:$4 sm:$0xff]   ;;  %v15880_v20 = vld [vmem:[#allocation10 + $0x14fc] ss:$92 sps:$4 sm:$0xff]  }
 0x758   :  { %9355 = vmatprep.subr.bf16.mxu0 %v15856_v43  ;;  %v15875_v43 = vld [vmem:[#allocation10 + $0x2070] ss:$92 sps:$4 sm:$0xff]  }
 0x75a   :  { %9254 = vmatpush1.bf16.msra.mxu1 %v15851_v56  ;;  %v15878_v56 = vld [vmem:[#allocation10 + $0x14f8] ss:$92 sps:$4 sm:$0xff]  }
 0x75b   :  { %9356 = vmatpush1.bf16.msra.mxu0 %v15854_v23  ;;  %9255 = vmatprep.subr.bf16.mxu1 %v15859_v4  ;;  %v15883_v23 = vld [vmem:[#allocation10 + $0x212c] ss:$92 sps:$4 sm:$0xff]   ;;  %v15886_v4 = vld [vmem:[#allocation10 + $0x15b4] ss:$92 sps:$4 sm:$0xff]  }
 0x75c   :  { %9357 = vmatprep.subr.bf16.mxu0 %v15862_v58  ;;  %v15881_v58 = vld [vmem:[#allocation10 + $0x2128] ss:$92 sps:$4 sm:$0xff]  }
 0x75e   :  { %9256 = vmatpush1.bf16.msra.mxu1 %v15857_v14  ;;  %v15884_v14 = vld [vmem:[#allocation10 + $0x15b0] ss:$92 sps:$4 sm:$0xff]  }
 0x75f   :  { %9358 = vmatpush1.bf16.msra.mxu0 %v15860_v61  ;;  %9257 = vmatprep.subr.bf16.mxu1 %v15865_v5  ;;  %v15889_v61 = vld [vmem:[#allocation10 + $0x21e4] ss:$92 sps:$4 sm:$0xff]   ;;  %v15892_v5 = vld [vmem:[#allocation10 + $0x166c] ss:$92 sps:$4 sm:$0xff]  }
 0x760   :  { %9359 = vmatprep.subr.bf16.mxu0 %v15868_v19  ;;  %v15887_v19 = vld [vmem:[#allocation10 + $0x21e0] ss:$92 sps:$4 sm:$0xff]  }
 0x762   :  { %9258 = vmatpush1.bf16.msra.mxu1 %v15863_v15  ;;  %v15890_v15 = vld [vmem:[#allocation10 + $0x1668] ss:$92 sps:$4 sm:$0xff]  }
 0x763   :  { %9360 = vmatpush1.bf16.msra.mxu0 %v15866_v57  ;;  %9259 = vmatprep.subr.bf16.mxu1 %v15871_v22  ;;  %v15898_v57 = vld [vmem:[#allocation10 + $0x2c] ss:$92 sps:$4 sm:$0xff]   ;;  %v15895_v22 = vld [vmem:[#allocation10 + $0x1724] ss:$92 sps:$4 sm:$0xff]  }
 0x764   :  { %9361 = vmatprep.subr.bf16.mxu0 %v15874_v31  ;;  %v15893_v31 = vld [vmem:[#allocation10 + $0x1720] ss:$92 sps:$4 sm:$0xff]  }
 0x766   :  { %9260 = vmatpush1.bf16.msra.mxu1 %v15869_v16  ;;  %v15896_v16 = vld [vmem:[#allocation10 + $0x28] ss:$92 sps:$4 sm:$0xff]  }
 0x767   :  { %9362 = vmatpush1.bf16.msra.mxu0 %v15872_v46  ;;  %9261 = vmatprep.subr.bf16.mxu1 %v15877_v11  ;;  %v15901_v46 = vld [vmem:[#allocation10 + $0x17dc] ss:$92 sps:$4 sm:$0xff]   ;;  %v15904_v11 = vld [vmem:[#allocation10 + $0xe4] ss:$92 sps:$4 sm:$0xff]  }
 0x768   :  { %9363 = vmatprep.subr.bf16.mxu0 %v15880_v20  ;;  %v15899_v20 = vld [vmem:[#allocation10 + $0x17d8] ss:$92 sps:$4 sm:$0xff]  }
 0x76a   :  { %9262 = vmatpush1.bf16.msra.mxu1 %v15875_v43  ;;  %v15902_v43 = vld [vmem:[#allocation10 + $0xe0] ss:$92 sps:$4 sm:$0xff]  }
 0x76b   :  { %9364 = vmatpush1.bf16.msra.mxu0 %v15878_v56  ;;  %9263 = vmatprep.subr.bf16.mxu1 %v15883_v23  ;;  %v15907_v56 = vld [vmem:[#allocation10 + $0x1894] ss:$92 sps:$4 sm:$0xff]   ;;  %v15910_v23 = vld [vmem:[#allocation10 + $0x19c] ss:$92 sps:$4 sm:$0xff]  }
 0x76c   :  { %9365 = vmatprep.subr.bf16.mxu0 %v15886_v4  ;;  %v15905_v4 = vld [vmem:[#allocation10 + $0x1890] ss:$92 sps:$4 sm:$0xff]  }
 0x76e   :  { %9264 = vmatpush1.bf16.msra.mxu1 %v15881_v58  ;;  %v15908_v58 = vld [vmem:[#allocation10 + $0x198] ss:$92 sps:$4 sm:$0xff]  }
 0x76f   :  { %9366 = vmatpush1.bf16.msra.mxu0 %v15884_v14  ;;  %9265 = vmatprep.subr.bf16.mxu1 %v15889_v61  ;;  %v15913_v14 = vld [vmem:[#allocation10 + $0x194c] ss:$92 sps:$4 sm:$0xff]   ;;  %v15916_v61 = vld [vmem:[#allocation10 + $0x254] ss:$92 sps:$4 sm:$0xff]  }
 0x770   :  { %9367 = vmatprep.subr.bf16.mxu0 %v15892_v5  ;;  %v15911_v5 = vld [vmem:[#allocation10 + $0x1948] ss:$92 sps:$4 sm:$0xff]  }
 0x772   :  { %9266 = vmatpush1.bf16.msra.mxu1 %v15887_v19  ;;  %v15914_v19 = vld [vmem:[#allocation10 + $0x250] ss:$92 sps:$4 sm:$0xff]  }
 0x773   :  { %9368 = vmatpush1.bf16.msra.mxu0 %v15890_v15  ;;  %9439 = vmatprep.subr.bf16.mxu1 %v15898_v57  ;;  %v15919_v15 = vld [vmem:[#allocation10 + $0x1a04] ss:$92 sps:$4 sm:$0xff]   ;;  %v15922_v57 = vld [vmem:[#allocation10 + $0x30c] ss:$92 sps:$4 sm:$0xff]  }
 0x774   :  { %9388 = vmatprep.subr.bf16.mxu0 %v15895_v22  ;;  %v15917_v22 = vld [vmem:[#allocation10 + $0x1a00] ss:$92 sps:$4 sm:$0xff]  }
 0x775   :  { %9268 = vmatmul.mubr.bf16.vlgmr.msra.gmra.mrb[68].mxu1 %v17759_v28 }
 0x776   :  { %9370 = vmatmul.mubr.bf16.vlgmr.msra.gmra.mrb[84].mxu0 %v17755_v26  ;;  %9277 = vmatprep.mubr.bf16.mxu1 %v17869_v48 }
 0x777   :  { %9379 = vmatprep.mubr.bf16.mxu0 %v17771_v38  ;;  %9389 = vmatpush1.bf16.msra.mxu0 %v15893_v31  ;;  %v15920_v31 = vld [vmem:[#allocation10 + $0x308] ss:$92 sps:$4 sm:$0xff]  }
 0x778   :  { %9440 = vmatpush1.bf16.msra.mxu1 %v15896_v16  ;;  %9390 = vmatprep.subr.bf16.mxu0 %v15901_v46  ;;  %v15925_v16 = vld [vmem:[#allocation10 + $0x1abc] ss:$92 sps:$4 sm:$0xff]  }
 0x779   :  { %9441 = vmatprep.subr.bf16.mxu1 %v15904_v11  ;;  %v15928_v11 = vld [vmem:[#allocation10 + $0x3c4] ss:$92 sps:$4 sm:$0xff]  }
 0x77b   :  { %9391 = vmatpush1.bf16.msra.mxu0 %v15899_v20 }
 0x77c   :  { %9442 = vmatpush1.bf16.msra.mxu1 %v15902_v43  ;;  %9392 = vmatprep.subr.bf16.mxu0 %v15907_v56 }
 0x77d   :  { %9278 = vmatmul.mubr.bf16.gmra.mrb[72].mxu1 %v17895_v34  ;;  %9443 = vmatprep.subr.bf16.mxu1 %v15910_v23  ;;  %v15923_v23 = vld [vmem:[#allocation10 + $0x1ab8] ss:$92 sps:$4 sm:$0xff]  }
 0x77e   :  { %9380 = vmatmul.mubr.bf16.gmra.mrb[88].mxu0 %v17787_v55  ;;  %9471 = vmatprep.mubr.bf16.mxu1 %v17753_v25 }
 0x77f   :  { %9393 = vmatpush1.bf16.msra.mxu0 %v15905_v4  ;;  %9420 = vmatprep.mubr.bf16.mxu0 %v17761_v29 }
 0x780   :  { %9444 = vmatpush1.bf16.msra.mxu1 %v15908_v58  ;;  %9394 = vmatprep.subr.bf16.mxu0 %v15913_v14  ;;  %v15926_v58 = vld [vmem:[#allocation10 + $0x3c0] ss:$92 sps:$4 sm:$0xff]  }
 0x781   :  { %9445 = vmatprep.subr.bf16.mxu1 %v15916_v61 }
 0x783   :  { %9395 = vmatpush1.bf16.msra.mxu0 %v15911_v5  ;;  %v15931_v5 = vld [vmem:[#allocation10 + $0x1b74] ss:$92 sps:$4 sm:$0xff]  }
 0x784   :  { %9446 = vmatpush1.bf16.msra.mxu1 %v15914_v19  ;;  %9396 = vmatprep.subr.bf16.mxu0 %v15919_v15  ;;  %v15932_v15 = vld [vmem:[#allocation10 + $0x478] ss:$92 sps:$4 sm:$0xff]  }
 0x785   :  { %9447 = vmatprep.subr.bf16.mxu1 %v15922_v57  ;;  %v8963_v46 = vpop.f32.mrb[52].mxu1  ;;  %v15937_v57 = vld [vmem:[#allocation10 + $0x1c2c] ss:$92 sps:$4 sm:$0xff]  }
 0x786   :  { %v18054_v20 = vadd.f32 %v8963_v46, %v17987_v36  ;;  %v8965_v43 = vpop.f32.mrb[53].mxu1  ;;  %v15934_v36 = vld [vmem:[#allocation10 + $0x47c] ss:$92 sps:$4 sm:$0xff]   ;;  %v15935_v46 = vld [vmem:[#allocation10 + $0x1c28] ss:$92 sps:$4 sm:$0xff]  }
 0x787   :  { %9397 = vmatpush1.bf16.msra.mxu0 %v15917_v22  ;;  %v18057_v56 = vadd.f32 %v8965_v43, %v17993_v52  ;;  %v8967_v4 = vpop.f32.mrb[54].mxu1  ;;  %v15929_v52 = vld [vmem:[#allocation10 + $0x1b70] ss:$92 sps:$4 sm:$0xff]  }
 0x788   :  { %9448 = vmatpush1.bf16.msra.mxu1 %v15920_v31  ;;  %9398 = vmatprep.subr.bf16.mxu0 %v15925_v16  ;;  %v18060_v14 = vadd.f32 %v8967_v4, %v17999_v7  ;;  %v8969_v61 = vpop.f32.mrb[55].mxu1  ;;  %v15940_v22 = vld [vmem:[#allocation10 + $0x534] ss:$92 sps:$4 sm:$0xff]   ;;  %v15943_v4 = vld [vmem:[#allocation10 + $0x1ce4] ss:$92 sps:$4 sm:$0xff]  }
 0x789   :  { %9449 = vmatprep.subr.bf16.mxu1 %v15928_v11  ;;  %v18063_v19 = vadd.f32 %v8969_v61, %v18005_v10  ;;  %11628 = vrot.lane.b32.xlu0 %v18054_v20, %s17291_s10  ;;  %v15938_v43 = vld [vmem:[#allocation10 + $0x530] ss:$92 sps:$4 sm:$0xff]   ;;  %v15944_v61 = vld [vmem:[#allocation10 + $0x5e8] ss:$92 sps:$4 sm:$0xff]  }
 0x78a   :  { %11630 = vrot.lane.b32.xlu1 %v18060_v14, %s17291_s10 }
 0x78b   :  { %9399 = vmatpush1.bf16.msra.mxu0 %v15923_v23 }
 0x78c   :  { %9450 = vmatpush1.bf16.msra.mxu1 %v15926_v58  ;;  %9400 = vmatprep.subr.bf16.mxu0 %v15931_v5  ;;  %v15941_v58 = vld [vmem:[#allocation10 + $0x1ce0] ss:$92 sps:$4 sm:$0xff]  }
 0x78d   :  { %9451 = vmatprep.subr.bf16.mxu1 %v15934_v36  ;;  %v8973_v7 = vpop.f32.mrb[56].mxu1  ;;  %v15952_v5 = vld [vmem:[#allocation10 + $0x6a4] ss:$92 sps:$4 sm:$0xff]   ;;  %v15947_v36 = vld [vmem:[#allocation10 + $0x1d98] ss:$92 sps:$4 sm:$0xff]  }
 0x78e   :  { %v18068_v31 = vadd.f32 %v8973_v7, %v18011_v63  ;;  %v8975_v10 = vpop.f32.mrb[57].mxu1  ;;  %12084 = vrot.lane.b32.xlu1 %v18054_v20, %s17292_s21  ;;  %v15946_v63 = vld [vmem:[#allocation10 + $0x5ec] ss:$92 sps:$4 sm:$0xff]  }
 0x78f   :  { %9401 = vmatpush1.bf16.msra.mxu0 %v15929_v52  ;;  %v18072_v16 = vadd.f32 %v8975_v10, %v18017_v51  ;;  %v8977_v11 = vpop.f32.mrb[58].mxu1  ;;  %v15949_v51 = vld [vmem:[#allocation10 + $0x1d9c] ss:$92 sps:$4 sm:$0xff]   ;;  %v15953_v7 = vld [vmem:[#allocation10 + $0x1e50] ss:$92 sps:$4 sm:$0xff]  }
 0x790   :  { %9452 = vmatpush1.bf16.msra.mxu1 %v15932_v15  ;;  %9402 = vmatprep.subr.bf16.mxu0 %v15937_v57  ;;  %v8978_v23 = vpop.f32.mrb[59].mxu1  ;;  %v15950_v52 = vld [vmem:[#allocation10 + $0x6a0] ss:$92 sps:$4 sm:$0xff]   ;;  %v15955_v15 = vld [vmem:[#allocation10 + $0x1e54] ss:$92 sps:$4 sm:$0xff]  }
 0x791   :  { %9453 = vmatprep.subr.bf16.mxu1 %v15940_v22  ;;  %11632 = vrot.lane.b32.xlu0 %v18068_v31, %s17291_s10  ;;  %v15958_v57 = vld [vmem:[#allocation10 + $0x75c] ss:$92 sps:$4 sm:$0xff]   ;;  %v15961_v10 = vld [vmem:[#allocation10 + $0x1f0c] ss:$92 sps:$4 sm:$0xff]   ;;  %v15967_v23 = vld [vmem:[#allocation10 + $0x1fc4] ss:$92 sps:$4 sm:$0xff]  }
 0x792   :  { %12088 = vrot.lane.b32.xlu1 %v18068_v31, %s17292_s21  ;;  %v15956_v22 = vld [vmem:[#allocation10 + $0x758] ss:$92 sps:$4 sm:$0xff]   ;;  %v15959_v11 = vld [vmem:[#allocation10 + $0x1f08] ss:$92 sps:$4 sm:$0xff]  }
 0x793   :  { %9403 = vmatpush1.bf16.msra.mxu0 %v15935_v46  ;;  %v15964_v46 = vld [vmem:[#allocation10 + $0x814] ss:$92 sps:$4 sm:$0xff]  }
 0x794   :  { %9454 = vmatpush1.bf16.msra.mxu1 %v15938_v43  ;;  %9404 = vmatprep.subr.bf16.mxu0 %v15943_v4  ;;  %v15962_v43 = vld [vmem:[#allocation10 + $0x810] ss:$92 sps:$4 sm:$0xff]  }
 0x795   :  { %9455 = vmatprep.subr.bf16.mxu1 %v15946_v63  ;;  %12086 = vrot.lane.b32.xlu0 %v18060_v14, %s17292_s21  ;;  %v15970_v4 = vld [vmem:[#allocation10 + $0x8cc] ss:$92 sps:$4 sm:$0xff]   ;;  %v15965_v63 = vld [vmem:[#allocation10 + $0x1fc0] ss:$92 sps:$4 sm:$0xff]  }
 0x797   :  { %9405 = vmatpush1.bf16.msra.mxu0 %v15941_v58  ;;  %v15968_v58 = vld [vmem:[#allocation10 + $0x8c8] ss:$92 sps:$4 sm:$0xff]  }
 0x798   :  { %9456 = vmatpush1.bf16.msra.mxu1 %v15944_v61  ;;  %9406 = vmatprep.subr.bf16.mxu0 %v15949_v51  ;;  %v15973_v61 = vld [vmem:[#allocation10 + $0x207c] ss:$92 sps:$4 sm:$0xff]   ;;  %v15976_v51 = vld [vmem:[#allocation10 + $0x984] ss:$92 sps:$4 sm:$0xff]  }
 0x799   :  { %9457 = vmatprep.subr.bf16.mxu1 %v15952_v5  ;;  %v15971_v5 = vld [vmem:[#allocation10 + $0x2078] ss:$92 sps:$4 sm:$0xff]  }
 0x79b   :  { %9407 = vmatpush1.bf16.msra.mxu0 %v15947_v36  ;;  %v15974_v36 = vld [vmem:[#allocation10 + $0x980] ss:$92 sps:$4 sm:$0xff]  }
 0x79c   :  { %9458 = vmatpush1.bf16.msra.mxu1 %v15950_v52  ;;  %9408 = vmatprep.subr.bf16.mxu0 %v15955_v15  ;;  %v15979_v52 = vld [vmem:[#allocation10 + $0x2134] ss:$92 sps:$4 sm:$0xff]   ;;  %v15982_v15 = vld [vmem:[#allocation10 + $0xa3c] ss:$92 sps:$4 sm:$0xff]  }
 0x79d   :  { %9459 = vmatprep.subr.bf16.mxu1 %v15958_v57  ;;  %v15977_v57 = vld [vmem:[#allocation10 + $0x2130] ss:$92 sps:$4 sm:$0xff]  }
 0x79f   :  { %9409 = vmatpush1.bf16.msra.mxu0 %v15953_v7  ;;  %v15980_v7 = vld [vmem:[#allocation10 + $0xa38] ss:$92 sps:$4 sm:$0xff]  }
 0x7a0   :  { %9460 = vmatpush1.bf16.msra.mxu1 %v15956_v22  ;;  %9410 = vmatprep.subr.bf16.mxu0 %v15961_v10  ;;  %v15985_v22 = vld [vmem:[#allocation10 + $0x21ec] ss:$92 sps:$4 sm:$0xff]   ;;  %v15988_v10 = vld [vmem:[#allocation10 + $0xaf4] ss:$92 sps:$4 sm:$0xff]  }
 0x7a1   :  { %9461 = vmatprep.subr.bf16.mxu1 %v15964_v46  ;;  %v15983_v46 = vld [vmem:[#allocation10 + $0x21e8] ss:$92 sps:$4 sm:$0xff]  }
 0x7a3   :  { %9411 = vmatpush1.bf16.msra.mxu0 %v15959_v11  ;;  %v15986_v11 = vld [vmem:[#allocation10 + $0xaf0] ss:$92 sps:$4 sm:$0xff]  }
 0x7a4   :  { %9462 = vmatpush1.bf16.msra.mxu1 %v15962_v43  ;;  %9412 = vmatprep.subr.bf16.mxu0 %v15967_v23  ;;  %v15994_v43 = vld [vmem:[#allocation10 + $0x34] ss:$92 sps:$4 sm:$0xff]   ;;  %v15991_v23 = vld [vmem:[#allocation10 + $0xbac] ss:$92 sps:$4 sm:$0xff]  }
 0x7a5   :  { %9463 = vmatprep.subr.bf16.mxu1 %v15970_v4  ;;  %v15989_v4 = vld [vmem:[#allocation10 + $0xba8] ss:$92 sps:$4 sm:$0xff]  }
 0x7a7   :  { %9413 = vmatpush1.bf16.msra.mxu0 %v15965_v63  ;;  %v15992_v63 = vld [vmem:[#allocation10 + $0x30] ss:$92 sps:$4 sm:$0xff]  }
 0x7a8   :  { %9464 = vmatpush1.bf16.msra.mxu1 %v15968_v58  ;;  %9414 = vmatprep.subr.bf16.mxu0 %v15973_v61  ;;  %v15997_v58 = vld [vmem:[#allocation10 + $0xc64] ss:$92 sps:$4 sm:$0xff]   ;;  %v16000_v61 = vld [vmem:[#allocation10 + $0xec] ss:$92 sps:$4 sm:$0xff]  }
 0x7a9   :  { %9465 = vmatprep.subr.bf16.mxu1 %v15976_v51  ;;  %v15995_v51 = vld [vmem:[#allocation10 + $0xc60] ss:$92 sps:$4 sm:$0xff]  }
 0x7ab   :  { %9415 = vmatpush1.bf16.msra.mxu0 %v15971_v5  ;;  %v15998_v5 = vld [vmem:[#allocation10 + $0xe8] ss:$92 sps:$4 sm:$0xff]  }
 0x7ac   :  { %9466 = vmatpush1.bf16.msra.mxu1 %v15974_v36  ;;  %9416 = vmatprep.subr.bf16.mxu0 %v15979_v52  ;;  %v16003_v36 = vld [vmem:[#allocation10 + $0xd1c] ss:$92 sps:$4 sm:$0xff]   ;;  %v16006_v52 = vld [vmem:[#allocation10 + $0x1a4] ss:$92 sps:$4 sm:$0xff]  }
 0x7ad   :  { %9467 = vmatprep.subr.bf16.mxu1 %v15982_v15  ;;  %v16001_v15 = vld [vmem:[#allocation10 + $0xd18] ss:$92 sps:$4 sm:$0xff]  }
 0x7af   :  { %9417 = vmatpush1.bf16.msra.mxu0 %v15977_v57  ;;  %v16004_v57 = vld [vmem:[#allocation10 + $0x1a0] ss:$92 sps:$4 sm:$0xff]  }
 0x7b0   :  { %9468 = vmatpush1.bf16.msra.mxu1 %v15980_v7  ;;  %9418 = vmatprep.subr.bf16.mxu0 %v15985_v22  ;;  %v16009_v7 = vld [vmem:[#allocation10 + $0xdd4] ss:$92 sps:$4 sm:$0xff]   ;;  %v16012_v22 = vld [vmem:[#allocation10 + $0x25c] ss:$92 sps:$4 sm:$0xff]  }
 0x7b1   :  { %9469 = vmatprep.subr.bf16.mxu1 %v15988_v10  ;;  %v16007_v10 = vld [vmem:[#allocation10 + $0xdd0] ss:$92 sps:$4 sm:$0xff]  }
 0x7b3   :  { %9419 = vmatpush1.bf16.msra.mxu0 %v15983_v46  ;;  %v16010_v46 = vld [vmem:[#allocation10 + $0x258] ss:$92 sps:$4 sm:$0xff]  }
 0x7b4   :  { %9470 = vmatpush1.bf16.msra.mxu1 %v15986_v11  ;;  %9592 = vmatprep.subr.bf16.mxu0 %v15994_v43  ;;  %v16015_v11 = vld [vmem:[#allocation10 + $0xe8c] ss:$92 sps:$4 sm:$0xff]   ;;  %v16018_v43 = vld [vmem:[#allocation10 + $0x314] ss:$92 sps:$4 sm:$0xff]  }
 0x7b5   :  { %9490 = vmatprep.subr.bf16.mxu1 %v15991_v23  ;;  %v16013_v23 = vld [vmem:[#allocation10 + $0xe88] ss:$92 sps:$4 sm:$0xff]  }
 0x7b6   :  { %9421 = vmatmul.mubr.bf16.vlgmr.msra.gmra.mrb[84].mxu0 %v17759_v28 }
 0x7b7   :  { %9472 = vmatmul.mubr.bf16.vlgmr.msra.gmra.mrb[76].mxu1 %v17751_v42  ;;  %9430 = vmatprep.mubr.bf16.mxu0 %v17869_v48 }
 0x7b8   :  { %9481 = vmatprep.mubr.bf16.mxu1 %v17774_v39  ;;  %9491 = vmatpush1.bf16.msra.mxu1 %v15989_v4  ;;  %v16016_v4 = vld [vmem:[#allocation10 + $0x310] ss:$92 sps:$4 sm:$0xff]  }
 0x7b9   :  { %9593 = vmatpush1.bf16.msra.mxu0 %v15992_v63  ;;  %9492 = vmatprep.subr.bf16.mxu1 %v15997_v58  ;;  %v16021_v63 = vld [vmem:[#allocation10 + $0xf44] ss:$92 sps:$4 sm:$0xff]  }
 0x7ba   :  { %9594 = vmatprep.subr.bf16.mxu0 %v16000_v61  ;;  %v16024_v61 = vld [vmem:[#allocation10 + $0x3cc] ss:$92 sps:$4 sm:$0xff]  }
 0x7bc   :  { %9493 = vmatpush1.bf16.msra.mxu1 %v15995_v51 }
 0x7bd   :  { %9595 = vmatpush1.bf16.msra.mxu0 %v15998_v5  ;;  %9494 = vmatprep.subr.bf16.mxu1 %v16003_v36 }
 0x7be   :  { %9431 = vmatmul.mubr.bf16.gmra.mrb[88].mxu0 %v17895_v34  ;;  %9596 = vmatprep.subr.bf16.mxu0 %v16006_v52 }
 0x7bf   :  { %9482 = vmatmul.mubr.bf16.gmra.mrb[80].mxu1 %v17782_v50  ;;  %9624 = vmatprep.mubr.bf16.mxu0 %v17753_v25 }
 0x7c0   :  { %9495 = vmatpush1.bf16.msra.mxu1 %v16001_v15  ;;  %9522 = vmatprep.mubr.bf16.mxu1 %v17757_v27 }
 0x7c1   :  { %9597 = vmatpush1.bf16.msra.mxu0 %v16004_v57  ;;  %9496 = vmatprep.subr.bf16.mxu1 %v16009_v7  ;;  %v16019_v7 = vld [vmem:[#allocation10 + $0xf40] ss:$92 sps:$4 sm:$0xff]  }
 0x7c2   :  { %9598 = vmatprep.subr.bf16.mxu0 %v16012_v22 }
 0x7c4   :  { %9497 = vmatpush1.bf16.msra.mxu1 %v16007_v10 }
 0x7c5   :  { %9599 = vmatpush1.bf16.msra.mxu0 %v16010_v46  ;;  %9498 = vmatprep.subr.bf16.mxu1 %v16015_v11  ;;  %v16022_v46 = vld [vmem:[#allocation10 + $0x3c8] ss:$92 sps:$4 sm:$0xff]  }
 0x7c6   :  { %9600 = vmatprep.subr.bf16.mxu0 %v16018_v43  ;;  %v9116_v58 = vpop.f32.mrb[68].mxu0 }
 0x7c7   :  { %v18086_v51 = vadd.f32 %v9116_v58, %v18028_v3  ;;  %v9167_v5 = vpop.f32.mrb[60].mxu1  ;;  %v9118_v36 = vpop.f32.mrb[69].mxu0 }
 0x7c8   :  { %9499 = vmatpush1.bf16.msra.mxu1 %v16013_v23  ;;  %v18089_v52 = vadd.f32 %v9167_v5, %v17811_v45  ;;  %v18092_v15 = vadd.f32 %v9118_v36, %v18031_v18  ;;  %v9169_v57 = vpop.f32.mrb[61].mxu1  ;;  %v9120_v22 = vpop.f32.mrb[70].mxu0  ;;  %v16027_v23 = vld [vmem:[#allocation10 + $0xffc] ss:$92 sps:$4 sm:$0xff]   ;;  %v16033_v5 = vld [vmem:[#allocation10 + $0x10b4] ss:$92 sps:$4 sm:$0xff]  }
 0x7c9   :  { %9601 = vmatpush1.bf16.msra.mxu0 %v16016_v4  ;;  %v18095_v10 = vadd.f32 %v9169_v57, %v17813_v33  ;;  %9500 = vmatprep.subr.bf16.mxu1 %v16021_v63  ;;  %v18098_v3 = vadd.f32 %v9120_v22, %v18034_v1  ;;  %v9171_v11 = vpop.f32.mrb[62].mxu1  ;;  %v9122_v43 = vpop.f32.mrb[71].mxu0  ;;  %v16030_v4 = vld [vmem:[#allocation10 + $0x484] ss:$92 sps:$4 sm:$0xff]   ;;  %v16025_v63 = vld [vmem:[#allocation10 + $0xff8] ss:$92 sps:$4 sm:$0xff]  }
 0x7ca   :  { %9602 = vmatprep.subr.bf16.mxu0 %v16024_v61  ;;  %v18101_v45 = vadd.f32 %v9171_v11, %v17815_v35  ;;  %v18104_v18 = vadd.f32 %v9122_v43, %v18037_v49  ;;  %v9173_v58 = vpop.f32.mrb[63].mxu1  ;;  %v16028_v1 = vld [vmem:[#allocation10 + $0x480] ss:$92 sps:$4 sm:$0xff]  }
 0x7cb   :  { %v18107_v33 = vadd.f32 %v9173_v58, %v17817_v40  ;;  %v16036_v61 = vld [vmem:[#allocation10 + $0x53c] ss:$92 sps:$4 sm:$0xff]  }
 0x7cc   :  { %9501 = vmatpush1.bf16.msra.mxu1 %v16019_v7 }
 0x7cd   :  { %9603 = vmatpush1.bf16.msra.mxu0 %v16022_v46  ;;  %9502 = vmatprep.subr.bf16.mxu1 %v16027_v23  ;;  %v16031_v46 = vld [vmem:[#allocation10 + $0x10b0] ss:$92 sps:$4 sm:$0xff]   ;;  %v16034_v23 = vld [vmem:[#allocation10 + $0x538] ss:$92 sps:$4 sm:$0xff]  }
 0x7ce   :  { %9604 = vmatprep.subr.bf16.mxu0 %v16030_v4  ;;  %v9126_v36 = vpop.f32.mrb[72].mxu0  ;;  %v16039_v4 = vld [vmem:[#allocation10 + $0x116c] ss:$92 sps:$4 sm:$0xff]  }
 0x7cf   :  { %v18110_v35 = vadd.f32 %v9126_v36, %v18040_v41  ;;  %v9177_v57 = vpop.f32.mrb[64].mxu1  ;;  %v9128_v49 = vpop.f32.mrb[73].mxu0  ;;  %v16042_v36 = vld [vmem:[#allocation10 + $0x5f4] ss:$92 sps:$4 sm:$0xff]  }
 0x7d0   :  { %9503 = vmatpush1.bf16.msra.mxu1 %v16025_v63  ;;  %v18113_v22 = vadd.f32 %v9177_v57, %v17819_v47  ;;  %v18116_v40 = vadd.f32 %v9128_v49, %v18043_v13  ;;  %v9179_v7 = vpop.f32.mrb[65].mxu1  ;;  %v9130_v11 = vpop.f32.mrb[74].mxu0  ;;  %v16037_v47 = vld [vmem:[#allocation10 + $0x1168] ss:$92 sps:$4 sm:$0xff]   ;;  %v16040_v13 = vld [vmem:[#allocation10 + $0x5f0] ss:$92 sps:$4 sm:$0xff]  }
 0x7d1   :  { %9605 = vmatpush1.bf16.msra.mxu0 %v16028_v1  ;;  %v18119_v43 = vadd.f32 %v9179_v7, %v17821_v53  ;;  %9504 = vmatprep.subr.bf16.mxu1 %v16033_v5  ;;  %v9181_v41 = vpop.f32.mrb[66].mxu1  ;;  %v9131_v58 = vpop.f32.mrb[75].mxu0  ;;  %v16045_v57 = vld [vmem:[#allocation10 + $0x1224] ss:$92 sps:$4 sm:$0xff]   ;;  %v16048_v49 = vld [vmem:[#allocation10 + $0x6ac] ss:$92 sps:$4 sm:$0xff]  }
 0x7d2   :  { %9606 = vmatprep.subr.bf16.mxu0 %v16036_v61  ;;  %v9182_v63 = vpop.f32.mrb[67].mxu1  ;;  %v16043_v1 = vld [vmem:[#allocation10 + $0x1220] ss:$92 sps:$4 sm:$0xff]   ;;  %v16046_v53 = vld [vmem:[#allocation10 + $0x6a8] ss:$92 sps:$4 sm:$0xff]  }
 0x7d3   :  { %v16051_v5 = vld [vmem:[#allocation10 + $0x12dc] ss:$92 sps:$4 sm:$0xff]   ;;  %v16054_v7 = vld [vmem:[#allocation10 + $0x764] ss:$92 sps:$4 sm:$0xff]   ;;  %v16057_v11 = vld [vmem:[#allocation10 + $0x1394] ss:$92 sps:$4 sm:$0xff]  }
 0x7d4   :  { %9505 = vmatpush1.bf16.msra.mxu1 %v16031_v46  ;;  %v16049_v61 = vld [vmem:[#allocation10 + $0x12d8] ss:$92 sps:$4 sm:$0xff]   ;;  %v16052_v46 = vld [vmem:[#allocation10 + $0x760] ss:$92 sps:$4 sm:$0xff]   ;;  %v16055_v41 = vld [vmem:[#allocation10 + $0x1390] ss:$92 sps:$4 sm:$0xff]  }
 0x7d5   :  { %9607 = vmatpush1.bf16.msra.mxu0 %v16034_v23  ;;  %9506 = vmatprep.subr.bf16.mxu1 %v16039_v4  ;;  %v16060_v23 = vld [vmem:[#allocation10 + $0x81c] ss:$92 sps:$4 sm:$0xff]   ;;  %v16063_v4 = vld [vmem:[#allocation10 + $0x144c] ss:$92 sps:$4 sm:$0xff]   ;;  %v16066_v63 = vld [vmem:[#allocation10 + $0x8d4] ss:$92 sps:$4 sm:$0xff]  }
 0x7d6   :  { %9608 = vmatprep.subr.bf16.mxu0 %v16042_v36  ;;  %v16058_v58 = vld [vmem:[#allocation10 + $0x818] ss:$92 sps:$4 sm:$0xff]   ;;  %v16061_v36 = vld [vmem:[#allocation10 + $0x1448] ss:$92 sps:$4 sm:$0xff]  }
 0x7d8   :  { %9507 = vmatpush1.bf16.msra.mxu1 %v16037_v47  ;;  %v16064_v47 = vld [vmem:[#allocation10 + $0x8d0] ss:$92 sps:$4 sm:$0xff]  }
 0x7d9   :  { %9609 = vmatpush1.bf16.msra.mxu0 %v16040_v13  ;;  %9508 = vmatprep.subr.bf16.mxu1 %v16045_v57  ;;  %v16069_v13 = vld [vmem:[#allocation10 + $0x1504] ss:$92 sps:$4 sm:$0xff]   ;;  %v16072_v57 = vld [vmem:[#allocation10 + $0x98c] ss:$92 sps:$4 sm:$0xff]  }
 0x7da   :  { %9610 = vmatprep.subr.bf16.mxu0 %v16048_v49  ;;  %v16067_v49 = vld [vmem:[#allocation10 + $0x1500] ss:$92 sps:$4 sm:$0xff]  }
 0x7dc   :  { %9509 = vmatpush1.bf16.msra.mxu1 %v16043_v1  ;;  %v16070_v1 = vld [vmem:[#allocation10 + $0x988] ss:$92 sps:$4 sm:$0xff]  }
 0x7dd   :  { %9611 = vmatpush1.bf16.msra.mxu0 %v16046_v53  ;;  %9510 = vmatprep.subr.bf16.mxu1 %v16051_v5  ;;  %v16075_v53 = vld [vmem:[#allocation10 + $0x15bc] ss:$92 sps:$4 sm:$0xff]   ;;  %v16078_v5 = vld [vmem:[#allocation10 + $0xa44] ss:$92 sps:$4 sm:$0xff]  }
 0x7de   :  { %9612 = vmatprep.subr.bf16.mxu0 %v16054_v7  ;;  %v16073_v7 = vld [vmem:[#allocation10 + $0x15b8] ss:$92 sps:$4 sm:$0xff]  }
 0x7e0   :  { %9511 = vmatpush1.bf16.msra.mxu1 %v16049_v61  ;;  %v16076_v61 = vld [vmem:[#allocation10 + $0xa40] ss:$92 sps:$4 sm:$0xff]  }
 0x7e1   :  { %9613 = vmatpush1.bf16.msra.mxu0 %v16052_v46  ;;  %9512 = vmatprep.subr.bf16.mxu1 %v16057_v11  ;;  %v16081_v46 = vld [vmem:[#allocation10 + $0x1674] ss:$92 sps:$4 sm:$0xff]   ;;  %v16084_v11 = vld [vmem:[#allocation10 + $0xafc] ss:$92 sps:$4 sm:$0xff]  }
 0x7e2   :  { %9614 = vmatprep.subr.bf16.mxu0 %v16060_v23  ;;  %v16079_v23 = vld [vmem:[#allocation10 + $0x1670] ss:$92 sps:$4 sm:$0xff]  }
 0x7e4   :  { %9513 = vmatpush1.bf16.msra.mxu1 %v16055_v41  ;;  %v16082_v41 = vld [vmem:[#allocation10 + $0xaf8] ss:$92 sps:$4 sm:$0xff]  }
 0x7e5   :  { %9615 = vmatpush1.bf16.msra.mxu0 %v16058_v58  ;;  %9514 = vmatprep.subr.bf16.mxu1 %v16063_v4  ;;  %v16087_v58 = vld [vmem:[#allocation10 + $0x172c] ss:$92 sps:$4 sm:$0xff]   ;;  %v16090_v4 = vld [vmem:[#allocation10 + $0xbb4] ss:$92 sps:$4 sm:$0xff]  }
 0x7e6   :  { %9616 = vmatprep.subr.bf16.mxu0 %v16066_v63  ;;  %v16085_v63 = vld [vmem:[#allocation10 + $0x1728] ss:$92 sps:$4 sm:$0xff]  }
 0x7e8   :  { %9515 = vmatpush1.bf16.msra.mxu1 %v16061_v36  ;;  %v16088_v36 = vld [vmem:[#allocation10 + $0xbb0] ss:$92 sps:$4 sm:$0xff]  }
 0x7e9   :  { %9617 = vmatpush1.bf16.msra.mxu0 %v16064_v47  ;;  %9516 = vmatprep.subr.bf16.mxu1 %v16069_v13  ;;  %v16093_v47 = vld [vmem:[#allocation10 + $0x17e4] ss:$92 sps:$4 sm:$0xff]   ;;  %v16096_v13 = vld [vmem:[#allocation10 + $0xc6c] ss:$92 sps:$4 sm:$0xff]  }
 0x7ea   :  { %9618 = vmatprep.subr.bf16.mxu0 %v16072_v57  ;;  %v16091_v57 = vld [vmem:[#allocation10 + $0x17e0] ss:$92 sps:$4 sm:$0xff]  }
 0x7ec   :  { %9517 = vmatpush1.bf16.msra.mxu1 %v16067_v49  ;;  %v16094_v49 = vld [vmem:[#allocation10 + $0xc68] ss:$92 sps:$4 sm:$0xff]  }
 0x7ed   :  { %9619 = vmatpush1.bf16.msra.mxu0 %v16070_v1  ;;  %9518 = vmatprep.subr.bf16.mxu1 %v16075_v53  ;;  %v16099_v1 = vld [vmem:[#allocation10 + $0x189c] ss:$92 sps:$4 sm:$0xff]   ;;  %v16102_v53 = vld [vmem:[#allocation10 + $0xd24] ss:$92 sps:$4 sm:$0xff]  }
 0x7ee   :  { %9620 = vmatprep.subr.bf16.mxu0 %v16078_v5  ;;  %v16097_v5 = vld [vmem:[#allocation10 + $0x1898] ss:$92 sps:$4 sm:$0xff]  }
 0x7f0   :  { %9519 = vmatpush1.bf16.msra.mxu1 %v16073_v7  ;;  %v16100_v7 = vld [vmem:[#allocation10 + $0xd20] ss:$92 sps:$4 sm:$0xff]  }
 0x7f1   :  { %9621 = vmatpush1.bf16.msra.mxu0 %v16076_v61  ;;  %9520 = vmatprep.subr.bf16.mxu1 %v16081_v46  ;;  %v16105_v61 = vld [vmem:[#allocation10 + $0x1954] ss:$92 sps:$4 sm:$0xff]   ;;  %v16108_v46 = vld [vmem:[#allocation10 + $0xddc] ss:$92 sps:$4 sm:$0xff]  }
 0x7f2   :  { %9622 = vmatprep.subr.bf16.mxu0 %v16084_v11  ;;  %v16103_v11 = vld [vmem:[#allocation10 + $0x1950] ss:$92 sps:$4 sm:$0xff]  }
 0x7f4   :  { %9521 = vmatpush1.bf16.msra.mxu1 %v16079_v23  ;;  %v16106_v23 = vld [vmem:[#allocation10 + $0xdd8] ss:$92 sps:$4 sm:$0xff]  }
 0x7f5   :  { %9623 = vmatpush1.bf16.msra.mxu0 %v16082_v41  ;;  %9541 = vmatprep.subr.bf16.mxu1 %v16087_v58  ;;  %v16111_v41 = vld [vmem:[#allocation10 + $0x1a0c] ss:$92 sps:$4 sm:$0xff]   ;;  %v16114_v58 = vld [vmem:[#allocation10 + $0xe94] ss:$92 sps:$4 sm:$0xff]  }
 0x7f6   :  { %9643 = vmatprep.subr.bf16.mxu0 %v16090_v4  ;;  %v16109_v4 = vld [vmem:[#allocation10 + $0x1a08] ss:$92 sps:$4 sm:$0xff]  }
 0x7f7   :  { %9523 = vmatmul.mubr.bf16.vlgmr.msra.gmra.mrb[84].mxu1 %v17755_v26 }
 0x7f8   :  { %9625 = vmatmul.mubr.bf16.vlgmr.msra.gmra.mrb[92].mxu0 %v17751_v42  ;;  %9532 = vmatprep.mubr.bf16.mxu1 %v17771_v38 }
 0x7f9   :  { %9542 = vmatpush1.bf16.msra.mxu1 %v16085_v63  ;;  %9634 = vmatprep.mubr.bf16.mxu0 %v17774_v39  ;;  %v16112_v63 = vld [vmem:[#allocation10 + $0xe90] ss:$92 sps:$4 sm:$0xff]  }
 0x7fa   :  { %9644 = vmatpush1.bf16.msra.mxu0 %v16088_v36  ;;  %9543 = vmatprep.subr.bf16.mxu1 %v16093_v47  ;;  %v16117_v36 = vld [vmem:[#allocation10 + $0x1ac4] ss:$92 sps:$4 sm:$0xff]   ;;  %v16120_v47 = vld [vmem:[#allocation10 + $0xf4c] ss:$92 sps:$4 sm:$0xff]  }
 0x7fb   :  { %9645 = vmatprep.subr.bf16.mxu0 %v16096_v13 }
 0x7fd   :  { %9544 = vmatpush1.bf16.msra.mxu1 %v16091_v57 }
 0x7fe   :  { %9646 = vmatpush1.bf16.msra.mxu0 %v16094_v49  ;;  %9545 = vmatprep.subr.bf16.mxu1 %v16099_v1  ;;  %v16115_v49 = vld [vmem:[#allocation10 + $0x1ac0] ss:$92 sps:$4 sm:$0xff]  }
 0x7ff   :  { %9533 = vmatmul.mubr.bf16.gmra.mrb[88].mxu1 %v17787_v55  ;;  %9647 = vmatprep.subr.bf16.mxu0 %v16102_v53  ;;  %v16118_v53 = vld [vmem:[#allocation10 + $0xf48] ss:$92 sps:$4 sm:$0xff]  }
 0x800   :  { %9635 = vmatmul.mubr.bf16.gmra.mrb[96].mxu0 %v17782_v50  ;;  %9573 = vmatprep.mubr.bf16.mxu1 %v17761_v29 }
 0x801   :  { %9546 = vmatpush1.bf16.msra.mxu1 %v16097_v5  ;;  %9675 = vmatprep.mubr.bf16.mxu0 %v17757_v27 }
 0x802   :  { %9648 = vmatpush1.bf16.msra.mxu0 %v16100_v7  ;;  %9547 = vmatprep.subr.bf16.mxu1 %v16105_v61  ;;  %v16123_v61 = vld [vmem:[#allocation10 + $0x1b7c] ss:$92 sps:$4 sm:$0xff]  }
 0x803   :  { %9649 = vmatprep.subr.bf16.mxu0 %v16108_v46 }
 0x805   :  { %9548 = vmatpush1.bf16.msra.mxu1 %v16103_v11 }
 0x806   :  { %9650 = vmatpush1.bf16.msra.mxu0 %v16106_v23  ;;  %9549 = vmatprep.subr.bf16.mxu1 %v16111_v41  ;;  %v16126_v23 = vld [vmem:[#allocation10 + $0x1004] ss:$92 sps:$4 sm:$0xff]  }
 0x807   :  { %9651 = vmatprep.subr.bf16.mxu0 %v16114_v58  ;;  %v16124_v58 = vld [vmem:[#allocation10 + $0x1000] ss:$92 sps:$4 sm:$0xff]  }
 0x808   :  { %v9320_v13 = vpop.f32.mrb[76].mxu0 }
 0x809   :  { %9550 = vmatpush1.bf16.msra.mxu1 %v16109_v4  ;;  %v18130_v57 = vadd.f32 %v9320_v13, %v17863_v32  ;;  %v9322_v1 = vpop.f32.mrb[77].mxu0  ;;  %v16121_v32 = vld [vmem:[#allocation10 + $0x1b78] ss:$92 sps:$4 sm:$0xff]  }
 0x80a   :  { %9652 = vmatpush1.bf16.msra.mxu0 %v16112_v63  ;;  %9551 = vmatprep.subr.bf16.mxu1 %v16117_v36  ;;  %v18133_v5 = vadd.f32 %v9322_v1, %v17867_v44  ;;  %v9324_v7 = vpop.f32.mrb[78].mxu0  ;;  %v16129_v4 = vld [vmem:[#allocation10 + $0x1c34] ss:$92 sps:$4 sm:$0xff]   ;;  %v16132_v44 = vld [vmem:[#allocation10 + $0x10bc] ss:$92 sps:$4 sm:$0xff]  }
 0x80b   :  { %9653 = vmatprep.subr.bf16.mxu0 %v16120_v47  ;;  %v18136_v46 = vadd.f32 %v9324_v7, %v17871_v6  ;;  %v9326_v11 = vpop.f32.mrb[79].mxu0  ;;  %v16127_v47 = vld [vmem:[#allocation10 + $0x1c30] ss:$92 sps:$4 sm:$0xff]  }
 0x80c   :  { %v18139_v41 = vadd.f32 %v9326_v11, %v17875_v60  ;;  %v16130_v60 = vld [vmem:[#allocation10 + $0x10b8] ss:$92 sps:$4 sm:$0xff]   ;;  %v16135_v1 = vld [vmem:[#allocation10 + $0x1cec] ss:$92 sps:$4 sm:$0xff]  }
 0x80d   :  { %9552 = vmatpush1.bf16.msra.mxu1 %v16115_v49  ;;  %v16138_v7 = vld [vmem:[#allocation10 + $0x1174] ss:$92 sps:$4 sm:$0xff]  }
 0x80e   :  { %9654 = vmatpush1.bf16.msra.mxu0 %v16118_v53  ;;  %9553 = vmatprep.subr.bf16.mxu1 %v16123_v61  ;;  %v16133_v61 = vld [vmem:[#allocation10 + $0x1ce8] ss:$92 sps:$4 sm:$0xff]   ;;  %v16136_v11 = vld [vmem:[#allocation10 + $0x1170] ss:$92 sps:$4 sm:$0xff]  }
 0x80f   :  { %9655 = vmatprep.subr.bf16.mxu0 %v16126_v23  ;;  %v16144_v23 = vld [vmem:[#allocation10 + $0x122c] ss:$92 sps:$4 sm:$0xff]  }
 0x810   :  { %v9330_v63 = vpop.f32.mrb[80].mxu0 }
 0x811   :  { %9554 = vmatpush1.bf16.msra.mxu1 %v16121_v32  ;;  %v18142_v36 = vadd.f32 %v9330_v63, %v17881_v9  ;;  %v9332_v6 = vpop.f32.mrb[81].mxu0  ;;  %v16141_v9 = vld [vmem:[#allocation10 + $0x1da4] ss:$92 sps:$4 sm:$0xff]  }
 0x812   :  { %9656 = vmatpush1.bf16.msra.mxu0 %v16124_v58  ;;  %v18145_v13 = vadd.f32 %v9332_v6, %v17887_v24  ;;  %9555 = vmatprep.subr.bf16.mxu1 %v16129_v4  ;;  %v9334_v49 = vpop.f32.mrb[82].mxu0  ;;  %v16139_v32 = vld [vmem:[#allocation10 + $0x1da0] ss:$92 sps:$4 sm:$0xff]   ;;  %v16142_v24 = vld [vmem:[#allocation10 + $0x1228] ss:$92 sps:$4 sm:$0xff]  }
 0x813   :  { %9657 = vmatprep.subr.bf16.mxu0 %v16132_v44  ;;  %v9335_v53 = vpop.f32.mrb[83].mxu0  ;;  %v16147_v58 = vld [vmem:[#allocation10 + $0x1e5c] ss:$92 sps:$4 sm:$0xff]   ;;  %v16150_v4 = vld [vmem:[#allocation10 + $0x12e4] ss:$92 sps:$4 sm:$0xff]  }
 0x814   :  { %v16145_v44 = vld [vmem:[#allocation10 + $0x1e58] ss:$92 sps:$4 sm:$0xff]   ;;  %v16148_v63 = vld [vmem:[#allocation10 + $0x12e0] ss:$92 sps:$4 sm:$0xff]  }
 0x815   :  { %9556 = vmatpush1.bf16.msra.mxu1 %v16127_v47  ;;  %v16153_v6 = vld [vmem:[#allocation10 + $0x1f14] ss:$92 sps:$4 sm:$0xff]   ;;  %v16156_v47 = vld [vmem:[#allocation10 + $0x139c] ss:$92 sps:$4 sm:$0xff]  }
 0x816   :  { %9658 = vmatpush1.bf16.msra.mxu0 %v16130_v60  ;;  %9557 = vmatprep.subr.bf16.mxu1 %v16135_v1  ;;  %v16151_v60 = vld [vmem:[#allocation10 + $0x1f10] ss:$92 sps:$4 sm:$0xff]   ;;  %v16154_v49 = vld [vmem:[#allocation10 + $0x1398] ss:$92 sps:$4 sm:$0xff]  }
 0x817   :  { %9659 = vmatprep.subr.bf16.mxu0 %v16138_v7  ;;  %v16159_v1 = vld [vmem:[#allocation10 + $0x1fcc] ss:$92 sps:$4 sm:$0xff]   ;;  %v16162_v53 = vld [vmem:[#allocation10 + $0x1454] ss:$92 sps:$4 sm:$0xff]  }
 0x818   :  { %v16157_v7 = vld [vmem:[#allocation10 + $0x1fc8] ss:$92 sps:$4 sm:$0xff]  }
 0x819   :  { %9558 = vmatpush1.bf16.msra.mxu1 %v16133_v61  ;;  %v16160_v61 = vld [vmem:[#allocation10 + $0x1450] ss:$92 sps:$4 sm:$0xff]  }
 0x81a   :  { %9660 = vmatpush1.bf16.msra.mxu0 %v16136_v11  ;;  %9559 = vmatprep.subr.bf16.mxu1 %v16141_v9  ;;  %v16165_v11 = vld [vmem:[#allocation10 + $0x2084] ss:$92 sps:$4 sm:$0xff]   ;;  %v16168_v9 = vld [vmem:[#allocation10 + $0x150c] ss:$92 sps:$4 sm:$0xff]  }
 0x81b   :  { %9661 = vmatprep.subr.bf16.mxu0 %v16144_v23  ;;  %v16163_v23 = vld [vmem:[#allocation10 + $0x2080] ss:$92 sps:$4 sm:$0xff]  }
 0x81d   :  { %9560 = vmatpush1.bf16.msra.mxu1 %v16139_v32  ;;  %v16166_v32 = vld [vmem:[#allocation10 + $0x1508] ss:$92 sps:$4 sm:$0xff]  }
 0x81e   :  { %9662 = vmatpush1.bf16.msra.mxu0 %v16142_v24  ;;  %9561 = vmatprep.subr.bf16.mxu1 %v16147_v58  ;;  %v16171_v24 = vld [vmem:[#allocation10 + $0x213c] ss:$92 sps:$4 sm:$0xff]   ;;  %v16174_v58 = vld [vmem:[#allocation10 + $0x15c4] ss:$92 sps:$4 sm:$0xff]  }
 0x81f   :  { %9663 = vmatprep.subr.bf16.mxu0 %v16150_v4  ;;  %v16169_v4 = vld [vmem:[#allocation10 + $0x2138] ss:$92 sps:$4 sm:$0xff]  }
 0x821   :  { %9562 = vmatpush1.bf16.msra.mxu1 %v16145_v44  ;;  %v16172_v44 = vld [vmem:[#allocation10 + $0x15c0] ss:$92 sps:$4 sm:$0xff]  }
 0x822   :  { %9664 = vmatpush1.bf16.msra.mxu0 %v16148_v63  ;;  %9563 = vmatprep.subr.bf16.mxu1 %v16153_v6  ;;  %v16177_v63 = vld [vmem:[#allocation10 + $0x21f4] ss:$92 sps:$4 sm:$0xff]   ;;  %v16180_v6 = vld [vmem:[#allocation10 + $0x167c] ss:$92 sps:$4 sm:$0xff]  }
 0x823   :  { %9665 = vmatprep.subr.bf16.mxu0 %v16156_v47  ;;  %v16175_v47 = vld [vmem:[#allocation10 + $0x21f0] ss:$92 sps:$4 sm:$0xff]  }
 0x825   :  { %9564 = vmatpush1.bf16.msra.mxu1 %v16151_v60  ;;  %v16178_v60 = vld [vmem:[#allocation10 + $0x1678] ss:$92 sps:$4 sm:$0xff]  }
 0x826   :  { %9666 = vmatpush1.bf16.msra.mxu0 %v16154_v49  ;;  %9565 = vmatprep.subr.bf16.mxu1 %v16159_v1  ;;  %v16186_v49 = vld [vmem:[#allocation10 + $0x3c] ss:$92 sps:$4 sm:$0xff]   ;;  %v16183_v1 = vld [vmem:[#allocation10 + $0x1734] ss:$92 sps:$4 sm:$0xff]  }
 0x827   :  { %9667 = vmatprep.subr.bf16.mxu0 %v16162_v53  ;;  %v16181_v53 = vld [vmem:[#allocation10 + $0x1730] ss:$92 sps:$4 sm:$0xff]  }
 0x829   :  { %9566 = vmatpush1.bf16.msra.mxu1 %v16157_v7  ;;  %v16184_v7 = vld [vmem:[#allocation10 + $0x38] ss:$92 sps:$4 sm:$0xff]  }
 0x82a   :  { %9668 = vmatpush1.bf16.msra.mxu0 %v16160_v61  ;;  %9567 = vmatprep.subr.bf16.mxu1 %v16165_v11  ;;  %v16189_v61 = vld [vmem:[#allocation10 + $0x17ec] ss:$92 sps:$4 sm:$0xff]   ;;  %v16192_v11 = vld [vmem:[#allocation10 + $0xf4] ss:$92 sps:$4 sm:$0xff]  }
 0x82b   :  { %9669 = vmatprep.subr.bf16.mxu0 %v16168_v9  ;;  %v16187_v9 = vld [vmem:[#allocation10 + $0x17e8] ss:$92 sps:$4 sm:$0xff]  }
 0x82d   :  { %9568 = vmatpush1.bf16.msra.mxu1 %v16163_v23  ;;  %v16190_v23 = vld [vmem:[#allocation10 + $0xf0] ss:$92 sps:$4 sm:$0xff]  }
 0x82e   :  { %9670 = vmatpush1.bf16.msra.mxu0 %v16166_v32  ;;  %9569 = vmatprep.subr.bf16.mxu1 %v16171_v24  ;;  %v16195_v32 = vld [vmem:[#allocation10 + $0x18a4] ss:$92 sps:$4 sm:$0xff]   ;;  %v16198_v24 = vld [vmem:[#allocation10 + $0x1ac] ss:$92 sps:$4 sm:$0xff]  }
 0x82f   :  { %9671 = vmatprep.subr.bf16.mxu0 %v16174_v58  ;;  %v16193_v58 = vld [vmem:[#allocation10 + $0x18a0] ss:$92 sps:$4 sm:$0xff]  }
 0x831   :  { %9570 = vmatpush1.bf16.msra.mxu1 %v16169_v4  ;;  %v16196_v4 = vld [vmem:[#allocation10 + $0x1a8] ss:$92 sps:$4 sm:$0xff]  }
 0x832   :  { %9672 = vmatpush1.bf16.msra.mxu0 %v16172_v44  ;;  %9571 = vmatprep.subr.bf16.mxu1 %v16177_v63  ;;  %v16201_v44 = vld [vmem:[#allocation10 + $0x195c] ss:$92 sps:$4 sm:$0xff]   ;;  %v16204_v63 = vld [vmem:[#allocation10 + $0x264] ss:$92 sps:$4 sm:$0xff]  }
 0x833   :  { %9673 = vmatprep.subr.bf16.mxu0 %v16180_v6  ;;  %v16199_v6 = vld [vmem:[#allocation10 + $0x1958] ss:$92 sps:$4 sm:$0xff]  }
 0x835   :  { %9572 = vmatpush1.bf16.msra.mxu1 %v16175_v47  ;;  %v16202_v47 = vld [vmem:[#allocation10 + $0x260] ss:$92 sps:$4 sm:$0xff]  }
 0x836   :  { %9674 = vmatpush1.bf16.msra.mxu0 %v16178_v60  ;;  %9745 = vmatprep.subr.bf16.mxu1 %v16186_v49  ;;  %v16207_v60 = vld [vmem:[#allocation10 + $0x1a14] ss:$92 sps:$4 sm:$0xff]   ;;  %v16210_v49 = vld [vmem:[#allocation10 + $0x31c] ss:$92 sps:$4 sm:$0xff]  }
 0x837   :  { %9694 = vmatprep.subr.bf16.mxu0 %v16183_v1  ;;  %v16205_v1 = vld [vmem:[#allocation10 + $0x1a10] ss:$92 sps:$4 sm:$0xff]  }
 0x838   :  { %9574 = vmatmul.mubr.bf16.vlgmr.msra.gmra.mrb[84].mxu1 %v17759_v28 }
 0x839   :  { %9676 = vmatmul.mubr.bf16.vlgmr.msra.gmra.mrb[100].mxu0 %v17755_v26  ;;  %9583 = vmatprep.mubr.bf16.mxu1 %v17869_v48 }
 0x83a   :  { %9685 = vmatprep.mubr.bf16.mxu0 %v17771_v38  ;;  %9695 = vmatpush1.bf16.msra.mxu0 %v16181_v53  ;;  %v16208_v53 = vld [vmem:[#allocation10 + $0x318] ss:$92 sps:$4 sm:$0xff]  }
 0x83b   :  { %9746 = vmatpush1.bf16.msra.mxu1 %v16184_v7  ;;  %9696 = vmatprep.subr.bf16.mxu0 %v16189_v61  ;;  %v16213_v7 = vld [vmem:[#allocation10 + $0x1acc] ss:$92 sps:$4 sm:$0xff]  }
 0x83c   :  { %9747 = vmatprep.subr.bf16.mxu1 %v16192_v11  ;;  %v16216_v11 = vld [vmem:[#allocation10 + $0x3d4] ss:$92 sps:$4 sm:$0xff]  }
 0x83e   :  { %9697 = vmatpush1.bf16.msra.mxu0 %v16187_v9 }
 0x83f   :  { %9748 = vmatpush1.bf16.msra.mxu1 %v16190_v23  ;;  %9698 = vmatprep.subr.bf16.mxu0 %v16195_v32 }
 0x840   :  { %9584 = vmatmul.mubr.bf16.gmra.mrb[88].mxu1 %v17895_v34  ;;  %9749 = vmatprep.subr.bf16.mxu1 %v16198_v24  ;;  %v16211_v24 = vld [vmem:[#allocation10 + $0x1ac8] ss:$92 sps:$4 sm:$0xff]  }
 0x841   :  { %9686 = vmatmul.mubr.bf16.gmra.mrb[104].mxu0 %v17787_v55  ;;  %9777 = vmatprep.mubr.bf16.mxu1 %v17753_v25 }
 0x842   :  { %9699 = vmatpush1.bf16.msra.mxu0 %v16193_v58  ;;  %9726 = vmatprep.mubr.bf16.mxu0 %v17761_v29 }
 0x843   :  { %9750 = vmatpush1.bf16.msra.mxu1 %v16196_v4  ;;  %9700 = vmatprep.subr.bf16.mxu0 %v16201_v44  ;;  %v16214_v4 = vld [vmem:[#allocation10 + $0x3d0] ss:$92 sps:$4 sm:$0xff]  }
 0x844   :  { %9751 = vmatprep.subr.bf16.mxu1 %v16204_v63 }
 0x846   :  { %9701 = vmatpush1.bf16.msra.mxu0 %v16199_v6  ;;  %v16219_v6 = vld [vmem:[#allocation10 + $0x1b84] ss:$92 sps:$4 sm:$0xff]  }
 0x847   :  { %9752 = vmatpush1.bf16.msra.mxu1 %v16202_v47  ;;  %9702 = vmatprep.subr.bf16.mxu0 %v16207_v60  ;;  %v16217_v60 = vld [vmem:[#allocation10 + $0x1b80] ss:$92 sps:$4 sm:$0xff]  }
 0x848   :  { %9753 = vmatprep.subr.bf16.mxu1 %v16210_v49  ;;  %v9269_v61 = vpop.f32.mrb[68].mxu1  ;;  %v16225_v49 = vld [vmem:[#allocation10 + $0x1c3c] ss:$92 sps:$4 sm:$0xff]  }
 0x849   :  { %v18156_v9 = vadd.f32 %v9269_v61, %v18089_v52  ;;  %v9271_v23 = vpop.f32.mrb[69].mxu1  ;;  %v16222_v52 = vld [vmem:[#allocation10 + $0x48c] ss:$92 sps:$4 sm:$0xff]  }
 0x84a   :  { %9703 = vmatpush1.bf16.msra.mxu0 %v16205_v1  ;;  %v18159_v32 = vadd.f32 %v9271_v23, %v18095_v10  ;;  %v9273_v58 = vpop.f32.mrb[70].mxu1  ;;  %v16220_v10 = vld [vmem:[#allocation10 + $0x488] ss:$92 sps:$4 sm:$0xff]   ;;  %v16226_v23 = vld [vmem:[#allocation10 + $0x540] ss:$92 sps:$4 sm:$0xff]  }
 0x84b   :  { %9754 = vmatpush1.bf16.msra.mxu1 %v16208_v53  ;;  %9704 = vmatprep.subr.bf16.mxu0 %v16213_v7  ;;  %v18162_v44 = vadd.f32 %v9273_v58, %v18101_v45  ;;  %v9275_v63 = vpop.f32.mrb[71].mxu1  ;;  %v16228_v53 = vld [vmem:[#allocation10 + $0x544] ss:$92 sps:$4 sm:$0xff]   ;;  %v16231_v58 = vld [vmem:[#allocation10 + $0x1cf4] ss:$92 sps:$4 sm:$0xff]  }
 0x84c   :  { %9755 = vmatprep.subr.bf16.mxu1 %v16216_v11  ;;  %v18165_v47 = vadd.f32 %v9275_v63, %v18107_v33  ;;  %v16223_v33 = vld [vmem:[#allocation10 + $0x1c38] ss:$92 sps:$4 sm:$0xff]   ;;  %v16229_v63 = vld [vmem:[#allocation10 + $0x1cf0] ss:$92 sps:$4 sm:$0xff]  }
 0x84e   :  { %9705 = vmatpush1.bf16.msra.mxu0 %v16211_v24 }
 0x84f   :  { %9756 = vmatpush1.bf16.msra.mxu1 %v16214_v4  ;;  %9706 = vmatprep.subr.bf16.mxu0 %v16219_v6  ;;  %v16234_v4 = vld [vmem:[#allocation10 + $0x5fc] ss:$92 sps:$4 sm:$0xff]   ;;  %v16237_v6 = vld [vmem:[#allocation10 + $0x1dac] ss:$92 sps:$4 sm:$0xff]  }
 0x850   :  { %9757 = vmatprep.subr.bf16.mxu1 %v16222_v52  ;;  %v9279_v1 = vpop.f32.mrb[72].mxu1  ;;  %v16240_v52 = vld [vmem:[#allocation10 + $0x6b4] ss:$92 sps:$4 sm:$0xff]  }
 0x851   :  { %v18168_v7 = vadd.f32 %v9279_v1, %v18113_v22  ;;  %v9281_v45 = vpop.f32.mrb[73].mxu1  ;;  %v16232_v22 = vld [vmem:[#allocation10 + $0x5f8] ss:$92 sps:$4 sm:$0xff]   ;;  %v16241_v1 = vld [vmem:[#allocation10 + $0x1e60] ss:$92 sps:$4 sm:$0xff]  }
 0x852   :  { %9707 = vmatpush1.bf16.msra.mxu0 %v16217_v60  ;;  %v18171_v61 = vadd.f32 %v9281_v45, %v18119_v43  ;;  %v9283_v11 = vpop.f32.mrb[74].mxu1  ;;  %v16235_v43 = vld [vmem:[#allocation10 + $0x1da8] ss:$92 sps:$4 sm:$0xff]   ;;  %v16238_v60 = vld [vmem:[#allocation10 + $0x6b0] ss:$92 sps:$4 sm:$0xff]  }
 0x853   :  { %19412 = vst [vmem:[#allocation59_spill] sm:$0xff] %v18168_v7  ;;  %9758 = vmatpush1.bf16.msra.mxu1 %v16220_v10  ;;  %9708 = vmatprep.subr.bf16.mxu0 %v16225_v49  ;;  %v9284_v24 = vpop.f32.mrb[75].mxu1  ;;  %v16243_v10 = vld [vmem:[#allocation10 + $0x1e64] ss:$92 sps:$4 sm:$0xff]   ;;  %v16246_v49 = vld [vmem:[#allocation10 + $0x76c] ss:$92 sps:$4 sm:$0xff]  }
 0x854   :  { %9759 = vmatprep.subr.bf16.mxu1 %v16228_v53  ;;  %v16244_v53 = vld [vmem:[#allocation10 + $0x768] ss:$92 sps:$4 sm:$0xff]   ;;  %v16249_v45 = vld [vmem:[#allocation10 + $0x1f1c] ss:$92 sps:$4 sm:$0xff]   ;;  %v16255_v24 = vld [vmem:[#allocation10 + $0x1fd4] ss:$92 sps:$4 sm:$0xff]  }
 0x855   :  { %v16247_v11 = vld [vmem:[#allocation10 + $0x1f18] ss:$92 sps:$4 sm:$0xff]  }
 0x856   :  { %9709 = vmatpush1.bf16.msra.mxu0 %v16223_v33  ;;  %v16252_v33 = vld [vmem:[#allocation10 + $0x824] ss:$92 sps:$4 sm:$0xff]  }
 0x857   :  { %9760 = vmatpush1.bf16.msra.mxu1 %v16226_v23  ;;  %9710 = vmatprep.subr.bf16.mxu0 %v16231_v58  ;;  %v16250_v23 = vld [vmem:[#allocation10 + $0x820] ss:$92 sps:$4 sm:$0xff]  }
 0x858   :  { %9761 = vmatprep.subr.bf16.mxu1 %v16234_v4  ;;  %v16258_v58 = vld [vmem:[#allocation10 + $0x8dc] ss:$92 sps:$4 sm:$0xff]   ;;  %v16253_v4 = vld [vmem:[#allocation10 + $0x1fd0] ss:$92 sps:$4 sm:$0xff]  }
 0x85a   :  { %9711 = vmatpush1.bf16.msra.mxu0 %v16229_v63  ;;  %v16256_v63 = vld [vmem:[#allocation10 + $0x8d8] ss:$92 sps:$4 sm:$0xff]  }
 0x85b   :  { %9762 = vmatpush1.bf16.msra.mxu1 %v16232_v22  ;;  %9712 = vmatprep.subr.bf16.mxu0 %v16237_v6  ;;  %v16261_v22 = vld [vmem:[#allocation10 + $0x208c] ss:$92 sps:$4 sm:$0xff]   ;;  %v16264_v6 = vld [vmem:[#allocation10 + $0x994] ss:$92 sps:$4 sm:$0xff]  }
 0x85c   :  { %9763 = vmatprep.subr.bf16.mxu1 %v16240_v52  ;;  %v16259_v52 = vld [vmem:[#allocation10 + $0x2088] ss:$92 sps:$4 sm:$0xff]  }
 0x85e   :  { %9713 = vmatpush1.bf16.msra.mxu0 %v16235_v43  ;;  %v16262_v43 = vld [vmem:[#allocation10 + $0x990] ss:$92 sps:$4 sm:$0xff]  }
 0x85f   :  { %9764 = vmatpush1.bf16.msra.mxu1 %v16238_v60  ;;  %9714 = vmatprep.subr.bf16.mxu0 %v16243_v10  ;;  %v16267_v60 = vld [vmem:[#allocation10 + $0x2144] ss:$92 sps:$4 sm:$0xff]   ;;  %v16270_v10 = vld [vmem:[#allocation10 + $0xa4c] ss:$92 sps:$4 sm:$0xff]  }
 0x860   :  { %9765 = vmatprep.subr.bf16.mxu1 %v16246_v49  ;;  %v16265_v49 = vld [vmem:[#allocation10 + $0x2140] ss:$92 sps:$4 sm:$0xff]  }
 0x862   :  { %9715 = vmatpush1.bf16.msra.mxu0 %v16241_v1  ;;  %v16268_v1 = vld [vmem:[#allocation10 + $0xa48] ss:$92 sps:$4 sm:$0xff]  }
 0x863   :  { %9766 = vmatpush1.bf16.msra.mxu1 %v16244_v53  ;;  %9716 = vmatprep.subr.bf16.mxu0 %v16249_v45  ;;  %v16273_v53 = vld [vmem:[#allocation10 + $0x21fc] ss:$92 sps:$4 sm:$0xff]   ;;  %v16276_v45 = vld [vmem:[#allocation10 + $0xb04] ss:$92 sps:$4 sm:$0xff]  }
 0x864   :  { %9767 = vmatprep.subr.bf16.mxu1 %v16252_v33  ;;  %v16271_v33 = vld [vmem:[#allocation10 + $0x21f8] ss:$92 sps:$4 sm:$0xff]  }
 0x866   :  { %9717 = vmatpush1.bf16.msra.mxu0 %v16247_v11  ;;  %v16274_v11 = vld [vmem:[#allocation10 + $0xb00] ss:$92 sps:$4 sm:$0xff]  }
 0x867   :  { %9768 = vmatpush1.bf16.msra.mxu1 %v16250_v23  ;;  %9718 = vmatprep.subr.bf16.mxu0 %v16255_v24  ;;  %v16282_v23 = vld [vmem:[#allocation10 + $0x44] ss:$92 sps:$4 sm:$0xff]   ;;  %v16279_v24 = vld [vmem:[#allocation10 + $0xbbc] ss:$92 sps:$4 sm:$0xff]  }
 0x868   :  { %9769 = vmatprep.subr.bf16.mxu1 %v16258_v58  ;;  %v16277_v58 = vld [vmem:[#allocation10 + $0xbb8] ss:$92 sps:$4 sm:$0xff]  }
 0x86a   :  { %9719 = vmatpush1.bf16.msra.mxu0 %v16253_v4  ;;  %v16280_v4 = vld [vmem:[#allocation10 + $0x40] ss:$92 sps:$4 sm:$0xff]  }
 0x86b   :  { %9770 = vmatpush1.bf16.msra.mxu1 %v16256_v63  ;;  %9720 = vmatprep.subr.bf16.mxu0 %v16261_v22  ;;  %v16285_v63 = vld [vmem:[#allocation10 + $0xc74] ss:$92 sps:$4 sm:$0xff]   ;;  %v16288_v22 = vld [vmem:[#allocation10 + $0xfc] ss:$92 sps:$4 sm:$0xff]  }
 0x86c   :  { %9771 = vmatprep.subr.bf16.mxu1 %v16264_v6  ;;  %v16283_v6 = vld [vmem:[#allocation10 + $0xc70] ss:$92 sps:$4 sm:$0xff]  }
 0x86e   :  { %9721 = vmatpush1.bf16.msra.mxu0 %v16259_v52  ;;  %v16286_v52 = vld [vmem:[#allocation10 + $0xf8] ss:$92 sps:$4 sm:$0xff]  }
 0x86f   :  { %9772 = vmatpush1.bf16.msra.mxu1 %v16262_v43  ;;  %9722 = vmatprep.subr.bf16.mxu0 %v16267_v60  ;;  %v16291_v43 = vld [vmem:[#allocation10 + $0xd2c] ss:$92 sps:$4 sm:$0xff]   ;;  %v16294_v60 = vld [vmem:[#allocation10 + $0x1b4] ss:$92 sps:$4 sm:$0xff]  }
 0x870   :  { %9773 = vmatprep.subr.bf16.mxu1 %v16270_v10  ;;  %v16289_v10 = vld [vmem:[#allocation10 + $0xd28] ss:$92 sps:$4 sm:$0xff]  }
 0x872   :  { %9723 = vmatpush1.bf16.msra.mxu0 %v16265_v49  ;;  %v16292_v49 = vld [vmem:[#allocation10 + $0x1b0] ss:$92 sps:$4 sm:$0xff]  }
 0x873   :  { %9774 = vmatpush1.bf16.msra.mxu1 %v16268_v1  ;;  %9724 = vmatprep.subr.bf16.mxu0 %v16273_v53  ;;  %v16297_v1 = vld [vmem:[#allocation10 + $0xde4] ss:$92 sps:$4 sm:$0xff]   ;;  %v16300_v53 = vld [vmem:[#allocation10 + $0x26c] ss:$92 sps:$4 sm:$0xff]  }
 0x874   :  { %9775 = vmatprep.subr.bf16.mxu1 %v16276_v45  ;;  %v16295_v45 = vld [vmem:[#allocation10 + $0xde0] ss:$92 sps:$4 sm:$0xff]  }
 0x876   :  { %9725 = vmatpush1.bf16.msra.mxu0 %v16271_v33  ;;  %v16298_v33 = vld [vmem:[#allocation10 + $0x268] ss:$92 sps:$4 sm:$0xff]  }
 0x877   :  { %9776 = vmatpush1.bf16.msra.mxu1 %v16274_v11  ;;  %9898 = vmatprep.subr.bf16.mxu0 %v16282_v23  ;;  %v16303_v11 = vld [vmem:[#allocation10 + $0xe9c] ss:$92 sps:$4 sm:$0xff]   ;;  %v16306_v23 = vld [vmem:[#allocation10 + $0x324] ss:$92 sps:$4 sm:$0xff]  }
 0x878   :  { %9796 = vmatprep.subr.bf16.mxu1 %v16279_v24  ;;  %v16301_v24 = vld [vmem:[#allocation10 + $0xe98] ss:$92 sps:$4 sm:$0xff]  }
 0x879   :  { %9727 = vmatmul.mubr.bf16.vlgmr.msra.gmra.mrb[100].mxu0 %v17759_v28 }
 0x87a   :  { %9778 = vmatmul.mubr.bf16.vlgmr.msra.gmra.mrb[92].mxu1 %v17751_v42  ;;  %9736 = vmatprep.mubr.bf16.mxu0 %v17869_v48 }
 0x87b   :  { %9787 = vmatprep.mubr.bf16.mxu1 %v17774_v39  ;;  %9797 = vmatpush1.bf16.msra.mxu1 %v16277_v58  ;;  %v16304_v58 = vld [vmem:[#allocation10 + $0x320] ss:$92 sps:$4 sm:$0xff]  }
 0x87c   :  { %9899 = vmatpush1.bf16.msra.mxu0 %v16280_v4  ;;  %9798 = vmatprep.subr.bf16.mxu1 %v16285_v63  ;;  %v16309_v4 = vld [vmem:[#allocation10 + $0xf54] ss:$92 sps:$4 sm:$0xff]  }
 0x87d   :  { %9900 = vmatprep.subr.bf16.mxu0 %v16288_v22  ;;  %v16312_v22 = vld [vmem:[#allocation10 + $0x3dc] ss:$92 sps:$4 sm:$0xff]  }
 0x87f   :  { %9799 = vmatpush1.bf16.msra.mxu1 %v16283_v6 }
 0x880   :  { %9901 = vmatpush1.bf16.msra.mxu0 %v16286_v52  ;;  %9800 = vmatprep.subr.bf16.mxu1 %v16291_v43 }
 0x881   :  { %9737 = vmatmul.mubr.bf16.gmra.mrb[104].mxu0 %v17895_v34  ;;  %9902 = vmatprep.subr.bf16.mxu0 %v16294_v60 }
 0x882   :  { %9788 = vmatmul.mubr.bf16.gmra.mrb[96].mxu1 %v17782_v50  ;;  %9930 = vmatprep.mubr.bf16.mxu0 %v17753_v25 }
 0x883   :  { %9801 = vmatpush1.bf16.msra.mxu1 %v16289_v10  ;;  %9828 = vmatprep.mubr.bf16.mxu1 %v17757_v27 }
 0x884   :  { %9903 = vmatpush1.bf16.msra.mxu0 %v16292_v49  ;;  %9802 = vmatprep.subr.bf16.mxu1 %v16297_v1  ;;  %v16307_v1 = vld [vmem:[#allocation10 + $0xf50] ss:$92 sps:$4 sm:$0xff]  }
 0x885   :  { %9904 = vmatprep.subr.bf16.mxu0 %v16300_v53 }
 0x887   :  { %9803 = vmatpush1.bf16.msra.mxu1 %v16295_v45 }
 0x888   :  { %9905 = vmatpush1.bf16.msra.mxu0 %v16298_v33  ;;  %9804 = vmatprep.subr.bf16.mxu1 %v16303_v11  ;;  %v16310_v33 = vld [vmem:[#allocation10 + $0x3d8] ss:$92 sps:$4 sm:$0xff]  }
 0x889   :  { %9906 = vmatprep.subr.bf16.mxu0 %v16306_v23  ;;  %v9422_v63 = vpop.f32.mrb[84].mxu0 }
 0x88a   :  { %v18182_v6 = vadd.f32 %v9422_v63, %v18130_v57  ;;  %v9473_v52 = vpop.f32.mrb[76].mxu1  ;;  %v9424_v43 = vpop.f32.mrb[85].mxu0 }
 0x88b   :  { %9805 = vmatpush1.bf16.msra.mxu1 %v16301_v24  ;;  %v18185_v60 = vadd.f32 %v9473_v52, %v17823_v59  ;;  %v18188_v10 = vadd.f32 %v9424_v43, %v18133_v5  ;;  %v9475_v49 = vpop.f32.mrb[77].mxu1  ;;  %v9426_v53 = vpop.f32.mrb[86].mxu0  ;;  %v16315_v24 = vld [vmem:[#allocation10 + $0x100c] ss:$92 sps:$4 sm:$0xff]   ;;  %v16321_v52 = vld [vmem:[#allocation10 + $0x10c4] ss:$92 sps:$4 sm:$0xff]  }
 0x88c   :  { %9907 = vmatpush1.bf16.msra.mxu0 %v16304_v58  ;;  %v18191_v45 = vadd.f32 %v9475_v49, %v17825_v2  ;;  %9806 = vmatprep.subr.bf16.mxu1 %v16309_v4  ;;  %v18194_v57 = vadd.f32 %v9426_v53, %v18136_v46  ;;  %v9477_v11 = vpop.f32.mrb[78].mxu1  ;;  %v9428_v23 = vpop.f32.mrb[87].mxu0  ;;  %v16318_v58 = vld [vmem:[#allocation10 + $0x494] ss:$92 sps:$4 sm:$0xff]   ;;  %v16313_v4 = vld [vmem:[#allocation10 + $0x1008] ss:$92 sps:$4 sm:$0xff]  }
 0x88d   :  { %19413 = vst [vmem:[#allocation60_spill] sm:$0xff] %v18188_v10  ;;  %9908 = vmatprep.subr.bf16.mxu0 %v16312_v22  ;;  %v18197_v59 = vadd.f32 %v9477_v11, %v17827_v8  ;;  %v18200_v5 = vadd.f32 %v9428_v23, %v18139_v41  ;;  %v9479_v63 = vpop.f32.mrb[79].mxu1  ;;  %v16316_v46 = vld [vmem:[#allocation10 + $0x490] ss:$92 sps:$4 sm:$0xff]   ;;  %v19421_v10 = vld [vmem:[#allocation43_spill] sm:$0xff] }
 0x88e   :  { %v18203_v2 = vadd.f32 %v9479_v63, %v17829_v12  ;;  %v16324_v22 = vld [vmem:[#allocation10 + $0x54c] ss:$92 sps:$4 sm:$0xff]  }
 0x88f   :  { %19414 = vst [vmem:[#allocation61_spill] sm:$0xff] %v18200_v5  ;;  %9807 = vmatpush1.bf16.msra.mxu1 %v16307_v1 }
 0x890   :  { %9909 = vmatpush1.bf16.msra.mxu0 %v16310_v33  ;;  %9808 = vmatprep.subr.bf16.mxu1 %v16315_v24  ;;  %v16319_v33 = vld [vmem:[#allocation10 + $0x10c0] ss:$92 sps:$4 sm:$0xff]   ;;  %v16322_v24 = vld [vmem:[#allocation10 + $0x548] ss:$92 sps:$4 sm:$0xff]  }
 0x891   :  { %9910 = vmatprep.subr.bf16.mxu0 %v16318_v58  ;;  %v9432_v43 = vpop.f32.mrb[88].mxu0  ;;  %v16327_v58 = vld [vmem:[#allocation10 + $0x117c] ss:$92 sps:$4 sm:$0xff]  }
 0x892   :  { %v18206_v8 = vadd.f32 %v9432_v43, %v18142_v36  ;;  %v9483_v49 = vpop.f32.mrb[80].mxu1  ;;  %v9434_v41 = vpop.f32.mrb[89].mxu0  ;;  %v16330_v43 = vld [vmem:[#allocation10 + $0x604] ss:$92 sps:$4 sm:$0xff]  }
 0x893   :  { %9809 = vmatpush1.bf16.msra.mxu1 %v16313_v4  ;;  %v18209_v53 = vadd.f32 %v9483_v49, %v17831_v17  ;;  %v18212_v12 = vadd.f32 %v9434_v41, %v18145_v13  ;;  %v9485_v1 = vpop.f32.mrb[81].mxu1  ;;  %v9436_v11 = vpop.f32.mrb[90].mxu0  ;;  %v16325_v17 = vld [vmem:[#allocation10 + $0x1178] ss:$92 sps:$4 sm:$0xff]   ;;  %v16328_v13 = vld [vmem:[#allocation10 + $0x600] ss:$92 sps:$4 sm:$0xff]  }
 0x894   :  { %9911 = vmatpush1.bf16.msra.mxu0 %v16316_v46  ;;  %v18215_v23 = vadd.f32 %v9485_v1, %v17833_v21  ;;  %9810 = vmatprep.subr.bf16.mxu1 %v16321_v52  ;;  %v9487_v36 = vpop.f32.mrb[82].mxu1  ;;  %v9437_v63 = vpop.f32.mrb[91].mxu0  ;;  %v16333_v49 = vld [vmem:[#allocation10 + $0x1234] ss:$92 sps:$4 sm:$0xff]   ;;  %v16336_v41 = vld [vmem:[#allocation10 + $0x6bc] ss:$92 sps:$4 sm:$0xff]  }
 0x895   :  { %19415 = vst [vmem:[#allocation62_spill] sm:$0xff] %v18212_v12  ;;  %9912 = vmatprep.subr.bf16.mxu0 %v16324_v22  ;;  %v9488_v4 = vpop.f32.mrb[83].mxu1  ;;  %v16331_v46 = vld [vmem:[#allocation10 + $0x1230] ss:$92 sps:$4 sm:$0xff]   ;;  %v16334_v21 = vld [vmem:[#allocation10 + $0x6b8] ss:$92 sps:$4 sm:$0xff]  }
 0x896   :  { %v16339_v52 = vld [vmem:[#allocation10 + $0x12ec] ss:$92 sps:$4 sm:$0xff]   ;;  %v16342_v1 = vld [vmem:[#allocation10 + $0x774] ss:$92 sps:$4 sm:$0xff]   ;;  %v16345_v11 = vld [vmem:[#allocation10 + $0x13a4] ss:$92 sps:$4 sm:$0xff]  }
 0x897   :  { %9811 = vmatpush1.bf16.msra.mxu1 %v16319_v33  ;;  %v16337_v22 = vld [vmem:[#allocation10 + $0x12e8] ss:$92 sps:$4 sm:$0xff]   ;;  %v16340_v33 = vld [vmem:[#allocation10 + $0x770] ss:$92 sps:$4 sm:$0xff]   ;;  %v16343_v36 = vld [vmem:[#allocation10 + $0x13a0] ss:$92 sps:$4 sm:$0xff]  }
 0x898   :  { %9913 = vmatpush1.bf16.msra.mxu0 %v16322_v24  ;;  %9812 = vmatprep.subr.bf16.mxu1 %v16327_v58  ;;  %v16348_v24 = vld [vmem:[#allocation10 + $0x82c] ss:$92 sps:$4 sm:$0xff]   ;;  %v16351_v58 = vld [vmem:[#allocation10 + $0x145c] ss:$92 sps:$4 sm:$0xff]   ;;  %v16354_v4 = vld [vmem:[#allocation10 + $0x8e4] ss:$92 sps:$4 sm:$0xff]  }
 0x899   :  { %9914 = vmatprep.subr.bf16.mxu0 %v16330_v43  ;;  %v16346_v63 = vld [vmem:[#allocation10 + $0x828] ss:$92 sps:$4 sm:$0xff]   ;;  %v16349_v43 = vld [vmem:[#allocation10 + $0x1458] ss:$92 sps:$4 sm:$0xff]  }
 0x89a   :  { %v16414_v12 = vld [vmem:[#allocation10 + $0x1014] ss:$92 sps:$4 sm:$0xff]  }
 0x89b   :  { %9813 = vmatpush1.bf16.msra.mxu1 %v16325_v17  ;;  %v16352_v17 = vld [vmem:[#allocation10 + $0x8e0] ss:$92 sps:$4 sm:$0xff]  }
 0x89c   :  { %9915 = vmatpush1.bf16.msra.mxu0 %v16328_v13  ;;  %9814 = vmatprep.subr.bf16.mxu1 %v16333_v49  ;;  %v16357_v13 = vld [vmem:[#allocation10 + $0x1514] ss:$92 sps:$4 sm:$0xff]   ;;  %v16360_v49 = vld [vmem:[#allocation10 + $0x99c] ss:$92 sps:$4 sm:$0xff]  }
 0x89d   :  { %9916 = vmatprep.subr.bf16.mxu0 %v16336_v41  ;;  %v16355_v41 = vld [vmem:[#allocation10 + $0x1510] ss:$92 sps:$4 sm:$0xff]  }
 0x89f   :  { %9815 = vmatpush1.bf16.msra.mxu1 %v16331_v46  ;;  %v16358_v46 = vld [vmem:[#allocation10 + $0x998] ss:$92 sps:$4 sm:$0xff]  }
 0x8a0   :  { %9917 = vmatpush1.bf16.msra.mxu0 %v16334_v21  ;;  %9816 = vmatprep.subr.bf16.mxu1 %v16339_v52  ;;  %v16363_v21 = vld [vmem:[#allocation10 + $0x15cc] ss:$92 sps:$4 sm:$0xff]   ;;  %v16366_v52 = vld [vmem:[#allocation10 + $0xa54] ss:$92 sps:$4 sm:$0xff]  }
 0x8a1   :  { %9918 = vmatprep.subr.bf16.mxu0 %v16342_v1  ;;  %v16361_v1 = vld [vmem:[#allocation10 + $0x15c8] ss:$92 sps:$4 sm:$0xff]  }
 0x8a3   :  { %9817 = vmatpush1.bf16.msra.mxu1 %v16337_v22  ;;  %v16364_v22 = vld [vmem:[#allocation10 + $0xa50] ss:$92 sps:$4 sm:$0xff]  }
 0x8a4   :  { %9919 = vmatpush1.bf16.msra.mxu0 %v16340_v33  ;;  %9818 = vmatprep.subr.bf16.mxu1 %v16345_v11  ;;  %v16369_v33 = vld [vmem:[#allocation10 + $0x1684] ss:$92 sps:$4 sm:$0xff]   ;;  %v16372_v11 = vld [vmem:[#allocation10 + $0xb0c] ss:$92 sps:$4 sm:$0xff]  }
 0x8a5   :  { %9920 = vmatprep.subr.bf16.mxu0 %v16348_v24  ;;  %v16367_v24 = vld [vmem:[#allocation10 + $0x1680] ss:$92 sps:$4 sm:$0xff]  }
 0x8a7   :  { %9819 = vmatpush1.bf16.msra.mxu1 %v16343_v36  ;;  %v16370_v36 = vld [vmem:[#allocation10 + $0xb08] ss:$92 sps:$4 sm:$0xff]  }
 0x8a8   :  { %9921 = vmatpush1.bf16.msra.mxu0 %v16346_v63  ;;  %9820 = vmatprep.subr.bf16.mxu1 %v16351_v58  ;;  %v16375_v63 = vld [vmem:[#allocation10 + $0x173c] ss:$92 sps:$4 sm:$0xff]   ;;  %v16378_v58 = vld [vmem:[#allocation10 + $0xbc4] ss:$92 sps:$4 sm:$0xff]  }
 0x8a9   :  { %9922 = vmatprep.subr.bf16.mxu0 %v16354_v4  ;;  %v16373_v4 = vld [vmem:[#allocation10 + $0x1738] ss:$92 sps:$4 sm:$0xff]  }
 0x8ab   :  { %9821 = vmatpush1.bf16.msra.mxu1 %v16349_v43  ;;  %v16376_v43 = vld [vmem:[#allocation10 + $0xbc0] ss:$92 sps:$4 sm:$0xff]  }
 0x8ac   :  { %9923 = vmatpush1.bf16.msra.mxu0 %v16352_v17  ;;  %9822 = vmatprep.subr.bf16.mxu1 %v16357_v13  ;;  %v16381_v17 = vld [vmem:[#allocation10 + $0x17f4] ss:$92 sps:$4 sm:$0xff]   ;;  %v16384_v13 = vld [vmem:[#allocation10 + $0xc7c] ss:$92 sps:$4 sm:$0xff]  }
 0x8ad   :  { %9924 = vmatprep.subr.bf16.mxu0 %v16360_v49  ;;  %v16379_v49 = vld [vmem:[#allocation10 + $0x17f0] ss:$92 sps:$4 sm:$0xff]  }
 0x8af   :  { %9823 = vmatpush1.bf16.msra.mxu1 %v16355_v41  ;;  %v16382_v41 = vld [vmem:[#allocation10 + $0xc78] ss:$92 sps:$4 sm:$0xff]  }
 0x8b0   :  { %9925 = vmatpush1.bf16.msra.mxu0 %v16358_v46  ;;  %9824 = vmatprep.subr.bf16.mxu1 %v16363_v21  ;;  %v16387_v46 = vld [vmem:[#allocation10 + $0x18ac] ss:$92 sps:$4 sm:$0xff]   ;;  %v16390_v21 = vld [vmem:[#allocation10 + $0xd34] ss:$92 sps:$4 sm:$0xff]  }
 0x8b1   :  { %9926 = vmatprep.subr.bf16.mxu0 %v16366_v52  ;;  %v16385_v52 = vld [vmem:[#allocation10 + $0x18a8] ss:$92 sps:$4 sm:$0xff]  }
 0x8b3   :  { %9825 = vmatpush1.bf16.msra.mxu1 %v16361_v1  ;;  %v16388_v1 = vld [vmem:[#allocation10 + $0xd30] ss:$92 sps:$4 sm:$0xff]  }
 0x8b4   :  { %9927 = vmatpush1.bf16.msra.mxu0 %v16364_v22  ;;  %9826 = vmatprep.subr.bf16.mxu1 %v16369_v33  ;;  %v16393_v22 = vld [vmem:[#allocation10 + $0x1964] ss:$92 sps:$4 sm:$0xff]   ;;  %v16396_v33 = vld [vmem:[#allocation10 + $0xdec] ss:$92 sps:$4 sm:$0xff]  }
 0x8b5   :  { %9928 = vmatprep.subr.bf16.mxu0 %v16372_v11  ;;  %v16391_v11 = vld [vmem:[#allocation10 + $0x1960] ss:$92 sps:$4 sm:$0xff]  }
 0x8b7   :  { %9827 = vmatpush1.bf16.msra.mxu1 %v16367_v24  ;;  %v16394_v24 = vld [vmem:[#allocation10 + $0xde8] ss:$92 sps:$4 sm:$0xff]  }
 0x8b8   :  { %9929 = vmatpush1.bf16.msra.mxu0 %v16370_v36  ;;  %9847 = vmatprep.subr.bf16.mxu1 %v16375_v63  ;;  %v16399_v36 = vld [vmem:[#allocation10 + $0x1a1c] ss:$92 sps:$4 sm:$0xff]   ;;  %v16402_v63 = vld [vmem:[#allocation10 + $0xea4] ss:$92 sps:$4 sm:$0xff]  }
 0x8b9   :  { %9949 = vmatprep.subr.bf16.mxu0 %v16378_v58  ;;  %v16397_v58 = vld [vmem:[#allocation10 + $0x1a18] ss:$92 sps:$4 sm:$0xff]  }
 0x8ba   :  { %9829 = vmatmul.mubr.bf16.vlgmr.msra.gmra.mrb[100].mxu1 %v17755_v26 }
 0x8bb   :  { %9931 = vmatmul.mubr.bf16.vlgmr.msra.gmra.mrb[108].mxu0 %v17751_v42  ;;  %9838 = vmatprep.mubr.bf16.mxu1 %v17771_v38 }
 0x8bc   :  { %9848 = vmatpush1.bf16.msra.mxu1 %v16373_v4  ;;  %9940 = vmatprep.mubr.bf16.mxu0 %v17774_v39  ;;  %v16400_v4 = vld [vmem:[#allocation10 + $0xea0] ss:$92 sps:$4 sm:$0xff]  }
 0x8bd   :  { %9950 = vmatpush1.bf16.msra.mxu0 %v16376_v43  ;;  %9849 = vmatprep.subr.bf16.mxu1 %v16381_v17  ;;  %v16405_v43 = vld [vmem:[#allocation10 + $0x1ad4] ss:$92 sps:$4 sm:$0xff]   ;;  %v16408_v17 = vld [vmem:[#allocation10 + $0xf5c] ss:$92 sps:$4 sm:$0xff]  }
 0x8be   :  { %9951 = vmatprep.subr.bf16.mxu0 %v16384_v13 }
 0x8c0   :  { %9850 = vmatpush1.bf16.msra.mxu1 %v16379_v49  ;;  %v19416_v49 = vld [vmem:[#allocation35_spill] sm:$0xff] }
 0x8c1   :  { %9952 = vmatpush1.bf16.msra.mxu0 %v16382_v41  ;;  %9851 = vmatprep.subr.bf16.mxu1 %v16387_v46 }
 0x8c2   :  { %9839 = vmatmul.mubr.bf16.gmra.mrb[104].mxu1 %v17787_v55  ;;  %9953 = vmatprep.subr.bf16.mxu0 %v16390_v21  ;;  %v16403_v21 = vld [vmem:[#allocation10 + $0x1ad0] ss:$92 sps:$4 sm:$0xff]  }
 0x8c3   :  { %9941 = vmatmul.mubr.bf16.gmra.mrb[112].mxu0 %v17782_v50  ;;  %9879 = vmatprep.mubr.bf16.mxu1 %v17761_v29 }
 0x8c4   :  { %9852 = vmatpush1.bf16.msra.mxu1 %v16385_v52  ;;  %9981 = vmatprep.mubr.bf16.mxu0 %v17757_v27  ;;  %v19417_v52 = vld [vmem:[#allocation37_spill] sm:$0xff] }
 0x8c5   :  { %9954 = vmatpush1.bf16.msra.mxu0 %v16388_v1  ;;  %9853 = vmatprep.subr.bf16.mxu1 %v16393_v22  ;;  %v16406_v22 = vld [vmem:[#allocation10 + $0xf58] ss:$92 sps:$4 sm:$0xff]  }
 0x8c6   :  { %9955 = vmatprep.subr.bf16.mxu0 %v16396_v33 }
 0x8c8   :  { %9854 = vmatpush1.bf16.msra.mxu1 %v16391_v11  ;;  %v16411_v11 = vld [vmem:[#allocation10 + $0x1b8c] ss:$92 sps:$4 sm:$0xff]  }
 0x8c9   :  { %9956 = vmatpush1.bf16.msra.mxu0 %v16394_v24  ;;  %9855 = vmatprep.subr.bf16.mxu1 %v16399_v36  ;;  %v19418_v24 = vld [vmem:[#allocation39_spill] sm:$0xff] }
 0x8ca   :  { %9957 = vmatprep.subr.bf16.mxu0 %v16402_v63 }
 0x8cb   :  { %v9626_v13 = vpop.f32.mrb[92].mxu0 }
 0x8cc   :  { %9856 = vmatpush1.bf16.msra.mxu1 %v16397_v58  ;;  %v18226_v41 = vadd.f32 %v9626_v13, %v19416_v49  ;;  %v9628_v46 = vpop.f32.mrb[93].mxu0  ;;  %v19419_v58 = vld [vmem:[#allocation40_spill] sm:$0xff]  ;;  %v16409_v13 = vld [vmem:[#allocation10 + $0x1b88] ss:$92 sps:$4 sm:$0xff]  }
 0x8cd   :  { %9958 = vmatpush1.bf16.msra.mxu0 %v16400_v4  ;;  %v18229_v1 = vadd.f32 %v9628_v46, %v19417_v52  ;;  %9857 = vmatprep.subr.bf16.mxu1 %v16405_v43  ;;  %v9630_v33 = vpop.f32.mrb[94].mxu0  ;;  %v16412_v4 = vld [vmem:[#allocation10 + $0x1010] ss:$92 sps:$4 sm:$0xff]   ;;  %v16417_v49 = vld [vmem:[#allocation10 + $0x1c44] ss:$92 sps:$4 sm:$0xff]  }
 0x8ce   :  { %9959 = vmatprep.subr.bf16.mxu0 %v16408_v17  ;;  %v18232_v36 = vadd.f32 %v9630_v33, %v19418_v24  ;;  %v9632_v63 = vpop.f32.mrb[95].mxu0  ;;  %v16420_v43 = vld [vmem:[#allocation10 + $0x10cc] ss:$92 sps:$4 sm:$0xff]   ;;  %v16415_v24 = vld [vmem:[#allocation10 + $0x1c40] ss:$92 sps:$4 sm:$0xff]  }
 0x8cf   :  { %v18235_v5 = vadd.f32 %v9632_v63, %v19419_v58  ;;  %v19420_v52 = vld [vmem:[#allocation41_spill] sm:$0xff] }
 0x8d0   :  { %9858 = vmatpush1.bf16.msra.mxu1 %v16403_v21  ;;  %v16418_v21 = vld [vmem:[#allocation10 + $0x10c8] ss:$92 sps:$4 sm:$0xff]  }
 0x8d1   :  { %9960 = vmatpush1.bf16.msra.mxu0 %v16406_v22  ;;  %9859 = vmatprep.subr.bf16.mxu1 %v16411_v11  ;;  %v16423_v22 = vld [vmem:[#allocation10 + $0x1cfc] ss:$92 sps:$4 sm:$0xff]   ;;  %v16426_v58 = vld [vmem:[#allocation10 + $0x1184] ss:$92 sps:$4 sm:$0xff]  }
 0x8d2   :  { %9961 = vmatprep.subr.bf16.mxu0 %v16414_v12  ;;  %v16421_v12 = vld [vmem:[#allocation10 + $0x1cf8] ss:$92 sps:$4 sm:$0xff]  }
 0x8d3   :  { %v9636_v46 = vpop.f32.mrb[96].mxu0 }
 0x8d4   :  { %9860 = vmatpush1.bf16.msra.mxu1 %v16409_v13  ;;  %v18238_v17 = vadd.f32 %v9636_v46, %v19420_v52  ;;  %v9638_v33 = vpop.f32.mrb[97].mxu0  ;;  %v16424_v13 = vld [vmem:[#allocation10 + $0x1180] ss:$92 sps:$4 sm:$0xff]   ;;  %v16429_v46 = vld [vmem:[#allocation10 + $0x1db4] ss:$92 sps:$4 sm:$0xff]  }
 0x8d5   :  { %9962 = vmatpush1.bf16.msra.mxu0 %v16412_v4  ;;  %v18241_v7 = vadd.f32 %v9638_v33, %v19421_v10  ;;  %9861 = vmatprep.subr.bf16.mxu1 %v16417_v49  ;;  %v9640_v63 = vpop.f32.mrb[98].mxu0  ;;  %v16432_v52 = vld [vmem:[#allocation10 + $0x123c] ss:$92 sps:$4 sm:$0xff]   ;;  %v16427_v4 = vld [vmem:[#allocation10 + $0x1db0] ss:$92 sps:$4 sm:$0xff]  }
 0x8d6   :  { %9963 = vmatprep.subr.bf16.mxu0 %v16420_v43  ;;  %v9641_v11 = vpop.f32.mrb[99].mxu0  ;;  %v16430_v10 = vld [vmem:[#allocation10 + $0x1238] ss:$92 sps:$4 sm:$0xff]   ;;  %v16435_v49 = vld [vmem:[#allocation10 + $0x1e6c] ss:$92 sps:$4 sm:$0xff]  }
 0x8d7   :  { %v16438_v33 = vld [vmem:[#allocation10 + $0x12f4] ss:$92 sps:$4 sm:$0xff]   ;;  %v16433_v43 = vld [vmem:[#allocation10 + $0x1e68] ss:$92 sps:$4 sm:$0xff]  }
 0x8d8   :  { %9862 = vmatpush1.bf16.msra.mxu1 %v16415_v24  ;;  %v16436_v24 = vld [vmem:[#allocation10 + $0x12f0] ss:$92 sps:$4 sm:$0xff]   ;;  %v16441_v63 = vld [vmem:[#allocation10 + $0x1f24] ss:$92 sps:$4 sm:$0xff]  }
 0x8d9   :  { %9964 = vmatpush1.bf16.msra.mxu0 %v16418_v21  ;;  %9863 = vmatprep.subr.bf16.mxu1 %v16423_v22  ;;  %v16444_v21 = vld [vmem:[#allocation10 + $0x13ac] ss:$92 sps:$4 sm:$0xff]   ;;  %v16439_v22 = vld [vmem:[#allocation10 + $0x1f20] ss:$92 sps:$4 sm:$0xff]  }
 0x8da   :  { %9965 = vmatprep.subr.bf16.mxu0 %v16426_v58  ;;  %v16442_v11 = vld [vmem:[#allocation10 + $0x13a8] ss:$92 sps:$4 sm:$0xff]   ;;  %v16447_v58 = vld [vmem:[#allocation10 + $0x1fdc] ss:$92 sps:$4 sm:$0xff]  }
 0x8dc   :  { %9864 = vmatpush1.bf16.msra.mxu1 %v16421_v12  ;;  %v16450_v12 = vld [vmem:[#allocation10 + $0x1464] ss:$92 sps:$4 sm:$0xff]  }
 0x8dd   :  { %9966 = vmatpush1.bf16.msra.mxu0 %v16424_v13  ;;  %9865 = vmatprep.subr.bf16.mxu1 %v16429_v46  ;;  %v16445_v13 = vld [vmem:[#allocation10 + $0x1fd8] ss:$92 sps:$4 sm:$0xff]   ;;  %v16448_v46 = vld [vmem:[#allocation10 + $0x1460] ss:$92 sps:$4 sm:$0xff]  }
 0x8de   :  { %9967 = vmatprep.subr.bf16.mxu0 %v16432_v52  ;;  %v16453_v52 = vld [vmem:[#allocation10 + $0x2094] ss:$92 sps:$4 sm:$0xff]  }
 0x8e0   :  { %9866 = vmatpush1.bf16.msra.mxu1 %v16427_v4  ;;  %v16456_v4 = vld [vmem:[#allocation10 + $0x151c] ss:$92 sps:$4 sm:$0xff]  }
 0x8e1   :  { %9968 = vmatpush1.bf16.msra.mxu0 %v16430_v10  ;;  %9867 = vmatprep.subr.bf16.mxu1 %v16435_v49  ;;  %v16451_v10 = vld [vmem:[#allocation10 + $0x2090] ss:$92 sps:$4 sm:$0xff]   ;;  %v16454_v49 = vld [vmem:[#allocation10 + $0x1518] ss:$92 sps:$4 sm:$0xff]  }
 0x8e2   :  { %9969 = vmatprep.subr.bf16.mxu0 %v16438_v33  ;;  %v16459_v33 = vld [vmem:[#allocation10 + $0x214c] ss:$92 sps:$4 sm:$0xff]  }
 0x8e4   :  { %9868 = vmatpush1.bf16.msra.mxu1 %v16433_v43  ;;  %v16462_v43 = vld [vmem:[#allocation10 + $0x15d4] ss:$92 sps:$4 sm:$0xff]  }
 0x8e5   :  { %9970 = vmatpush1.bf16.msra.mxu0 %v16436_v24  ;;  %9869 = vmatprep.subr.bf16.mxu1 %v16441_v63  ;;  %v16457_v24 = vld [vmem:[#allocation10 + $0x2148] ss:$92 sps:$4 sm:$0xff]   ;;  %v16460_v63 = vld [vmem:[#allocation10 + $0x15d0] ss:$92 sps:$4 sm:$0xff]  }
 0x8e6   :  { %9971 = vmatprep.subr.bf16.mxu0 %v16444_v21  ;;  %v16465_v21 = vld [vmem:[#allocation10 + $0x2204] ss:$92 sps:$4 sm:$0xff]  }
 0x8e8   :  { %9870 = vmatpush1.bf16.msra.mxu1 %v16439_v22  ;;  %v16468_v22 = vld [vmem:[#allocation10 + $0x168c] ss:$92 sps:$4 sm:$0xff]  }
 0x8e9   :  { %9972 = vmatpush1.bf16.msra.mxu0 %v16442_v11  ;;  %9871 = vmatprep.subr.bf16.mxu1 %v16447_v58  ;;  %v16463_v11 = vld [vmem:[#allocation10 + $0x2200] ss:$92 sps:$4 sm:$0xff]   ;;  %v16466_v58 = vld [vmem:[#allocation10 + $0x1688] ss:$92 sps:$4 sm:$0xff]  }
 0x8ea   :  { %9973 = vmatprep.subr.bf16.mxu0 %v16450_v12  ;;  %v16474_v12 = vld [vmem:[#allocation10 + $0x4c] ss:$92 sps:$4 sm:$0xff]  }
 0x8ec   :  { %9872 = vmatpush1.bf16.msra.mxu1 %v16445_v13  ;;  %v16471_v13 = vld [vmem:[#allocation10 + $0x1744] ss:$92 sps:$4 sm:$0xff]  }
 0x8ed   :  { %9974 = vmatpush1.bf16.msra.mxu0 %v16448_v46  ;;  %9873 = vmatprep.subr.bf16.mxu1 %v16453_v52  ;;  %v16469_v46 = vld [vmem:[#allocation10 + $0x1740] ss:$92 sps:$4 sm:$0xff]   ;;  %v16472_v52 = vld [vmem:[#allocation10 + $0x48] ss:$92 sps:$4 sm:$0xff]  }
 0x8ee   :  { %9975 = vmatprep.subr.bf16.mxu0 %v16456_v4  ;;  %v16477_v4 = vld [vmem:[#allocation10 + $0x17fc] ss:$92 sps:$4 sm:$0xff]  }
 0x8f0   :  { %9874 = vmatpush1.bf16.msra.mxu1 %v16451_v10  ;;  %v16480_v10 = vld [vmem:[#allocation10 + $0x104] ss:$92 sps:$4 sm:$0xff]  }
 0x8f1   :  { %9976 = vmatpush1.bf16.msra.mxu0 %v16454_v49  ;;  %9875 = vmatprep.subr.bf16.mxu1 %v16459_v33  ;;  %v16475_v49 = vld [vmem:[#allocation10 + $0x17f8] ss:$92 sps:$4 sm:$0xff]   ;;  %v16478_v33 = vld [vmem:[#allocation10 + $0x100] ss:$92 sps:$4 sm:$0xff]  }
 0x8f2   :  { %9977 = vmatprep.subr.bf16.mxu0 %v16462_v43  ;;  %v16483_v43 = vld [vmem:[#allocation10 + $0x18b4] ss:$92 sps:$4 sm:$0xff]  }
 0x8f4   :  { %9876 = vmatpush1.bf16.msra.mxu1 %v16457_v24  ;;  %v16486_v24 = vld [vmem:[#allocation10 + $0x1bc] ss:$92 sps:$4 sm:$0xff]  }
 0x8f5   :  { %9978 = vmatpush1.bf16.msra.mxu0 %v16460_v63  ;;  %9877 = vmatprep.subr.bf16.mxu1 %v16465_v21  ;;  %v16481_v63 = vld [vmem:[#allocation10 + $0x18b0] ss:$92 sps:$4 sm:$0xff]   ;;  %v16484_v21 = vld [vmem:[#allocation10 + $0x1b8] ss:$92 sps:$4 sm:$0xff]  }
 0x8f6   :  { %9979 = vmatprep.subr.bf16.mxu0 %v16468_v22  ;;  %v16489_v22 = vld [vmem:[#allocation10 + $0x196c] ss:$92 sps:$4 sm:$0xff]  }
 0x8f8   :  { %9878 = vmatpush1.bf16.msra.mxu1 %v16463_v11  ;;  %v16492_v11 = vld [vmem:[#allocation10 + $0x274] ss:$92 sps:$4 sm:$0xff]  }
 0x8f9   :  { %9980 = vmatpush1.bf16.msra.mxu0 %v16466_v58  ;;  %10051 = vmatprep.subr.bf16.mxu1 %v16474_v12  ;;  %v16487_v58 = vld [vmem:[#allocation10 + $0x1968] ss:$92 sps:$4 sm:$0xff]   ;;  %v16490_v12 = vld [vmem:[#allocation10 + $0x270] ss:$92 sps:$4 sm:$0xff]  }
 0x8fa   :  { %10000 = vmatprep.subr.bf16.mxu0 %v16471_v13  ;;  %v16495_v13 = vld [vmem:[#allocation10 + $0x1a24] ss:$92 sps:$4 sm:$0xff]  }
 0x8fb   :  { %9880 = vmatmul.mubr.bf16.vlgmr.msra.gmra.mrb[100].mxu1 %v17759_v28 }
 0x8fc   :  { %9982 = vmatmul.mubr.bf16.vlgmr.msra.gmra.mrb[116].mxu0 %v17755_v26  ;;  %9889 = vmatprep.mubr.bf16.mxu1 %v17869_v48 }
 0x8fd   :  { %9991 = vmatprep.mubr.bf16.mxu0 %v17771_v38  ;;  %10001 = vmatpush1.bf16.msra.mxu0 %v16469_v46  ;;  %v16498_v46 = vld [vmem:[#allocation10 + $0x32c] ss:$92 sps:$4 sm:$0xff]  }
 0x8fe   :  { %10052 = vmatpush1.bf16.msra.mxu1 %v16472_v52  ;;  %10002 = vmatprep.subr.bf16.mxu0 %v16477_v4  ;;  %v16493_v52 = vld [vmem:[#allocation10 + $0x1a20] ss:$92 sps:$4 sm:$0xff]   ;;  %v16496_v4 = vld [vmem:[#allocation10 + $0x328] ss:$92 sps:$4 sm:$0xff]  }
 0x8ff   :  { %10053 = vmatprep.subr.bf16.mxu1 %v16480_v10  ;;  %v16501_v10 = vld [vmem:[#allocation10 + $0x1adc] ss:$92 sps:$4 sm:$0xff]  }
 0x901   :  { %10003 = vmatpush1.bf16.msra.mxu0 %v16475_v49 }
 0x902   :  { %10054 = vmatpush1.bf16.msra.mxu1 %v16478_v33  ;;  %10004 = vmatprep.subr.bf16.mxu0 %v16483_v43  ;;  %v16504_v33 = vld [vmem:[#allocation10 + $0x3e4] ss:$92 sps:$4 sm:$0xff]  }
 0x903   :  { %9890 = vmatmul.mubr.bf16.gmra.mrb[104].mxu1 %v17895_v34  ;;  %10055 = vmatprep.subr.bf16.mxu1 %v16486_v24 }
 0x904   :  { %9992 = vmatmul.mubr.bf16.gmra.mrb[120].mxu0 %v17787_v55  ;;  %10083 = vmatprep.mubr.bf16.mxu1 %v17753_v25 }
 0x905   :  { %10005 = vmatpush1.bf16.msra.mxu0 %v16481_v63  ;;  %10032 = vmatprep.mubr.bf16.mxu0 %v17761_v29 }
 0x906   :  { %10056 = vmatpush1.bf16.msra.mxu1 %v16484_v21  ;;  %10006 = vmatprep.subr.bf16.mxu0 %v16489_v22  ;;  %v16499_v21 = vld [vmem:[#allocation10 + $0x1ad8] ss:$92 sps:$4 sm:$0xff]  }
 0x907   :  { %10057 = vmatprep.subr.bf16.mxu1 %v16492_v11  ;;  %v16502_v11 = vld [vmem:[#allocation10 + $0x3e0] ss:$92 sps:$4 sm:$0xff]  }
 0x909   :  { %10007 = vmatpush1.bf16.msra.mxu0 %v16487_v58 }
 0x90a   :  { %10058 = vmatpush1.bf16.msra.mxu1 %v16490_v12  ;;  %10008 = vmatprep.subr.bf16.mxu0 %v16495_v13  ;;  %v16507_v13 = vld [vmem:[#allocation10 + $0x1b94] ss:$92 sps:$4 sm:$0xff]  }
 0x90b   :  { %10059 = vmatprep.subr.bf16.mxu1 %v16498_v46  ;;  %v9575_v49 = vpop.f32.mrb[84].mxu1 }
 0x90c   :  { %v18252_v43 = vadd.f32 %v9575_v49, %v18185_v60  ;;  %v9577_v24 = vpop.f32.mrb[85].mxu1  ;;  %v16510_v60 = vld [vmem:[#allocation10 + $0x49c] ss:$92 sps:$4 sm:$0xff]   ;;  %v16513_v49 = vld [vmem:[#allocation10 + $0x1c4c] ss:$92 sps:$4 sm:$0xff]  }
 0x90d   :  { %10009 = vmatpush1.bf16.msra.mxu0 %v16493_v52  ;;  %v18255_v63 = vadd.f32 %v9577_v24, %v18191_v45  ;;  %v9579_v22 = vpop.f32.mrb[86].mxu1  ;;  %v16505_v52 = vld [vmem:[#allocation10 + $0x1b90] ss:$92 sps:$4 sm:$0xff]   ;;  %v16508_v45 = vld [vmem:[#allocation10 + $0x498] ss:$92 sps:$4 sm:$0xff]  }
 0x90e   :  { %19422 = vst [vmem:[#allocation35_spill] sm:$0xff] %v18252_v43  ;;  %10060 = vmatpush1.bf16.msra.mxu1 %v16496_v4  ;;  %10010 = vmatprep.subr.bf16.mxu0 %v16501_v10  ;;  %v18258_v58 = vadd.f32 %v9579_v22, %v18197_v59  ;;  %v9581_v12 = vpop.f32.mrb[87].mxu1  ;;  %v16516_v10 = vld [vmem:[#allocation10 + $0x554] ss:$92 sps:$4 sm:$0xff]  }
 0x90f   :  { %19423 = vst [vmem:[#allocation37_spill] sm:$0xff] %v18255_v63  ;;  %10061 = vmatprep.subr.bf16.mxu1 %v16504_v33  ;;  %v18261_v46 = vadd.f32 %v9581_v12, %v18203_v2  ;;  %v16511_v2 = vld [vmem:[#allocation10 + $0x1c48] ss:$92 sps:$4 sm:$0xff]   ;;  %v16618_v63 = vld [vmem:[#allocation10 + $0x614] ss:$92 sps:$4 sm:$0xff]  }
 0x910   :  { %19424 = vst [vmem:[#allocation39_spill] sm:$0xff] %v18258_v58  ;;  %v16519_v12 = vld [vmem:[#allocation10 + $0x1d04] ss:$92 sps:$4 sm:$0xff]   ;;  %v19445_v58 = vld [vmem:[#allocation50_spill] sm:$0xff] }
 0x911   :  { %19425 = vst [vmem:[#allocation40_spill] sm:$0xff] %v18261_v46  ;;  %10011 = vmatpush1.bf16.msra.mxu0 %v16499_v21  ;;  %v16514_v21 = vld [vmem:[#allocation10 + $0x550] ss:$92 sps:$4 sm:$0xff]   ;;  %v16598_v46 = vld [vmem:[#allocation10 + $0x3e8] ss:$92 sps:$4 sm:$0xff]  }
 0x912   :  { %10062 = vmatpush1.bf16.msra.mxu1 %v16502_v11  ;;  %10012 = vmatprep.subr.bf16.mxu0 %v16507_v13  ;;  %v16522_v13 = vld [vmem:[#allocation10 + $0x60c] ss:$92 sps:$4 sm:$0xff]  }
 0x913   :  { %10063 = vmatprep.subr.bf16.mxu1 %v16510_v60  ;;  %v9585_v4 = vpop.f32.mrb[88].mxu1  ;;  %v16517_v60 = vld [vmem:[#allocation10 + $0x1d00] ss:$92 sps:$4 sm:$0xff]  }
 0x914   :  { %v18264_v24 = vadd.f32 %v9585_v4, %v18209_v53  ;;  %v9587_v59 = vpop.f32.mrb[89].mxu1  ;;  %v16520_v53 = vld [vmem:[#allocation10 + $0x608] ss:$92 sps:$4 sm:$0xff]   ;;  %v16525_v4 = vld [vmem:[#allocation10 + $0x1dbc] ss:$92 sps:$4 sm:$0xff]  }
 0x915   :  { %10013 = vmatpush1.bf16.msra.mxu0 %v16505_v52  ;;  %v18267_v33 = vadd.f32 %v9587_v59, %v18215_v23  ;;  %v9589_v22 = vpop.f32.mrb[90].mxu1  ;;  %v16528_v52 = vld [vmem:[#allocation10 + $0x6c4] ss:$92 sps:$4 sm:$0xff]   ;;  %v16523_v23 = vld [vmem:[#allocation10 + $0x1db8] ss:$92 sps:$4 sm:$0xff]  }
 0x916   :  { %19426 = vst [vmem:[#allocation41_spill] sm:$0xff] %v18264_v24  ;;  %10064 = vmatpush1.bf16.msra.mxu1 %v16508_v45  ;;  %10014 = vmatprep.subr.bf16.mxu0 %v16513_v49  ;;  %v9590_v11 = vpop.f32.mrb[91].mxu1  ;;  %v16526_v59 = vld [vmem:[#allocation10 + $0x6c0] ss:$92 sps:$4 sm:$0xff]   ;;  %v16531_v45 = vld [vmem:[#allocation10 + $0x1e74] ss:$92 sps:$4 sm:$0xff]  }
 0x917   :  { %19427 = vst [vmem:[#allocation43_spill] sm:$0xff] %v18267_v33  ;;  %10065 = vmatprep.subr.bf16.mxu1 %v16516_v10  ;;  %v16534_v49 = vld [vmem:[#allocation10 + $0x77c] ss:$92 sps:$4 sm:$0xff]   ;;  %v16529_v22 = vld [vmem:[#allocation10 + $0x1e70] ss:$92 sps:$4 sm:$0xff]  }
 0x918   :  { %v16532_v10 = vld [vmem:[#allocation10 + $0x778] ss:$92 sps:$4 sm:$0xff]   ;;  %v16535_v11 = vld [vmem:[#allocation10 + $0x1f28] ss:$92 sps:$4 sm:$0xff]   ;;  %v19431_v33 = vld [vmem:[#allocation26_spill] sm:$0xff] }
 0x919   :  { %10015 = vmatpush1.bf16.msra.mxu0 %v16511_v2  ;;  %v16537_v2 = vld [vmem:[#allocation10 + $0x1f2c] ss:$92 sps:$4 sm:$0xff]  }
 0x91a   :  { %10066 = vmatpush1.bf16.msra.mxu1 %v16514_v21  ;;  %10016 = vmatprep.subr.bf16.mxu0 %v16519_v12  ;;  %v16540_v21 = vld [vmem:[#allocation10 + $0x834] ss:$92 sps:$4 sm:$0xff]  }
 0x91b   :  { %10067 = vmatprep.subr.bf16.mxu1 %v16522_v13  ;;  %v16538_v12 = vld [vmem:[#allocation10 + $0x830] ss:$92 sps:$4 sm:$0xff]   ;;  %v16543_v13 = vld [vmem:[#allocation10 + $0x1fe4] ss:$92 sps:$4 sm:$0xff]  }
 0x91d   :  { %10017 = vmatpush1.bf16.msra.mxu0 %v16517_v60  ;;  %v16546_v60 = vld [vmem:[#allocation10 + $0x8ec] ss:$92 sps:$4 sm:$0xff]  }
 0x91e   :  { %10068 = vmatpush1.bf16.msra.mxu1 %v16520_v53  ;;  %10018 = vmatprep.subr.bf16.mxu0 %v16525_v4  ;;  %v16541_v53 = vld [vmem:[#allocation10 + $0x1fe0] ss:$92 sps:$4 sm:$0xff]   ;;  %v16544_v4 = vld [vmem:[#allocation10 + $0x8e8] ss:$92 sps:$4 sm:$0xff]  }
 0x91f   :  { %10069 = vmatprep.subr.bf16.mxu1 %v16528_v52  ;;  %v16549_v52 = vld [vmem:[#allocation10 + $0x209c] ss:$92 sps:$4 sm:$0xff]  }
 0x921   :  { %10019 = vmatpush1.bf16.msra.mxu0 %v16523_v23  ;;  %v16552_v23 = vld [vmem:[#allocation10 + $0x9a4] ss:$92 sps:$4 sm:$0xff]  }
 0x922   :  { %10070 = vmatpush1.bf16.msra.mxu1 %v16526_v59  ;;  %10020 = vmatprep.subr.bf16.mxu0 %v16531_v45  ;;  %v16547_v59 = vld [vmem:[#allocation10 + $0x2098] ss:$92 sps:$4 sm:$0xff]   ;;  %v16550_v45 = vld [vmem:[#allocation10 + $0x9a0] ss:$92 sps:$4 sm:$0xff]  }
 0x923   :  { %10071 = vmatprep.subr.bf16.mxu1 %v16534_v49  ;;  %v16555_v49 = vld [vmem:[#allocation10 + $0x2154] ss:$92 sps:$4 sm:$0xff]  }
 0x925   :  { %10021 = vmatpush1.bf16.msra.mxu0 %v16529_v22  ;;  %v16558_v22 = vld [vmem:[#allocation10 + $0xa5c] ss:$92 sps:$4 sm:$0xff]  }
 0x926   :  { %10072 = vmatpush1.bf16.msra.mxu1 %v16532_v10  ;;  %10022 = vmatprep.subr.bf16.mxu0 %v16537_v2  ;;  %v16553_v10 = vld [vmem:[#allocation10 + $0x2150] ss:$92 sps:$4 sm:$0xff]   ;;  %v16556_v2 = vld [vmem:[#allocation10 + $0xa58] ss:$92 sps:$4 sm:$0xff]  }
 0x927   :  { %10073 = vmatprep.subr.bf16.mxu1 %v16540_v21  ;;  %v16561_v21 = vld [vmem:[#allocation10 + $0x220c] ss:$92 sps:$4 sm:$0xff]  }
 0x929   :  { %10023 = vmatpush1.bf16.msra.mxu0 %v16535_v11  ;;  %v16564_v11 = vld [vmem:[#allocation10 + $0xb14] ss:$92 sps:$4 sm:$0xff]  }
 0x92a   :  { %10074 = vmatpush1.bf16.msra.mxu1 %v16538_v12  ;;  %10024 = vmatprep.subr.bf16.mxu0 %v16543_v13  ;;  %v16559_v12 = vld [vmem:[#allocation10 + $0x2208] ss:$92 sps:$4 sm:$0xff]   ;;  %v16562_v13 = vld [vmem:[#allocation10 + $0xb10] ss:$92 sps:$4 sm:$0xff]  }
 0x92b   :  { %10075 = vmatprep.subr.bf16.mxu1 %v16546_v60  ;;  %v16570_v60 = vld [vmem:[#allocation10 + $0x54] ss:$92 sps:$4 sm:$0xff]  }
 0x92d   :  { %10025 = vmatpush1.bf16.msra.mxu0 %v16541_v53  ;;  %v16567_v53 = vld [vmem:[#allocation10 + $0xbcc] ss:$92 sps:$4 sm:$0xff]  }
 0x92e   :  { %10076 = vmatpush1.bf16.msra.mxu1 %v16544_v4  ;;  %10026 = vmatprep.subr.bf16.mxu0 %v16549_v52  ;;  %v16565_v4 = vld [vmem:[#allocation10 + $0xbc8] ss:$92 sps:$4 sm:$0xff]   ;;  %v16568_v52 = vld [vmem:[#allocation10 + $0x50] ss:$92 sps:$4 sm:$0xff]  }
 0x92f   :  { %10077 = vmatprep.subr.bf16.mxu1 %v16552_v23  ;;  %v16573_v23 = vld [vmem:[#allocation10 + $0xc84] ss:$92 sps:$4 sm:$0xff]  }
 0x931   :  { %10027 = vmatpush1.bf16.msra.mxu0 %v16547_v59  ;;  %v16576_v59 = vld [vmem:[#allocation10 + $0x10c] ss:$92 sps:$4 sm:$0xff]  }
 0x932   :  { %10078 = vmatpush1.bf16.msra.mxu1 %v16550_v45  ;;  %10028 = vmatprep.subr.bf16.mxu0 %v16555_v49  ;;  %v16571_v45 = vld [vmem:[#allocation10 + $0xc80] ss:$92 sps:$4 sm:$0xff]   ;;  %v16574_v49 = vld [vmem:[#allocation10 + $0x108] ss:$92 sps:$4 sm:$0xff]  }
 0x933   :  { %10079 = vmatprep.subr.bf16.mxu1 %v16558_v22  ;;  %v16579_v22 = vld [vmem:[#allocation10 + $0xd3c] ss:$92 sps:$4 sm:$0xff]  }
 0x935   :  { %10029 = vmatpush1.bf16.msra.mxu0 %v16553_v10  ;;  %v16582_v10 = vld [vmem:[#allocation10 + $0x1c4] ss:$92 sps:$4 sm:$0xff]  }
 0x936   :  { %10080 = vmatpush1.bf16.msra.mxu1 %v16556_v2  ;;  %10030 = vmatprep.subr.bf16.mxu0 %v16561_v21  ;;  %v16577_v2 = vld [vmem:[#allocation10 + $0xd38] ss:$92 sps:$4 sm:$0xff]   ;;  %v16580_v21 = vld [vmem:[#allocation10 + $0x1c0] ss:$92 sps:$4 sm:$0xff]  }
 0x937   :  { %10081 = vmatprep.subr.bf16.mxu1 %v16564_v11  ;;  %v16585_v11 = vld [vmem:[#allocation10 + $0xdf4] ss:$92 sps:$4 sm:$0xff]  }
 0x939   :  { %10031 = vmatpush1.bf16.msra.mxu0 %v16559_v12  ;;  %v16588_v12 = vld [vmem:[#allocation10 + $0x27c] ss:$92 sps:$4 sm:$0xff]  }
 0x93a   :  { %10082 = vmatpush1.bf16.msra.mxu1 %v16562_v13  ;;  %10204 = vmatprep.subr.bf16.mxu0 %v16570_v60  ;;  %v16583_v13 = vld [vmem:[#allocation10 + $0xdf0] ss:$92 sps:$4 sm:$0xff]   ;;  %v16586_v60 = vld [vmem:[#allocation10 + $0x278] ss:$92 sps:$4 sm:$0xff]  }
 0x93b   :  { %10102 = vmatprep.subr.bf16.mxu1 %v16567_v53  ;;  %v16591_v53 = vld [vmem:[#allocation10 + $0xeac] ss:$92 sps:$4 sm:$0xff]  }
 0x93c   :  { %10033 = vmatmul.mubr.bf16.vlgmr.msra.gmra.mrb[116].mxu0 %v17759_v28 }
 0x93d   :  { %10084 = vmatmul.mubr.bf16.vlgmr.msra.gmra.mrb[108].mxu1 %v17751_v42  ;;  %10042 = vmatprep.mubr.bf16.mxu0 %v17869_v48 }
 0x93e   :  { %10093 = vmatprep.mubr.bf16.mxu1 %v17774_v39  ;;  %10103 = vmatpush1.bf16.msra.mxu1 %v16565_v4  ;;  %v16594_v4 = vld [vmem:[#allocation10 + $0x334] ss:$92 sps:$4 sm:$0xff]  }
 0x93f   :  { %10205 = vmatpush1.bf16.msra.mxu0 %v16568_v52  ;;  %10104 = vmatprep.subr.bf16.mxu1 %v16573_v23  ;;  %v16589_v52 = vld [vmem:[#allocation10 + $0xea8] ss:$92 sps:$4 sm:$0xff]   ;;  %v16592_v23 = vld [vmem:[#allocation10 + $0x330] ss:$92 sps:$4 sm:$0xff]  }
 0x940   :  { %10206 = vmatprep.subr.bf16.mxu0 %v16576_v59  ;;  %v16597_v59 = vld [vmem:[#allocation10 + $0xf64] ss:$92 sps:$4 sm:$0xff]  }
 0x942   :  { %10105 = vmatpush1.bf16.msra.mxu1 %v16571_v45 }
 0x943   :  { %10207 = vmatpush1.bf16.msra.mxu0 %v16574_v49  ;;  %10106 = vmatprep.subr.bf16.mxu1 %v16579_v22  ;;  %v16600_v49 = vld [vmem:[#allocation10 + $0x3ec] ss:$92 sps:$4 sm:$0xff]  }
 0x944   :  { %10043 = vmatmul.mubr.bf16.gmra.mrb[120].mxu0 %v17895_v34  ;;  %10208 = vmatprep.subr.bf16.mxu0 %v16582_v10 }
 0x945   :  { %10094 = vmatmul.mubr.bf16.gmra.mrb[112].mxu1 %v17782_v50  ;;  %10236 = vmatprep.mubr.bf16.mxu0 %v17753_v25 }
 0x946   :  { %10107 = vmatpush1.bf16.msra.mxu1 %v16577_v2  ;;  %10134 = vmatprep.mubr.bf16.mxu1 %v17757_v27 }
 0x947   :  { %10209 = vmatpush1.bf16.msra.mxu0 %v16580_v21  ;;  %10108 = vmatprep.subr.bf16.mxu1 %v16585_v11  ;;  %v19429_v21 = vld [vmem:[#allocation25_spill] sm:$0xff] }
 0x948   :  { %10210 = vmatprep.subr.bf16.mxu0 %v16588_v12 }
 0x94a   :  { %10109 = vmatpush1.bf16.msra.mxu1 %v16583_v13 }
 0x94b   :  { %10211 = vmatpush1.bf16.msra.mxu0 %v16586_v60  ;;  %10110 = vmatprep.subr.bf16.mxu1 %v16591_v53  ;;  %v16595_v60 = vld [vmem:[#allocation10 + $0xf60] ss:$92 sps:$4 sm:$0xff]  }
 0x94c   :  { %10212 = vmatprep.subr.bf16.mxu0 %v16594_v4  ;;  %v9728_v45 = vpop.f32.mrb[100].mxu0 }
 0x94d   :  { %v18278_v22 = vadd.f32 %v9728_v45, %v18226_v41  ;;  %v9779_v10 = vpop.f32.mrb[92].mxu1  ;;  %v9730_v2 = vpop.f32.mrb[101].mxu0 }
 0x94e   :  { %10111 = vmatpush1.bf16.msra.mxu1 %v16589_v52  ;;  %v18281_v11 = vadd.f32 %v9779_v10, %v19429_v21  ;;  %v18284_v12 = vadd.f32 %v9730_v2, %v18229_v1  ;;  %v9781_v13 = vpop.f32.mrb[93].mxu1  ;;  %v9732_v53 = vpop.f32.mrb[102].mxu0  ;;  %v19433_v10 = vld [vmem:[#allocation27_spill] sm:$0xff] }
 0x94f   :  { %19428 = vst [vmem:[#allocation63_spill] sm:$0xff] %v18278_v22  ;;  %10213 = vmatpush1.bf16.msra.mxu0 %v16592_v23  ;;  %v18287_v4 = vadd.f32 %v9781_v13, %v19431_v33  ;;  %10112 = vmatprep.subr.bf16.mxu1 %v16597_v59  ;;  %v18290_v41 = vadd.f32 %v9732_v53, %v18232_v36  ;;  %v9783_v45 = vpop.f32.mrb[94].mxu1  ;;  %v9734_v52 = vpop.f32.mrb[103].mxu0  ;;  %v16603_v22 = vld [vmem:[#allocation10 + $0x101c] ss:$92 sps:$4 sm:$0xff]  }
 0x950   :  { %19430 = vst [vmem:[#allocation25_spill] sm:$0xff] %v18284_v12  ;;  %10214 = vmatprep.subr.bf16.mxu0 %v16600_v49  ;;  %v18293_v21 = vadd.f32 %v9783_v45, %v19433_v10  ;;  %v18296_v1 = vadd.f32 %v9734_v52, %v18235_v5  ;;  %v9785_v2 = vpop.f32.mrb[95].mxu1  ;;  %v16606_v23 = vld [vmem:[#allocation10 + $0x4a4] ss:$92 sps:$4 sm:$0xff]   ;;  %v16601_v59 = vld [vmem:[#allocation10 + $0x1018] ss:$92 sps:$4 sm:$0xff]  }
 0x951   :  { %19432 = vst [vmem:[#allocation26_spill] sm:$0xff] %v18290_v41  ;;  %v19435_v12 = vld [vmem:[#allocation28_spill] sm:$0xff]  ;;  %v16609_v13 = vld [vmem:[#allocation10 + $0x10d4] ss:$92 sps:$4 sm:$0xff]   ;;  %v19437_v52 = vld [vmem:[#allocation29_spill] sm:$0xff] }
 0x952   :  { %19434 = vst [vmem:[#allocation27_spill] sm:$0xff] %v18296_v1  ;;  %v18299_v33 = vadd.f32 %v9785_v2, %v19435_v12  ;;  %10113 = vmatpush1.bf16.msra.mxu1 %v16595_v60  ;;  %v16604_v36 = vld [vmem:[#allocation10 + $0x4a0] ss:$92 sps:$4 sm:$0xff]   ;;  %v19439_v2 = vld [vmem:[#allocation30_spill] sm:$0xff]  ;;  %v16610_v1 = vld [vmem:[#allocation10 + $0x558] ss:$92 sps:$4 sm:$0xff]  }
 0x953   :  { %10215 = vmatpush1.bf16.msra.mxu0 %v16598_v46  ;;  %10114 = vmatprep.subr.bf16.mxu1 %v16603_v22  ;;  %v16612_v49 = vld [vmem:[#allocation10 + $0x55c] ss:$92 sps:$4 sm:$0xff]   ;;  %v16607_v46 = vld [vmem:[#allocation10 + $0x10d0] ss:$92 sps:$4 sm:$0xff]  }
 0x954   :  { %10216 = vmatprep.subr.bf16.mxu0 %v16606_v23  ;;  %v9738_v53 = vpop.f32.mrb[104].mxu0 }
 0x955   :  { %v18302_v45 = vadd.f32 %v9738_v53, %v18238_v17  ;;  %v9789_v10 = vpop.f32.mrb[96].mxu1  ;;  %v9740_v5 = vpop.f32.mrb[105].mxu0 }
 0x956   :  { %10115 = vmatpush1.bf16.msra.mxu1 %v16601_v59  ;;  %v18305_v41 = vadd.f32 %v9789_v10, %v19437_v52  ;;  %v18308_v12 = vadd.f32 %v9740_v5, %v18241_v7  ;;  %v9791_v60 = vpop.f32.mrb[97].mxu1  ;;  %v9742_v22 = vpop.f32.mrb[106].mxu0  ;;  %v16613_v10 = vld [vmem:[#allocation10 + $0x1188] ss:$92 sps:$4 sm:$0xff]   ;;  %v16616_v7 = vld [vmem:[#allocation10 + $0x610] ss:$92 sps:$4 sm:$0xff]  }
 0x957   :  { %19436 = vst [vmem:[#allocation28_spill] sm:$0xff] %v18302_v45  ;;  %10217 = vmatpush1.bf16.msra.mxu0 %v16604_v36  ;;  %v18311_v23 = vadd.f32 %v9791_v60, %v19439_v2  ;;  %10116 = vmatprep.subr.bf16.mxu1 %v16609_v13  ;;  %v9793_v17 = vpop.f32.mrb[98].mxu1  ;;  %v9743_v53 = vpop.f32.mrb[107].mxu0  ;;  %v16615_v45 = vld [vmem:[#allocation10 + $0x118c] ss:$92 sps:$4 sm:$0xff]  }
 0x958   :  { %19438 = vst [vmem:[#allocation29_spill] sm:$0xff] %v18308_v12  ;;  %10218 = vmatprep.subr.bf16.mxu0 %v16612_v49  ;;  %v9794_v59 = vpop.f32.mrb[99].mxu1  ;;  %v16621_v5 = vld [vmem:[#allocation10 + $0x1244] ss:$92 sps:$4 sm:$0xff]   ;;  %v16624_v52 = vld [vmem:[#allocation10 + $0x6cc] ss:$92 sps:$4 sm:$0xff]  }
 0x959   :  { %v16619_v36 = vld [vmem:[#allocation10 + $0x1240] ss:$92 sps:$4 sm:$0xff]   ;;  %v16622_v13 = vld [vmem:[#allocation10 + $0x6c8] ss:$92 sps:$4 sm:$0xff]   ;;  %v16625_v49 = vld [vmem:[#allocation10 + $0x12f8] ss:$92 sps:$4 sm:$0xff]  }
 0x95a   :  { %10117 = vmatpush1.bf16.msra.mxu1 %v16607_v46  ;;  %v16627_v60 = vld [vmem:[#allocation10 + $0x12fc] ss:$92 sps:$4 sm:$0xff]   ;;  %v16630_v22 = vld [vmem:[#allocation10 + $0x784] ss:$92 sps:$4 sm:$0xff]   ;;  %v16633_v2 = vld [vmem:[#allocation10 + $0x13b4] ss:$92 sps:$4 sm:$0xff]  }
 0x95b   :  { %10219 = vmatpush1.bf16.msra.mxu0 %v16610_v1  ;;  %10118 = vmatprep.subr.bf16.mxu1 %v16615_v45  ;;  %v16628_v46 = vld [vmem:[#allocation10 + $0x780] ss:$92 sps:$4 sm:$0xff]   ;;  %v16631_v45 = vld [vmem:[#allocation10 + $0x13b0] ss:$92 sps:$4 sm:$0xff]   ;;  %v16637_v59 = vld [vmem:[#allocation10 + $0x1468] ss:$92 sps:$4 sm:$0xff]  }
 0x95c   :  { %10220 = vmatprep.subr.bf16.mxu0 %v16618_v63  ;;  %v16636_v1 = vld [vmem:[#allocation10 + $0x83c] ss:$92 sps:$4 sm:$0xff]   ;;  %v16639_v17 = vld [vmem:[#allocation10 + $0x146c] ss:$92 sps:$4 sm:$0xff]   ;;  %v16642_v53 = vld [vmem:[#allocation10 + $0x8f4] ss:$92 sps:$4 sm:$0xff]  }
 0x95d   :  { %v16634_v63 = vld [vmem:[#allocation10 + $0x838] ss:$92 sps:$4 sm:$0xff]   ;;  %v16702_v12 = vld [vmem:[#allocation10 + $0x1024] ss:$92 sps:$4 sm:$0xff]  }
 0x95e   :  { %10119 = vmatpush1.bf16.msra.mxu1 %v16613_v10  ;;  %v16640_v10 = vld [vmem:[#allocation10 + $0x8f0] ss:$92 sps:$4 sm:$0xff]  }
 0x95f   :  { %10221 = vmatpush1.bf16.msra.mxu0 %v16616_v7  ;;  %10120 = vmatprep.subr.bf16.mxu1 %v16621_v5  ;;  %v16645_v7 = vld [vmem:[#allocation10 + $0x1524] ss:$92 sps:$4 sm:$0xff]   ;;  %v16648_v5 = vld [vmem:[#allocation10 + $0x9ac] ss:$92 sps:$4 sm:$0xff]  }
 0x960   :  { %10222 = vmatprep.subr.bf16.mxu0 %v16624_v52  ;;  %v16643_v52 = vld [vmem:[#allocation10 + $0x1520] ss:$92 sps:$4 sm:$0xff]  }
 0x962   :  { %10121 = vmatpush1.bf16.msra.mxu1 %v16619_v36  ;;  %v16646_v36 = vld [vmem:[#allocation10 + $0x9a8] ss:$92 sps:$4 sm:$0xff]  }
 0x963   :  { %10223 = vmatpush1.bf16.msra.mxu0 %v16622_v13  ;;  %10122 = vmatprep.subr.bf16.mxu1 %v16627_v60  ;;  %v16651_v13 = vld [vmem:[#allocation10 + $0x15dc] ss:$92 sps:$4 sm:$0xff]   ;;  %v16654_v60 = vld [vmem:[#allocation10 + $0xa64] ss:$92 sps:$4 sm:$0xff]  }
 0x964   :  { %10224 = vmatprep.subr.bf16.mxu0 %v16630_v22  ;;  %v16649_v22 = vld [vmem:[#allocation10 + $0x15d8] ss:$92 sps:$4 sm:$0xff]  }
 0x966   :  { %10123 = vmatpush1.bf16.msra.mxu1 %v16625_v49  ;;  %v16652_v49 = vld [vmem:[#allocation10 + $0xa60] ss:$92 sps:$4 sm:$0xff]  }
 0x967   :  { %10225 = vmatpush1.bf16.msra.mxu0 %v16628_v46  ;;  %10124 = vmatprep.subr.bf16.mxu1 %v16633_v2  ;;  %v16657_v46 = vld [vmem:[#allocation10 + $0x1694] ss:$92 sps:$4 sm:$0xff]   ;;  %v16660_v2 = vld [vmem:[#allocation10 + $0xb1c] ss:$92 sps:$4 sm:$0xff]  }
 0x968   :  { %10226 = vmatprep.subr.bf16.mxu0 %v16636_v1  ;;  %v16655_v1 = vld [vmem:[#allocation10 + $0x1690] ss:$92 sps:$4 sm:$0xff]  }
 0x96a   :  { %10125 = vmatpush1.bf16.msra.mxu1 %v16631_v45  ;;  %v16658_v45 = vld [vmem:[#allocation10 + $0xb18] ss:$92 sps:$4 sm:$0xff]  }
 0x96b   :  { %10227 = vmatpush1.bf16.msra.mxu0 %v16634_v63  ;;  %10126 = vmatprep.subr.bf16.mxu1 %v16639_v17  ;;  %v16663_v63 = vld [vmem:[#allocation10 + $0x174c] ss:$92 sps:$4 sm:$0xff]   ;;  %v16666_v17 = vld [vmem:[#allocation10 + $0xbd4] ss:$92 sps:$4 sm:$0xff]  }
 0x96c   :  { %10228 = vmatprep.subr.bf16.mxu0 %v16642_v53  ;;  %v16661_v53 = vld [vmem:[#allocation10 + $0x1748] ss:$92 sps:$4 sm:$0xff]  }
 0x96e   :  { %10127 = vmatpush1.bf16.msra.mxu1 %v16637_v59  ;;  %v16664_v59 = vld [vmem:[#allocation10 + $0xbd0] ss:$92 sps:$4 sm:$0xff]  }
 0x96f   :  { %10229 = vmatpush1.bf16.msra.mxu0 %v16640_v10  ;;  %10128 = vmatprep.subr.bf16.mxu1 %v16645_v7  ;;  %v16669_v10 = vld [vmem:[#allocation10 + $0x1804] ss:$92 sps:$4 sm:$0xff]   ;;  %v16672_v7 = vld [vmem:[#allocation10 + $0xc8c] ss:$92 sps:$4 sm:$0xff]  }
 0x970   :  { %10230 = vmatprep.subr.bf16.mxu0 %v16648_v5  ;;  %v16667_v5 = vld [vmem:[#allocation10 + $0x1800] ss:$92 sps:$4 sm:$0xff]  }
 0x972   :  { %10129 = vmatpush1.bf16.msra.mxu1 %v16643_v52  ;;  %v16670_v52 = vld [vmem:[#allocation10 + $0xc88] ss:$92 sps:$4 sm:$0xff]  }
 0x973   :  { %10231 = vmatpush1.bf16.msra.mxu0 %v16646_v36  ;;  %10130 = vmatprep.subr.bf16.mxu1 %v16651_v13  ;;  %v16675_v36 = vld [vmem:[#allocation10 + $0x18bc] ss:$92 sps:$4 sm:$0xff]   ;;  %v16678_v13 = vld [vmem:[#allocation10 + $0xd44] ss:$92 sps:$4 sm:$0xff]  }
 0x974   :  { %10232 = vmatprep.subr.bf16.mxu0 %v16654_v60  ;;  %v16673_v60 = vld [vmem:[#allocation10 + $0x18b8] ss:$92 sps:$4 sm:$0xff]  }
 0x976   :  { %10131 = vmatpush1.bf16.msra.mxu1 %v16649_v22  ;;  %v16676_v22 = vld [vmem:[#allocation10 + $0xd40] ss:$92 sps:$4 sm:$0xff]  }
 0x977   :  { %10233 = vmatpush1.bf16.msra.mxu0 %v16652_v49  ;;  %10132 = vmatprep.subr.bf16.mxu1 %v16657_v46  ;;  %v16681_v49 = vld [vmem:[#allocation10 + $0x1974] ss:$92 sps:$4 sm:$0xff]   ;;  %v16684_v46 = vld [vmem:[#allocation10 + $0xdfc] ss:$92 sps:$4 sm:$0xff]  }
 0x978   :  { %10234 = vmatprep.subr.bf16.mxu0 %v16660_v2  ;;  %v16679_v2 = vld [vmem:[#allocation10 + $0x1970] ss:$92 sps:$4 sm:$0xff]  }
 0x97a   :  { %10133 = vmatpush1.bf16.msra.mxu1 %v16655_v1  ;;  %v16682_v1 = vld [vmem:[#allocation10 + $0xdf8] ss:$92 sps:$4 sm:$0xff]  }
 0x97b   :  { %10235 = vmatpush1.bf16.msra.mxu0 %v16658_v45  ;;  %10153 = vmatprep.subr.bf16.mxu1 %v16663_v63  ;;  %v16687_v45 = vld [vmem:[#allocation10 + $0x1a2c] ss:$92 sps:$4 sm:$0xff]   ;;  %v16690_v63 = vld [vmem:[#allocation10 + $0xeb4] ss:$92 sps:$4 sm:$0xff]  }
 0x97c   :  { %10255 = vmatprep.subr.bf16.mxu0 %v16666_v17  ;;  %v16685_v17 = vld [vmem:[#allocation10 + $0x1a28] ss:$92 sps:$4 sm:$0xff]  }
 0x97d   :  { %10135 = vmatmul.mubr.bf16.vlgmr.msra.gmra.mrb[116].mxu1 %v17755_v26 }
 0x97e   :  { %10237 = vmatmul.mubr.bf16.vlgmr.msra.gmra.mrb[124].mxu0 %v17751_v42  ;;  %10144 = vmatprep.mubr.bf16.mxu1 %v17771_v38 }
 0x97f   :  { %10154 = vmatpush1.bf16.msra.mxu1 %v16661_v53  ;;  %10246 = vmatprep.mubr.bf16.mxu0 %v17774_v39  ;;  %v16688_v53 = vld [vmem:[#allocation10 + $0xeb0] ss:$92 sps:$4 sm:$0xff]  }
 0x980   :  { %10256 = vmatpush1.bf16.msra.mxu0 %v16664_v59  ;;  %10155 = vmatprep.subr.bf16.mxu1 %v16669_v10  ;;  %v16693_v59 = vld [vmem:[#allocation10 + $0x1ae4] ss:$92 sps:$4 sm:$0xff]   ;;  %v16696_v10 = vld [vmem:[#allocation10 + $0xf6c] ss:$92 sps:$4 sm:$0xff]  }
 0x981   :  { %10257 = vmatprep.subr.bf16.mxu0 %v16672_v7 }
 0x983   :  { %10156 = vmatpush1.bf16.msra.mxu1 %v16667_v5  ;;  %v19440_v5 = vld [vmem:[#allocation44_spill] sm:$0xff] }
 0x984   :  { %10258 = vmatpush1.bf16.msra.mxu0 %v16670_v52  ;;  %10157 = vmatprep.subr.bf16.mxu1 %v16675_v36 }
 0x985   :  { %10145 = vmatmul.mubr.bf16.gmra.mrb[120].mxu1 %v17787_v55  ;;  %10259 = vmatprep.subr.bf16.mxu0 %v16678_v13  ;;  %v16691_v13 = vld [vmem:[#allocation10 + $0x1ae0] ss:$92 sps:$4 sm:$0xff]  }
 0x986   :  { %10247 = vmatmul.mubr.bf16.gmra.mrb[128].mxu0 %v17782_v50  ;;  %10185 = vmatprep.mubr.bf16.mxu1 %v17761_v29 }
 0x987   :  { %10158 = vmatpush1.bf16.msra.mxu1 %v16673_v60  ;;  %10287 = vmatprep.mubr.bf16.mxu0 %v17757_v27  ;;  %v19441_v60 = vld [vmem:[#allocation45_spill] sm:$0xff] }
 0x988   :  { %10260 = vmatpush1.bf16.msra.mxu0 %v16676_v22  ;;  %10159 = vmatprep.subr.bf16.mxu1 %v16681_v49  ;;  %v16694_v49 = vld [vmem:[#allocation10 + $0xf68] ss:$92 sps:$4 sm:$0xff]  }
 0x989   :  { %10261 = vmatprep.subr.bf16.mxu0 %v16684_v46 }
 0x98b   :  { %10160 = vmatpush1.bf16.msra.mxu1 %v16679_v2  ;;  %v16699_v2 = vld [vmem:[#allocation10 + $0x1b9c] ss:$92 sps:$4 sm:$0xff]  }
 0x98c   :  { %10262 = vmatpush1.bf16.msra.mxu0 %v16682_v1  ;;  %10161 = vmatprep.subr.bf16.mxu1 %v16687_v45  ;;  %v19442_v1 = vld [vmem:[#allocation46_spill] sm:$0xff] }
 0x98d   :  { %10263 = vmatprep.subr.bf16.mxu0 %v16690_v63 }
 0x98e   :  { %v9932_v7 = vpop.f32.mrb[108].mxu0 }
 0x98f   :  { %10162 = vmatpush1.bf16.msra.mxu1 %v16685_v17  ;;  %v18322_v52 = vadd.f32 %v9932_v7, %v19440_v5  ;;  %v9934_v36 = vpop.f32.mrb[109].mxu0  ;;  %v19443_v17 = vld [vmem:[#allocation47_spill] sm:$0xff] }
 0x990   :  { %10264 = vmatpush1.bf16.msra.mxu0 %v16688_v53  ;;  %v18325_v22 = vadd.f32 %v9934_v36, %v19441_v60  ;;  %10163 = vmatprep.subr.bf16.mxu1 %v16693_v59  ;;  %v9936_v46 = vpop.f32.mrb[110].mxu0  ;;  %v16697_v7 = vld [vmem:[#allocation10 + $0x1b98] ss:$92 sps:$4 sm:$0xff]   ;;  %v16700_v53 = vld [vmem:[#allocation10 + $0x1020] ss:$92 sps:$4 sm:$0xff]   ;;  %v19444_v60 = vld [vmem:[#allocation49_spill] sm:$0xff] }
 0x991   :  { %10265 = vmatprep.subr.bf16.mxu0 %v16696_v10  ;;  %v18328_v45 = vadd.f32 %v9936_v46, %v19442_v1  ;;  %v9938_v63 = vpop.f32.mrb[111].mxu0  ;;  %v16705_v5 = vld [vmem:[#allocation10 + $0x1c54] ss:$92 sps:$4 sm:$0xff]   ;;  %v16708_v59 = vld [vmem:[#allocation10 + $0x10dc] ss:$92 sps:$4 sm:$0xff]  }
 0x992   :  { %v18331_v24 = vadd.f32 %v9938_v63, %v19443_v17  ;;  %v16703_v1 = vld [vmem:[#allocation10 + $0x1c50] ss:$92 sps:$4 sm:$0xff]  }
 0x993   :  { %10164 = vmatpush1.bf16.msra.mxu1 %v16691_v13  ;;  %v16706_v13 = vld [vmem:[#allocation10 + $0x10d8] ss:$92 sps:$4 sm:$0xff]  }
 0x994   :  { %10266 = vmatpush1.bf16.msra.mxu0 %v16694_v49  ;;  %10165 = vmatprep.subr.bf16.mxu1 %v16699_v2  ;;  %v16711_v49 = vld [vmem:[#allocation10 + $0x1d0c] ss:$92 sps:$4 sm:$0xff]   ;;  %v16714_v17 = vld [vmem:[#allocation10 + $0x1194] ss:$92 sps:$4 sm:$0xff]  }
 0x995   :  { %10267 = vmatprep.subr.bf16.mxu0 %v16702_v12  ;;  %v16709_v12 = vld [vmem:[#allocation10 + $0x1d08] ss:$92 sps:$4 sm:$0xff]  }
 0x996   :  { %v9942_v36 = vpop.f32.mrb[112].mxu0 }
 0x997   :  { %10166 = vmatpush1.bf16.msra.mxu1 %v16697_v7  ;;  %v18334_v10 = vadd.f32 %v9942_v36, %v19444_v60  ;;  %v9944_v46 = vpop.f32.mrb[113].mxu0  ;;  %v16712_v7 = vld [vmem:[#allocation10 + $0x1190] ss:$92 sps:$4 sm:$0xff]   ;;  %v16717_v36 = vld [vmem:[#allocation10 + $0x1dc4] ss:$92 sps:$4 sm:$0xff]  }
 0x998   :  { %10268 = vmatpush1.bf16.msra.mxu0 %v16700_v53  ;;  %v18337_v43 = vadd.f32 %v9944_v46, %v19445_v58  ;;  %10167 = vmatprep.subr.bf16.mxu1 %v16705_v5  ;;  %v9946_v63 = vpop.f32.mrb[114].mxu0  ;;  %v16720_v60 = vld [vmem:[#allocation10 + $0x124c] ss:$92 sps:$4 sm:$0xff]   ;;  %v16715_v53 = vld [vmem:[#allocation10 + $0x1dc0] ss:$92 sps:$4 sm:$0xff]  }
 0x999   :  { %10269 = vmatprep.subr.bf16.mxu0 %v16708_v59  ;;  %v9947_v2 = vpop.f32.mrb[115].mxu0  ;;  %v16718_v58 = vld [vmem:[#allocation10 + $0x1248] ss:$92 sps:$4 sm:$0xff]   ;;  %v16723_v5 = vld [vmem:[#allocation10 + $0x1e7c] ss:$92 sps:$4 sm:$0xff]  }
 0x99a   :  { %v16726_v46 = vld [vmem:[#allocation10 + $0x1304] ss:$92 sps:$4 sm:$0xff]   ;;  %v16721_v59 = vld [vmem:[#allocation10 + $0x1e78] ss:$92 sps:$4 sm:$0xff]  }
 0x99b   :  { %10168 = vmatpush1.bf16.msra.mxu1 %v16703_v1  ;;  %v16724_v1 = vld [vmem:[#allocation10 + $0x1300] ss:$92 sps:$4 sm:$0xff]   ;;  %v16729_v63 = vld [vmem:[#allocation10 + $0x1f34] ss:$92 sps:$4 sm:$0xff]  }
 0x99c   :  { %10270 = vmatpush1.bf16.msra.mxu0 %v16706_v13  ;;  %10169 = vmatprep.subr.bf16.mxu1 %v16711_v49  ;;  %v16732_v13 = vld [vmem:[#allocation10 + $0x13bc] ss:$92 sps:$4 sm:$0xff]   ;;  %v16727_v49 = vld [vmem:[#allocation10 + $0x1f30] ss:$92 sps:$4 sm:$0xff]  }
 0x99d   :  { %10271 = vmatprep.subr.bf16.mxu0 %v16714_v17  ;;  %v16730_v2 = vld [vmem:[#allocation10 + $0x13b8] ss:$92 sps:$4 sm:$0xff]   ;;  %v16735_v17 = vld [vmem:[#allocation10 + $0x1fec] ss:$92 sps:$4 sm:$0xff]  }
 0x99f   :  { %10170 = vmatpush1.bf16.msra.mxu1 %v16709_v12  ;;  %v16738_v12 = vld [vmem:[#allocation10 + $0x1474] ss:$92 sps:$4 sm:$0xff]  }
 0x9a0   :  { %10272 = vmatpush1.bf16.msra.mxu0 %v16712_v7  ;;  %10171 = vmatprep.subr.bf16.mxu1 %v16717_v36  ;;  %v16733_v7 = vld [vmem:[#allocation10 + $0x1fe8] ss:$92 sps:$4 sm:$0xff]   ;;  %v16736_v36 = vld [vmem:[#allocation10 + $0x1470] ss:$92 sps:$4 sm:$0xff]  }
 0x9a1   :  { %10273 = vmatprep.subr.bf16.mxu0 %v16720_v60  ;;  %v16741_v60 = vld [vmem:[#allocation10 + $0x20a4] ss:$92 sps:$4 sm:$0xff]  }
 0x9a3   :  { %10172 = vmatpush1.bf16.msra.mxu1 %v16715_v53  ;;  %v16744_v53 = vld [vmem:[#allocation10 + $0x152c] ss:$92 sps:$4 sm:$0xff]  }
 0x9a4   :  { %10274 = vmatpush1.bf16.msra.mxu0 %v16718_v58  ;;  %10173 = vmatprep.subr.bf16.mxu1 %v16723_v5  ;;  %v16739_v58 = vld [vmem:[#allocation10 + $0x20a0] ss:$92 sps:$4 sm:$0xff]   ;;  %v16742_v5 = vld [vmem:[#allocation10 + $0x1528] ss:$92 sps:$4 sm:$0xff]  }
 0x9a5   :  { %10275 = vmatprep.subr.bf16.mxu0 %v16726_v46  ;;  %v16747_v46 = vld [vmem:[#allocation10 + $0x215c] ss:$92 sps:$4 sm:$0xff]  }
 0x9a7   :  { %10174 = vmatpush1.bf16.msra.mxu1 %v16721_v59  ;;  %v16750_v59 = vld [vmem:[#allocation10 + $0x15e4] ss:$92 sps:$4 sm:$0xff]  }
 0x9a8   :  { %10276 = vmatpush1.bf16.msra.mxu0 %v16724_v1  ;;  %10175 = vmatprep.subr.bf16.mxu1 %v16729_v63  ;;  %v16745_v1 = vld [vmem:[#allocation10 + $0x2158] ss:$92 sps:$4 sm:$0xff]   ;;  %v16748_v63 = vld [vmem:[#allocation10 + $0x15e0] ss:$92 sps:$4 sm:$0xff]  }
 0x9a9   :  { %10277 = vmatprep.subr.bf16.mxu0 %v16732_v13  ;;  %v16753_v13 = vld [vmem:[#allocation10 + $0x2214] ss:$92 sps:$4 sm:$0xff]  }
 0x9ab   :  { %10176 = vmatpush1.bf16.msra.mxu1 %v16727_v49  ;;  %v16756_v49 = vld [vmem:[#allocation10 + $0x169c] ss:$92 sps:$4 sm:$0xff]  }
 0x9ac   :  { %10278 = vmatpush1.bf16.msra.mxu0 %v16730_v2  ;;  %10177 = vmatprep.subr.bf16.mxu1 %v16735_v17  ;;  %v16751_v2 = vld [vmem:[#allocation10 + $0x2210] ss:$92 sps:$4 sm:$0xff]   ;;  %v16754_v17 = vld [vmem:[#allocation10 + $0x1698] ss:$92 sps:$4 sm:$0xff]  }
 0x9ad   :  { %10279 = vmatprep.subr.bf16.mxu0 %v16738_v12  ;;  %v16760_v12 = vld [vmem:[#allocation10 + $0x618] ss:$92 sps:$4 sm:$0xff]  }
 0x9af   :  { %10178 = vmatpush1.bf16.msra.mxu1 %v16733_v7  ;;  %v16759_v7 = vld [vmem:[#allocation10 + $0x1754] ss:$92 sps:$4 sm:$0xff]  }
 0x9b0   :  { %10280 = vmatpush1.bf16.msra.mxu0 %v16736_v36  ;;  %10179 = vmatprep.subr.bf16.mxu1 %v16741_v60  ;;  %v16757_v36 = vld [vmem:[#allocation10 + $0x1750] ss:$92 sps:$4 sm:$0xff]   ;;  %v16761_v60 = vld [vmem:[#allocation10 + $0x58] ss:$92 sps:$4 sm:$0xff]  }
 0x9b1   :  { %10281 = vmatprep.subr.bf16.mxu0 %v16744_v53  ;;  %v16764_v53 = vld [vmem:[#allocation10 + $0x180c] ss:$92 sps:$4 sm:$0xff]  }
 0x9b3   :  { %10180 = vmatpush1.bf16.msra.mxu1 %v16739_v58  ;;  %v16765_v58 = vld [vmem:[#allocation10 + $0x6d0] ss:$92 sps:$4 sm:$0xff]  }
 0x9b4   :  { %10282 = vmatpush1.bf16.msra.mxu0 %v16742_v5  ;;  %10181 = vmatprep.subr.bf16.mxu1 %v16747_v46  ;;  %v16762_v5 = vld [vmem:[#allocation10 + $0x1808] ss:$92 sps:$4 sm:$0xff]   ;;  %v16766_v46 = vld [vmem:[#allocation10 + $0x110] ss:$92 sps:$4 sm:$0xff]  }
 0x9b5   :  { %10283 = vmatprep.subr.bf16.mxu0 %v16750_v59  ;;  %v16769_v59 = vld [vmem:[#allocation10 + $0x18c4] ss:$92 sps:$4 sm:$0xff]  }
 0x9b7   :  { %10182 = vmatpush1.bf16.msra.mxu1 %v16745_v1  ;;  %v16770_v1 = vld [vmem:[#allocation10 + $0x788] ss:$92 sps:$4 sm:$0xff]  }
 0x9b8   :  { %10284 = vmatpush1.bf16.msra.mxu0 %v16748_v63  ;;  %10183 = vmatprep.subr.bf16.mxu1 %v16753_v13  ;;  %v16767_v63 = vld [vmem:[#allocation10 + $0x18c0] ss:$92 sps:$4 sm:$0xff]   ;;  %v16771_v13 = vld [vmem:[#allocation10 + $0x1c8] ss:$92 sps:$4 sm:$0xff]  }
 0x9b9   :  { %10285 = vmatprep.subr.bf16.mxu0 %v16756_v49  ;;  %v16774_v49 = vld [vmem:[#allocation10 + $0x197c] ss:$92 sps:$4 sm:$0xff]  }
 0x9bb   :  { %10184 = vmatpush1.bf16.msra.mxu1 %v16751_v2  ;;  %v16775_v2 = vld [vmem:[#allocation10 + $0x840] ss:$92 sps:$4 sm:$0xff]  }
 0x9bc   :  { %10286 = vmatpush1.bf16.msra.mxu0 %v16754_v17  ;;  %14401 = vmatprep.subr.bf16.mxu1 %v16760_v12  ;;  %v16772_v17 = vld [vmem:[#allocation10 + $0x1978] ss:$92 sps:$4 sm:$0xff]   ;;  %v16776_v12 = vld [vmem:[#allocation10 + $0x280] ss:$92 sps:$4 sm:$0xff]  }
 0x9bd   :  { %10306 = vmatprep.subr.bf16.mxu0 %v16759_v7  ;;  %v16779_v7 = vld [vmem:[#allocation10 + $0x1a34] ss:$92 sps:$4 sm:$0xff]  }
 0x9be   :  { %10186 = vmatmul.mubr.bf16.vlgmr.msra.gmra.mrb[116].mxu1 %v17759_v28 }
 0x9bf   :  { %10288 = vmatmul.mubr.bf16.vlgmr.msra.gmra.mrb[132].mxu0 %v17755_v26  ;;  %10195 = vmatprep.mubr.bf16.mxu1 %v17869_v48 }
 0x9c0   :  { %10297 = vmatprep.mubr.bf16.mxu0 %v17771_v38  ;;  %10307 = vmatpush1.bf16.msra.mxu0 %v16757_v36  ;;  %v16780_v36 = vld [vmem:[#allocation10 + $0x8f8] ss:$92 sps:$4 sm:$0xff]  }
 0x9c1   :  { %14402 = vmatpush3.bf16.msra.mxu1 %v16761_v60  ;;  %10308 = vmatprep.subr.bf16.mxu0 %v16764_v53  ;;  %v16777_v60 = vld [vmem:[#allocation10 + $0x1a30] ss:$92 sps:$4 sm:$0xff]   ;;  %v16781_v53 = vld [vmem:[#allocation10 + $0x338] ss:$92 sps:$4 sm:$0xff]  }
 0x9c2   :  { %14403 = vmatprep.subr.bf16.mxu1 %v16765_v58  ;;  %v16784_v58 = vld [vmem:[#allocation10 + $0x1aec] ss:$92 sps:$4 sm:$0xff]  }
 0x9c4   :  { %10309 = vmatpush1.bf16.msra.mxu0 %v16762_v5 }
 0x9c5   :  { %14404 = vmatpush3.bf16.msra.mxu1 %v16766_v46  ;;  %10310 = vmatprep.subr.bf16.mxu0 %v16769_v59  ;;  %v16785_v46 = vld [vmem:[#allocation10 + $0x9b0] ss:$92 sps:$4 sm:$0xff]  }
 0x9c6   :  { %10196 = vmatmul.mubr.bf16.gmra.mrb[120].mxu1 %v17895_v34  ;;  %14405 = vmatprep.subr.bf16.mxu1 %v16770_v1 }
 0x9c7   :  { %10298 = vmatmul.mubr.bf16.gmra.mrb[136].mxu0 %v17787_v55  ;;  %10389 = vmatprep.mubr.bf16.mxu1 %v17753_v25 }
 0x9c8   :  { %10311 = vmatpush1.bf16.msra.mxu0 %v16767_v63  ;;  %10338 = vmatprep.mubr.bf16.mxu0 %v17761_v29  ;;  %v16782_v63 = vld [vmem:[#allocation10 + $0x1ae8] ss:$92 sps:$4 sm:$0xff]  }
 0x9c9   :  { %14406 = vmatpush3.bf16.msra.mxu1 %v16771_v13  ;;  %10312 = vmatprep.subr.bf16.mxu0 %v16774_v49 }
 0x9ca   :  { %14407 = vmatprep.subr.bf16.mxu1 %v16775_v2  ;;  %v16786_v2 = vld [vmem:[#allocation10 + $0x3f0] ss:$92 sps:$4 sm:$0xff]  }
 0x9cc   :  { %10313 = vmatpush1.bf16.msra.mxu0 %v16772_v17 }
 0x9cd   :  { %14408 = vmatpush3.bf16.msra.mxu1 %v16776_v12  ;;  %10314 = vmatprep.subr.bf16.mxu0 %v16779_v7  ;;  %v16789_v12 = vld [vmem:[#allocation10 + $0x1ba4] ss:$92 sps:$4 sm:$0xff]  }
 0x9ce   :  { %14409 = vmatprep.subr.bf16.mxu1 %v16780_v36  ;;  %v9881_v5 = vpop.f32.mrb[100].mxu1  ;;  %v16787_v36 = vld [vmem:[#allocation10 + $0x1ba0] ss:$92 sps:$4 sm:$0xff]  }
 0x9cf   :  { %v18348_v25 = vadd.f32 %v9881_v5, %v18281_v11  ;;  %v9883_v59 = vpop.f32.mrb[101].mxu1  ;;  %v16790_v11 = vld [vmem:[#allocation10 + $0xa68] ss:$92 sps:$4 sm:$0xff]  }
 0x9d0   :  { %10315 = vmatpush1.bf16.msra.mxu0 %v16777_v60  ;;  %v18351_v1 = vadd.f32 %v9883_v59, %v18287_v4  ;;  %v9885_v13 = vpop.f32.mrb[102].mxu1  ;;  %v16791_v4 = vld [vmem:[#allocation10 + $0x4a8] ss:$92 sps:$4 sm:$0xff]   ;;  %v16794_v60 = vld [vmem:[#allocation10 + $0x1c5c] ss:$92 sps:$4 sm:$0xff]  }
 0x9d1   :  { %19446 = vst [vmem:[#allocation30_spill] sm:$0xff] %v18348_v25  ;;  %14410 = vmatpush3.bf16.msra.mxu1 %v16781_v53  ;;  %10316 = vmatprep.subr.bf16.mxu0 %v16784_v58  ;;  %v18354_v49 = vadd.f32 %v9885_v13, %v18293_v21  ;;  %v9887_v17 = vpop.f32.mrb[103].mxu1  ;;  %v16795_v58 = vld [vmem:[#allocation10 + $0xb20] ss:$92 sps:$4 sm:$0xff]  }
 0x9d2   :  { %19447 = vst [vmem:[#allocation44_spill] sm:$0xff] %v18351_v1  ;;  %14411 = vmatprep.subr.bf16.mxu1 %v16785_v46  ;;  %v18357_v7 = vadd.f32 %v9887_v17, %v18299_v33  ;;  %v16792_v33 = vld [vmem:[#allocation10 + $0x1c58] ss:$92 sps:$4 sm:$0xff]   ;;  %v18771_v1 = vld [vmem:[%s19322_s15 + $0xa0] sm:$0xff]   ;;  %v18791_v25 = vld [vmem:[%s19322_s15 + $0xf0] sm:$0xff]  }
 0x9d3   :  { %19448 = vst [vmem:[#allocation45_spill] sm:$0xff] %v18354_v49  ;;  %v16800_v17 = vld [vmem:[#allocation10 + $0x1198] ss:$92 sps:$4 sm:$0xff]   ;;  %19500 = vst [vmem:[#allocation78_spill] sm:$0xff] %v18771_v1 }
 0x9d4   :  { %19449 = vst [vmem:[#allocation46_spill] sm:$0xff] %v18357_v7  ;;  %10317 = vmatpush1.bf16.msra.mxu0 %v16782_v63  ;;  %v16796_v63 = vld [vmem:[#allocation10 + $0x560] ss:$92 sps:$4 sm:$0xff]   ;;  %v18747_v7 = vld [vmem:[%s19322_s15 + $0x38] sm:$0xff]   ;;  %v18784_v49 = vld [vmem:[%s19322_s15 + $0xa8] sm:$0xff]  }
 0x9d5   :  { %14412 = vmatpush3.bf16.msra.mxu1 %v16786_v2  ;;  %10318 = vmatprep.subr.bf16.mxu0 %v16789_v12  ;;  %v16799_v2 = vld [vmem:[#allocation10 + $0x1d14] ss:$92 sps:$4 sm:$0xff]   ;;  %19497 = vst [vmem:[#allocation75_spill] sm:$0xff] %v18747_v7  ;;  %19502 = vst [vmem:[#allocation80_spill] sm:$0xff] %v18784_v49 }
 0x9d6   :  { %14413 = vmatprep.subr.bf16.mxu1 %v16790_v11  ;;  %v9891_v53 = vpop.f32.mrb[104].mxu1  ;;  %v16797_v12 = vld [vmem:[#allocation10 + $0x1d10] ss:$92 sps:$4 sm:$0xff]   ;;  %19503 = vst [vmem:[#allocation81_spill] sm:$0xff] %v18791_v25 }
 0x9d7   :  { %v18360_v21 = vadd.f32 %v9891_v53, %v18305_v41  ;;  %v9893_v5 = vpop.f32.mrb[105].mxu1  ;;  %v16801_v41 = vld [vmem:[#allocation10 + $0xbd8] ss:$92 sps:$4 sm:$0xff]   ;;  %v16804_v11 = vld [vmem:[#allocation10 + $0x1dcc] ss:$92 sps:$4 sm:$0xff]  }
 0x9d8   :  { %10319 = vmatpush1.bf16.msra.mxu0 %v16787_v36  ;;  %v18363_v46 = vadd.f32 %v9893_v5, %v18311_v23  ;;  %v9895_v59 = vpop.f32.mrb[106].mxu1  ;;  %v16805_v36 = vld [vmem:[#allocation10 + $0x1250] ss:$92 sps:$4 sm:$0xff]   ;;  %v16802_v23 = vld [vmem:[#allocation10 + $0x1dc8] ss:$92 sps:$4 sm:$0xff]  }
 0x9d9   :  { %19450 = vst [vmem:[#allocation47_spill] sm:$0xff] %v18360_v21  ;;  %14414 = vmatpush3.bf16.msra.mxu1 %v16791_v4  ;;  %10320 = vmatprep.subr.bf16.mxu0 %v16794_v60  ;;  %v9896_v13 = vpop.f32.mrb[107].mxu1  ;;  %v16806_v4 = vld [vmem:[#allocation10 + $0xc90] ss:$92 sps:$4 sm:$0xff]   ;;  %v16809_v60 = vld [vmem:[#allocation10 + $0x1e84] ss:$92 sps:$4 sm:$0xff]  }
 0x9da   :  { %19451 = vst [vmem:[#allocation49_spill] sm:$0xff] %v18363_v46  ;;  %14415 = vmatprep.subr.bf16.mxu1 %v16795_v58  ;;  %v16810_v53 = vld [vmem:[#allocation10 + $0x1308] ss:$92 sps:$4 sm:$0xff]   ;;  %v16807_v58 = vld [vmem:[#allocation10 + $0x1e80] ss:$92 sps:$4 sm:$0xff]   ;;  %v18779_v21 = vld [vmem:[%s19322_s15 + $0xe8] sm:$0xff]  }
 0x9db   :  { %v16811_v5 = vld [vmem:[#allocation10 + $0xd48] ss:$92 sps:$4 sm:$0xff]   ;;  %v16815_v59 = vld [vmem:[#allocation10 + $0x13c0] ss:$92 sps:$4 sm:$0xff]   ;;  %v16820_v13 = vld [vmem:[#allocation10 + $0x1478] ss:$92 sps:$4 sm:$0xff]  }
 0x9dc   :  { %10321 = vmatpush1.bf16.msra.mxu0 %v16792_v33  ;;  %v16814_v33 = vld [vmem:[#allocation10 + $0x1f3c] ss:$92 sps:$4 sm:$0xff]   ;;  %v19479_v46 = vld [vmem:[#allocation53_spill] sm:$0xff]  ;;  %19501 = vst [vmem:[#allocation79_spill] sm:$0xff] %v18779_v21 }
 0x9dd   :  { %14416 = vmatpush3.bf16.msra.mxu1 %v16796_v63  ;;  %10322 = vmatprep.subr.bf16.mxu0 %v16799_v2  ;;  %v16819_v63 = vld [vmem:[#allocation10 + $0x1ff4] ss:$92 sps:$4 sm:$0xff]  }
 0x9de   :  { %14429 = vmatprep.subr.bf16.mxu1 %v16800_v17  ;;  %v16817_v2 = vld [vmem:[#allocation10 + $0x1ff0] ss:$92 sps:$4 sm:$0xff]   ;;  %v16821_v17 = vld [vmem:[#allocation10 + $0xeb8] ss:$92 sps:$4 sm:$0xff]  }
 0x9e0   :  { %10390 = vmatmul.mubr.bf16.vlgmr.msra.gmra.mrb[124].mxu1 %v17751_v42  ;;  %10323 = vmatpush1.bf16.msra.mxu0 %v16797_v12  ;;  %v16812_v42 = vld [vmem:[#allocation10 + $0x1f38] ss:$92 sps:$4 sm:$0xff]   ;;  %v16824_v12 = vld [vmem:[#allocation10 + $0x20ac] ss:$92 sps:$4 sm:$0xff]  }
 0x9e1   :  { %10397 = vmatprep.mubr.bf16.mxu1 %v17774_v39  ;;  %14430 = vmatpush3.bf16.msra.mxu1 %v16801_v41  ;;  %v16816_v39 = vld [vmem:[#allocation10 + $0xe00] ss:$92 sps:$4 sm:$0xff]   ;;  %v16825_v41 = vld [vmem:[#allocation10 + $0x1530] ss:$92 sps:$4 sm:$0xff]  }
 0x9e2   :  { %10324 = vmatprep.subr.bf16.mxu0 %v16804_v11  ;;  %14431 = vmatprep.subr.bf16.mxu1 %v16805_v36  ;;  %v16826_v11 = vld [vmem:[#allocation10 + $0xf70] ss:$92 sps:$4 sm:$0xff]   ;;  %v16829_v36 = vld [vmem:[#allocation10 + $0x2164] ss:$92 sps:$4 sm:$0xff]  }
 0x9e4   :  { %10325 = vmatpush1.bf16.msra.mxu0 %v16802_v23  ;;  %v16827_v23 = vld [vmem:[#allocation10 + $0x2160] ss:$92 sps:$4 sm:$0xff]  }
 0x9e5   :  { %14432 = vmatpush3.bf16.msra.mxu1 %v16806_v4  ;;  %10326 = vmatprep.subr.bf16.mxu0 %v16809_v60  ;;  %v16831_v4 = vld [vmem:[#allocation10 + $0x1028] ss:$92 sps:$4 sm:$0xff]   ;;  %v16834_v60 = vld [vmem:[#allocation10 + $0x221c] ss:$92 sps:$4 sm:$0xff]  }
 0x9e6   :  { %14433 = vmatprep.subr.bf16.mxu1 %v16810_v53  ;;  %v16835_v53 = vld [vmem:[#allocation10 + $0x16a0] ss:$92 sps:$4 sm:$0xff]  }
 0x9e8   :  { %10398 = vmatmul.mubr.bf16.gmra.mrb[128].mxu1 %v17782_v50  ;;  %10327 = vmatpush1.bf16.msra.mxu0 %v16807_v58  ;;  %v16822_v50 = vld [vmem:[#allocation10 + $0x20a8] ss:$92 sps:$4 sm:$0xff]   ;;  %v10506_v58 = vld [vmem:[#allocation15] sm:$0xff] }
 0x9e9   :  { %14434 = vmatpush3.bf16.msra.mxu1 %v16811_v5  ;;  %10437 = vmatprep.mubr.bf16.mxu1 %v17757_v27  ;;  %v16830_v27 = vld [vmem:[#allocation10 + $0x15e8] ss:$92 sps:$4 sm:$0xff]   ;;  %v16832_v5 = vld [vmem:[#allocation10 + $0x2218] ss:$92 sps:$4 sm:$0xff]  }
 0x9ea   :  { %10328 = vmatprep.subr.bf16.mxu0 %v16814_v33  ;;  %14435 = vmatprep.subr.bf16.mxu1 %v16815_v59  ;;  %v16836_v33 = vld [vmem:[#allocation10 + $0x10e0] ss:$92 sps:$4 sm:$0xff]   ;;  %v14179_v59 = vcombine.high %v10506_v58, %v10506_v58 }
 0x9ec   :  { %10329 = vmatpush1.bf16.msra.mxu0 %v16812_v42  ;;  %v16837_v42 = vld [vmem:[#allocation10 + $0x1d18] ss:$92 sps:$4 sm:$0xff]  }
 0x9ed   :  { %14436 = vmatpush3.bf16.msra.mxu1 %v16816_v39  ;;  %10330 = vmatprep.subr.bf16.mxu0 %v16819_v63  ;;  %v14178_v39 = vcombine.low %v10506_v58, %v10506_v58  ;;  %v16838_v63 = vld [vmem:[#allocation10 + $0x1758] ss:$92 sps:$4 sm:$0xff]  }
 0x9ee   :  { %14437 = vmatprep.subr.bf16.mxu1 %v16820_v13  ;;  %v16839_v13 = vld [vmem:[#allocation10 + $0x1dd0] ss:$92 sps:$4 sm:$0xff]  }
 0x9f0   :  { %10331 = vmatpush1.bf16.msra.mxu0 %v16817_v2  ;;  %v10519_v2 = vsel %vm285_vm2, %v14178_v39, 0 }
 0x9f1   :  { %14438 = vmatpush3.bf16.msra.mxu1 %v16821_v17  ;;  %10332 = vmatprep.subr.bf16.mxu0 %v16824_v12  ;;  %v16840_v17 = vld [vmem:[#allocation10 + $0x1810] ss:$92 sps:$4 sm:$0xff]   ;;  %v16843_v12 = vld [vmem:[#allocation10 + $0x1e88] ss:$92 sps:$4 sm:$0xff]  }
 0x9f2   :  { %14439 = vmatprep.subr.bf16.mxu1 %v16825_v41  ;;  %v16844_v41 = vld [vmem:[#allocation10 + $0x18c8] ss:$92 sps:$4 sm:$0xff]  }
 0x9f4   :  { %10333 = vmatpush1.bf16.msra.mxu0 %v16822_v50  ;;  %v16845_v50 = vld [vmem:[#allocation10 + $0x1f40] ss:$92 sps:$4 sm:$0xff]  }
 0x9f5   :  { %14440 = vmatpush3.bf16.msra.mxu1 %v16826_v11  ;;  %10334 = vmatprep.subr.bf16.mxu0 %v16829_v36  ;;  %v19452_v11 = vmov 0   ;;  %v16846_v36 = vld [vmem:[#allocation10 + $0x1980] ss:$92 sps:$4 sm:$0xff]  }
 0x9f6   :  { %14441 = vmatprep.subr.bf16.mxu1 %v16830_v27  ;;  %v16847_v27 = vld [vmem:[#allocation10 + $0x1ff8] ss:$92 sps:$4 sm:$0xff]  }
 0x9f8   :  { %10335 = vmatpush1.bf16.msra.mxu0 %v16827_v23 }
 0x9f9   :  { %14442 = vmatpush3.bf16.msra.mxu1 %v16831_v4  ;;  %10336 = vmatprep.subr.bf16.mxu0 %v16834_v60  ;;  %v16848_v4 = vld [vmem:[#allocation10 + $0x1a38] ss:$92 sps:$4 sm:$0xff]  }
 0x9fa   :  { %14443 = vmatprep.subr.bf16.mxu1 %v16835_v53 }
 0x9fc   :  { %10337 = vmatpush1.bf16.msra.mxu0 %v16832_v5 }
 0x9fd   :  { %14444 = vmatpush3.bf16.msra.mxu1 %v16836_v33  ;;  %14180 = vmatprep.subr.msk.bf16.mxu0 %vm285_vm2, %v14179_v59  ;;  %v19454_v33 = vld [vmem:[#allocation31_spill] sm:$0xff] }
 0x9fe   :  { %14457 = vmatprep.subr.bf16.mxu1 %v16837_v42 }
 0x9ff   :  { %10339 = vmatmul.mubr.bf16.vlgmr.msra.gmra.mrb[132].mxu0 %v17759_v28 }
 0xa00   :  { %10438 = vmatmul.mubr.bf16.vlgmr.msra.gmra.mrb[132].mxu1 %v17755_v26  ;;  %10348 = vmatprep.mubr.bf16.mxu0 %v17869_v48  ;;  %v10501_v26 = vld [vmem:[%s19315_s8] sm:$0xff] }
 0xa01   :  { %10445 = vmatprep.mubr.bf16.mxu1 %v17771_v38  ;;  %14458 = vmatpush3.bf16.msra.mxu1 %v16838_v63  ;;  %v10502_v38 = vld [vmem:[%s19315_s8 + $0x8] sm:$0xff] }
 0xa02   :  { %14459 = vmatprep.subr.bf16.mxu1 %v16839_v13  ;;  %10525 = vmatpush1.bf16.msra.mxu0 %v10519_v2  ;;  %v10504_v23 = vpack.c.bf16 %v10502_v38, %v10501_v26  ;;  %v16850_v13 = vld [vmem:[#allocation10 + $0x1af0] ss:$92 sps:$4 sm:$0xff]   ;;  %v19458_v26 = vld [vmem:[#allocation33_spill] sm:$0xff] }
 0xa05   :  { %14460 = vmatpush3.bf16.msra.mxu1 %v16840_v17 }
 0xa06   :  { %14461 = vmatprep.subr.bf16.mxu1 %v16843_v12 }
 0xa07   :  { %10349 = vmatmul.mubr.bf16.gmra.mrb[136].mxu0 %v17895_v34 }
 0xa08   :  { %10446 = vmatmul.mubr.bf16.gmra.mrb[136].mxu1 %v17787_v55  ;;  %10556 = vmatprep.mubr.bf16.mxu0 %v19452_v11  ;;  %v16849_v55 = vld [vmem:[#allocation10 + $0x20b0] ss:$92 sps:$4 sm:$0xff]  }
 0xa09   :  { %14462 = vmatpush3.bf16.msra.mxu1 %v16844_v41  ;;  %10485 = vmatprep.mubr.bf16.mxu1 %v17761_v29  ;;  %v10503_v29 = vld [vmem:[%s19315_s8 + $0x10] sm:$0xff] }
 0xa0a   :  { %14463 = vmatprep.subr.bf16.mxu1 %v16845_v50  ;;  %v16851_v50 = vld [vmem:[#allocation10 + $0x2168] ss:$92 sps:$4 sm:$0xff]  }
 0xa0d   :  { %14464 = vmatpush3.bf16.msra.mxu1 %v16846_v36 }
 0xa0e   :  { %14465 = vmatprep.subr.bf16.mxu1 %v16847_v27  ;;  %v10505_v27 = vpack.c.bf16 %v10503_v29, %v10503_v29 }
 0xa0f   :  { %14181 = vmatmul.mubr.msk.bf16.vlgmr.msra.gmra.mrb[140].mxu0 %vm210_vm1, %v10504_v23  ;;  %v10034_v60 = vpop.f32.mrb[116].mxu0  ;;  %v19460_v23 = vld [vmem:[#allocation34_spill] sm:$0xff] }
 0xa10   :  { %v18387_v53 = vadd.f32 %v10034_v60, %v18322_v52  ;;  %v10085_v58 = vpop.f32.mrb[108].mxu1  ;;  %v10036_v5 = vpop.f32.mrb[117].mxu0  ;;  %10566 = vmatprep.mubr.bf16.mxu0 %v19452_v11  ;;  %v19456_v52 = vld [vmem:[#allocation32_spill] sm:$0xff]  ;;  %v16852_v60 = vld [vmem:[#allocation10 + $0x1ba8] ss:$92 sps:$4 sm:$0xff]  }
 0xa11   :  { %14466 = vmatpush3.bf16.msra.mxu1 %v16848_v4  ;;  %v18394_v59 = vadd.f32 %v10085_v58, %v19454_v33  ;;  %v18397_v42 = vadd.f32 %v10036_v5, %v18325_v22  ;;  %v10087_v39 = vpop.f32.mrb[109].mxu1  ;;  %v10038_v63 = vpop.f32.mrb[118].mxu0 }
 0xa12   :  { %19453 = vst [vmem:[#allocation50_spill] sm:$0xff] %v18387_v53  ;;  %v18400_v2 = vadd.f32 %v10087_v39, %v19456_v52  ;;  %14467 = vmatprep.subr.bf16.mxu1 %v16849_v55  ;;  %v18403_v17 = vadd.f32 %v10038_v63, %v18328_v45  ;;  %v10089_v12 = vpop.f32.mrb[110].mxu1  ;;  %v10040_v41 = vpop.f32.mrb[119].mxu0  ;;  %v16853_v55 = vld [vmem:[#allocation10 + $0x2220] ss:$92 sps:$4 sm:$0xff]   ;;  %v18761_v53 = vld [vmem:[%s19322_s15 + $0xe0] sm:$0xff]  }
 0xa13   :  { %19455 = vst [vmem:[#allocation31_spill] sm:$0xff] %v18397_v42  ;;  %v18406_v38 = vadd.f32 %v10089_v12, %v19458_v26  ;;  %v18409_v36 = vadd.f32 %v10040_v41, %v18331_v24  ;;  %v10091_v22 = vpop.f32.mrb[111].mxu1  ;;  %v19462_v24 = vld [vmem:[#allocation36_spill] sm:$0xff]  ;;  %v19464_v12 = vld [vmem:[#allocation38_spill] sm:$0xff]  ;;  %19498 = vst [vmem:[#allocation76_spill] sm:$0xff] %v18761_v53 }
 0xa14   :  { %19457 = vst [vmem:[#allocation32_spill] sm:$0xff] %v18403_v17  ;;  %v18412_v4 = vadd.f32 %v10091_v22, %v19460_v23  ;;  %v16854_v52 = vld [vmem:[#allocation10 + $0x1c60] ss:$92 sps:$4 sm:$0xff]   ;;  %v16856_v22 = vld [vmem:[%s19320_s13] sm:$0xff]  }
 0xa15   :  { %19459 = vst [vmem:[#allocation33_spill] sm:$0xff] %v18409_v36  ;;  %14468 = vmatpush3.bf16.msra.mxu1 %v16850_v13  ;;  %v18728_v17 = vld [vmem:[%s19322_s15 + $0x90] sm:$0xff]   ;;  %v18742_v36 = vld [vmem:[%s19322_s15 + $0xd8] sm:$0xff]   ;;  %v18766_v42 = vld [vmem:[%s19322_s15 + $0x140] sm:$0xff]  }
 0xa16   :  { %14469 = vmatprep.subr.bf16.mxu1 %v16851_v50  ;;  %19499 = vst [vmem:[#allocation77_spill] sm:$0xff] %v18766_v42 }
 0xa17   :  { %14182 = vmatmul.mubr.msk.bf16.gmra.mrb[144].mxu0 %vm210_vm1, %v10505_v27  ;;  %v10044_v45 = vpop.f32.mrb[120].mxu0  ;;  %v16857_v27 = vld [vmem:[%s19320_s13 + $0x48] sm:$0xff]  }
 0xa18   :  { %v18416_v58 = vadd.f32 %v10044_v45, %v18334_v10  ;;  %v10095_v5 = vpop.f32.mrb[112].mxu1  ;;  %v10046_v33 = vpop.f32.mrb[121].mxu0  ;;  %v19466_v45 = vld [vmem:[#allocation52_spill] sm:$0xff] }
 0xa19   :  { %14470 = vmatpush3.bf16.msra.mxu1 %v16852_v60  ;;  %v18419_v39 = vadd.f32 %v10095_v5, %v19462_v24  ;;  %v18422_v29 = vadd.f32 %v10046_v33, %v18337_v43  ;;  %v10097_v63 = vpop.f32.mrb[113].mxu1  ;;  %v10048_v13 = vpop.f32.mrb[122].mxu0  ;;  %v16855_v43 = vld [vmem:[%s19320_s13 + $0x40] sm:$0xff]   ;;  %v16860_v24 = vld [vmem:[%s19320_s13 + $0x10] sm:$0xff]  }
 0xa1a   :  { %19461 = vst [vmem:[#allocation34_spill] sm:$0xff] %v18416_v58  ;;  %v18425_v41 = vadd.f32 %v10097_v63, %v19464_v12  ;;  %14471 = vmatprep.subr.bf16.mxu1 %v16853_v55  ;;  %v10099_v50 = vpop.f32.mrb[114].mxu1  ;;  %v10049_v26 = vpop.f32.mrb[123].mxu0  ;;  %14485 = vmatprep.subr.bf16.mxu0 %v16855_v43  ;;  %v16859_v55 = vld [vmem:[%s19320_s13 + $0x50] sm:$0xff]   ;;  %v19467_v63 = vld [vmem:[#allocation54_spill] sm:$0xff]  ;;  %v19468_v12 = vld [vmem:[#allocation55_spill] sm:$0xff] }
 0xa1b   :  { %19463 = vst [vmem:[#allocation36_spill] sm:$0xff] %v18422_v29  ;;  %v10100_v10 = vpop.f32.mrb[115].mxu1  ;;  %14486 = vmatpush3.bf16.msra.mxu0 %v16856_v22  ;;  %v16861_v26 = vld [vmem:[%s19320_s13 + $0x58] sm:$0xff]   ;;  %v19469_v22 = vld [vmem:[#allocation56_spill] sm:$0xff] }
 0xa1c   :  { %14487 = vmatprep.subr.bf16.mxu0 %v16857_v27  ;;  %v16862_v10 = vld [vmem:[%s19320_s13 + $0x18] sm:$0xff]  }
 0xa1d   :  { %14472 = vmatpush3.bf16.msra.mxu1 %v16854_v52 }
 0xa20   :  { %10486 = vmatmul.mubr.bf16.vlgmr.msra.gmra.mrb[140].mxu1 %v17759_v28  ;;  %v16858_v28 = vld [vmem:[%s19320_s13 + $0x8] sm:$0xff]  }
 0xa21   :  { %10493 = vmatprep.mubr.bf16.mxu1 %v17869_v48  ;;  %14488 = vmatpush3.bf16.msra.mxu0 %v16858_v28  ;;  %v19465_v48 = vld [vmem:[#allocation51_spill] sm:$0xff] }
 0xa22   :  { %14489 = vmatprep.subr.bf16.mxu0 %v16859_v55 }
 0xa25   :  { %14490 = vmatpush3.bf16.msra.mxu0 %v16860_v24  ;;  %v16865_v24 = vld [vmem:[%s19320_s13 + $0x68] sm:$0xff]  }
 0xa26   :  { %14491 = vmatprep.subr.bf16.mxu0 %v16861_v26  ;;  %v16869_v26 = vld [vmem:[%s19320_s13 + $0x78] sm:$0xff]  }
 0xa28   :  { %10494 = vmatmul.mubr.bf16.gmra.mrb[144].mxu1 %v17895_v34 }
 0xa29   :  { %10901 = vmatprep.mubr.bf16.mxu1 %v19452_v11  ;;  %14492 = vmatpush3.bf16.msra.mxu0 %v16862_v10  ;;  %v16870_v10 = vld [vmem:[%s19320_s13 + $0x38] sm:$0xff]  }
 0xa51   :  { %v10238_v34 = vpop.f32.mrb[124].mxu0 }
 0xa52   :  { %v18444_v23 = vadd.f32 %v10238_v34, %v19465_v48  ;;  %v10240_v60 = vpop.f32.mrb[125].mxu0  ;;  %v16863_v34 = vld [vmem:[%s19320_s13 + $0x60] sm:$0xff]   ;;  %v19470_v48 = vld [vmem:[#allocation57_spill] sm:$0xff] }
 0xa53   :  { %v18450_v5 = vadd.f32 %v10240_v60, %v19466_v45  ;;  %v10242_v33 = vpop.f32.mrb[126].mxu0  ;;  %v16864_v45 = vld [vmem:[%s19320_s13 + $0x20] sm:$0xff]   ;;  %14493 = vmatprep.subr.bf16.mxu0 %v16863_v34 }
 0xa54   :  { %v18456_v13 = vadd.f32 %v10242_v33, %v19467_v63  ;;  %v10244_v52 = vpop.f32.mrb[127].mxu0  ;;  %14494 = vmatpush3.bf16.msra.mxu0 %v16864_v45  ;;  %v16866_v63 = vld [vmem:[%s19320_s13 + $0x28] sm:$0xff]  }
 0xa55   :  { %v18459_v50 = vadd.f32 %v10244_v52, %v19468_v12  ;;  %14495 = vmatprep.subr.bf16.mxu0 %v16865_v24  ;;  %v16867_v52 = vld [vmem:[%s19320_s13 + $0x70] sm:$0xff]  }
 0xa56   :  { %v16868_v12 = vld [vmem:[%s19320_s13 + $0x30] sm:$0xff]  }
 0xa58   :  { %14496 = vmatpush3.bf16.msra.mxu0 %v16866_v63 }
 0xa59   :  { %v10248_v43 = vpop.f32.mrb[128].mxu0  ;;  %14497 = vmatprep.subr.bf16.mxu0 %v16867_v52 }
 0xa5a   :  { %v18468_v27 = vadd.f32 %v10248_v43, %v19469_v22  ;;  %v10250_v28 = vpop.f32.mrb[129].mxu0 }
 0xa5b   :  { %v18474_v60 = vadd.f32 %v10250_v28, %v19470_v48  ;;  %v10252_v55 = vpop.f32.mrb[130].mxu0 }
 0xa5c   :  { %v10253_v33 = vpop.f32.mrb[131].mxu0  ;;  %14498 = vmatpush3.bf16.msra.mxu0 %v16868_v12 }
 0xa5d   :  { %14499 = vmatprep.subr.bf16.mxu0 %v16869_v26 }
 0xa60   :  { %14500 = vmatpush3.bf16.msra.mxu0 %v16870_v10 }
 0xa91   :  { %v10187_v43 = vpop.f32.mrb[116].mxu1 }
 0xa92   :  { %v18498_v22 = vadd.f32 %v10187_v43, %v18394_v59  ;;  %v10189_v28 = vpop.f32.mrb[117].mxu1 }
 0xa93   :  { %v18501_v34 = vadd.f32 %v10189_v28, %v18400_v2  ;;  %v10191_v48 = vpop.f32.mrb[118].mxu1 }
 0xa94   :  { %19471 = vst [vmem:[#allocation38_spill] sm:$0xff] %v18498_v22  ;;  %v18504_v55 = vadd.f32 %v10191_v48, %v18406_v38  ;;  %v10193_v45 = vpop.f32.mrb[119].mxu1  ;;  %v19477_v48 = vld [vmem:[#allocation42_spill] sm:$0xff]  ;;  %v18752_v22 = vld [vmem:[%s19322_s15 + $0x98] sm:$0xff]  }
 0xa95   :  { %19472 = vst [vmem:[#allocation51_spill] sm:$0xff] %v18501_v34  ;;  %v18507_v33 = vadd.f32 %v10193_v45, %v18412_v4  ;;  %v19478_v4 = vld [vmem:[#allocation48_spill] sm:$0xff] }
 0xa96   :  { %19473 = vst [vmem:[#allocation52_spill] sm:$0xff] %v18504_v55  ;;  %v18723_v55 = vld [vmem:[%s19322_s15 + $0x30] sm:$0xff]  }
 0xa97   :  { %19474 = vst [vmem:[#allocation54_spill] sm:$0xff] %v18507_v33  ;;  %19495 = vst [vmem:[#allocation73_spill] sm:$0xff] %v18723_v55 }
 0xa99   :  { %v10197_v24 = vpop.f32.mrb[120].mxu1 }
 0xa9a   :  { %v18510_v63 = vadd.f32 %v10197_v24, %v18419_v39  ;;  %v10199_v52 = vpop.f32.mrb[121].mxu1 }
 0xa9b   :  { %v18513_v59 = vadd.f32 %v10199_v52, %v18425_v41  ;;  %v10201_v12 = vpop.f32.mrb[122].mxu1 }
 0xa9c   :  { %19475 = vst [vmem:[#allocation55_spill] sm:$0xff] %v18510_v63  ;;  %v10202_v26 = vpop.f32.mrb[123].mxu1 }
 0xa9d   :  { %19476 = vst [vmem:[#allocation56_spill] sm:$0xff] %v18513_v59 }
 0xab3   :  { %v14417_v2 = vpop.f32.mrb[124].mxu1 }
 0xab4   :  { %v14418_v10 = vpop.f32.mrb[125].mxu1 }
 0xab5   :  { %v14419_v43 = vadd.f32 %v14418_v10, %v14417_v2  ;;  %v14420_v28 = vpop.f32.mrb[126].mxu1 }
 0xab6   :  { %v14421_v38 = vpop.f32.mrb[127].mxu1 }
 0xab7   :  { %v10392_v34 = vadd.f32 %v14419_v43, %v19477_v48  ;;  %v14422_v58 = vadd.f32 %v14421_v38, %v14420_v28 }
 0xab9   :  { %v10395_v45 = vadd.f32 %v14422_v58, %v19478_v4 }
 0xabb   :  { %v14423_v33 = vpop.f32.mrb[128].mxu1 }
 0xabc   :  { %v14424_v29 = vpop.f32.mrb[129].mxu1 }
 0xabd   :  { %v14425_v39 = vadd.f32 %v14424_v29, %v14423_v33  ;;  %v14426_v24 = vpop.f32.mrb[130].mxu1 }
 0xabe   :  { %v14427_v63 = vpop.f32.mrb[131].mxu1 }
 0xabf   :  { %v10400_v41 = vadd.f32 %v14425_v39, %v19479_v46 }
 0xad2   :  { %v10340_v52 = vpop.f32.mrb[132].mxu0 }
 0xad3   :  { %v18519_v12 = vadd.f32 %v10340_v52, %v18444_v23  ;;  %v14445_v26 = vpop.f32.mrb[132].mxu1  ;;  %v10342_v2 = vpop.f32.mrb[133].mxu0 }
 0xad4   :  { %v18522_v10 = vadd.f32 %v10342_v2, %v18450_v5  ;;  %v14446_v43 = vpop.f32.mrb[133].mxu1  ;;  %v10344_v28 = vpop.f32.mrb[134].mxu0 }
 0xad5   :  { %19480 = vst [vmem:[#allocation57_spill] sm:$0xff] %v18519_v12  ;;  %v14447_v38 = vadd.f32 %v14446_v43, %v14445_v26  ;;  %v18525_v58 = vadd.f32 %v10344_v28, %v18456_v13  ;;  %v14448_v29 = vpop.f32.mrb[134].mxu1  ;;  %v10346_v33 = vpop.f32.mrb[135].mxu0  ;;  %v18705_v12 = vld [vmem:[%s19322_s15 + $0x88] sm:$0xff]  }
 0xad6   :  { %19481 = vst [vmem:[#allocation42_spill] sm:$0xff] %v18522_v10  ;;  %v18528_v63 = vadd.f32 %v10346_v33, %v18459_v50  ;;  %v14449_v46 = vpop.f32.mrb[135].mxu1  ;;  %v18713_v10 = vld [vmem:[%s19322_s15 + $0x70] sm:$0xff]  }
 0xad7   :  { %19482 = vst [vmem:[#allocation48_spill] sm:$0xff] %v18525_v58  ;;  %v10440_v48 = vadd.f32 %v14447_v38, %v10392_v34  ;;  %v14450_v23 = vadd.f32 %v14449_v46, %v14448_v29  ;;  %19494 = vst [vmem:[#allocation72_spill] sm:$0xff] %v18713_v10 }
 0xad8   :  { %19483 = vst [vmem:[#allocation53_spill] sm:$0xff] %v18528_v63 }
 0xad9   :  { %v10443_v4 = vadd.f32 %v14450_v23, %v10395_v45 }
 0xada   :  { %v10350_v39 = vpop.f32.mrb[136].mxu0 }
 0xadb   :  { %v18531_v24 = vadd.f32 %v10350_v39, %v18468_v27  ;;  %v14451_v5 = vpop.f32.mrb[136].mxu1  ;;  %v10352_v52 = vpop.f32.mrb[137].mxu0 }
 0xadc   :  { %v18534_v26 = vadd.f32 %v10352_v52, %v18474_v60  ;;  %v14452_v13 = vpop.f32.mrb[137].mxu1  ;;  %v10354_v2 = vpop.f32.mrb[138].mxu0 }
 0xadd   :  { %19484 = vst [vmem:[#allocation64_spill] sm:$0xff] %v18531_v24  ;;  %v14453_v43 = vadd.f32 %v14452_v13, %v14451_v5  ;;  %v14454_v28 = vpop.f32.mrb[138].mxu1  ;;  %v10355_v59 = vpop.f32.mrb[139].mxu0  ;;  %v19486_v5 = vld [vmem:[#allocation58_spill] sm:$0xff] }
 0xade   :  { %19485 = vst [vmem:[#allocation65_spill] sm:$0xff] %v18534_v26  ;;  %v14455_v50 = vpop.f32.mrb[139].mxu1 }
 0xadf   :  { %v10448_v33 = vadd.f32 %v14453_v43, %v10400_v41 }
 0xae2   :  { %v10558_v58 = vpop.f32.mrb[140].mxu0 }
 0xae3   :  { %v10575_v34 = vmul.f32 %v17984_v54, %v10558_v58  ;;  %v10560_v45 = vpop.f32.mrb[141].mxu0 }
 0xae4   :  { %v10576_v38 = vmul.f32 %v17990_v62, %v10560_v45  ;;  %v10562_v27 = vpop.f32.mrb[142].mxu0 }
 0xae5   :  { %v10577_v29 = vmul.f32 %v17996_v37, %v10562_v27  ;;  %v10564_v46 = vpop.f32.mrb[143].mxu0 }
 0xae6   :  { %v10578_v60 = vmul.f32 %v18002_v30, %v10564_v46 }
 0xae7   :  { %v10581_v23 = vpack.c.bf16 %v10577_v29, %v10575_v34 }
 0xae8   :  { %v10582_v39 = vpack.c.bf16 %v10578_v60, %v10576_v38 }
 0xaea   :  { %v10568_v52 = vpop.f32.mrb[144].mxu0  ;;  %10745 = vmatprep.mubr.bf16.mxu0 %v10582_v39  ;;  %v10766_v39 = vld [vmem:[#allocation16] sm:$0xff] }
 0xaeb   :  { %v10579_v59 = vmul.f32 %v19486_v5, %v10568_v52  ;;  %v10570_v13 = vpop.f32.mrb[145].mxu0  ;;  %10746 = vmatmul.mubr.bf16.vlgmr.msra.gmra.mrb[148].mxu0 %v10581_v23  ;;  %v10770_v52 = vld [vmem:[#allocation16 + $0x20] sm:$0xff]  ;;  %v10768_v5 = vld [vmem:[#allocation16 + $0x10] sm:$0xff] }
 0xaec   :  { %v10580_v41 = vmul.f32 %v18014_v0, %v10570_v13  ;;  %v10572_v54 = vpop.f32.mrb[146].mxu0  ;;  %v10772_v13 = vld [vmem:[#allocation16 + $0x30] sm:$0xff] }
 0xaed   :  { %v10573_v58 = vpop.f32.mrb[147].mxu0  ;;  %v10583_v62 = vpack.c.bf16 %v10579_v59, %v10579_v59  ;;  %v18549_v59 = vcombine.high %v10766_v39, %v10770_v52  ;;  %v18553_v54 = vcombine.low %v10768_v5, %v10772_v13 }
 0xaee   :  { %v10584_v2 = vpack.c.bf16 %v10580_v41, %v10580_v41  ;;  %v18551_v41 = vcombine.low %v10766_v39, %v10770_v52  ;;  %v10776_v58 = vld [vmem:[#allocation16 + $0x50] sm:$0xff] }
 0xaef   :  { %10869 = vmatprep.subr.bf16.mxu1 %v18549_v59 }
 0xaf0   :  { %10753 = vmatprep.mubr.bf16.mxu0 %v10584_v2  ;;  %10870 = vmatpush1.bf16.msra.mxu1 %v18551_v41 }
 0xaf3   :  { %v14473_v43 = vpop.f32.mrb[140].mxu1  ;;  %10754 = vmatmul.mubr.bf16.gmra.mrb[152].mxu0 %v10583_v62  ;;  %v10780_v62 = vld [vmem:[#allocation16 + $0x70] sm:$0xff] }
 0xaf4   :  { %v14474_v37 = vpop.f32.mrb[141].mxu1  ;;  %11003 = vmatprep.mubr.bf16.mxu0 %v19452_v11 }
 0xaf5   :  { %v14475_v30 = vadd.f32 %v14474_v37, %v14473_v43  ;;  %v14476_v28 = vpop.f32.mrb[142].mxu1  ;;  %v18565_v37 = vcombine.low %v10776_v58, %v10780_v62 }
 0xaf6   :  { %v14477_v50 = vpop.f32.mrb[143].mxu1 }
 0xaf7   :  { %v14478_v34 = vadd.f32 %v14477_v50, %v14476_v28  ;;  %v18543_v45 = vadd.f32 %v14475_v30, %v10440_v48  ;;  %v18555_v48 = vcombine.high %v10768_v5, %v10772_v13  ;;  %v18567_v30 = vcombine.high %v10776_v58, %v10780_v62  ;;  %v10767_v28 = vld [vmem:[#allocation16 + $0x8] sm:$0xff] }
 0xaf8   :  { %v10771_v50 = vld [vmem:[#allocation16 + $0x28] sm:$0xff] }
 0xaf9   :  { %19487 = vst [vmem:[#allocation58_spill] sm:$0xff] %v18543_v45  ;;  %v18545_v38 = vadd.f32 %v14478_v34, %v10443_v4  ;;  %10971 = vmatprep.subr.bf16.mxu0 %v18555_v48  ;;  %v10774_v4 = vld [vmem:[#allocation16 + $0x40] sm:$0xff]  ;;  %v18573_v34 = vcombine.low %v10767_v28, %v10771_v50  ;;  %v10779_v58 = vld [vmem:[#allocation16 + $0x68] sm:$0xff]  ;;  %v10773_v45 = vld [vmem:[#allocation16 + $0x38] sm:$0xff] }
 0xafa   :  { %10972 = vmatpush1.bf16.msra.mxu0 %v18553_v54 }
 0xafb   :  { %19488 = vst [vmem:[#allocation66_spill] sm:$0xff] %v18545_v38  ;;  %v14479_v27 = vpop.f32.mrb[144].mxu1  ;;  %10973 = vmatprep.subr.bf16.mxu0 %v18567_v30 }
 0xafc   :  { %v14480_v0 = vpop.f32.mrb[145].mxu1 }
 0xafd   :  { %v14481_v29 = vadd.f32 %v14480_v0, %v14479_v27  ;;  %v14482_v46 = vpop.f32.mrb[146].mxu1  ;;  %v18575_v27 = vcombine.high %v10767_v28, %v10771_v50  ;;  %v18581_v0 = vld [vmem:[%s19322_s15 + $0x40] sm:$0xff]  }
 0xafe   :  { %v14483_v60 = vpop.f32.mrb[147].mxu1  ;;  %10974 = vmatpush1.bf16.msra.mxu0 %v18565_v37 }
 0xaff   :  { %v18547_v23 = vadd.f32 %v14481_v29, %v10448_v33  ;;  %v10778_v33 = vld [vmem:[#allocation16 + $0x60] sm:$0xff]  ;;  %14513 = vmatprep.subr.bf16.mxu0 %v18581_v0 }
 0xb00   :  { %v18561_v2 = vcombine.high %v10774_v4, %v10778_v33  ;;  %v18563_v43 = vcombine.low %v10774_v4, %v10778_v33  ;;  %v10775_v33 = vld [vmem:[#allocation16 + $0x48] sm:$0xff] }
 0xb01   :  { %19489 = vst [vmem:[#allocation67_spill] sm:$0xff] %v18547_v23  ;;  %v18586_v63 = vcombine.high %v10775_v33, %v10779_v58 }
 0xb02   :  { %10871 = vmatprep.subr.bf16.mxu1 %v18561_v2 }
 0xb03   :  { %10872 = vmatpush1.bf16.msra.mxu1 %v18563_v43 }
 0xb04   :  { %10920 = vmatprep.subr.bf16.mxu1 %v18575_v27 }
 0xbbe   :  { %v14501_v29 = vpop.f32.mrb[148].mxu0 }
 0xbbf   :  { %v14502_v46 = vpop.f32.mrb[149].mxu0 }
 0xbc0   :  { %v14503_v60 = vadd.f32 %v14502_v46, %v14501_v29  ;;  %v14504_v39 = vpop.f32.mrb[150].mxu0  ;;  %v10769_v46 = vld [vmem:[#allocation16 + $0x18] sm:$0xff] }
 0xbc1   :  { %v14505_v52 = vpop.f32.mrb[151].mxu0 }
 0xbc2   :  { %v10748_v5 = vadd.f32 %v18054_v20, %v14503_v60  ;;  %v14506_v13 = vadd.f32 %v14505_v52, %v14504_v39  ;;  %v18591_v20 = vld [vmem:[%s19322_s15] sm:$0xff]   ;;  %v18620_v39 = vld [vmem:[%s19322_s15 + $0x50] sm:$0xff]  }
 0xbc4   :  { %v10751_v4 = vadd.f32 %v18060_v14, %v14506_v13  ;;  %v10761_v62 = vmax.f32 %v10748_v5, 0.0  ;;  %v18627_v5 = vld [vmem:[%s19322_s15 + $0x10] sm:$0xff]   ;;  %v18634_v13 = vld [vmem:[%s19322_s15 + $0x58] sm:$0xff]  }
 0xbc6   :  { %v10762_v28 = vmax.f32 %v10751_v4, 0.0  ;;  %v14507_v50 = vpop.f32.mrb[152].mxu0  ;;  %v10777_v4 = vld [vmem:[#allocation16 + $0x58] sm:$0xff] }
 0xbc7   :  { %v14508_v23 = vpop.f32.mrb[153].mxu0 }
 0xbc8   :  { %v10764_v24 = vpack.c.bf16 %v10762_v28, %v10761_v62  ;;  %v14509_v26 = vadd.f32 %v14508_v23, %v14507_v50  ;;  %v14510_v38 = vpop.f32.mrb[154].mxu0  ;;  %v18603_v23 = vcombine.low %v10775_v33, %v10779_v58  ;;  %v10781_v33 = vld [vmem:[#allocation16 + $0x78] sm:$0xff]  ;;  %v18642_v58 = vld [vmem:[%s19322_s15 + $0x18] sm:$0xff]   ;;  %v18648_v62 = vld [vmem:[%s19322_s15 + $0x60] sm:$0xff]   ;;  %v18650_v28 = vcombine.low %v10769_v46, %v10773_v45 }
 0xbc9   :  { %v14511_v29 = vpop.f32.mrb[155].mxu0  ;;  %v18599_v38 = vld [vmem:[%s19322_s15 + $0x48] sm:$0xff]   ;;  %19490 = vst [vmem:[#allocation68_spill] sm:$0xff] %v18648_v62  ;;  %v18652_v50 = vcombine.high %v10777_v4, %v10781_v33 }
 0xbca   :  { %v10756_v14 = vadd.f32 %v18068_v31, %v14509_v26  ;;  %14215 = vmatmul.mubr.msk.bf16.vlgmr.msra.gmra.mrb[148].mxu1 %vm10862_vm4, %v10764_v24  ;;  %14219 = vmatmul.mubr.msk.bf16.vlgmr.msra.gmra.mrb[156].mxu0 %vm10862_vm4, %v10764_v24  ;;  %v18607_v31 = vcombine.high %v10769_v46, %v10773_v45  ;;  %v18613_v26 = vld [vmem:[%s19322_s15 + $0x8] sm:$0xff]   ;;  %v18658_v29 = vld [vmem:[%s19322_s15 + $0x20] sm:$0xff]   ;;  %v18669_v45 = vcombine.low %v10777_v4, %v10781_v33 }
 0xbcb   :  { %10911 = vmatprep.mubr.bf16.mxu1 %v19452_v11  ;;  %10921 = vmatpush1.bf16.msra.mxu1 %v18573_v34  ;;  %19491 = vst [vmem:[#allocation69_spill] sm:$0xff] %v18658_v29  ;;  %v18675_v46 = vld [vmem:[%s19322_s15 + $0xc0] sm:$0xff]   ;;  %v18697_v33 = vld [vmem:[%s19322_s15 + $0xc8] sm:$0xff]  }
 0xbcc   :  { %v10763_v60 = vmax.f32 %v10756_v14, 0.0  ;;  %11013 = vmatprep.mubr.bf16.mxu0 %v19452_v11  ;;  %10922 = vmatprep.subr.bf16.mxu1 %v18586_v63  ;;  %v18665_v14 = vld [vmem:[%s19322_s15 + $0x68] sm:$0xff]   ;;  %v18692_v4 = vld [vmem:[%s19322_s15 + $0x80] sm:$0xff]  }
 0xbcd   :  { %14514 = vmatpush3.bf16.msra.mxu0 %v18591_v20  ;;  %19492 = vst [vmem:[#allocation70_spill] sm:$0xff] %v18665_v14 }
 0xbce   :  { %14515 = vmatprep.subr.bf16.mxu0 %v18599_v38  ;;  %v10765_v52 = vpack.c.bf16 %v10763_v60, %v10763_v60  ;;  %v18681_v60 = vld [vmem:[%s19322_s15 + $0x28] sm:$0xff]  }
 0xbcf   :  { %10923 = vmatpush1.bf16.msra.mxu1 %v18603_v23  ;;  %19493 = vst [vmem:[#allocation71_spill] sm:$0xff] %v18681_v60 }
 0xbd0   :  { %11022 = vmatprep.subr.bf16.mxu1 %v18607_v31 }
 0xbd1   :  { %14516 = vmatpush3.bf16.msra.mxu0 %v18613_v26 }
 0xbd2   :  { %14216 = vmatmul.mubr.msk.bf16.gmra.mrb[152].mxu1 %vm10862_vm4, %v10765_v52  ;;  %14220 = vmatmul.mubr.msk.bf16.gmra.mrb[160].mxu0 %vm10862_vm4, %v10765_v52 }
 0xbd3   :  { %10952 = vmatprep.mubr.bf16.mxu1 %v19452_v11  ;;  %14517 = vmatprep.subr.bf16.mxu0 %v18620_v39 }
 0xbd5   :  { %14518 = vmatpush3.bf16.msra.mxu0 %v18627_v5 }
 0xbd6   :  { %14519 = vmatprep.subr.bf16.mxu0 %v18634_v13 }
 0xbd9   :  { %14520 = vmatpush3.bf16.msra.mxu0 %v18642_v58 }
 0xbda   :  { %14217 = vmatmul.mubr.msk.bf16.vlgmr.msra.gmra.mrb[156].mxu1 %vm10862_vm4, %v10764_v24  ;;  %14521 = vmatprep.subr.bf16.mxu0 %v18648_v62 }
 0xbdb   :  { %10962 = vmatprep.mubr.bf16.mxu1 %v19452_v11  ;;  %11023 = vmatpush1.bf16.msra.mxu1 %v18650_v28 }
 0xbdc   :  { %11024 = vmatprep.subr.bf16.mxu1 %v18652_v50 }
 0xbdd   :  { %14522 = vmatpush3.bf16.msra.mxu0 %v18658_v29 }
 0xbde   :  { %14523 = vmatprep.subr.bf16.mxu0 %v18665_v14 }
 0xbdf   :  { %11025 = vmatpush1.bf16.msra.mxu1 %v18669_v45 }
 0xbe0   :  { %14541 = vmatprep.subr.bf16.mxu1 %v18675_v46 }
 0xbe1   :  { %14524 = vmatpush3.bf16.msra.mxu0 %v18681_v60 }
 0xbe2   :  { %14218 = vmatmul.mubr.msk.bf16.gmra.mrb[160].mxu1 %vm10862_vm4, %v10765_v52  ;;  %14525 = vmatprep.subr.bf16.mxu0 %v18713_v10 }
 0xbe3   :  { %11054 = vmatprep.mubr.bf16.mxu1 %v19452_v11 }
 0xbe5   :  { %14526 = vmatpush3.bf16.msra.mxu0 %v18723_v55  ;;  %v18815_v55 = vld [vmem:[%s19322_s15 + $0x1c0] sm:$0xff]  }
 0xbe6   :  { %19507 = vst [vmem:[#allocation85_spill] sm:$0xff] %v18815_v55 }
 0xbea   :  { %14221 = vmatmul.mubr.msk.bf16.vlgmr.msra.gmra.mrb[164].mxu1 %vm10862_vm4, %v10764_v24  ;;  %v18718_v24 = vld [vmem:[%s19322_s15 + $0xd0] sm:$0xff]  }
 0xbeb   :  { %11064 = vmatprep.mubr.bf16.mxu1 %v19452_v11  ;;  %14542 = vmatpush3.bf16.msra.mxu1 %v18692_v4 }
 0xbec   :  { %14543 = vmatprep.subr.bf16.mxu1 %v18697_v33 }
 0xbef   :  { %14544 = vmatpush3.bf16.msra.mxu1 %v18705_v12 }
 0xbf0   :  { %14545 = vmatprep.subr.bf16.mxu1 %v18718_v24 }
 0xbf2   :  { %14222 = vmatmul.mubr.msk.bf16.gmra.mrb[168].mxu1 %vm10862_vm4, %v10765_v52  ;;  %v18737_v52 = vld [vmem:[%s19322_s15 + $0x78] sm:$0xff]  }
 0xbf3   :  { %14546 = vmatpush3.bf16.msra.mxu1 %v18728_v17  ;;  %19496 = vst [vmem:[#allocation74_spill] sm:$0xff] %v18737_v52  ;;  %14527 = vmatprep.subr.bf16.mxu0 %v18737_v52  ;;  %v18808_v52 = vld [vmem:[%s19322_s15 + $0xb8] sm:$0xff]  }
 0xbf4   :  { %14547 = vmatprep.subr.bf16.mxu1 %v18742_v36  ;;  %14528 = vmatpush3.bf16.msra.mxu0 %v18747_v7  ;;  %v18803_v7 = vld [vmem:[%s19322_s15 + $0xf8] sm:$0xff]   ;;  %19506 = vst [vmem:[#allocation84_spill] sm:$0xff] %v18808_v52 }
 0xbf5   :  { %14569 = vmatprep.subr.bf16.mxu0 %v18766_v42  ;;  %v18796_v42 = vld [vmem:[%s19322_s15 + $0xb0] sm:$0xff]   ;;  %19505 = vst [vmem:[#allocation83_spill] sm:$0xff] %v18803_v7 }
 0xbf6   :  { %19504 = vst [vmem:[#allocation82_spill] sm:$0xff] %v18796_v42 }
 0xbf7   :  { %14548 = vmatpush3.bf16.msra.mxu1 %v18752_v22 }
 0xbf8   :  { %14549 = vmatprep.subr.bf16.mxu1 %v18761_v53 }
 0xbfb   :  { %14550 = vmatpush3.bf16.msra.mxu1 %v18771_v1 }
 0xbfc   :  { %14551 = vmatprep.subr.bf16.mxu1 %v18779_v21 }
 0xbff   :  { %14552 = vmatpush3.bf16.msra.mxu1 %v18784_v49 }
 0xc00   :  { %14553 = vmatprep.subr.bf16.mxu1 %v18791_v25 }
 0xc03   :  { %14554 = vmatpush3.bf16.msra.mxu1 %v18796_v42 }
 0xc04   :  { %14555 = vmatprep.subr.bf16.mxu1 %v18803_v7 }
 0xc07   :  { %14556 = vmatpush3.bf16.msra.mxu1 %v18808_v52 }
 0xc08   :  { %14597 = vmatprep.subr.bf16.mxu1 %v18815_v55 }
 0xc9d   :  { %v10903_v42 = vpop.f32.mrb[148].mxu1  ;;  %v11005_v25 = vpop.f32.mrb[156].mxu0 }
 0xc9e   :  { %v11073_v10 = vmul.f32 %v18057_v56, %v10903_v42  ;;  %v18820_v49 = vmul.f32 %v18159_v32, %v11005_v25  ;;  %v10905_v60 = vpop.f32.mrb[149].mxu1  ;;  %v11007_v21 = vpop.f32.mrb[157].mxu0 }
 0xc9f   :  { %v11074_v7 = vmul.f32 %v18086_v51, %v10905_v60  ;;  %v11078_v52 = vmul.f32 %v18182_v6, %v11007_v21  ;;  %v10907_v14 = vpop.f32.mrb[150].mxu1  ;;  %v11009_v1 = vpop.f32.mrb[158].mxu0  ;;  %v18835_v6 = vld [vmem:[%s19322_s15 + $0x100] sm:$0xff]  }
 0xca0   :  { %v11081_v29 = vmul.f32 %v18063_v19, %v10907_v14  ;;  %v18826_v53 = vmul.f32 %v18165_v47, %v11009_v1  ;;  %v10909_v55 = vpop.f32.mrb[151].mxu1  ;;  %v11011_v62 = vpop.f32.mrb[159].mxu0  ;;  %v18840_v19 = vld [vmem:[%s19322_s15 + $0x148] sm:$0xff]  }
 0xca1   :  { %v11082_v56 = vmul.f32 %v18098_v3, %v10909_v55  ;;  %v11086_v32 = vmul.f32 %v18194_v57, %v11011_v62  ;;  %v18854_v14 = vld [vmem:[%s19322_s15 + $0x108] sm:$0xff]  }
 0xca2   :  { %v11097_v25 = vpack.c.bf16 %v11081_v29, %v11073_v10 }
 0xca3   :  { %v11098_v51 = vpack.c.bf16 %v11082_v56, %v11074_v7  ;;  %v11102_v60 = vpack.c.bf16 %v11086_v32, %v11078_v52  ;;  %v18866_v52 = vld [vmem:[%s19322_s15 + $0x110] sm:$0xff]   ;;  %v18872_v32 = vld [vmem:[%s19322_s15 + $0x158] sm:$0xff]  }
 0xca5   :  { %v10913_v47 = vpop.f32.mrb[152].mxu1  ;;  %v11015_v3 = vpop.f32.mrb[160].mxu0  ;;  %11669 = vmatprep.mubr.bf16.mxu0 %v11098_v51 }
 0xca6   :  { %v11089_v57 = vmul.f32 %v18072_v16, %v10913_v47  ;;  %v18844_v1 = vmul.f32 %v18171_v61, %v11015_v3  ;;  %v10915_v7 = vpop.f32.mrb[153].mxu1  ;;  %v11017_v21 = vpop.f32.mrb[161].mxu0  ;;  %11670 = vmatmul.mubr.bf16.vlgmr.msra.gmra.mrb[164].mxu0 %v11097_v25 }
 0xca7   :  { %v11090_v55 = vmul.f32 %v18110_v35, %v10915_v7  ;;  %v18848_v10 = vmul.f32 %v18206_v8, %v11017_v21  ;;  %14570 = vmatpush3.bf16.msra.mxu0 %v18835_v6  ;;  %v10917_v62 = vpop.f32.mrb[154].mxu1  ;;  %v11019_v29 = vpop.f32.mrb[162].mxu0  ;;  %v18860_v35 = vld [vmem:[%s19322_s15 + $0x150] sm:$0xff]  }
 0xca8   :  { %v10918_v16 = vpop.f32.mrb[155].mxu1  ;;  %v11020_v61 = vpop.f32.mrb[163].mxu0  ;;  %14571 = vmatprep.subr.bf16.mxu0 %v18840_v19  ;;  %v11105_v56 = vpack.c.bf16 %v11089_v57, %v11089_v57  ;;  %v18880_v57 = vld [vmem:[%s19322_s15 + $0x118] sm:$0xff]  }
 0xca9   :  { %v11106_v8 = vpack.c.bf16 %v11090_v55, %v11090_v55  ;;  %v18910_v16 = vld [vmem:[%s19322_s15 + $0x1c8] sm:$0xff]  }
 0xcab   :  { %14572 = vmatpush3.bf16.msra.mxu0 %v18854_v14  ;;  %11677 = vmatprep.mubr.bf16.mxu0 %v11106_v8 }
 0xcac   :  { %14573 = vmatprep.subr.bf16.mxu0 %v18860_v35 }
 0xcad   :  { %v10954_v25 = vpop.f32.mrb[156].mxu1 }
 0xcae   :  { %v11075_v51 = vmul.f32 %v18092_v15, %v10954_v25  ;;  %v10956_v47 = vpop.f32.mrb[157].mxu1  ;;  %11678 = vmatmul.mubr.bf16.gmra.mrb[168].mxu0 %v11105_v56  ;;  %v18887_v15 = vld [vmem:[%s19322_s15 + $0x160] sm:$0xff]   ;;  %v19511_v25 = vld [vmem:[#allocation59_spill] sm:$0xff] }
 0xcaf   :  { %v11076_v3 = vmul.f32 %v18156_v9, %v10956_v47  ;;  %14574 = vmatpush3.bf16.msra.mxu0 %v18866_v52  ;;  %v10958_v7 = vpop.f32.mrb[158].mxu1  ;;  %11765 = vmatprep.mubr.bf16.mxu0 %v11102_v60  ;;  %19508 = vst [vmem:[#allocation86_spill] sm:$0xff] %v18887_v15  ;;  %v18894_v60 = vld [vmem:[%s19322_s15 + $0x120] sm:$0xff]  }
 0xcb0   :  { %v11083_v21 = vmul.f32 %v18104_v18, %v10958_v7  ;;  %v10960_v55 = vpop.f32.mrb[159].mxu1  ;;  %14575 = vmatprep.subr.bf16.mxu0 %v18872_v32  ;;  %19509 = vst [vmem:[#allocation87_spill] sm:$0xff] %v18894_v60  ;;  %v18899_v18 = vld [vmem:[%s19322_s15 + $0x180] sm:$0xff]   ;;  %v18924_v7 = vld [vmem:[%s19322_s15 + $0x188] sm:$0xff]  }
 0xcb1   :  { %v11084_v9 = vmul.f32 %v18162_v44, %v10960_v55  ;;  %v18905_v44 = vld [vmem:[%s19322_s15 + $0x168] sm:$0xff]  }
 0xcb2   :  { %v11099_v62 = vpack.c.bf16 %v11083_v21, %v11075_v51  ;;  %19510 = vst [vmem:[#allocation88_spill] sm:$0xff] %v18905_v44  ;;  %v18931_v21 = vld [vmem:[%s19322_s15 + $0x170] sm:$0xff]  }
 0xcb3   :  { %v11100_v29 = vpack.c.bf16 %v11084_v9, %v11076_v3  ;;  %14576 = vmatpush3.bf16.msra.mxu0 %v18880_v57  ;;  %v18919_v3 = vld [vmem:[%s19322_s15 + $0x128] sm:$0xff]   ;;  %19513 = vst [vmem:[#allocation89_spill] sm:$0xff] %v18931_v21  ;;  %v18936_v9 = vld [vmem:[%s19322_s15 + $0x1d0] sm:$0xff]  }
 0xcb4   :  { %14577 = vmatprep.subr.bf16.mxu0 %v18887_v15  ;;  %19512 = vst [vmem:[#allocation59_spill] sm:$0xff] %v18919_v3 }
 0xcb5   :  { %v10964_v61 = vpop.f32.mrb[160].mxu1  ;;  %11717 = vmatprep.mubr.bf16.mxu1 %v11100_v29  ;;  %v18948_v29 = vld [vmem:[%s19322_s15 + $0x190] sm:$0xff]  }
 0xcb6   :  { %v11091_v8 = vmul.f32 %v18116_v40, %v10964_v61  ;;  %v10966_v56 = vpop.f32.mrb[161].mxu1  ;;  %11718 = vmatmul.mubr.bf16.vlgmr.msra.gmra.mrb[172].mxu1 %v11099_v62  ;;  %v18943_v62 = vld [vmem:[%s19322_s15 + $0x130] sm:$0xff]  }
 0xcb7   :  { %v11092_v51 = vmul.f32 %v19511_v25, %v10966_v56  ;;  %14578 = vmatpush3.bf16.msra.mxu0 %v18894_v60  ;;  %14598 = vmatpush3.bf16.msra.mxu1 %v18899_v18  ;;  %v10968_v47 = vpop.f32.mrb[162].mxu1  ;;  %19514 = vst [vmem:[#allocation90_spill] sm:$0xff] %v18943_v62  ;;  %v18954_v56 = vld [vmem:[%s19322_s15 + $0x178] sm:$0xff]  }
 0xcb8   :  { %v10969_v40 = vpop.f32.mrb[163].mxu1  ;;  %14579 = vmatprep.subr.bf16.mxu0 %v18905_v44  ;;  %14599 = vmatprep.subr.bf16.mxu1 %v18910_v16  ;;  %v11107_v61 = vpack.c.bf16 %v11091_v8, %v11091_v8  ;;  %19515 = vst [vmem:[#allocation91_spill] sm:$0xff] %v18954_v56  ;;  %v18959_v25 = vld [vmem:[%s19322_s15 + $0x1d8] sm:$0xff]   ;;  %v19516_v47 = vld [vmem:[#allocation60_spill] sm:$0xff]  ;;  %v19517_v8 = vld [vmem:[#allocation35_spill] sm:$0xff] }
 0xcb9   :  { %v11108_v55 = vpack.c.bf16 %v11092_v51, %v11092_v51  ;;  %v18974_v44 = vld [vmem:[%s19322_s15 + $0x198] sm:$0xff]  }
 0xcbb   :  { %14580 = vmatpush3.bf16.msra.mxu0 %v18919_v3  ;;  %14600 = vmatpush3.bf16.msra.mxu1 %v18924_v7  ;;  %v18969_v3 = vld [vmem:[%s19322_s15 + $0x138] sm:$0xff]  }
 0xcbc   :  { %11725 = vmatprep.mubr.bf16.mxu1 %v11108_v55  ;;  %14581 = vmatprep.subr.bf16.mxu0 %v18931_v21  ;;  %19518 = vst [vmem:[#allocation60_spill] sm:$0xff] %v18969_v3 }
 0xcbd   :  { %v11056_v51 = vpop.f32.mrb[164].mxu1  ;;  %14601 = vmatprep.subr.bf16.mxu1 %v18936_v9 }
 0xcbe   :  { %v11079_v40 = vmul.f32 %v19516_v47, %v11056_v51  ;;  %v11058_v42 = vpop.f32.mrb[165].mxu1  ;;  %11726 = vmatmul.mubr.bf16.gmra.mrb[176].mxu1 %v11107_v61  ;;  %v19519_v51 = vld [vmem:[#allocation61_spill] sm:$0xff] }
 0xcbf   :  { %v11080_v55 = vmul.f32 %v19517_v8, %v11058_v42  ;;  %14582 = vmatpush3.bf16.msra.mxu0 %v18943_v62  ;;  %14602 = vmatpush3.bf16.msra.mxu1 %v18948_v29  ;;  %v11060_v21 = vpop.f32.mrb[166].mxu1  ;;  %v18982_v42 = vld [vmem:[%s19322_s15 + $0x1e0] sm:$0xff]   ;;  %v19521_v8 = vld [vmem:[#allocation39_spill] sm:$0xff] }
 0xcc0   :  { %v11087_v47 = vmul.f32 %v19519_v51, %v11060_v21  ;;  %v11062_v61 = vpop.f32.mrb[167].mxu1  ;;  %14583 = vmatprep.subr.bf16.mxu0 %v18954_v56  ;;  %14603 = vmatprep.subr.bf16.mxu1 %v18959_v25  ;;  %19520 = vst [vmem:[#allocation35_spill] sm:$0xff] %v18982_v42  ;;  %v18990_v21 = vld [vmem:[%s19322_s15 + $0x1a0] sm:$0xff]   ;;  %v18996_v51 = vld [vmem:[%s19322_s15 + $0x1e8] sm:$0xff]  }
 0xcc1   :  { %v11088_v62 = vmul.f32 %v19521_v8, %v11062_v61  ;;  %19522 = vst [vmem:[#allocation61_spill] sm:$0xff] %v18990_v21  ;;  %19523 = vst [vmem:[#allocation39_spill] sm:$0xff] %v18996_v51  ;;  %v19525_v61 = vpack.c.bf16 %v18826_v53, %v18820_v49  ;;  %v19016_v49 = vld [vmem:[%s19322_s15 + $0x1f0] sm:$0xff]  }
 0xcc2   :  { %v11103_v60 = vpack.c.bf16 %v11087_v47, %v11079_v40  ;;  %v19024_v53 = vld [vmem:[%s19322_s15 + $0x1b0] sm:$0xff]  }
 0xcc3   :  { %v11104_v15 = vpack.c.bf16 %v11088_v62, %v11080_v55  ;;  %14584 = vmatpush3.bf16.msra.mxu0 %v18969_v3  ;;  %14604 = vmatpush3.bf16.msra.mxu1 %v18974_v44  ;;  %v11110_v62 = vpack.c.bf16 %v18848_v10, %v18848_v10  ;;  %v19524_v55 = vld [vmem:[#allocation62_spill] sm:$0xff]  ;;  %v19526_v3 = vld [vmem:[#allocation41_spill] sm:$0xff]  ;;  %19529 = vst [vmem:[#allocation92_spill] sm:$0xff] %v19024_v53 }
 0xcc4   :  { %14605 = vmatprep.subr.bf16.mxu1 %v18982_v42  ;;  %11840 = vmatprep.subr.bf16.mxu0 %v18549_v59  ;;  %v19010_v59 = vld [vmem:[%s19322_s15 + $0x1a8] sm:$0xff]   ;;  %19528 = vst [vmem:[#allocation41_spill] sm:$0xff] %v19016_v49 }
 0xcc5   :  { %v11066_v40 = vpop.f32.mrb[168].mxu1  ;;  %11813 = vmatprep.mubr.bf16.mxu1 %v11104_v15  ;;  %19527 = vst [vmem:[#allocation62_spill] sm:$0xff] %v19010_v59  ;;  %v11109_v15 = vpack.c.bf16 %v18844_v1, %v18844_v1 }
 0xcc6   :  { %v11095_v47 = vmul.f32 %v19524_v55, %v11066_v40  ;;  %11766 = vmatmul.mubr.bf16.vlgmr.msra.gmra.mrb[172].mxu0 %v19525_v61  ;;  %v11068_v8 = vpop.f32.mrb[169].mxu1 }
 0xcc7   :  { %v11096_v56 = vmul.f32 %v19526_v3, %v11068_v8  ;;  %11773 = vmatprep.mubr.bf16.mxu0 %v11110_v62  ;;  %14606 = vmatpush3.bf16.msra.mxu1 %v18990_v21  ;;  %v11070_v42 = vpop.f32.mrb[170].mxu1  ;;  %v19032_v3 = vld [vmem:[%s19322_s15 + $0x1f8] sm:$0xff]   ;;  %v11629_v8 = vpop.permute.xlu0 %11628 }
 0xcc8   :  { %v11071_v10 = vpop.f32.mrb[171].mxu1  ;;  %14607 = vmatprep.subr.bf16.mxu1 %v18996_v51  ;;  %11841 = vmatpush1.bf16.msra.mxu0 %v18551_v41  ;;  %19530 = vst [vmem:[#allocation93_spill] sm:$0xff] %v19032_v3  ;;  %v19040_v41 = vld [vmem:[%s19322_s15 + $0x1b8] sm:$0xff]  }
 0xcc9   :  { %11842 = vmatprep.subr.bf16.mxu0 %v18561_v2  ;;  %19531 = vst [vmem:[#allocation94_spill] sm:$0xff] %v19040_v41  ;;  %v11112_v2 = vpack.c.bf16 %v11096_v56, %v11096_v56 }
 0xccb   :  { %14608 = vmatpush3.bf16.msra.mxu1 %v19010_v59 }
 0xccc   :  { %14609 = vmatprep.subr.bf16.mxu1 %v19016_v49  ;;  %11843 = vmatpush1.bf16.msra.mxu0 %v18563_v43 }
 0xccd   :  { %11942 = vmatprep.subr.bf16.mxu0 %v18555_v48  ;;  %v11111_v48 = vpack.c.bf16 %v11095_v47, %v11095_v47 }
 0xcce   :  { %11774 = vmatmul.mubr.bf16.gmra.mrb[176].mxu0 %v11109_v15  ;;  %v11631_v15 = vpop.permute.xlu1 %11630 }
 0xccf   :  { %14610 = vmatpush3.bf16.msra.mxu1 %v19024_v53  ;;  %11872 = vmatprep.mubr.bf16.mxu0 %v19452_v11  ;;  %v11633_v53 = vpop.permute.xlu0 %11632 }
 0xcd0   :  { %14611 = vmatprep.subr.bf16.mxu1 %v19032_v3 }
 0xcd3   :  { %14612 = vmatpush3.bf16.msra.mxu1 %v19040_v41 }
 0xcd4   :  { %11891 = vmatprep.subr.bf16.mxu1 %v18575_v27 }
 0xcd6   :  { %11814 = vmatmul.mubr.bf16.vlgmr.msra.gmra.mrb[180].mxu1 %v11103_v60 }
 0xcd7   :  { %11821 = vmatprep.mubr.bf16.mxu1 %v11112_v2  ;;  %11892 = vmatpush1.bf16.msra.mxu1 %v18573_v34 }
 0xcd8   :  { %11893 = vmatprep.subr.bf16.mxu1 %v18586_v63 }
 0xcdb   :  { %11894 = vmatpush1.bf16.msra.mxu1 %v18603_v23 }
 0xcdc   :  { %11993 = vmatprep.subr.bf16.mxu1 %v18607_v31 }
 0xcde   :  { %11822 = vmatmul.mubr.bf16.gmra.mrb[184].mxu1 %v11111_v48 }
 0xcdf   :  { %11923 = vmatprep.mubr.bf16.mxu1 %v19452_v11 }
 0xd79   :  { %v14529_v43 = vpop.f32.mrb[164].mxu0 }
 0xd7a   :  { %v14530_v1 = vpop.f32.mrb[165].mxu0 }
 0xd7b   :  { %v14531_v42 = vadd.f32 %v14530_v1, %v14529_v43  ;;  %v14532_v62 = vpop.f32.mrb[166].mxu0 }
 0xd7c   :  { %v14533_v27 = vpop.f32.mrb[167].mxu0 }
 0xd7d   :  { %v14534_v56 = vadd.f32 %v14533_v27, %v14532_v62  ;;  %v11672_v47 = vadd.f32 %v14531_v42, %v11629_v8 }
 0xd7f   :  { %v11675_v48 = vadd.f32 %v14534_v56, %v11631_v15 }
 0xd81   :  { %v14535_v60 = vpop.f32.mrb[168].mxu0 }
 0xd82   :  { %v14536_v40 = vpop.f32.mrb[169].mxu0 }
 0xd83   :  { %v14537_v55 = vadd.f32 %v14536_v40, %v14535_v60  ;;  %v14538_v34 = vpop.f32.mrb[170].mxu0 }
 0xd84   :  { %v14539_v61 = vpop.f32.mrb[171].mxu0 }
 0xd85   :  { %v11680_v27 = vadd.f32 %v14537_v55, %v11633_v53 }
 0xd89   :  { %v14557_v63 = vpop.f32.mrb[172].mxu1 }
 0xd8a   :  { %v14558_v23 = vpop.f32.mrb[173].mxu1 }
 0xd8b   :  { %v14559_v10 = vadd.f32 %v14558_v23, %v14557_v63  ;;  %v14560_v31 = vpop.f32.mrb[174].mxu1 }
 0xd8c   :  { %v14561_v2 = vpop.f32.mrb[175].mxu1 }
 0xd8d   :  { %v11720_v41 = vadd.f32 %v14559_v10, %v11672_v47  ;;  %v14562_v3 = vadd.f32 %v14561_v2, %v14560_v31 }
 0xd8f   :  { %v11723_v43 = vadd.f32 %v14562_v3, %v11675_v48 }
 0xd91   :  { %v14563_v1 = vpop.f32.mrb[176].mxu1 }
 0xd92   :  { %v14564_v62 = vpop.f32.mrb[177].mxu1 }
 0xd93   :  { %v14565_v49 = vadd.f32 %v14564_v62, %v14563_v1  ;;  %v14566_v60 = vpop.f32.mrb[178].mxu1 }
 0xd94   :  { %v14567_v40 = vpop.f32.mrb[179].mxu1 }
 0xd95   :  { %v11728_v34 = vadd.f32 %v14565_v49, %v11680_v27 }
 0xd99   :  { %v14585_v61 = vpop.f32.mrb[172].mxu0 }
 0xd9a   :  { %v14586_v59 = vpop.f32.mrb[173].mxu0 }
 0xd9b   :  { %v14587_v51 = vadd.f32 %v14586_v59, %v14585_v61  ;;  %v14588_v42 = vpop.f32.mrb[174].mxu0 }
 0xd9c   :  { %v14589_v63 = vpop.f32.mrb[175].mxu0 }
 0xd9d   :  { %v11768_v8 = vadd.f32 %v14587_v51, %v11720_v41  ;;  %v14590_v23 = vadd.f32 %v14589_v63, %v14588_v42 }
 0xd9f   :  { %v11771_v21 = vadd.f32 %v14590_v23, %v11723_v43 }
 0xda1   :  { %v14591_v56 = vpop.f32.mrb[176].mxu0 }
 0xda2   :  { %v14592_v47 = vpop.f32.mrb[177].mxu0 }
 0xda3   :  { %v14593_v10 = vadd.f32 %v14592_v47, %v14591_v56  ;;  %v14594_v3 = vpop.f32.mrb[178].mxu0 }
 0xda4   :  { %v14595_v31 = vpop.f32.mrb[179].mxu0 }
 0xda5   :  { %v11776_v15 = vadd.f32 %v14593_v10, %v11728_v34  ;;  %v19552_v10 = vld [vmem:[#allocation63_spill] sm:$0xff]  ;;  %v19553_v31 = vld [vmem:[#allocation30_spill] sm:$0xff] }
 0xda9   :  { %v14613_v2 = vpop.f32.mrb[180].mxu1 }
 0xdaa   :  { %v14614_v53 = vpop.f32.mrb[181].mxu1 }
 0xdab   :  { %v14615_v55 = vadd.f32 %v14614_v53, %v14613_v2  ;;  %v14616_v48 = vpop.f32.mrb[182].mxu1 }
 0xdac   :  { %v14617_v1 = vpop.f32.mrb[183].mxu1 }
 0xdad   :  { %v11816_v49 = vadd.f32 %v14615_v55, %v11768_v8  ;;  %v14618_v62 = vadd.f32 %v14617_v1, %v14616_v48  ;;  %v19551_v8 = vld [vmem:[#allocation25_spill] sm:$0xff]  ;;  %v19554_v55 = vld [vmem:[#allocation40_spill] sm:$0xff]  ;;  %v19555_v1 = vld [vmem:[#allocation27_spill] sm:$0xff] }
 0xdaf   :  { %v11819_v27 = vadd.f32 %v14618_v62, %v11771_v21  ;;  %v11829_v59 = vmax.f32 %v11816_v49, 0.0 }
 0xdb1   :  { %v11830_v60 = vmax.f32 %v11819_v27, 0.0  ;;  %v14619_v40 = vpop.f32.mrb[184].mxu1 }
 0xdb2   :  { %v14620_v51 = vpop.f32.mrb[185].mxu1 }
 0xdb3   :  { %v11832_v41 = vpack.c.bf16 %v11830_v60, %v11829_v59  ;;  %v14621_v43 = vadd.f32 %v14620_v51, %v14619_v40  ;;  %v14622_v61 = vpop.f32.mrb[186].mxu1  ;;  %v19556_v59 = vld [vmem:[#allocation26_spill] sm:$0xff]  ;;  %v19557_v40 = vld [vmem:[#allocation45_spill] sm:$0xff] }
 0xdb4   :  { %v14623_v42 = vpop.f32.mrb[187].mxu1 }
 0xdb5   :  { %v11824_v63 = vadd.f32 %v14621_v43, %v11776_v15  ;;  %14287 = vmatmul.mubr.msk.bf16.vlgmr.msra.gmra.mrb[180].mxu0 %vm10862_vm4, %v11832_v41  ;;  %14289 = vmatmul.mubr.msk.bf16.vlgmr.msra.gmra.mrb[188].mxu1 %vm10862_vm4, %v11832_v41 }
 0xdb6   :  { %11882 = vmatprep.mubr.bf16.mxu0 %v19452_v11  ;;  %11933 = vmatprep.mubr.bf16.mxu1 %v19452_v11 }
 0xdb7   :  { %v11831_v34 = vmax.f32 %v11824_v63, 0.0  ;;  %11943 = vmatpush1.bf16.msra.mxu0 %v18553_v54  ;;  %11994 = vmatpush1.bf16.msra.mxu1 %v18650_v28  ;;  %v19533_v54 = vld [vmem:[#allocation76_spill] sm:$0xff] }
 0xdb8   :  { %11944 = vmatprep.subr.bf16.mxu0 %v18567_v30  ;;  %11995 = vmatprep.subr.bf16.mxu1 %v18652_v50  ;;  %v19535_v30 = vld [vmem:[#allocation78_spill] sm:$0xff]  ;;  %v19547_v28 = vld [vmem:[#allocation84_spill] sm:$0xff]  ;;  %v19548_v50 = vld [vmem:[#allocation77_spill] sm:$0xff] }
 0xdb9   :  { %v11833_v21 = vpack.c.bf16 %v11831_v34, %v11831_v34 }
 0xdbb   :  { %11945 = vmatpush1.bf16.msra.mxu0 %v18565_v37  ;;  %11996 = vmatpush1.bf16.msra.mxu1 %v18669_v45  ;;  %v19534_v37 = vld [vmem:[#allocation69_spill] sm:$0xff] }
 0xdbc   :  { %14625 = vmatprep.subr.bf16.mxu0 %v18581_v0  ;;  %14653 = vmatprep.subr.bf16.mxu1 %v18675_v46  ;;  %v19536_v0 = vld [vmem:[#allocation70_spill] sm:$0xff]  ;;  %v19549_v45 = vld [vmem:[#allocation85_spill] sm:$0xff] }
 0xdbd   :  { %14288 = vmatmul.mubr.msk.bf16.gmra.mrb[184].mxu0 %vm10862_vm4, %v11833_v21  ;;  %14290 = vmatmul.mubr.msk.bf16.gmra.mrb[192].mxu1 %vm10862_vm4, %v11833_v21 }
 0xdbe   :  { %11974 = vmatprep.mubr.bf16.mxu0 %v19452_v11  ;;  %12025 = vmatprep.mubr.bf16.mxu1 %v19452_v11 }
 0xdc5   :  { %14291 = vmatmul.mubr.msk.bf16.vlgmr.msra.gmra.mrb[188].mxu0 %vm10862_vm4, %v11832_v41  ;;  %14293 = vmatmul.mubr.msk.bf16.vlgmr.msra.gmra.mrb[196].mxu1 %vm10862_vm4, %v11832_v41 }
 0xdc6   :  { %11984 = vmatprep.mubr.bf16.mxu0 %v19452_v11  ;;  %12035 = vmatprep.mubr.bf16.mxu1 %v19452_v11 }
 0xdc7   :  { %14626 = vmatpush3.bf16.msra.mxu0 %v18591_v20  ;;  %14654 = vmatpush3.bf16.msra.mxu1 %v18692_v4  ;;  %v19537_v20 = vld [vmem:[#allocation79_spill] sm:$0xff] }
 0xdc8   :  { %14627 = vmatprep.subr.bf16.mxu0 %v18599_v38  ;;  %14655 = vmatprep.subr.bf16.mxu1 %v18697_v33  ;;  %v19539_v38 = vld [vmem:[#allocation80_spill] sm:$0xff]  ;;  %v19550_v33 = vld [vmem:[#allocation37_spill] sm:$0xff] }
 0xdcb   :  { %14628 = vmatpush3.bf16.msra.mxu0 %v18613_v26  ;;  %14656 = vmatpush3.bf16.msra.mxu1 %v18705_v12  ;;  %v19532_v12 = vld [vmem:[#allocation68_spill] sm:$0xff]  ;;  %v19541_v26 = vld [vmem:[#allocation81_spill] sm:$0xff] }
 0xdcc   :  { %14629 = vmatprep.subr.bf16.mxu0 %v18620_v39  ;;  %14657 = vmatprep.subr.bf16.mxu1 %v18718_v24  ;;  %v19543_v39 = vld [vmem:[#allocation82_spill] sm:$0xff] }
 0xdcd   :  { %14292 = vmatmul.mubr.msk.bf16.gmra.mrb[192].mxu0 %vm10862_vm4, %v11833_v21  ;;  %14294 = vmatmul.mubr.msk.bf16.gmra.mrb[200].mxu1 %vm10862_vm4, %v11833_v21  ;;  %v19558_v21 = vld [vmem:[#allocation43_spill] sm:$0xff] }
 0xdcf   :  { %14630 = vmatpush3.bf16.msra.mxu0 %v18627_v5  ;;  %14658 = vmatpush3.bf16.msra.mxu1 %v18728_v17  ;;  %v19538_v17 = vld [vmem:[#allocation71_spill] sm:$0xff]  ;;  %v19544_v5 = vld [vmem:[#allocation74_spill] sm:$0xff] }
 0xdd0   :  { %14631 = vmatprep.subr.bf16.mxu0 %v18634_v13  ;;  %14659 = vmatprep.subr.bf16.mxu1 %v18742_v36  ;;  %v19540_v36 = vld [vmem:[#allocation72_spill] sm:$0xff]  ;;  %v19545_v13 = vld [vmem:[#allocation83_spill] sm:$0xff] }
 0xdd3   :  { %14632 = vmatpush3.bf16.msra.mxu0 %v18642_v58  ;;  %14660 = vmatpush3.bf16.msra.mxu1 %v18752_v22  ;;  %v19542_v22 = vld [vmem:[#allocation73_spill] sm:$0xff]  ;;  %v19546_v58 = vld [vmem:[#allocation75_spill] sm:$0xff] }
 0xdd4   :  { %14633 = vmatprep.subr.bf16.mxu0 %v19532_v12  ;;  %14661 = vmatprep.subr.bf16.mxu1 %v19533_v54  ;;  %v19559_v54 = vld [vmem:[#allocation29_spill] sm:$0xff] }
 0xdd7   :  { %14634 = vmatpush3.bf16.msra.mxu0 %v19534_v37  ;;  %14662 = vmatpush3.bf16.msra.mxu1 %v19535_v30 }
 0xdd8   :  { %14635 = vmatprep.subr.bf16.mxu0 %v19536_v0  ;;  %14663 = vmatprep.subr.bf16.mxu1 %v19537_v20  ;;  %v19560_v20 = vld [vmem:[#allocation28_spill] sm:$0xff] }
 0xddb   :  { %14636 = vmatpush3.bf16.msra.mxu0 %v19538_v17  ;;  %14664 = vmatpush3.bf16.msra.mxu1 %v19539_v38  ;;  %v19561_v38 = vld [vmem:[#allocation47_spill] sm:$0xff] }
 0xddc   :  { %14637 = vmatprep.subr.bf16.mxu0 %v19540_v36  ;;  %14665 = vmatprep.subr.bf16.mxu1 %v19541_v26 }
 0xddf   :  { %14638 = vmatpush3.bf16.msra.mxu0 %v19542_v22  ;;  %14666 = vmatpush3.bf16.msra.mxu1 %v19543_v39 }
 0xde0   :  { %14639 = vmatprep.subr.bf16.mxu0 %v19544_v5  ;;  %14667 = vmatprep.subr.bf16.mxu1 %v19545_v13 }
 0xde3   :  { %14640 = vmatpush3.bf16.msra.mxu0 %v19546_v58  ;;  %14668 = vmatpush3.bf16.msra.mxu1 %v19547_v28 }
 0xde4   :  { %14681 = vmatprep.subr.bf16.mxu0 %v19548_v50  ;;  %14709 = vmatprep.subr.bf16.mxu1 %v19549_v45  ;;  %v19562_v45 = vld [vmem:[#allocation44_spill] sm:$0xff] }
 0xe88   :  { %v11874_v46 = vpop.f32.mrb[180].mxu0  ;;  %v11925_v4 = vpop.f32.mrb[188].mxu1 }
 0xe89   :  { %v12044_v24 = vmul.f32 %v19550_v33, %v11874_v46  ;;  %v12046_v23 = vmul.f32 %v19551_v8, %v11925_v4  ;;  %v11876_v56 = vpop.f32.mrb[181].mxu0  ;;  %v11927_v47 = vpop.f32.mrb[189].mxu1  ;;  %v19563_v46 = vld [vmem:[#allocation31_spill] sm:$0xff] }
 0xe8a   :  { %v12045_v3 = vmul.f32 %v19552_v10, %v11876_v56  ;;  %v12047_v15 = vmul.f32 %v19553_v31, %v11927_v47  ;;  %v11878_v2 = vpop.f32.mrb[182].mxu0  ;;  %v11929_v53 = vpop.f32.mrb[190].mxu1  ;;  %v19566_v56 = vld [vmem:[#allocation46_spill] sm:$0xff]  ;;  %v19567_v47 = vld [vmem:[#allocation33_spill] sm:$0xff] }
 0xe8b   :  { %v12052_v48 = vmul.f32 %v19554_v55, %v11878_v2  ;;  %v12054_v49 = vmul.f32 %v19555_v1, %v11929_v53  ;;  %v11880_v62 = vpop.f32.mrb[183].mxu0  ;;  %v11931_v27 = vpop.f32.mrb[191].mxu1  ;;  %v19569_v53 = vld [vmem:[#allocation52_spill] sm:$0xff] }
 0xe8c   :  { %v12053_v60 = vmul.f32 %v19556_v59, %v11880_v62  ;;  %v12055_v51 = vmul.f32 %v19557_v40, %v11931_v27  ;;  %v19571_v62 = vld [vmem:[#allocation35_spill] sm:$0xff] }
 0xe8d   :  { %v12068_v41 = vpack.c.bf16 %v12052_v48, %v12044_v24  ;;  %v12070_v43 = vpack.c.bf16 %v12054_v49, %v12046_v23  ;;  %v19565_v24 = vld [vmem:[#allocation38_spill] sm:$0xff] }
 0xe8e   :  { %v12069_v61 = vpack.c.bf16 %v12053_v60, %v12045_v3  ;;  %v12071_v42 = vpack.c.bf16 %v12055_v51, %v12047_v15  ;;  %v19568_v15 = vld [vmem:[#allocation32_spill] sm:$0xff]  ;;  %v19570_v49 = vld [vmem:[#allocation86_spill] sm:$0xff] }
 0xe8f   :  { %v19573_v60 = vld [vmem:[#allocation36_spill] sm:$0xff] }
 0xe90   :  { %v11884_v63 = vpop.f32.mrb[184].mxu0  ;;  %v11935_v34 = vpop.f32.mrb[192].mxu1  ;;  %12125 = vmatprep.mubr.bf16.mxu0 %v12069_v61  ;;  %12173 = vmatprep.mubr.bf16.mxu1 %v12071_v42  ;;  %v19575_v42 = vld [vmem:[#allocation55_spill] sm:$0xff] }
 0xe91   :  { %v12060_v12 = vmul.f32 %v19558_v21, %v11884_v63  ;;  %v12062_v37 = vmul.f32 %v19559_v54, %v11935_v34  ;;  %v11886_v30 = vpop.f32.mrb[185].mxu0  ;;  %v11937_v0 = vpop.f32.mrb[193].mxu1  ;;  %12126 = vmatmul.mubr.bf16.vlgmr.msra.gmra.mrb[196].mxu0 %v12068_v41  ;;  %12174 = vmatmul.mubr.bf16.vlgmr.msra.gmra.mrb[204].mxu1 %v12070_v43  ;;  %v19574_v43 = vld [vmem:[#allocation34_spill] sm:$0xff]  ;;  %v19576_v63 = vld [vmem:[#allocation87_spill] sm:$0xff] }
 0xe92   :  { %v12061_v17 = vmul.f32 %v19560_v20, %v11886_v30  ;;  %v12063_v36 = vmul.f32 %v19561_v38, %v11937_v0  ;;  %14682 = vmatpush3.bf16.msra.mxu0 %v18835_v6  ;;  %14710 = vmatpush3.bf16.msra.mxu1 %v18899_v18  ;;  %v11888_v26 = vpop.f32.mrb[186].mxu0  ;;  %v11939_v22 = vpop.f32.mrb[194].mxu1  ;;  %v19579_v30 = vld [vmem:[#allocation39_spill] sm:$0xff]  ;;  %v19581_v20 = vld [vmem:[#allocation62_spill] sm:$0xff]  ;;  %v19583_v38 = vld [vmem:[#allocation41_spill] sm:$0xff] }
 0xe93   :  { %v11889_v39 = vpop.f32.mrb[187].mxu0  ;;  %v11940_v5 = vpop.f32.mrb[195].mxu1  ;;  %14683 = vmatprep.subr.bf16.mxu0 %v18840_v19  ;;  %14711 = vmatprep.subr.bf16.mxu1 %v18910_v16  ;;  %v12076_v28 = vpack.c.bf16 %v12060_v12, %v12060_v12  ;;  %v12078_v50 = vpack.c.bf16 %v12062_v37, %v12062_v37  ;;  %v19578_v37 = vld [vmem:[#allocation88_spill] sm:$0xff]  ;;  %v19580_v0 = vld [vmem:[#allocation59_spill] sm:$0xff] }
 0xe94   :  { %v12077_v13 = vpack.c.bf16 %v12061_v17, %v12061_v17  ;;  %v12079_v58 = vpack.c.bf16 %v12063_v36, %v12063_v36  ;;  %v19582_v17 = vld [vmem:[#allocation89_spill] sm:$0xff]  ;;  %v19584_v36 = vld [vmem:[#allocation90_spill] sm:$0xff]  ;;  %v19585_v26 = vld [vmem:[#allocation92_spill] sm:$0xff] }
 0xe95   :  { %v19586_v22 = vld [vmem:[#allocation91_spill] sm:$0xff]  ;;  %v19587_v39 = vld [vmem:[#allocation93_spill] sm:$0xff]  ;;  %v19588_v5 = vld [vmem:[#allocation60_spill] sm:$0xff] }
 0xe96   :  { %14684 = vmatpush3.bf16.msra.mxu0 %v18854_v14  ;;  %14712 = vmatpush3.bf16.msra.mxu1 %v18924_v7  ;;  %v19564_v14 = vld [vmem:[#allocation50_spill] sm:$0xff] }
 0xe97   :  { %12133 = vmatprep.mubr.bf16.mxu0 %v12077_v13  ;;  %12181 = vmatprep.mubr.bf16.mxu1 %v12079_v58  ;;  %v19589_v13 = vld [vmem:[#allocation94_spill] sm:$0xff] }
 0xe98   :  { %v11976_v6 = vpop.f32.mrb[188].mxu0  ;;  %v12027_v18 = vpop.f32.mrb[196].mxu1  ;;  %14685 = vmatprep.subr.bf16.mxu0 %v18860_v35  ;;  %14713 = vmatprep.subr.bf16.mxu1 %v18936_v9 }
 0xe99   :  { %v12048_v19 = vmul.f32 %v19562_v45, %v11976_v6  ;;  %v12050_v16 = vmul.f32 %v19563_v46, %v12027_v18  ;;  %v11978_v4 = vpop.f32.mrb[189].mxu0  ;;  %v12029_v33 = vpop.f32.mrb[197].mxu1  ;;  %12134 = vmatmul.mubr.bf16.gmra.mrb[200].mxu0 %v12076_v28  ;;  %12182 = vmatmul.mubr.bf16.gmra.mrb[208].mxu1 %v12078_v50  ;;  %v16937_v18 = vld [vmem:[#allocation18 + $0x4] ss:$16 sps:$4 sm:$0xff]   ;;  %v16940_v45 = vld [vmem:[#allocation18 + $0xc] ss:$16 sps:$4 sm:$0xff]  }
 0xe9a   :  { %v12049_v7 = vmul.f32 %v19564_v14, %v11978_v4  ;;  %v12051_v8 = vmul.f32 %v19565_v24, %v12029_v33  ;;  %14686 = vmatpush3.bf16.msra.mxu0 %v18866_v52  ;;  %14714 = vmatpush3.bf16.msra.mxu1 %v18948_v29  ;;  %v11980_v23 = vpop.f32.mrb[190].mxu0  ;;  %v12031_v35 = vpop.f32.mrb[198].mxu1  ;;  %v16938_v46 = vld [vmem:[#allocation18 + $0x8] ss:$16 sps:$4 sm:$0xff]   ;;  %v16946_v4 = vld [vmem:[#allocation18 + $0x2c] ss:$16 sps:$4 sm:$0xff]  }
 0xe9b   :  { %v12056_v9 = vmul.f32 %v19566_v56, %v11980_v23  ;;  %v12058_v10 = vmul.f32 %v19567_v47, %v12031_v35  ;;  %v11982_v3 = vpop.f32.mrb[191].mxu0  ;;  %v12033_v31 = vpop.f32.mrb[199].mxu1  ;;  %14687 = vmatprep.subr.bf16.mxu0 %v18872_v32  ;;  %14715 = vmatprep.subr.bf16.mxu1 %v18959_v25  ;;  %v19572_v25 = vld [vmem:[#allocation49_spill] sm:$0xff]  ;;  %v16944_v14 = vld [vmem:[#allocation18 + $0x28] ss:$16 sps:$4 sm:$0xff]  }
 0xe9c   :  { %v12057_v2 = vmul.f32 %v19568_v15, %v11982_v3  ;;  %v12059_v55 = vmul.f32 %v19569_v53, %v12033_v31  ;;  %v16941_v33 = vld [vmem:[#allocation18 + $0x20] ss:$16 sps:$4 sm:$0xff]   ;;  %v16948_v24 = vld [vmem:[%s19590_s19 + $0xc0] sm:$0xff]  }
 0xe9d   :  { %v12072_v48 = vpack.c.bf16 %v12056_v9, %v12048_v19  ;;  %v12074_v52 = vpack.c.bf16 %v12058_v10, %v12050_v16  ;;  %v16935_v19 = vld [vmem:[#allocation18] ss:$16 sps:$4 sm:$0xff]   ;;  %v16943_v16 = vld [vmem:[#allocation18 + $0x24] ss:$16 sps:$4 sm:$0xff]  }
 0xe9e   :  { %v12073_v1 = vpack.c.bf16 %v12057_v2, %v12049_v7  ;;  %v12075_v29 = vpack.c.bf16 %v12059_v55, %v12051_v8  ;;  %14688 = vmatpush3.bf16.msra.mxu0 %v18880_v57  ;;  %14716 = vmatpush3.bf16.msra.mxu1 %v18974_v44  ;;  %v19577_v44 = vld [vmem:[#allocation61_spill] sm:$0xff]  ;;  %v16947_v7 = vld [vmem:[%s19590_s19 + $0x40] sm:$0xff]   ;;  %v12085_v8 = vpop.permute.xlu1 %12084 }
 0xe9f   :  { %14689 = vmatprep.subr.bf16.mxu0 %v19570_v49  ;;  %14717 = vmatprep.subr.bf16.mxu1 %v19571_v62 }
 0xea0   :  { %v11986_v27 = vpop.f32.mrb[192].mxu0  ;;  %v12037_v32 = vpop.f32.mrb[200].mxu1  ;;  %12221 = vmatprep.mubr.bf16.mxu0 %v12073_v1  ;;  %12269 = vmatprep.mubr.bf16.mxu1 %v12075_v29 }
 0xea1   :  { %v12064_v59 = vmul.f32 %v19572_v25, %v11986_v27  ;;  %v12066_v40 = vmul.f32 %v19573_v60, %v12037_v32  ;;  %v11988_v51 = vpop.f32.mrb[193].mxu0  ;;  %v12039_v41 = vpop.f32.mrb[201].mxu1 }
 0xea2   :  { %v12065_v61 = vmul.f32 %v19574_v43, %v11988_v51  ;;  %v12067_v57 = vmul.f32 %v19575_v42, %v12039_v41  ;;  %14690 = vmatpush3.bf16.msra.mxu0 %v19576_v63  ;;  %14718 = vmatpush3.bf16.msra.mxu1 %v19577_v44  ;;  %v11990_v34 = vpop.f32.mrb[194].mxu0  ;;  %v12041_v21 = vpop.f32.mrb[202].mxu1 }
 0xea3   :  { %v11991_v12 = vpop.f32.mrb[195].mxu0  ;;  %v12042_v54 = vpop.f32.mrb[203].mxu1  ;;  %14691 = vmatprep.subr.bf16.mxu0 %v19578_v37  ;;  %14719 = vmatprep.subr.bf16.mxu1 %v19579_v30  ;;  %v12080_v50 = vpack.c.bf16 %v12064_v59, %v12064_v59  ;;  %v12082_v6 = vpack.c.bf16 %v12066_v40, %v12066_v40 }
 0xea4   :  { %v12081_v58 = vpack.c.bf16 %v12065_v61, %v12065_v61  ;;  %v12083_v28 = vpack.c.bf16 %v12067_v57, %v12067_v57  ;;  %v12089_v49 = vpop.permute.xlu1 %12088 }
 0xea6   :  { %14692 = vmatpush3.bf16.msra.mxu0 %v19580_v0  ;;  %14720 = vmatpush3.bf16.msra.mxu1 %v19581_v20 }
 0xea7   :  { %14693 = vmatprep.subr.bf16.mxu0 %v19582_v17  ;;  %14721 = vmatprep.subr.bf16.mxu1 %v19583_v38 }
 0xeaa   :  { %14694 = vmatpush3.bf16.msra.mxu0 %v19584_v36  ;;  %14722 = vmatpush3.bf16.msra.mxu1 %v19585_v26 }
 0xeab   :  { %14695 = vmatprep.subr.bf16.mxu0 %v19586_v22  ;;  %14723 = vmatprep.subr.bf16.mxu1 %v19587_v39 }
 0xeae   :  { %14696 = vmatpush3.bf16.msra.mxu0 %v19588_v5  ;;  %14724 = vmatpush3.bf16.msra.mxu1 %v19589_v13 }
 0xeaf   :  { %12344 = vmatprep.subr.bf16.mxu0 %v16937_v18  ;;  %12395 = vmatprep.subr.bf16.mxu1 %v16940_v45 }
 0xeb1   :  { %12222 = vmatmul.mubr.bf16.vlgmr.msra.gmra.mrb[204].mxu0 %v12072_v48  ;;  %12270 = vmatmul.mubr.bf16.vlgmr.msra.gmra.mrb[212].mxu1 %v12074_v52  ;;  %v12087_v52 = vpop.permute.xlu0 %12086 }
 0xeb2   :  { %12229 = vmatprep.mubr.bf16.mxu0 %v12081_v58  ;;  %12277 = vmatprep.mubr.bf16.mxu1 %v12083_v28 }
 0xeb3   :  { %12345 = vmatpush1.bf16.msra.mxu0 %v16935_v19  ;;  %12396 = vmatpush1.bf16.msra.mxu1 %v16938_v46 }
 0xeb4   :  { %12346 = vmatprep.subr.bf16.mxu0 %v16943_v16  ;;  %12397 = vmatprep.subr.bf16.mxu1 %v16946_v4 }
 0xeb7   :  { %12347 = vmatpush1.bf16.msra.mxu0 %v16941_v33  ;;  %12398 = vmatpush1.bf16.msra.mxu1 %v16944_v14 }
 0xeb8   :  { %14737 = vmatprep.subr.bf16.mxu0 %v16947_v7  ;;  %14765 = vmatprep.subr.bf16.mxu1 %v16948_v24  ;;  %v16949_v7 = vld [vmem:[%s19590_s19] sm:$0xff]  }
 0xeb9   :  { %12230 = vmatmul.mubr.bf16.gmra.mrb[208].mxu0 %v12080_v50  ;;  %12278 = vmatmul.mubr.bf16.gmra.mrb[216].mxu1 %v12082_v6  ;;  %v16950_v24 = vld [vmem:[%s19590_s19 + $0x80] sm:$0xff]  }
 0xeba   :  { %12376 = vmatprep.mubr.bf16.mxu0 %v19452_v11  ;;  %12427 = vmatprep.mubr.bf16.mxu1 %v19452_v11 }
 0xf64   :  { %v14641_v23 = vpop.f32.mrb[196].mxu0  ;;  %v14669_v35 = vpop.f32.mrb[204].mxu1 }
 0xf65   :  { %v14642_v56 = vpop.f32.mrb[197].mxu0  ;;  %v14670_v9 = vpop.f32.mrb[205].mxu1 }
 0xf66   :  { %v14643_v47 = vadd.f32 %v14642_v56, %v14641_v23  ;;  %v14671_v10 = vadd.f32 %v14670_v9, %v14669_v35  ;;  %v14644_v3 = vpop.f32.mrb[198].mxu0  ;;  %v14672_v31 = vpop.f32.mrb[206].mxu1  ;;  %v16952_v23 = vld [vmem:[%s19590_s19 + $0xc8] sm:$0xff]  }
 0xf67   :  { %v14645_v15 = vpop.f32.mrb[199].mxu0  ;;  %v14673_v2 = vpop.f32.mrb[207].mxu1  ;;  %v16953_v9 = vld [vmem:[%s19590_s19 + $0x8] sm:$0xff]  }
 0xf68   :  { %v12128_v53 = vadd.f32 %v14643_v47, %v12085_v8  ;;  %v14646_v55 = vadd.f32 %v14645_v15, %v14644_v3  ;;  %v14674_v48 = vadd.f32 %v14673_v2, %v14672_v31  ;;  %v16951_v8 = vld [vmem:[%s19590_s19 + $0x48] sm:$0xff]   ;;  %v16957_v31 = vld [vmem:[%s19590_s19 + $0x10] sm:$0xff]   ;;  %v16959_v2 = vld [vmem:[%s19590_s19 + $0x58] sm:$0xff]  }
 0xf69   :  { %v16954_v47 = vld [vmem:[%s19590_s19 + $0x88] sm:$0xff]   ;;  %v16958_v15 = vld [vmem:[%s19590_s19 + $0x90] sm:$0xff]  }
 0xf6a   :  { %v12176_v1 = vadd.f32 %v14671_v10, %v12128_v53  ;;  %v12131_v29 = vadd.f32 %v14646_v55, %v12087_v52  ;;  %v16955_v10 = vld [vmem:[%s19590_s19 + $0x50] sm:$0xff]   ;;  %v16960_v53 = vld [vmem:[%s19590_s19 + $0xd8] sm:$0xff]   ;;  %v16963_v52 = vld [vmem:[%s19590_s19 + $0x60] sm:$0xff]  }
 0xf6b   :  { %v16961_v55 = vld [vmem:[%s19590_s19 + $0x18] sm:$0xff]  }
 0xf6c   :  { %v12179_v62 = vadd.f32 %v14674_v48, %v12131_v29  ;;  %v14647_v27 = vpop.f32.mrb[200].mxu0  ;;  %v14675_v32 = vpop.f32.mrb[208].mxu1  ;;  %v16962_v48 = vld [vmem:[%s19590_s19 + $0x98] sm:$0xff]   ;;  %v16965_v29 = vld [vmem:[%s19590_s19 + $0x20] sm:$0xff]  }
 0xf6d   :  { %v14648_v25 = vpop.f32.mrb[201].mxu0  ;;  %v14676_v59 = vpop.f32.mrb[209].mxu1 }
 0xf6e   :  { %v14649_v60 = vadd.f32 %v14648_v25, %v14647_v27  ;;  %v14677_v40 = vadd.f32 %v14676_v59, %v14675_v32  ;;  %v14650_v51 = vpop.f32.mrb[202].mxu0  ;;  %v14678_v41 = vpop.f32.mrb[210].mxu1  ;;  %v16968_v27 = vld [vmem:[%s19590_s19 + $0xe8] sm:$0xff]   ;;  %v16971_v59 = vld [vmem:[%s19590_s19 + $0x70] sm:$0xff]  }
 0xf6f   :  { %v14651_v43 = vpop.f32.mrb[203].mxu0  ;;  %v14679_v61 = vpop.f32.mrb[211].mxu1  ;;  %v16969_v32 = vld [vmem:[%s19590_s19 + $0x28] sm:$0xff]   ;;  %v16974_v51 = vld [vmem:[%s19590_s19 + $0xb0] sm:$0xff]   ;;  %v16975_v41 = vld [vmem:[%s19590_s19 + $0x78] sm:$0xff]  }
 0xf70   :  { %v12136_v42 = vadd.f32 %v14649_v60, %v12089_v49  ;;  %v16966_v49 = vld [vmem:[%s19590_s19 + $0xa0] sm:$0xff]   ;;  %v16970_v25 = vld [vmem:[%s19590_s19 + $0xa8] sm:$0xff]   ;;  %v16972_v60 = vld [vmem:[%s19590_s19 + $0xf0] sm:$0xff]  }
 0xf71   :  { %v16976_v43 = vld [vmem:[%s19590_s19 + $0xf8] sm:$0xff]  }
 0xf72   :  { %v12184_v57 = vadd.f32 %v14677_v40, %v12136_v42  ;;  %v16973_v40 = vld [vmem:[%s19590_s19 + $0x30] sm:$0xff]   ;;  %v16977_v61 = vld [vmem:[%s19590_s19 + $0x38] sm:$0xff]  }
 0xf73   :  { %v16978_v42 = vld [vmem:[%s19590_s19 + $0xb8] sm:$0xff]  }
 0xf84   :  { %v14697_v63 = vpop.f32.mrb[204].mxu0  ;;  %v14725_v44 = vpop.f32.mrb[212].mxu1 }
 0xf85   :  { %v14698_v34 = vpop.f32.mrb[205].mxu0  ;;  %v14726_v21 = vpop.f32.mrb[213].mxu1 }
 0xf86   :  { %v14699_v12 = vadd.f32 %v14698_v34, %v14697_v63  ;;  %v14727_v54 = vadd.f32 %v14726_v21, %v14725_v44  ;;  %v14700_v37 = vpop.f32.mrb[206].mxu0  ;;  %v14728_v30 = vpop.f32.mrb[214].mxu1  ;;  %v17293_v63 = vmov 6   ;;  %v17005_v44 = vld [vmem:[%s19315_s8 + $0x8] sm:$0xff]  ;;  %v17006_v34 = vld [vmem:[%s19315_s8] sm:$0xff]  ;;  %v17294_v21 = vmov 7  }
 0xf87   :  { %v14701_v0 = vpop.f32.mrb[207].mxu0  ;;  %v14729_v20 = vpop.f32.mrb[215].mxu1  ;;  %15216 = vset.pattern.permute.xlu1 %v17293_v63  ;;  %15215 = vset.pattern.permute.xlu0 %v17293_v63 }
 0xf88   :  { %v12224_v17 = vadd.f32 %v14699_v12, %v12176_v1  ;;  %v14702_v38 = vadd.f32 %v14701_v0, %v14700_v37  ;;  %v14730_v36 = vadd.f32 %v14729_v20, %v14728_v30  ;;  %v16964_v1 = vld [vmem:[%s19590_s19 + $0xe0] sm:$0xff]   ;;  %12834 = vperm.xlu1 %15216, %v17005_v44   ;;  %12829 = vperm.xlu0 %15215, %v17006_v34   ;;  %v19273_v12 = vld [vmem:[%s19315_s8 + $0x10] sm:$0xff]  ;;  %v19592_v30 = vld [vmem:[#allocation51_spill] sm:$0xff]  ;;  %s17295_s8 = smov 120  }
 0xf89   :  { %v19593_v20 = vld [vmem:[#allocation42_spill] sm:$0xff] }
 0xf8a   :  { %v12272_v26 = vadd.f32 %v14727_v54, %v12224_v17  ;;  %v12227_v22 = vadd.f32 %v14702_v38, %v12179_v62  ;;  %v16967_v62 = vld [vmem:[%s19590_s19 + $0x68] sm:$0xff]  }
 0xf8c   :  { %v12275_v39 = vadd.f32 %v14730_v36, %v12227_v22  ;;  %v14703_v5 = vpop.f32.mrb[208].mxu0  ;;  %v14731_v13 = vpop.f32.mrb[216].mxu1  ;;  %v12285_v50 = vmax.f32 %v12272_v26, 0.0  ;;  %15217 = vset.pattern.permute.xlu1 %v17294_v21  ;;  %15218 = vset.pattern.permute.xlu0 %v17294_v21  ;;  %v19594_v26 = vld [vmem:[#allocation57_spill] sm:$0xff] }
 0xf8d   :  { %v14704_v58 = vpop.f32.mrb[209].mxu0  ;;  %v14732_v28 = vpop.f32.mrb[217].mxu1  ;;  %12861 = vperm.xlu1 %15217, %v17006_v34   ;;  %12865 = vperm.xlu0 %15218, %v17005_v44  }
 0xf8e   :  { %v12286_v6 = vmax.f32 %v12275_v39, 0.0  ;;  %v14705_v18 = vadd.f32 %v14704_v58, %v14703_v5  ;;  %v14733_v45 = vadd.f32 %v14732_v28, %v14731_v13  ;;  %v14706_v19 = vpop.f32.mrb[210].mxu0  ;;  %v14734_v46 = vpop.f32.mrb[218].mxu1  ;;  %v19595_v39 = vld [vmem:[#allocation58_spill] sm:$0xff] }
 0xf8f   :  { %v14707_v16 = vpop.f32.mrb[211].mxu0  ;;  %v14735_v4 = vpop.f32.mrb[219].mxu1  ;;  %v19596_v28 = vld [vmem:[#allocation54_spill] sm:$0xff]  ;;  %v19598_v46 = vld [vmem:[#allocation48_spill] sm:$0xff] }
 0xf90   :  { %v12288_v33 = vpack.c.bf16 %v12286_v6, %v12285_v50  ;;  %v12232_v14 = vadd.f32 %v14705_v18, %v12184_v57  ;;  %v19591_v57 = vmov 0.0|0.0   ;;  %v19597_v6 = vld [vmem:[#allocation53_spill] sm:$0xff]  ;;  %v19599_v4 = vld [vmem:[#allocation66_spill] sm:$0xff] }
 0xf91   :  { %15219 = vset.pattern.permute.xlu0 %v17293_v63 }
 0xf92   :  { %v12280_v35 = vadd.f32 %v14733_v45, %v12232_v14  ;;  %14303 = vmatmul.mubr.msk.bf16.vlgmr.msra.gmra.mrb[212].mxu0 %vm10862_vm4, %v12288_v33  ;;  %14305 = vmatmul.mubr.msk.bf16.vlgmr.msra.gmra.mrb[220].mxu1 %vm10862_vm4, %v12288_v33 }
 0xf93   :  { %12386 = vmatprep.mubr.bf16.mxu0 %v19452_v11  ;;  %12437 = vmatprep.mubr.bf16.mxu1 %v19452_v11  ;;  %v16956_v11 = vld [vmem:[%s19590_s19 + $0xd0] sm:$0xff]  }
 0xf94   :  { %v12287_v56 = vmax.f32 %v12280_v35, 0.0  ;;  %14738 = vmatpush3.bf16.msra.mxu0 %v16949_v7  ;;  %14766 = vmatpush3.bf16.msra.mxu1 %v16950_v24 }
 0xf95   :  { %14739 = vmatprep.subr.bf16.mxu0 %v16951_v8  ;;  %14767 = vmatprep.subr.bf16.mxu1 %v16952_v23 }
 0xf96   :  { %v12289_v3 = vpack.c.bf16 %v12287_v56, %v12287_v56  ;;  %12839 = vperm.xlu0 %15219, %v19273_v12   ;;  %v19600_v56 = vld [vmem:[#allocation56_spill] sm:$0xff] }
 0xf98   :  { %14740 = vmatpush3.bf16.msra.mxu0 %v16953_v9  ;;  %14768 = vmatpush3.bf16.msra.mxu1 %v16954_v47  ;;  %v19601_v47 = vld [vmem:[#allocation65_spill] sm:$0xff] }
 0xf99   :  { %14741 = vmatprep.subr.bf16.mxu0 %v16955_v10  ;;  %14769 = vmatprep.subr.bf16.mxu1 %v16956_v11 }
 0xf9a   :  { %14304 = vmatmul.mubr.msk.bf16.gmra.mrb[216].mxu0 %vm10862_vm4, %v12289_v3  ;;  %14306 = vmatmul.mubr.msk.bf16.gmra.mrb[224].mxu1 %vm10862_vm4, %v12289_v3 }
 0xf9b   :  { %15220 = vset.pattern.permute.xlu0 %v17294_v21 }
 0xf9c   :  { %14742 = vmatpush3.bf16.msra.mxu0 %v16957_v31  ;;  %14770 = vmatpush3.bf16.msra.mxu1 %v16958_v15  ;;  %v19602_v31 = vld [vmem:[#allocation64_spill] sm:$0xff] }
 0xf9d   :  { %14743 = vmatprep.subr.bf16.mxu0 %v16959_v2  ;;  %14771 = vmatprep.subr.bf16.mxu1 %v16960_v53  ;;  %v19603_v2 = vld [vmem:[#allocation67_spill] sm:$0xff] }
 0xfa0   :  { %14744 = vmatpush3.bf16.msra.mxu0 %v16961_v55  ;;  %14772 = vmatpush3.bf16.msra.mxu1 %v16962_v48 }
 0xfa1   :  { %14745 = vmatprep.subr.bf16.mxu0 %v16963_v52  ;;  %14773 = vmatprep.subr.bf16.mxu1 %v16964_v1 }
 0xfa4   :  { %14746 = vmatpush3.bf16.msra.mxu0 %v16965_v29  ;;  %14774 = vmatpush3.bf16.msra.mxu1 %v16966_v49 }
 0xfa5   :  { %14747 = vmatprep.subr.bf16.mxu0 %v16967_v62  ;;  %14775 = vmatprep.subr.bf16.mxu1 %v16968_v27 }
 0xfa8   :  { %14748 = vmatpush3.bf16.msra.mxu0 %v16969_v32  ;;  %14776 = vmatpush3.bf16.msra.mxu1 %v16970_v25  ;;  %v19604_v32 = vmov 0.0  }
 0xfa9   :  { %14749 = vmatprep.subr.bf16.mxu0 %v16971_v59  ;;  %14777 = vmatprep.subr.bf16.mxu1 %v16972_v60 }
 0xfac   :  { %14750 = vmatpush3.bf16.msra.mxu0 %v16973_v40  ;;  %14778 = vmatpush3.bf16.msra.mxu1 %v16974_v51 }
 0xfad   :  { %14751 = vmatprep.subr.bf16.mxu0 %v16975_v41  ;;  %14779 = vmatprep.subr.bf16.mxu1 %v16976_v43 }
 0xfb0   :  { %14752 = vmatpush3.bf16.msra.mxu0 %v16977_v61  ;;  %14780 = vmatpush3.bf16.msra.mxu1 %v16978_v42 }
 0xfb1   :  { %15010 = vmatprep.subr.bf16.mxu0 %v19591_v57 }
0x1065   :  { %v12378_v54 = vpop.f32.mrb[212].mxu0  ;;  %v12429_v37 = vpop.f32.mrb[220].mxu1 }
0x1066   :  { %v12446_v0 = vmul.f32 %v19592_v30, %v12378_v54  ;;  %v12448_v17 = vmul.f32 %v19593_v20, %v12429_v37  ;;  %v12380_v38 = vpop.f32.mrb[213].mxu0  ;;  %v12431_v36 = vpop.f32.mrb[221].mxu1 }
0x1067   :  { %v12447_v22 = vmul.f32 %v19594_v26, %v12380_v38  ;;  %v12449_v5 = vmul.f32 %v12431_v36, %v19595_v39  ;;  %v12382_v13 = vpop.f32.mrb[214].mxu0  ;;  %v12433_v58 = vpop.f32.mrb[222].mxu1 }
0x1068   :  { %v12450_v50 = vmul.f32 %v19596_v28, %v12382_v13  ;;  %v12452_v18 = vmul.f32 %v19597_v6, %v12433_v58  ;;  %v12384_v45 = vpop.f32.mrb[215].mxu0  ;;  %v12435_v19 = vpop.f32.mrb[223].mxu1 }
0x1069   :  { %v12451_v16 = vmul.f32 %v19598_v46, %v12384_v45  ;;  %v12453_v33 = vmul.f32 %v12435_v19, %v19599_v4 }
0x106a   :  { %v12458_v14 = vpack.c.bf16 %v12450_v50, %v12446_v0  ;;  %v12460_v7 = vpack.c.bf16 %v12452_v18, %v12448_v17  ;;  %v12835_v18 = vpop.permute.xlu1 %12834 }
0x106b   :  { %v12459_v24 = vpack.c.bf16 %v12451_v16, %v12447_v22  ;;  %v12461_v8 = vpack.c.bf16 %v12453_v33, %v12449_v5 }
0x106d   :  { %v12388_v23 = vpop.f32.mrb[216].mxu0  ;;  %v12439_v35 = vpop.f32.mrb[224].mxu1  ;;  %12754 = vmatprep.mubr.bf16.mxu0 %v12459_v24  ;;  %12802 = vmatprep.mubr.bf16.mxu1 %v12461_v8 }
0x106e   :  { %v12454_v9 = vmul.f32 %v19600_v56, %v12388_v23  ;;  %v12456_v10 = vmul.f32 %v19601_v47, %v12439_v35  ;;  %v12390_v11 = vpop.f32.mrb[217].mxu0  ;;  %v12441_v3 = vpop.f32.mrb[225].mxu1  ;;  %12755 = vmatmul.mubr.bf16.vlgmr.msra.gmra.mrb[220].mxu0 %v12458_v14  ;;  %12803 = vmatmul.mubr.bf16.vlgmr.msra.gmra.mrb[228].mxu1 %v12460_v7 }
0x106f   :  { %v12455_v15 = vmul.f32 %v19602_v31, %v12390_v11  ;;  %v12457_v53 = vmul.f32 %v12441_v3, %v19603_v2  ;;  %v12392_v55 = vpop.f32.mrb[218].mxu0  ;;  %v12443_v48 = vpop.f32.mrb[226].mxu1 }
0x1070   :  { %v12393_v52 = vpop.f32.mrb[219].mxu0  ;;  %v12444_v1 = vpop.f32.mrb[227].mxu1  ;;  %v12462_v62 = vpack.c.bf16 %v12454_v9, %v12454_v9  ;;  %v12464_v27 = vpack.c.bf16 %v12456_v10, %v12456_v10 }
0x1071   :  { %v12463_v29 = vpack.c.bf16 %v12455_v15, %v12455_v15  ;;  %v12465_v49 = vpack.c.bf16 %v12457_v53, %v12457_v53  ;;  %v12862_v16 = vpop.permute.xlu1 %12861  ;;  %v12830_v14 = vpop.permute.xlu0 %12829 }
0x1073   :  { %12762 = vmatprep.mubr.bf16.mxu0 %v12463_v29  ;;  %12810 = vmatprep.mubr.bf16.mxu1 %v12465_v49 }
0x1075   :  { %v12866_v56 = vpop.permute.xlu0 %12865 }
0x1076   :  { %12763 = vmatmul.mubr.bf16.gmra.mrb[224].mxu0 %v12462_v62  ;;  %12811 = vmatmul.mubr.bf16.gmra.mrb[232].mxu1 %v12464_v27 }
0x1077   :  { %14935 = vmatprep.mubr.msk.f32.mxu0 %vm17283_vm0, %v19604_v32 }
0x1079   :  { %v12840_v1 = vpop.permute.xlu0 %12839 }
0x1141   :  { %v14753_v25 = vpop.f32.mrb[220].mxu0  ;;  %v14781_v59 = vpop.f32.mrb[228].mxu1 }
0x1142   :  { %v14754_v60 = vpop.f32.mrb[221].mxu0  ;;  %v14782_v40 = vpop.f32.mrb[229].mxu1 }
0x1143   :  { %v14755_v51 = vadd.f32 %v14754_v60, %v14753_v25  ;;  %v14783_v41 = vadd.f32 %v14782_v40, %v14781_v59  ;;  %v14756_v43 = vpop.f32.mrb[222].mxu0  ;;  %v14784_v61 = vpop.f32.mrb[230].mxu1 }
0x1144   :  { %v14757_v42 = vpop.f32.mrb[223].mxu0  ;;  %v14785_v57 = vpop.f32.mrb[231].mxu1 }
0x1145   :  { %v12805_v63 = vadd.f32 %v14783_v41, %v14755_v51  ;;  %v14758_v44 = vadd.f32 %v14757_v42, %v14756_v43  ;;  %v14786_v34 = vadd.f32 %v14785_v57, %v14784_v61 }
0x1147   :  { %v12808_v21 = vadd.f32 %v14786_v34, %v14758_v44  ;;  %v12845_v54 = vand.u32 2147483647, %v12805_v63  ;;  %16987 = vtanh.f32 %v12805_v63 }
0x1149   :  { %v14759_v37 = vpop.f32.mrb[224].mxu0  ;;  %v14787_v30 = vpop.f32.mrb[232].mxu1  ;;  %v12848_v0 = vadd.f32 1e-12, %v12845_v54  ;;  %v12846_v20 = vand.u32 2147483647, %v12808_v21  ;;  %16989 = vtanh.f32 %v12808_v21 }
0x114a   :  { %v14760_v17 = vpop.f32.mrb[225].mxu0  ;;  %v14788_v38 = vpop.f32.mrb[233].mxu1 }
0x114b   :  { %v14761_v36 = vadd.f32 %v14760_v17, %v14759_v37  ;;  %v14789_v26 = vadd.f32 %v14788_v38, %v14787_v30  ;;  %v14762_v22 = vpop.f32.mrb[226].mxu0  ;;  %v14790_v39 = vpop.f32.mrb[234].mxu1  ;;  %12881 = vrot.lane.b32.xlu1 %v12848_v0, %s17295_s8  ;;  %v12849_v28 = vadd.f32 1e-12, %v12846_v20  ;;  %v12851_v59 = vmul.f32 6.2831855, %v12848_v0 }
0x114c   :  { %v14763_v5 = vpop.f32.mrb[227].mxu0  ;;  %v14791_v13 = vpop.f32.mrb[235].mxu1 }
0x114d   :  { %v12813_v58 = vadd.f32 %v14789_v26, %v14761_v36  ;;  %v12852_v60 = vmul.f32 6.2831855, %v12849_v28 }
0x114f   :  { %12883 = vrot.lane.b32.xlu1 %v12849_v28, %s17295_s8  ;;  %v12847_v50 = vand.u32 2147483647, %v12813_v58  ;;  %v12935_v28 = vld [vmem:[#allocation13] sm:$0xf] }
0x1151   :  { %v12850_v6 = vadd.f32 1e-12, %v12847_v50  ;;  %v16988_v45 = vpop.eup %16987 }
0x1152   :  { %v12821_v19 = vadd.f32 1.0, %v16988_v45 }
0x1153   :  { %12869 = vperm.xlu1 %15217, %v19273_v12   ;;  %v16990_v46 = vpop.eup %16989  ;;  %v12853_v21 = vmul.f32 6.2831855, %v12850_v6 }
0x1154   :  { %v12822_v4 = vadd.f32 1.0, %v16990_v46  ;;  %v12824_v33 = vmul.f32 0.5, %v12821_v19 }
0x1156   :  { %v12825_v24 = vmul.f32 0.5, %v12822_v4  ;;  %v12842_v8 = vmul.f32 %v12830_v14, %v12824_v33 }
0x1157   :  { %12885 = vrot.lane.b32.xlu1 %v12850_v6, %s17295_s8 }
0x1158   :  { %v12843_v12 = vmul.f32 %v12835_v18, %v12825_v24  ;;  %v12872_v35 = vsub.f32 %v12862_v16, %v12842_v8 }
0x115a   :  { %v12875_v9 = vmul.f32 %v12872_v35, %v12872_v35  ;;  %v12873_v47 = vsub.f32 %v12866_v56, %v12843_v12 }
0x115c   :  { %v12876_v3 = vmul.f32 %v12873_v47, %v12873_v47 }
0x11bd   :  { %v12882_v7 = vpop.permute.xlu1 %12881 }
0x11be   :  { %16991 = vrcp.f32 %v12882_v7 }
0x11c1   :  { %v12884_v23 = vpop.permute.xlu1 %12883 }
0x11c2   :  { %16993 = vrcp.f32 %v12884_v23 }
0x11c3   :  { %16995 = vtanh.f32 %v12813_v58 }
0x11c8   :  { %v16992_v10 = vpop.eup %16991 }
0x11c9   :  { %v12891_v11 = vmul.f32 %v16992_v10, %v12875_v9 }
0x11cb   :  { %12899 = vrot.lane.b32.xlu0 %v12891_v11, %s19605_s2 }
0x11cc   :  { %v16994_v31 = vpop.eup %16993 }
0x11cd   :  { %v12893_v15 = vmul.f32 %v16994_v31, %v12876_v3  ;;  %v16996_v2 = vpop.eup %16995 }
0x11ce   :  { %v12823_v53 = vadd.f32 1.0, %v16996_v2 }
0x11cf   :  { %12901 = vrot.lane.b32.xlu1 %v12893_v15, %s19605_s2 }
0x11d0   :  { %v12826_v48 = vmul.f32 0.5, %v12823_v53 }
0x11d2   :  { %v12870_v55 = vpop.permute.xlu1 %12869  ;;  %v12844_v29 = vmul.f32 %v12840_v1, %v12826_v48 }
0x11d4   :  { %v12874_v49 = vsub.f32 %v12870_v55, %v12844_v29 }
0x11d6   :  { %v12886_v52 = vpop.permute.xlu1 %12885  ;;  %v12877_v62 = vmul.f32 %v12874_v49, %v12874_v49 }
0x11d7   :  { %16997 = vrcp.f32 %v12886_v52 }
0x11d8   :  { %16999 = vlog2.f32 %v12851_v59 }
0x11d9   :  { %17001 = vlog2.f32 %v12852_v60 }
0x11da   :  { %17003 = vlog2.f32 %v12853_v21 }
0x11e1   :  { %v16998_v27 = vpop.eup %16997 }
0x11e2   :  { %v12895_v25 = vmul.f32 %v16998_v27, %v12877_v62  ;;  %v17000_v40 = vpop.eup %16999 }
0x11e3   :  { %v12855_v51 = vmul.f32 0.6931472, %v17000_v40  ;;  %v17002_v41 = vpop.eup %17001 }
0x11e4   :  { %12903 = vrot.lane.b32.xlu0 %v12895_v25, %s19605_s2  ;;  %v12857_v57 = vmul.f32 0.6931472, %v17002_v41  ;;  %v17004_v54 = vpop.eup %17003 }
0x11e5   :  { %v12859_v37 = vmul.f32 0.6931472, %v17004_v54 }
0x123d   :  { %v12900_v43 = vpop.permute.xlu0 %12899 }
0x123e   :  { %v12908_v61 = vadd.f32 %v12900_v43, %v12855_v51 }
0x1240   :  { %v12911_v42 = vmul.f32 -0.5, %v12908_v61 }
0x1241   :  { %v12902_v63 = vpop.permute.xlu1 %12901 }
0x1242   :  { %v12909_v44 = vadd.f32 %v12902_v63, %v12857_v57  ;;  %12917 = vrot.lane.b32.xlu1 %v12911_v42, %s17295_s8 }
0x1244   :  { %v12912_v34 = vmul.f32 -0.5, %v12909_v44 }
0x1246   :  { %12919 = vrot.lane.b32.xlu0 %v12912_v34, %s17295_s8 }
0x1256   :  { %v12904_v30 = vpop.permute.xlu0 %12903 }
0x1257   :  { %v12910_v0 = vadd.f32 %v12904_v30, %v12859_v37 }
0x1259   :  { %v12913_v20 = vmul.f32 -0.5, %v12910_v0 }
0x125b   :  { %12921 = vrot.lane.b32.xlu1 %v12913_v20, %s17295_s8 }
0x12b4   :  { %v12918_v17 = vpop.permute.xlu1 %12917 }
0x12b5   :  { %v12926_v38 = vsel %vm210_vm1, %v12918_v17, 0.0 }
0x12b6   :  { %12927 = vadd.xlane.f32.xlu0 %v12926_v38 }
0x12b8   :  { %v12920_v36 = vpop.permute.xlu0 %12919 }
0x12b9   :  { %v12929_v26 = vsel %vm210_vm1, %v12920_v36, 0.0 }
0x12ba   :  { %12930 = vadd.xlane.f32.xlu1 %v12929_v26 }
0x12cd   :  { %v12922_v22 = vpop.permute.xlu1 %12921 }
0x12ce   :  { %v12932_v39 = vsel %vm210_vm1, %v12922_v22, 0.0 }
0x12cf   :  { %12933 = vadd.xlane.f32.xlu0 %v12932_v39 }
0x1343   :  { %v12928_v5 = vpop.xlane.xlu0 %12927 }
0x1347   :  { %v12931_v13 = vpop.xlane.xlu1 %12930 }
0x1348   :  { %v15011_v58 = vpack.c.bf16 %v12931_v13, %v12928_v5 }
0x134a   :  { %15012 = vmatpush3.bf16.msra.mxu0 %v15011_v58 }
0x134b   :  { %14933 = vmatprep.subr.mxu0 %v19604_v32 }
0x135c   :  { %v12934_v50 = vpop.xlane.xlu0 %12933 }
0x135d   :  { %14934 = vmatpush3.msra.mxu0 %v12934_v50 }
0x135e   :  { %14936 = vmatmul.mubr.msk.f32.vlgmr.msra.gmra.mrb[228].mxu0 %vm12936_vm5, %v12935_v28 }
0x1431   :  { %v13006_v6 = vpop.f32.mrb[228].mxu0 }
0x1432   :  { %13010 = vst [vmem:[%s19606_s5] sm:$0xf] %v13006_v6  ;;  %v14937_v18 = vpop.f32.mrb[229].mxu0 }
0x1433   :  { %13015 = vsyncpa [#allocation3], 1 }
0x1434   :  { %13016 = vsyncpa [#allocation5], 1 }
0x1435   :  { %13017 = vsyncpa [#allocation8], 1 }
0x1436   :  { %13018 = vsyncpa [#allocation11], 1 }
0x1437   :  { %13019 = vsyncpa [#allocation14], 1 }
0x1438   :  { %13020 = vsyncpa [#allocation17], 1 }

</bundles_post_ra>
